<compile_context>
chip_gen: v5e
topology: v5e:2x2
jax: 0.10.0
libtpu: 0.0.40
codegen_flags: <defaults>
</compile_context>

<pallas_src>
import jax
import jax.numpy as jnp
from jax.experimental import pallas as pl
from jax.experimental.pallas import tpu as pltpu


def attentive_pooling_kernel(x_ref, ws_ref, w1_ref, b1_ref, w2_ref, b2_ref,
                             out_ref):
    """One (batch, row-tile) grid step, N-on-lanes end to end.

    x_ref   : (1, K, Cin, TN)  neighborhood features (K leading, TN on lanes)
    ws_ref  : (K, Cin, Cin)    score_fn Linear weight, replicated over K
    w1_ref  : (Cout, Cin)      mlp conv weight with eval-mode BN folded in
    b1_ref  : (Cout, 1)        mlp bias with BN folded in
    w2_ref  : (Cout, Cout)     mlp_1 conv weight
    b2_ref  : (Cout, 1)        mlp_1 bias
    out_ref : (1, Cout, TN)    transposed output block: TN on the lane axis
    """
    K = x_ref.shape[1]
    Cin = x_ref.shape[2]
    TN = x_ref.shape[3]

    # ---- score_fn logits: one batched bf16 MXU matmul -> (K, Cin, TN) f32 ----
    logits = jnp.einsum("kdc,kcn->kdn", ws_ref[...], x_ref[0],
                        preferred_element_type=jnp.float32)

    # ---- softmax over K (leading, untiled axis => pure VALU) ----
    m = jnp.max(logits, axis=0)                       # (Cin, TN)

    # Fused exp-sum and attention-weighted sum over K: never materialize the
    # full (K, Cin, TN) `e` or `scores*x` tensors.  Columns (points) are
    # independent, so any padded garbage columns of a ragged last tile cannot
    # contaminate valid ones (and their output columns are never written back).
    s = jnp.zeros((Cin, TN), jnp.float32)
    num = jnp.zeros((Cin, TN), jnp.float32)
    for k in range(K):
        e_k = jnp.exp(logits[k] - m)                  # (Cin, TN)
        s = s + e_k
        num = num + e_k * x_ref[0, k].astype(jnp.float32)

    # softmax denominator via the EUP reciprocal (off the VALU).
    feat = num * pl.reciprocal(s, approx=True)        # (Cin, TN)

    # ---- mlp: 1x1 conv (+ folded BN) + ReLU, lane-dense (Cout, TN) ----
    z = jnp.dot(w1_ref[...], feat,
                preferred_element_type=jnp.float32) + b1_ref[...]
    z = jnp.maximum(z, 0.0)

    # ---- mlp_1: 1x1 conv, no activation ----
    y = jnp.dot(w2_ref[...], z,
                preferred_element_type=jnp.float32) + b2_ref[...]

    out_ref[0] = y.astype(out_ref.dtype)              # (Cout, TN)


def attentive_pooling(x_bcnk, params, *, tile_n=1024, eps=1e-6,
                      compute_dtype=jnp.bfloat16):
    """x_bcnk: (B, C_in, N, K)  ->  (B, C_out, N, 1)   (PyTorch layouts).

    The kernel consumes/produces `compute_dtype` (default bf16) to halve HBM
    traffic; softmax and accumulation are done in f32 inside the kernel.
    """
    B, Cin, N, K = x_bcnk.shape
    Cout = params["w1"].shape[0]

    tile_n = min(tile_n, N)
    if tile_n != N:
        tile_n = max(128, (tile_n // 128) * 128)      # (8,128) lane rule

    # Single relayout pass (XLA fuses the downcast into it): K leading,
    # N on the minor/lane axis — exactly the layout the kernel wants.
    x = jnp.transpose(x_bcnk, (0, 3, 1, 2)).astype(compute_dtype)  # (B,K,Cin,N)

    # Fold eval-mode BN into the first conv; replicate the score weight over K
    # so the kernel does one batched matmul.
    bn_scale = params["bn_gamma"] / jnp.sqrt(params["bn_var"] + eps)     # (Cout,)
    w1_eff = (params["w1"] * bn_scale[:, None]).astype(jnp.float32)      # (Cout, Cin)
    b1_eff = ((params["b1"] - params["bn_mean"]) * bn_scale
              + params["bn_beta"]).reshape(Cout, 1).astype(jnp.float32)  # (Cout, 1)
    ws_k = jnp.broadcast_to(params["w_score"].astype(compute_dtype)[None],
                            (K, Cin, Cin))                               # (K, Cin, Cin)
    w2 = params["w2"].astype(jnp.float32)                                # (Cout, Cout)
    b2 = params["b2"].reshape(Cout, 1).astype(jnp.float32)               # (Cout, 1)

    grid = (B, pl.cdiv(N, tile_n))

    out = pl.pallas_call(
        attentive_pooling_kernel,
        out_shape=jax.ShapeDtypeStruct((B, Cout, N), compute_dtype),
        grid_spec=pltpu.PrefetchScalarGridSpec(
            num_scalar_prefetch=0,
            grid=grid,
            in_specs=[
                pl.BlockSpec((1, K, Cin, tile_n), lambda b, n: (b, 0, 0, n)),
                pl.BlockSpec((K, Cin, Cin), lambda b, n: (0, 0, 0)),
                pl.BlockSpec((Cout, Cin), lambda b, n: (0, 0)),
                pl.BlockSpec((Cout, 1), lambda b, n: (0, 0)),
                pl.BlockSpec((Cout, Cout), lambda b, n: (0, 0)),
                pl.BlockSpec((Cout, 1), lambda b, n: (0, 0)),
            ],
            out_specs=pl.BlockSpec((1, Cout, tile_n), lambda b, n: (b, 0, n)),
        ),
        compiler_params=pltpu.CompilerParams(
            dimension_semantics=("parallel", "parallel"),
            vmem_limit_bytes=24 * 1024 * 1024),
    )(x, ws_k, w1_eff, b1_eff, w2, b2)

    # Already (B, C_out, N); just add the trailing singleton (no transpose).
    return out[..., None]


def reference_forward(x_bcnk, params, eps=1e-6):
    """Plain-JAX f32 reference mirroring the torch module (eval-mode BN)."""
    x = jnp.transpose(x_bcnk, (0, 2, 3, 1)).astype(jnp.float32)   # (B,N,K,Cin)
    logits = jnp.einsum("bnkc,dc->bnkd", x, params["w_score"])
    scores = jax.nn.softmax(logits, axis=2)                       # over K
    feat = jnp.sum(scores * x, axis=2)                            # (B,N,Cin)
    y = jnp.einsum("bnc,dc->bnd", feat, params["w1"]) + params["b1"]
    y = (y - params["bn_mean"]) / jnp.sqrt(params["bn_var"] + eps)
    y = y * params["bn_gamma"] + params["bn_beta"]
    y = jnp.maximum(y, 0.0)
    y = jnp.einsum("bnc,dc->bnd", y, params["w2"]) + params["b2"]
    return jnp.transpose(y, (0, 2, 1))[..., None]                 # (B,Cout,N,1)


def init_params(key, c_in, c_out):
    ks = jax.random.split(key, 8)
    return {
        # score_fn Linear (bias=False): weight (Cin, Cin)
        "w_score": jax.random.normal(ks[0], (c_in, c_in), jnp.float32) * 0.2,
        # mlp: Conv2d 1x1 (Cout, Cin) + bias, BatchNorm2d(Cout, eps=1e-6)
        "w1": jax.random.normal(ks[1], (c_out, c_in), jnp.float32) * 0.2,
        "b1": jax.random.normal(ks[2], (c_out,), jnp.float32) * 0.1,
        "bn_gamma": 1.0 + 0.1 * jax.random.normal(ks[3], (c_out,), jnp.float32),
        "bn_beta": 0.1 * jax.random.normal(ks[4], (c_out,), jnp.float32),
        "bn_mean": 0.05 * jax.random.normal(ks[5], (c_out,), jnp.float32),
        "bn_var": jnp.abs(1.0 + 0.1 * jax.random.normal(ks[6], (c_out,), jnp.float32)),
        # mlp_1: Conv2d 1x1 (Cout, Cout) + bias
        "w2": jax.random.normal(ks[7], (c_out, c_out), jnp.float32) * 0.2,
        "b2": jnp.linspace(-0.1, 0.1, c_out, dtype=jnp.float32),
    }


if __name__ == "__main__":
    B, C_IN, N, K = 2, 16, 2048, 16        # (B, d_in, N, num_neighbors)
    C_OUT = 32

    key = jax.random.PRNGKey(0)
    k_x, k_p = jax.random.split(key)
    x = jax.random.normal(k_x, (B, C_IN, N, K), jnp.float32)
    params = init_params(k_p, C_IN, C_OUT)

    out = attentive_pooling(x, params, tile_n=1024)   # grid (2, 2)
    out = jax.block_until_ready(out)
    assert out.shape == (B, C_OUT, N, 1), out.shape

    ref = reference_forward(x, params)
    out_f32 = out.astype(jnp.float32)
    max_err = float(jnp.max(jnp.abs(out_f32 - ref)))
    # Tolerance absorbs the bf16 input/weight/output quantization and the
    # approximate EUP reciprocal in the softmax denominator.
    assert jnp.allclose(out_f32, ref, atol=5e-2, rtol=5e-2), max_err

    print("KERNEL_OK")
</pallas_src>

<mosaic_0001>
module attributes {stable_mosaic.version = 11 : i64} {
  func.func @attentive_pooling_kernel(%arg0: i32, %arg1: i32, %arg2: memref<1x16x16x1024xbf16, #tpu.memory_space<vmem>>, %arg3: memref<16x16x16xbf16, #tpu.memory_space<vmem>>, %arg4: memref<32x16xf32, #tpu.memory_space<vmem>>, %arg5: memref<32x1xf32, #tpu.memory_space<vmem>>, %arg6: memref<32x32xf32, #tpu.memory_space<vmem>>, %arg7: memref<32x1xf32, #tpu.memory_space<vmem>>, %arg8: memref<1x32x1024xbf16, #tpu.memory_space<vmem>>) attributes {dimension_semantics = [#tpu.dimension_semantics<parallel>, #tpu.dimension_semantics<parallel>], iteration_bounds = array<i64: 2, 2>, scalar_prefetch = 0 : i64, scratch_operands = 0 : i64, tpu.core_type = #tpu.core_type<tc>, window_params = [{transform_indices = @transform_0, window_bounds = array<i64: 1, 16, 16, 1024>}, {pipeline_mode = #tpu.pipeline_mode<synchronous>, transform_indices = @transform_1, window_bounds = array<i64: 16, 16, 16>}, {pipeline_mode = #tpu.pipeline_mode<synchronous>, transform_indices = @transform_2, window_bounds = array<i64: 32, 16>}, {pipeline_mode = #tpu.pipeline_mode<synchronous>, transform_indices = @transform_3, window_bounds = array<i64: 32, 1>}, {pipeline_mode = #tpu.pipeline_mode<synchronous>, transform_indices = @transform_4, window_bounds = array<i64: 32, 32>}, {pipeline_mode = #tpu.pipeline_mode<synchronous>, transform_indices = @transform_5, window_bounds = array<i64: 32, 1>}, {transform_indices = @transform_6, window_bounds = array<i64: 1, 32, 1024>}]} {
    %c0 = arith.constant 0 : index
    %c0_0 = arith.constant 0 : index
    %c0_1 = arith.constant 0 : index
    %0 = vector.load %arg3[%c0, %c0_0, %c0_1] : memref<16x16x16xbf16, #tpu.memory_space<vmem>>, vector<16x16x16xbf16>
    %c0_2 = arith.constant 0 : index
    %c0_3 = arith.constant 0 : index
    %c0_4 = arith.constant 0 : index
    %c0_5 = arith.constant 0 : index
    %1 = vector.load %arg2[%c0_2, %c0_3, %c0_4, %c0_5] : memref<1x16x16x1024xbf16, #tpu.memory_space<vmem>>, vector<1x16x16x1024xbf16>
    %2 = vector.shape_cast %1 : vector<1x16x16x1024xbf16> to vector<16x16x1024xbf16>
    "tpu.trace_start"() <{level = 10 : i32, message = "kdc,kcn->kdn"}> : () -> ()
    %cst = arith.constant dense<0.000000e+00> : vector<16x16x1024xf32>
    %3 = tpu.matmul %0, %2, %cst {dimension_numbers = #tpu.dot_dimension_numbers<[2], [1], [1], [2], [0, 0, 0, 1, 1, 2], [0], [0]>} : vector<16x16x16xbf16>, vector<16x16x1024xbf16>, vector<16x16x1024xf32> -> vector<16x16x1024xf32>
    "tpu.trace_stop"() : () -> ()
    %cst_6 = arith.constant dense<0xFF800000> : vector<16x1024xf32>
    %4 = vector.multi_reduction <maximumf>, %3, %cst_6 [0] : vector<16x16x1024xf32> to vector<16x1024xf32>
    %cst_7 = arith.constant 0.000000e+00 : f32
    %5 = vector.broadcast %cst_7 : f32 to vector<16x1024xf32>
    %cst_8 = arith.constant 0.000000e+00 : f32
    %6 = vector.broadcast %cst_8 : f32 to vector<16x1024xf32>
    %7 = vector.extract_strided_slice %3 {offsets = [0, 0, 0], sizes = [1, 16, 1024], strides = [1, 1, 1]} : vector<16x16x1024xf32> to vector<1x16x1024xf32>
    %8 = vector.shape_cast %7 : vector<1x16x1024xf32> to vector<16x1024xf32>
    %9 = arith.subf %8, %4 : vector<16x1024xf32>
    %10 = math.exp %9 : vector<16x1024xf32>
    %11 = arith.addf %5, %10 : vector<16x1024xf32>
    %c0_9 = arith.constant 0 : index
    %c0_10 = arith.constant 0 : index
    %c0_11 = arith.constant 0 : index
    %c0_12 = arith.constant 0 : index
    %12 = vector.load %arg2[%c0_9, %c0_10, %c0_11, %c0_12] : memref<1x16x16x1024xbf16, #tpu.memory_space<vmem>>, vector<1x1x16x1024xbf16>
    %13 = vector.shape_cast %12 : vector<1x1x16x1024xbf16> to vector<16x1024xbf16>
    %14 = arith.extf %13 : vector<16x1024xbf16> to vector<16x1024xf32>
    %15 = arith.mulf %10, %14 : vector<16x1024xf32>
    %16 = arith.addf %6, %15 : vector<16x1024xf32>
    %17 = vector.extract_strided_slice %3 {offsets = [1, 0, 0], sizes = [1, 16, 1024], strides = [1, 1, 1]} : vector<16x16x1024xf32> to vector<1x16x1024xf32>
    %18 = vector.shape_cast %17 : vector<1x16x1024xf32> to vector<16x1024xf32>
    %19 = arith.subf %18, %4 : vector<16x1024xf32>
    %20 = math.exp %19 : vector<16x1024xf32>
    %21 = arith.addf %11, %20 : vector<16x1024xf32>
    %c0_13 = arith.constant 0 : index
    %c1 = arith.constant 1 : index
    %c0_14 = arith.constant 0 : index
    %c0_15 = arith.constant 0 : index
    %22 = vector.load %arg2[%c0_13, %c1, %c0_14, %c0_15] : memref<1x16x16x1024xbf16, #tpu.memory_space<vmem>>, vector<1x1x16x1024xbf16>
    %23 = vector.shape_cast %22 : vector<1x1x16x1024xbf16> to vector<16x1024xbf16>
    %24 = arith.extf %23 : vector<16x1024xbf16> to vector<16x1024xf32>
    %25 = arith.mulf %20, %24 : vector<16x1024xf32>
    %26 = arith.addf %16, %25 : vector<16x1024xf32>
    %27 = vector.extract_strided_slice %3 {offsets = [2, 0, 0], sizes = [1, 16, 1024], strides = [1, 1, 1]} : vector<16x16x1024xf32> to vector<1x16x1024xf32>
    %28 = vector.shape_cast %27 : vector<1x16x1024xf32> to vector<16x1024xf32>
    %29 = arith.subf %28, %4 : vector<16x1024xf32>
    %30 = math.exp %29 : vector<16x1024xf32>
    %31 = arith.addf %21, %30 : vector<16x1024xf32>
    %c0_16 = arith.constant 0 : index
    %c2 = arith.constant 2 : index
    %c0_17 = arith.constant 0 : index
    %c0_18 = arith.constant 0 : index
    %32 = vector.load %arg2[%c0_16, %c2, %c0_17, %c0_18] : memref<1x16x16x1024xbf16, #tpu.memory_space<vmem>>, vector<1x1x16x1024xbf16>
    %33 = vector.shape_cast %32 : vector<1x1x16x1024xbf16> to vector<16x1024xbf16>
    %34 = arith.extf %33 : vector<16x1024xbf16> to vector<16x1024xf32>
    %35 = arith.mulf %30, %34 : vector<16x1024xf32>
    %36 = arith.addf %26, %35 : vector<16x1024xf32>
    %37 = vector.extract_strided_slice %3 {offsets = [3, 0, 0], sizes = [1, 16, 1024], strides = [1, 1, 1]} : vector<16x16x1024xf32> to vector<1x16x1024xf32>
    %38 = vector.shape_cast %37 : vector<1x16x1024xf32> to vector<16x1024xf32>
    %39 = arith.subf %38, %4 : vector<16x1024xf32>
    %40 = math.exp %39 : vector<16x1024xf32>
    %41 = arith.addf %31, %40 : vector<16x1024xf32>
    %c0_19 = arith.constant 0 : index
    %c3 = arith.constant 3 : index
    %c0_20 = arith.constant 0 : index
    %c0_21 = arith.constant 0 : index
    %42 = vector.load %arg2[%c0_19, %c3, %c0_20, %c0_21] : memref<1x16x16x1024xbf16, #tpu.memory_space<vmem>>, vector<1x1x16x1024xbf16>
    %43 = vector.shape_cast %42 : vector<1x1x16x1024xbf16> to vector<16x1024xbf16>
    %44 = arith.extf %43 : vector<16x1024xbf16> to vector<16x1024xf32>
    %45 = arith.mulf %40, %44 : vector<16x1024xf32>
    %46 = arith.addf %36, %45 : vector<16x1024xf32>
    %47 = vector.extract_strided_slice %3 {offsets = [4, 0, 0], sizes = [1, 16, 1024], strides = [1, 1, 1]} : vector<16x16x1024xf32> to vector<1x16x1024xf32>
    %48 = vector.shape_cast %47 : vector<1x16x1024xf32> to vector<16x1024xf32>
    %49 = arith.subf %48, %4 : vector<16x1024xf32>
    %50 = math.exp %49 : vector<16x1024xf32>
    %51 = arith.addf %41, %50 : vector<16x1024xf32>
    %c0_22 = arith.constant 0 : index
    %c4 = arith.constant 4 : index
    %c0_23 = arith.constant 0 : index
    %c0_24 = arith.constant 0 : index
    %52 = vector.load %arg2[%c0_22, %c4, %c0_23, %c0_24] : memref<1x16x16x1024xbf16, #tpu.memory_space<vmem>>, vector<1x1x16x1024xbf16>
    %53 = vector.shape_cast %52 : vector<1x1x16x1024xbf16> to vector<16x1024xbf16>
    %54 = arith.extf %53 : vector<16x1024xbf16> to vector<16x1024xf32>
    %55 = arith.mulf %50, %54 : vector<16x1024xf32>
    %56 = arith.addf %46, %55 : vector<16x1024xf32>
    %57 = vector.extract_strided_slice %3 {offsets = [5, 0, 0], sizes = [1, 16, 1024], strides = [1, 1, 1]} : vector<16x16x1024xf32> to vector<1x16x1024xf32>
    %58 = vector.shape_cast %57 : vector<1x16x1024xf32> to vector<16x1024xf32>
    %59 = arith.subf %58, %4 : vector<16x1024xf32>
    %60 = math.exp %59 : vector<16x1024xf32>
    %61 = arith.addf %51, %60 : vector<16x1024xf32>
    %c0_25 = arith.constant 0 : index
    %c5 = arith.constant 5 : index
    %c0_26 = arith.constant 0 : index
    %c0_27 = arith.constant 0 : index
    %62 = vector.load %arg2[%c0_25, %c5, %c0_26, %c0_27] : memref<1x16x16x1024xbf16, #tpu.memory_space<vmem>>, vector<1x1x16x1024xbf16>
    %63 = vector.shape_cast %62 : vector<1x1x16x1024xbf16> to vector<16x1024xbf16>
    %64 = arith.extf %63 : vector<16x1024xbf16> to vector<16x1024xf32>
    %65 = arith.mulf %60, %64 : vector<16x1024xf32>
    %66 = arith.addf %56, %65 : vector<16x1024xf32>
    %67 = vector.extract_strided_slice %3 {offsets = [6, 0, 0], sizes = [1, 16, 1024], strides = [1, 1, 1]} : vector<16x16x1024xf32> to vector<1x16x1024xf32>
    %68 = vector.shape_cast %67 : vector<1x16x1024xf32> to vector<16x1024xf32>
    %69 = arith.subf %68, %4 : vector<16x1024xf32>
    %70 = math.exp %69 : vector<16x1024xf32>
    %71 = arith.addf %61, %70 : vector<16x1024xf32>
    %c0_28 = arith.constant 0 : index
    %c6 = arith.constant 6 : index
    %c0_29 = arith.constant 0 : index
    %c0_30 = arith.constant 0 : index
    %72 = vector.load %arg2[%c0_28, %c6, %c0_29, %c0_30] : memref<1x16x16x1024xbf16, #tpu.memory_space<vmem>>, vector<1x1x16x1024xbf16>
    %73 = vector.shape_cast %72 : vector<1x1x16x1024xbf16> to vector<16x1024xbf16>
    %74 = arith.extf %73 : vector<16x1024xbf16> to vector<16x1024xf32>
    %75 = arith.mulf %70, %74 : vector<16x1024xf32>
    %76 = arith.addf %66, %75 : vector<16x1024xf32>
    %77 = vector.extract_strided_slice %3 {offsets = [7, 0, 0], sizes = [1, 16, 1024], strides = [1, 1, 1]} : vector<16x16x1024xf32> to vector<1x16x1024xf32>
    %78 = vector.shape_cast %77 : vector<1x16x1024xf32> to vector<16x1024xf32>
    %79 = arith.subf %78, %4 : vector<16x1024xf32>
    %80 = math.exp %79 : vector<16x1024xf32>
    %81 = arith.addf %71, %80 : vector<16x1024xf32>
    %c0_31 = arith.constant 0 : index
    %c7 = arith.constant 7 : index
    %c0_32 = arith.constant 0 : index
    %c0_33 = arith.constant 0 : index
    %82 = vector.load %arg2[%c0_31, %c7, %c0_32, %c0_33] : memref<1x16x16x1024xbf16, #tpu.memory_space<vmem>>, vector<1x1x16x1024xbf16>
    %83 = vector.shape_cast %82 : vector<1x1x16x1024xbf16> to vector<16x1024xbf16>
    %84 = arith.extf %83 : vector<16x1024xbf16> to vector<16x1024xf32>
    %85 = arith.mulf %80, %84 : vector<16x1024xf32>
    %86 = arith.addf %76, %85 : vector<16x1024xf32>
    %87 = vector.extract_strided_slice %3 {offsets = [8, 0, 0], sizes = [1, 16, 1024], strides = [1, 1, 1]} : vector<16x16x1024xf32> to vector<1x16x1024xf32>
    %88 = vector.shape_cast %87 : vector<1x16x1024xf32> to vector<16x1024xf32>
    %89 = arith.subf %88, %4 : vector<16x1024xf32>
    %90 = math.exp %89 : vector<16x1024xf32>
    %91 = arith.addf %81, %90 : vector<16x1024xf32>
    %c0_34 = arith.constant 0 : index
    %c8 = arith.constant 8 : index
    %c0_35 = arith.constant 0 : index
    %c0_36 = arith.constant 0 : index
    %92 = vector.load %arg2[%c0_34, %c8, %c0_35, %c0_36] : memref<1x16x16x1024xbf16, #tpu.memory_space<vmem>>, vector<1x1x16x1024xbf16>
    %93 = vector.shape_cast %92 : vector<1x1x16x1024xbf16> to vector<16x1024xbf16>
    %94 = arith.extf %93 : vector<16x1024xbf16> to vector<16x1024xf32>
    %95 = arith.mulf %90, %94 : vector<16x1024xf32>
    %96 = arith.addf %86, %95 : vector<16x1024xf32>
    %97 = vector.extract_strided_slice %3 {offsets = [9, 0, 0], sizes = [1, 16, 1024], strides = [1, 1, 1]} : vector<16x16x1024xf32> to vector<1x16x1024xf32>
    %98 = vector.shape_cast %97 : vector<1x16x1024xf32> to vector<16x1024xf32>
    %99 = arith.subf %98, %4 : vector<16x1024xf32>
    %100 = math.exp %99 : vector<16x1024xf32>
    %101 = arith.addf %91, %100 : vector<16x1024xf32>
    %c0_37 = arith.constant 0 : index
    %c9 = arith.constant 9 : index
    %c0_38 = arith.constant 0 : index
    %c0_39 = arith.constant 0 : index
    %102 = vector.load %arg2[%c0_37, %c9, %c0_38, %c0_39] : memref<1x16x16x1024xbf16, #tpu.memory_space<vmem>>, vector<1x1x16x1024xbf16>
    %103 = vector.shape_cast %102 : vector<1x1x16x1024xbf16> to vector<16x1024xbf16>
    %104 = arith.extf %103 : vector<16x1024xbf16> to vector<16x1024xf32>
    %105 = arith.mulf %100, %104 : vector<16x1024xf32>
    %106 = arith.addf %96, %105 : vector<16x1024xf32>
    %107 = vector.extract_strided_slice %3 {offsets = [10, 0, 0], sizes = [1, 16, 1024], strides = [1, 1, 1]} : vector<16x16x1024xf32> to vector<1x16x1024xf32>
    %108 = vector.shape_cast %107 : vector<1x16x1024xf32> to vector<16x1024xf32>
    %109 = arith.subf %108, %4 : vector<16x1024xf32>
    %110 = math.exp %109 : vector<16x1024xf32>
    %111 = arith.addf %101, %110 : vector<16x1024xf32>
    %c0_40 = arith.constant 0 : index
    %c10 = arith.constant 10 : index
    %c0_41 = arith.constant 0 : index
    %c0_42 = arith.constant 0 : index
    %112 = vector.load %arg2[%c0_40, %c10, %c0_41, %c0_42] : memref<1x16x16x1024xbf16, #tpu.memory_space<vmem>>, vector<1x1x16x1024xbf16>
    %113 = vector.shape_cast %112 : vector<1x1x16x1024xbf16> to vector<16x1024xbf16>
    %114 = arith.extf %113 : vector<16x1024xbf16> to vector<16x1024xf32>
    %115 = arith.mulf %110, %114 : vector<16x1024xf32>
    %116 = arith.addf %106, %115 : vector<16x1024xf32>
    %117 = vector.extract_strided_slice %3 {offsets = [11, 0, 0], sizes = [1, 16, 1024], strides = [1, 1, 1]} : vector<16x16x1024xf32> to vector<1x16x1024xf32>
    %118 = vector.shape_cast %117 : vector<1x16x1024xf32> to vector<16x1024xf32>
    %119 = arith.subf %118, %4 : vector<16x1024xf32>
    %120 = math.exp %119 : vector<16x1024xf32>
    %121 = arith.addf %111, %120 : vector<16x1024xf32>
    %c0_43 = arith.constant 0 : index
    %c11 = arith.constant 11 : index
    %c0_44 = arith.constant 0 : index
    %c0_45 = arith.constant 0 : index
    %122 = vector.load %arg2[%c0_43, %c11, %c0_44, %c0_45] : memref<1x16x16x1024xbf16, #tpu.memory_space<vmem>>, vector<1x1x16x1024xbf16>
    %123 = vector.shape_cast %122 : vector<1x1x16x1024xbf16> to vector<16x1024xbf16>
    %124 = arith.extf %123 : vector<16x1024xbf16> to vector<16x1024xf32>
    %125 = arith.mulf %120, %124 : vector<16x1024xf32>
    %126 = arith.addf %116, %125 : vector<16x1024xf32>
    %127 = vector.extract_strided_slice %3 {offsets = [12, 0, 0], sizes = [1, 16, 1024], strides = [1, 1, 1]} : vector<16x16x1024xf32> to vector<1x16x1024xf32>
    %128 = vector.shape_cast %127 : vector<1x16x1024xf32> to vector<16x1024xf32>
    %129 = arith.subf %128, %4 : vector<16x1024xf32>
    %130 = math.exp %129 : vector<16x1024xf32>
    %131 = arith.addf %121, %130 : vector<16x1024xf32>
    %c0_46 = arith.constant 0 : index
    %c12 = arith.constant 12 : index
    %c0_47 = arith.constant 0 : index
    %c0_48 = arith.constant 0 : index
    %132 = vector.load %arg2[%c0_46, %c12, %c0_47, %c0_48] : memref<1x16x16x1024xbf16, #tpu.memory_space<vmem>>, vector<1x1x16x1024xbf16>
    %133 = vector.shape_cast %132 : vector<1x1x16x1024xbf16> to vector<16x1024xbf16>
    %134 = arith.extf %133 : vector<16x1024xbf16> to vector<16x1024xf32>
    %135 = arith.mulf %130, %134 : vector<16x1024xf32>
    %136 = arith.addf %126, %135 : vector<16x1024xf32>
    %137 = vector.extract_strided_slice %3 {offsets = [13, 0, 0], sizes = [1, 16, 1024], strides = [1, 1, 1]} : vector<16x16x1024xf32> to vector<1x16x1024xf32>
    %138 = vector.shape_cast %137 : vector<1x16x1024xf32> to vector<16x1024xf32>
    %139 = arith.subf %138, %4 : vector<16x1024xf32>
    %140 = math.exp %139 : vector<16x1024xf32>
    %141 = arith.addf %131, %140 : vector<16x1024xf32>
    %c0_49 = arith.constant 0 : index
    %c13 = arith.constant 13 : index
    %c0_50 = arith.constant 0 : index
    %c0_51 = arith.constant 0 : index
    %142 = vector.load %arg2[%c0_49, %c13, %c0_50, %c0_51] : memref<1x16x16x1024xbf16, #tpu.memory_space<vmem>>, vector<1x1x16x1024xbf16>
    %143 = vector.shape_cast %142 : vector<1x1x16x1024xbf16> to vector<16x1024xbf16>
    %144 = arith.extf %143 : vector<16x1024xbf16> to vector<16x1024xf32>
    %145 = arith.mulf %140, %144 : vector<16x1024xf32>
    %146 = arith.addf %136, %145 : vector<16x1024xf32>
    %147 = vector.extract_strided_slice %3 {offsets = [14, 0, 0], sizes = [1, 16, 1024], strides = [1, 1, 1]} : vector<16x16x1024xf32> to vector<1x16x1024xf32>
    %148 = vector.shape_cast %147 : vector<1x16x1024xf32> to vector<16x1024xf32>
    %149 = arith.subf %148, %4 : vector<16x1024xf32>
    %150 = math.exp %149 : vector<16x1024xf32>
    %151 = arith.addf %141, %150 : vector<16x1024xf32>
    %c0_52 = arith.constant 0 : index
    %c14 = arith.constant 14 : index
    %c0_53 = arith.constant 0 : index
    %c0_54 = arith.constant 0 : index
    %152 = vector.load %arg2[%c0_52, %c14, %c0_53, %c0_54] : memref<1x16x16x1024xbf16, #tpu.memory_space<vmem>>, vector<1x1x16x1024xbf16>
    %153 = vector.shape_cast %152 : vector<1x1x16x1024xbf16> to vector<16x1024xbf16>
    %154 = arith.extf %153 : vector<16x1024xbf16> to vector<16x1024xf32>
    %155 = arith.mulf %150, %154 : vector<16x1024xf32>
    %156 = arith.addf %146, %155 : vector<16x1024xf32>
    %157 = vector.extract_strided_slice %3 {offsets = [15, 0, 0], sizes = [1, 16, 1024], strides = [1, 1, 1]} : vector<16x16x1024xf32> to vector<1x16x1024xf32>
    %158 = vector.shape_cast %157 : vector<1x16x1024xf32> to vector<16x1024xf32>
    %159 = arith.subf %158, %4 : vector<16x1024xf32>
    %160 = math.exp %159 : vector<16x1024xf32>
    %161 = arith.addf %151, %160 : vector<16x1024xf32>
    %c0_55 = arith.constant 0 : index
    %c15 = arith.constant 15 : index
    %c0_56 = arith.constant 0 : index
    %c0_57 = arith.constant 0 : index
    %162 = vector.load %arg2[%c0_55, %c15, %c0_56, %c0_57] : memref<1x16x16x1024xbf16, #tpu.memory_space<vmem>>, vector<1x1x16x1024xbf16>
    %163 = vector.shape_cast %162 : vector<1x1x16x1024xbf16> to vector<16x1024xbf16>
    %164 = arith.extf %163 : vector<16x1024xbf16> to vector<16x1024xf32>
    %165 = arith.mulf %160, %164 : vector<16x1024xf32>
    %166 = arith.addf %156, %165 : vector<16x1024xf32>
    %167 = tpu.reciprocal %161 {approx = true} : vector<16x1024xf32> -> vector<16x1024xf32>
    %168 = arith.mulf %166, %167 : vector<16x1024xf32>
    %c0_58 = arith.constant 0 : index
    %c0_59 = arith.constant 0 : index
    %169 = vector.load %arg4[%c0_58, %c0_59] : memref<32x16xf32, #tpu.memory_space<vmem>>, vector<32x16xf32>
    %cst_60 = arith.constant dense<0.000000e+00> : vector<32x1024xf32>
    %170 = tpu.matmul %169, %168, %cst_60 {dimension_numbers = #tpu.dot_dimension_numbers<[1], [0], [0], [1], [0, 0, 1, 1], [], []>} : vector<32x16xf32>, vector<16x1024xf32>, vector<32x1024xf32> -> vector<32x1024xf32>
    %c0_61 = arith.constant 0 : index
    %c0_62 = arith.constant 0 : index
    %171 = vector.load %arg5[%c0_61, %c0_62] : memref<32x1xf32, #tpu.memory_space<vmem>>, vector<32x1xf32>
    %172 = vector.broadcast %171 : vector<32x1xf32> to vector<32x1024xf32>
    %173 = arith.addf %170, %172 : vector<32x1024xf32>
    %cst_63 = arith.constant 0.000000e+00 : f32
    %174 = vector.broadcast %cst_63 : f32 to vector<32x1024xf32>
    %175 = arith.maximumf %173, %174 : vector<32x1024xf32>
    %c0_64 = arith.constant 0 : index
    %c0_65 = arith.constant 0 : index
    %176 = vector.load %arg6[%c0_64, %c0_65] : memref<32x32xf32, #tpu.memory_space<vmem>>, vector<32x32xf32>
    %cst_66 = arith.constant dense<0.000000e+00> : vector<32x1024xf32>
    %177 = tpu.matmul %176, %175, %cst_66 {dimension_numbers = #tpu.dot_dimension_numbers<[1], [0], [0], [1], [0, 0, 1, 1], [], []>} : vector<32x32xf32>, vector<32x1024xf32>, vector<32x1024xf32> -> vector<32x1024xf32>
    %c0_67 = arith.constant 0 : index
    %c0_68 = arith.constant 0 : index
    %178 = vector.load %arg7[%c0_67, %c0_68] : memref<32x1xf32, #tpu.memory_space<vmem>>, vector<32x1xf32>
    %179 = vector.broadcast %178 : vector<32x1xf32> to vector<32x1024xf32>
    %180 = arith.addf %177, %179 : vector<32x1024xf32>
    %181 = arith.truncf %180 : vector<32x1024xf32> to vector<32x1024xbf16>
    %c0_69 = arith.constant 0 : index
    %c0_70 = arith.constant 0 : index
    %c0_71 = arith.constant 0 : index
    %182 = vector.load %arg8[%c0_69, %c0_70, %c0_71] : memref<1x32x1024xbf16, #tpu.memory_space<vmem>>, vector<1x32x1024xbf16>
    %183 = vector.shape_cast %182 : vector<1x32x1024xbf16> to vector<32x1024xbf16>
    %184 = vector.shape_cast %181 : vector<32x1024xbf16> to vector<1x32x1024xbf16>
    tpu.vector_store %arg8[%c0_69, %c0_70, %c0_71], %184 {strides = array<i32>} : memref<1x32x1024xbf16, #tpu.memory_space<vmem>>, vector<1x32x1024xbf16>,
    return
  }
  func.func @transform_0(%arg0: i32, %arg1: i32) -> (i32, i32, i32, i32) {
    %c0_i32 = arith.constant 0 : i32
    %c0_i32_0 = arith.constant 0 : i32
    %c0_i32_1 = arith.constant 0 : i32
    return %arg0, %c0_i32, %c0_i32_0, %arg1 : i32, i32, i32, i32
  }
  func.func @transform_1(%arg0: i32, %arg1: i32) -> (i32, i32, i32) {
    %c0_i32 = arith.constant 0 : i32
    %c0_i32_0 = arith.constant 0 : i32
    %c0_i32_1 = arith.constant 0 : i32
    %c0_i32_2 = arith.constant 0 : i32
    return %c0_i32, %c0_i32_0, %c0_i32_1 : i32, i32, i32
  }
  func.func @transform_2(%arg0: i32, %arg1: i32) -> (i32, i32) {
    %c0_i32 = arith.constant 0 : i32
    %c0_i32_0 = arith.constant 0 : i32
    %c0_i32_1 = arith.constant 0 : i32
    return %c0_i32, %c0_i32_0 : i32, i32
  }
  func.func @transform_3(%arg0: i32, %arg1: i32) -> (i32, i32) {
    %c0_i32 = arith.constant 0 : i32
    %c0_i32_0 = arith.constant 0 : i32
    %c0_i32_1 = arith.constant 0 : i32
    return %c0_i32, %c0_i32_0 : i32, i32
  }
  func.func @transform_4(%arg0: i32, %arg1: i32) -> (i32, i32) {
    %c0_i32 = arith.constant 0 : i32
    %c0_i32_0 = arith.constant 0 : i32
    %c0_i32_1 = arith.constant 0 : i32
    return %c0_i32, %c0_i32_0 : i32, i32
  }
  func.func @transform_5(%arg0: i32, %arg1: i32) -> (i32, i32) {
    %c0_i32 = arith.constant 0 : i32
    %c0_i32_0 = arith.constant 0 : i32
    %c0_i32_1 = arith.constant 0 : i32
    return %c0_i32, %c0_i32_0 : i32, i32
  }
  func.func @transform_6(%arg0: i32, %arg1: i32) -> (i32, i32, i32) {
    %c0_i32 = arith.constant 0 : i32
    %c0_i32_0 = arith.constant 0 : i32
    return %arg0, %c0_i32, %arg1 : i32, i32, i32
  }
}

</mosaic_0001>

<bundles_post_ra>
// kernel: tpu_custom_call.1
= control target key start
LH: loop header
LB: loop body
LE: loop exit
PB: predicated region body
PF: predicated region fallthrough
CT: control target
= control target key end

     0   :  { %s12103_s0 = inlined_call_operand.hbm [shape: bf16[2,16,16,2048], index: 0, kind: input, shape index: {}]   ;;  %s12104_s1 = inlined_call_operand.hbm [shape: bf16[16,16,16], index: 1, kind: input, shape index: {}]   ;;  %s12105_s2 = inlined_call_operand.vmem [shape: f32[32,16], index: 2, kind: input, shape index: {}]   ;;  %s12106_s3 = inlined_call_operand.vmem [shape: f32[32,1], index: 3, kind: input, shape index: {}]   ;;  %s12107_s4 = inlined_call_operand.hbm [shape: f32[32,32], index: 4, kind: input, shape index: {}]   ;;  %s12108_s5 = inlined_call_operand.vmem [shape: f32[32,1], index: 5, kind: input, shape index: {}]   ;;  %s12109_s6 = inlined_call_operand.hbm [shape: bf16[2,32,2048], index: 6, kind: output, shape index: {}]  }
   0x1   :  { %12569 = sst [smem:[#allocation250_spill]] %s12104_s1 }
   0x2   :  { %12570 = sst [smem:[#allocation251_spill]] %s12107_s4 }
   0x3   :  { %12571 = sst [smem:[#allocation252_spill]] %s12109_s6 }
   0x4   :  { %11 = vsyncpa [#allocation3], 0 }
   0x5   :  { %13 = vsyncpa [#allocation3 + $0x1], 0 }
   0x6   :  { %14 = vsyncpa [#allocation6], 0 }
   0x7   :  { %15 = vsyncpa [#allocation4], 0 }
   0x8   :  { %17 = vsyncpa [#allocation4 + $0x1], 0  ;;  %s7944_s21 = smov 0   ;;  %s7946_s22 = smov 0  }
   0x9   :  { %s7948_s23 = smov 0   ;;  %s7950_s24 = smov 0  }
   0xa   :  { %s7952_s25 = smov 0   ;;  %s7954_s26 = smov 0  }
   0xb   :  { %s7956_s27 = smov 0   ;;  %s7958_s28 = smov 0  }
   0xc LB: > { %12572 = sst [smem:[#allocation12_spill]] %s7866_s21  ;;  %s5990_s29 = sadd.s32 4294967295, %s7894_s28   ;;  %s7894_s28 = sphi %s7958_s28, %s23_s28   ;;  %s7890_s27 = sphi %s7956_s27, %s13701_s27   ;;  %s7886_s26 = sphi %s7954_s26, %s13700_s26   ;;  %s7882_s25 = sphi %s7952_s25, %s13699_s25   ;;  %s7878_s24 = sphi %s7950_s24, %s13698_s24   ;;  %s7874_s23 = sphi %s7948_s23, %s13697_s23   ;;  %s7870_s22 = sphi %s7946_s22, %s13696_s22   ;;  %s7866_s21 = sphi %s7944_s21, %s13695_s21  }
   0xd   : > { %12573 = sst [smem:[#allocation13_spill]] %s7878_s24  ;;  %s5991_s30 = sadd.s32 4294967294, %s7894_s28  }
   0xe   : > { %12574 = sst [smem:[#allocation14_spill]] %s7882_s25  ;;  %p57_p0 = scmp.ne.s32.totalorder %s7870_s22, %s7866_s21 }
   0xf   : > { %p7988_p1 = scmp.eq.s32.totalorder %s5990_s29, 0  ;;  %p7992_p2 = scmp.eq.s32.totalorder %s5990_s29, 3 }
  0x10   : > { %p194_p3 = scmp.eq.s32.totalorder %s5991_s30, 3  ;;  %p5992_p5 = scmp.ge.s32.totalorder %s7894_s28, 1 }
  0x11   : > { %p7998_p4 = por %p7988_p1, %p57_p0  ;;  %p201_p7 = scmp.lt.s32.totalorder %s7894_s28, 5 }
  0x12   : > { %p8003_p6 = por %p194_p3, %p57_p0  ;;  %s12580_s1 = sld [smem:[#allocation250_spill]] }
  0x13   : > { %p8011_p8 = pnand %p5992_p5, %p201_p7  ;;  %s7896_s15 = smov [#allocation5]  }
  0x14   : > { %s12578_s10 = scalar_select %p8003_p6, 1, 0 }
  0x15   : > { %p7055_p9 = pneg %p8011_p8  ;;  %s214_s16 = sshll.u32 %s7896_s15, 4  ;;  %s215_s16 = int_to_ptr.vmem [resolvable:$true] %s214_s16 }
  0x16   : > { %12579 = sst [smem:[#allocation15_spill]] %s12578_s10  ;;  %s7897_s20 = smov 64  }
  0x17   : > { %p7056_p10 = pnand %p7055_p9, %p7988_p1  ;;  %s12582_s4 = sld [smem:[#allocation251_spill]] }
  0x18   : > { %s212_s13 = sshll.u32 %s12580_s1, 4  ;;  %s7898_s29 = smov 4   ;;  %s213_s13 = int_to_ptr.hbm [resolvable:$true] %s212_s13 }
  0x19   : > { %7058 = dma.hbm_to_vmem [thread:$0]  (!%p7056_p10), %s213_s13, 2048, %s215_s16, [#allocation6], %s7897_s20, %s7897_s20, %s7898_s29  }
  0x1a   : > { %s7899_s30 = smov [#allocation7]   ;;  %s7900_s12 = smov 128  }
  0x1b   : > { %s234_s11 = sshll.u32 %s7899_s30, 4  ;;  %s7901_s15 = smov 8   ;;  %s235_s11 = int_to_ptr.vmem [resolvable:$true] %s234_s11 }
  0x1c   : > { %s32_s17 = sadd.s32 1, %s7886_s26  ;;  %s35_s18 = sadd.s32 1, %s7890_s27 }
  0x1d   : > { %s232_s19 = sshll.u32 %s12582_s4, 4  ;;  %p33_p11 = scmp.ge.s32.totalorder %s32_s17, 2  ;;  %s233_s19 = int_to_ptr.hbm [resolvable:$true] %s232_s19 }
  0x1e   : > { %7061 = dma.hbm_to_vmem [thread:$0]  (!%p7056_p10), %s233_s19, 512, %s235_s11, [#allocation6], %s7900_s12, %s7900_s12, %s7901_s15  }
  0x1f   : > { %s44_s1 = sadd.s32 1, %s7874_s23  ;;  %p51_p12 = scmp.ne.s32.totalorder %s7874_s23, %s7870_s22 }
  0x20   : > { %p52_p13 = scmp.eq.s32.totalorder %s7894_s28, 0  ;;  %s13703_s17 = smov (%p33_p11, %s32_s17), 0 }
  0x21   : > { %12583 = sst [smem:[#allocation16_spill]] %s13703_s17  ;;  %s13705_s18 = smov (!%p33_p11, %s35_s18), %s7890_s27 }
  0x22   : > { %s40_s13 = ssub.s32 %s7886_s26, %s13703_s17  ;;  %p8033_p0 = por %p52_p13, %p51_p12 }
  0x23   : > { %p37_p3 = scmp.ge.s32.totalorder %s13705_s18, 2  ;;  %p8039_p5 = por %p7992_p2, %p51_p12 }
  0x24   : > { %p7072_p7 = scmp.lt.s32.totalorder %s7894_s28, 4  ;;  %s251_s20 = sand.u32 1, %s7874_s23  }
  0x25   : > { %s12585_s19 = scalar_select %p8039_p5, 1, 0 }
  0x26   : > { %s13707_s18 = smov (%p37_p3, %s13705_s18), 0  ;;  %s5996_s29 = sshll.u32 %s251_s20, 10 }
  0x27   : > { %12586 = sst [smem:[#allocation17_spill]] %s12585_s19  ;;  %s39_s30 = ssub.s32 %s7890_s27, %s13707_s18 }
  0x28   : > { %12587 = sst [smem:[#allocation18_spill]] %s13707_s18  ;;  %s41_s11 = sor.u32 %s40_s13, %s39_s30 }
  0x29   : > { %s5997_s12 = sshll.u32 %s7886_s26, 3  ;;  %p42_p9 = scmp.eq.s32.totalorder %s41_s11, 0 }
  0x2a   : > { %s5998_s15 = sshll.u32 %s7890_s27, 9  ;;  %s255_s17 = scalar_lea.vmem [#allocation2], %s5996_s29 }
  0x2b   : > { %s260_s4 = sadd.s32 %s5998_s15, %s5997_s12  ;;  %s265_s8 = sshll.u32 %s255_s17, 4  ;;  %s266_s8 = int_to_ptr.vmem [resolvable:$true] %s265_s8 }
  0x2c   : > { %s8052_s10 = scalar_select %p42_p9, %s7874_s23, %s44_s1  }
  0x2d   : > { %s5999_s21 = sshll.u32 %s260_s4, 2  ;;  %p7063_p2 = pnand %p7072_p7, %p8033_p0 }
  0x2e   : > { %s262_s25 = scalar_lea.hbm %s12103_s0, %s5999_s21  ;;  %s252_s13 = scalar_lea.sflag [#allocation3], %s251_s20 }
  0x2f   : > { %s263_s24 = sshll.u32 %s262_s25, 4  ;;  %s7902_s30 = smov 1024   ;;  %s264_s24 = int_to_ptr.hbm [resolvable:$true] %s263_s24 }
  0x30   : > { %s7903_s11 = smov 512   ;;  %s7904_s18 = smov 32  }
  0x31   : > { %7065 = dma.hbm_to_vmem [thread:$0]  (!%p7063_p2), %s264_s24, 16384, %s266_s8, %s252_s13, %s7902_s30, %s7903_s11, %s7904_s18  }
  0x32   : > { %277 = sbr.rel (%p8011_p8) target bundleno = 1484 (0x5cc), region = 44 }
  0x37   : > { %s8064_s1 = sand.u32 1, %s7870_s22  }
  0x38   : > { %s6001_s4 = sshll.u32 %s8064_s1, 10  ;;  %s280_s6 = scalar_lea.sflag [#allocation3], %s8064_s1 }
  0x39   : > { %s8068_s21 = scalar_lea.vmem [#allocation2], %s6001_s4 }
  0x3a   : > { %7853 = dma.done.wait (%p7998_p4), %s280_s6, 16384  }
  0x3b   : > { %7855 = vsyncadd (%p7998_p4), %s280_s6, 4294950912 }
  0x3c   : > { %7857 = dma.done.wait (%p7988_p1), [#allocation6], 2560  }
  0x3d   : > { %7859 = vsyncadd (%p7988_p1), [#allocation6], 4294964736  ;;  %v6011_v0 = vld [vmem:[%s8068_s21] sm:$0xf]  ;;  %v6915_v2 = vld [vmem:[%s8068_s21 + $0x4] sm:$0xf] }
  0x3e   : > { %v6919_v1 = vld [vmem:[%s8068_s21 + $0x1c] sm:$0xf0]  ;;  %v6013_v4 = vld [vmem:[%s8068_s21 + $0x20] sm:$0xf0]  ;;  %v6019_v5 = vld [vmem:[%s8068_s21 + $0x8] sm:$0xf] }
  0x3f   : > { %v6012_v3 = vor.u32 %v6919_v1, %v6011_v0  ;;  %v6920_v6 = vld [vmem:[%s8068_s21 + $0x24] sm:$0xf0]  ;;  %v6016_v7 = vor.u32 %v6915_v2, %v6013_v4  ;;  %v6916_v9 = vld [vmem:[%s8068_s21 + $0xc] sm:$0xf]  ;;  %v6899_v11 = vld [vmem:[#allocation5] sm:$0xff]  ;;  %vm531_vm0 = vcmask 130048  }
  0x40   : > { %v6020_v8 = vor.u32 %v6920_v6, %v6019_v5  ;;  %v6021_v10 = vld [vmem:[%s8068_s21 + $0x28] sm:$0xf0]  ;;  %v6027_v13 = vld [vmem:[%s8068_s21 + $0x10] sm:$0xf]  ;;  %v6917_v15 = vld [vmem:[%s8068_s21 + $0x14] sm:$0xf] }
  0x41   : > { %542 = vmatpush.bf16.msra.mxu0 %v6012_v3  ;;  %v6024_v12 = vor.u32 %v6916_v9, %v6021_v10  ;;  %v6921_v14 = vld [vmem:[%s8068_s21 + $0x2c] sm:$0xf0]  ;;  %556 = vmatpush.bf16.msra.mxu1 %v6016_v7  ;;  %v6029_v17 = vld [vmem:[%s8068_s21 + $0x30] sm:$0xf0]  ;;  %v6035_v18 = vld [vmem:[%s8068_s21 + $0x18] sm:$0xf] }
  0x42   : > { %570 = vmatpush.bf16.msra.mxu2 %v6020_v8  ;;  %v6028_v16 = vor.u32 %v6921_v14, %v6027_v13  ;;  %v6922_v19 = vld [vmem:[%s8068_s21 + $0x34] sm:$0xf0]  ;;  %v6032_v20 = vor.u32 %v6917_v15, %v6029_v17  ;;  %v6918_v22 = vld [vmem:[%s8068_s21 + $0x1c] sm:$0xf]  ;;  %v6055_v24 = vld [vmem:[%s8068_s21 + $0x40] sm:$0xf] }
  0x43   : > { %584 = vmatpush.bf16.msra.mxu3 %v6024_v12  ;;  %v6036_v21 = vor.u32 %v6922_v19, %v6035_v18  ;;  %v6037_v23 = vld [vmem:[%s8068_s21 + $0x38] sm:$0xf0]  ;;  %v6927_v26 = vld [vmem:[%s8068_s21 + $0x5c] sm:$0xf0]  ;;  %v6923_v27 = vld [vmem:[%s8068_s21 + $0x44] sm:$0xf] }
  0x44   : > { %6041 = vmatmul.msk.bf16.vlgmr.msra.gmra.mxu0 %vm531_vm0, %v6899_v11  ;;  %v6040_v25 = vor.u32 %v6918_v22, %v6037_v23  ;;  %v6057_v28 = vld [vmem:[%s8068_s21 + $0x60] sm:$0xf0]  ;;  %6042 = vmatmul.msk.bf16.vlgmr.msra.gmra.mxu1 %vm531_vm0, %v6899_v11  ;;  %v6056_v29 = vor.u32 %v6927_v26, %v6055_v24  ;;  %v6063_v31 = vld [vmem:[%s8068_s21 + $0x48] sm:$0xf]  ;;  %v6924_v33 = vld [vmem:[%s8068_s21 + $0x4c] sm:$0xf] }
  0x45   : > { %6043 = vmatmul.msk.bf16.vlgmr.msra.gmra.mxu2 %vm531_vm0, %v6899_v11  ;;  %v6060_v30 = vor.u32 %v6923_v27, %v6057_v28  ;;  %v6928_v32 = vld [vmem:[%s8068_s21 + $0x64] sm:$0xf0]  ;;  %598 = vmatpush.bf16.msrb.mxu0 %v6028_v16  ;;  %v6065_v35 = vld [vmem:[%s8068_s21 + $0x68] sm:$0xf0]  ;;  %v6071_v37 = vld [vmem:[%s8068_s21 + $0x50] sm:$0xf] }
  0x46   : > { %6044 = vmatmul.msk.bf16.vlgmr.msra.gmra.mxu3 %vm531_vm0, %v6899_v11  ;;  %v6064_v34 = vor.u32 %v6928_v32, %v6063_v31  ;;  %612 = vmatpush.bf16.msrb.mxu1 %v6032_v20  ;;  %v6068_v36 = vor.u32 %v6924_v33, %v6065_v35  ;;  %v6929_v38 = vld [vmem:[%s8068_s21 + $0x6c] sm:$0xf0]  ;;  %v6925_v39 = vld [vmem:[%s8068_s21 + $0x54] sm:$0xf]  ;;  %v6079_v41 = vld [vmem:[%s8068_s21 + $0x58] sm:$0xf] }
  0x47   : > { %626 = vmatpush.bf16.msrb.mxu2 %v6036_v21  ;;  %640 = vmatpush.bf16.msrb.mxu3 %v6040_v25  ;;  %v6073_v40 = vld [vmem:[%s8068_s21 + $0x70] sm:$0xf0]  ;;  %v6930_v42 = vld [vmem:[%s8068_s21 + $0x74] sm:$0xf0]  ;;  %v6926_v43 = vld [vmem:[%s8068_s21 + $0x5c] sm:$0xf]  ;;  %v6072_v45 = vor.u32 %v6929_v38, %v6071_v37 }
  0x48   : > { %v6081_v44 = vld [vmem:[%s8068_s21 + $0x78] sm:$0xf0]  ;;  %v6076_v46 = vor.u32 %v6925_v39, %v6073_v40  ;;  %v6080_v47 = vor.u32 %v6930_v42, %v6079_v41  ;;  %v6900_v49 = vld [vmem:[#allocation5 + $0x8] sm:$0xff]  ;;  %v6099_v50 = vld [vmem:[%s8068_s21 + $0x80] sm:$0xf]  ;;  %vm5586_vm1 = vcmask 261120  }
  0x49   : > { %702 = vmatpush.bf16.msra.mxu0 %v6056_v29  ;;  %v6084_v48 = vor.u32 %v6926_v43, %v6081_v44  ;;  %v6935_v51 = vld [vmem:[%s8068_s21 + $0x9c] sm:$0xf0]  ;;  %v6931_v52 = vld [vmem:[%s8068_s21 + $0x84] sm:$0xf]  ;;  %v6107_v54 = vld [vmem:[%s8068_s21 + $0x88] sm:$0xf] }
  0x4a   : > { %716 = vmatpush.bf16.msra.mxu1 %v6060_v30  ;;  %v6101_v53 = vld [vmem:[%s8068_s21 + $0xa0] sm:$0xf0]  ;;  %v6936_v55 = vld [vmem:[%s8068_s21 + $0xa4] sm:$0xf0]  ;;  %v6932_v56 = vld [vmem:[%s8068_s21 + $0x8c] sm:$0xf]  ;;  %v6100_v58 = vor.u32 %v6935_v51, %v6099_v50 }
  0x4b   : > { %730 = vmatpush.bf16.msra.mxu2 %v6064_v34  ;;  %744 = vmatpush.bf16.msra.mxu3 %v6068_v36  ;;  %v6109_v57 = vld [vmem:[%s8068_s21 + $0xa8] sm:$0xf0]  ;;  %v6104_v59 = vor.u32 %v6931_v52, %v6101_v53  ;;  %v6108_v60 = vor.u32 %v6936_v55, %v6107_v54  ;;  %v6115_v62 = vld [vmem:[%s8068_s21 + $0x90] sm:$0xf]  ;;  %v6933_v0 = vld [vmem:[%s8068_s21 + $0x94] sm:$0xf] }
  0x4c   : > { %v6112_v61 = vor.u32 %v6932_v56, %v6109_v57  ;;  %v6937_v63 = vld [vmem:[%s8068_s21 + $0xac] sm:$0xf0]  ;;  %v6117_v1 = vld [vmem:[%s8068_s21 + $0xb0] sm:$0xf0]  ;;  %v6123_v2 = vld [vmem:[%s8068_s21 + $0x98] sm:$0xf] }
  0x4d   : > { %v6938_v3 = vld [vmem:[%s8068_s21 + $0xb4] sm:$0xf0]  ;;  %v6934_v4 = vld [vmem:[%s8068_s21 + $0x9c] sm:$0xf]  ;;  %v6116_v6 = vor.u32 %v6937_v63, %v6115_v62  ;;  %v6120_v7 = vor.u32 %v6933_v0, %v6117_v1  ;;  %v6901_v10 = vld [vmem:[#allocation5 + $0x10] sm:$0xff]  ;;  %s6004_s19 = sshll.u32 %s8064_s1, 7 }
  0x4e   : > { %v6125_v5 = vld [vmem:[%s8068_s21 + $0xb8] sm:$0xf0]  ;;  %v6124_v8 = vor.u32 %v6938_v3, %v6123_v2  ;;  %v6943_v12 = vld [vmem:[%s8068_s21 + $0xdc] sm:$0xf0]  ;;  %v6939_v13 = vld [vmem:[%s8068_s21 + $0xc4] sm:$0xf] }
  0x4f   : > { %v6128_v9 = vor.u32 %v6934_v4, %v6125_v5  ;;  %v6145_v14 = vld [vmem:[%s8068_s21 + $0xe0] sm:$0xf0]  ;;  %v6151_v15 = vld [vmem:[%s8068_s21 + $0xc8] sm:$0xf]  ;;  %v6940_v17 = vld [vmem:[%s8068_s21 + $0xcc] sm:$0xf] }
  0x50   : > { %v6944_v16 = vld [vmem:[%s8068_s21 + $0xe4] sm:$0xf0]  ;;  %v6153_v18 = vld [vmem:[%s8068_s21 + $0xe8] sm:$0xf0]  ;;  %v6148_v20 = vor.u32 %v6939_v13, %v6145_v14  ;;  %v6159_v23 = vld [vmem:[%s8068_s21 + $0xd0] sm:$0xf] }
  0x51   : > { %v6152_v21 = vor.u32 %v6944_v16, %v6151_v15  ;;  %v6156_v22 = vor.u32 %v6940_v17, %v6153_v18  ;;  %v6945_v24 = vld [vmem:[%s8068_s21 + $0xec] sm:$0xf0]  ;;  %v6941_v25 = vld [vmem:[%s8068_s21 + $0xd4] sm:$0xf]  ;;  %v6167_v27 = vld [vmem:[%s8068_s21 + $0xd8] sm:$0xf] }
  0x52   : > { %v6161_v26 = vld [vmem:[%s8068_s21 + $0xf0] sm:$0xf0]  ;;  %v6946_v28 = vld [vmem:[%s8068_s21 + $0xf4] sm:$0xf0]  ;;  %v6942_v29 = vld [vmem:[%s8068_s21 + $0xdc] sm:$0xf]  ;;  %v6160_v31 = vor.u32 %v6945_v24, %v6159_v23 }
  0x53   : > { %v6169_v30 = vld [vmem:[%s8068_s21 + $0xf8] sm:$0xf0]  ;;  %v6164_v32 = vor.u32 %v6941_v25, %v6161_v26  ;;  %v6168_v33 = vor.u32 %v6946_v28, %v6167_v27  ;;  %v6187_v36 = vld [vmem:[%s8068_s21 + $0x100] sm:$0xf]  ;;  %v6947_v38 = vld [vmem:[%s8068_s21 + $0x104] sm:$0xf] }
  0x54   : > { %6045 = vmatmul.msk.bf16.vlgmr.msrb.gmra.mxu0 %vm531_vm0, %v6899_v11  ;;  %6046 = vmatmul.msk.bf16.vlgmr.msrb.gmra.mxu1 %vm531_vm0, %v6899_v11  ;;  %v6172_v34 = vor.u32 %v6942_v29, %v6169_v30  ;;  %v6902_v35 = vld [vmem:[#allocation5 + $0x18] sm:$0xff]  ;;  %v6951_v37 = vld [vmem:[%s8068_s21 + $0x11c] sm:$0xf0]  ;;  %v6189_v39 = vld [vmem:[%s8068_s21 + $0x120] sm:$0xf0]  ;;  %s12020_s20 = scalar_lea.vmem [#allocation8], %s6004_s19 }
  0x55   : > { %6047 = vmatmul.msk.bf16.vlgmr.msrb.gmra.mxu2 %vm531_vm0, %v6899_v11  ;;  %758 = vmatpush.bf16.msrb.mxu0 %v6072_v45  ;;  %v6195_v40 = vld [vmem:[%s8068_s21 + $0x108] sm:$0xf]  ;;  %v6188_v42 = vor.u32 %v6951_v37, %v6187_v36  ;;  %v6948_v43 = vld [vmem:[%s8068_s21 + $0x10c] sm:$0xf]  ;;  %v6192_v45 = vor.u32 %v6947_v38, %v6189_v39  ;;  %v6949_v50 = vld [vmem:[%s8068_s21 + $0x114] sm:$0xf] }
  0x56   : > { %6048 = vmatmul.msk.bf16.vlgmr.msrb.gmra.mxu3 %vm531_vm0, %v6899_v11  ;;  %772 = vmatpush.bf16.msrb.mxu1 %v6076_v46  ;;  %v6143_v11 = vld [vmem:[%s8068_s21 + $0xc0] sm:$0xf]  ;;  %v6952_v41 = vld [vmem:[%s8068_s21 + $0x124] sm:$0xf0]  ;;  %v6197_v44 = vld [vmem:[%s8068_s21 + $0x128] sm:$0xf0] }
  0x57   : > { %786 = vmatpush.bf16.msrb.mxu2 %v6080_v47  ;;  %800 = vmatpush.bf16.msrb.mxu3 %v6084_v48  ;;  %v6144_v19 = vor.u32 %v6943_v12, %v6143_v11  ;;  %v6196_v46 = vor.u32 %v6952_v41, %v6195_v40  ;;  %v6200_v47 = vor.u32 %v6948_v43, %v6197_v44  ;;  %v6203_v48 = vld [vmem:[%s8068_s21 + $0x110] sm:$0xf]  ;;  %v6205_v51 = vld [vmem:[%s8068_s21 + $0x130] sm:$0xf0]  ;;  %v6211_v52 = vld [vmem:[%s8068_s21 + $0x118] sm:$0xf] }
  0x58   : > { %v6954_v53 = vld [vmem:[%s8068_s21 + $0x134] sm:$0xf0]  ;;  %v6950_v55 = vld [vmem:[%s8068_s21 + $0x11c] sm:$0xf]  ;;  %v6208_v57 = vor.u32 %v6949_v50, %v6205_v51  ;;  %v6959_v62 = vld [vmem:[%s8068_s21 + $0x15c] sm:$0xf0] }
  0x59   : > { %v6213_v56 = vld [vmem:[%s8068_s21 + $0x138] sm:$0xf0]  ;;  %v6955_v63 = vld [vmem:[%s8068_s21 + $0x144] sm:$0xf]  ;;  %v6239_v2 = vld [vmem:[%s8068_s21 + $0x148] sm:$0xf] }
  0x5a   : > { %v6233_v1 = vld [vmem:[%s8068_s21 + $0x160] sm:$0xf0]  ;;  %v6960_v3 = vld [vmem:[%s8068_s21 + $0x164] sm:$0xf0]  ;;  %v6247_v16 = vld [vmem:[%s8068_s21 + $0x150] sm:$0xf] }
  0x5b   : > { %v6961_v17 = vld [vmem:[%s8068_s21 + $0x16c] sm:$0xf0]  ;;  %v6957_v18 = vld [vmem:[%s8068_s21 + $0x154] sm:$0xf]  ;;  %v6962_v23 = vld [vmem:[%s8068_s21 + $0x174] sm:$0xf0] }
  0x5c   : > { %v6248_v25 = vor.u32 %v6961_v17, %v6247_v16  ;;  %v6958_v26 = vld [vmem:[%s8068_s21 + $0x15c] sm:$0xf]  ;;  %v6275_v37 = vld [vmem:[%s8068_s21 + $0x180] sm:$0xf]  ;;  %v6963_v39 = vld [vmem:[%s8068_s21 + $0x184] sm:$0xf] }
  0x5d   : > { %v6257_v27 = vld [vmem:[%s8068_s21 + $0x178] sm:$0xf0]  ;;  %v6967_v38 = vld [vmem:[%s8068_s21 + $0x19c] sm:$0xf0]  ;;  %v6283_v43 = vld [vmem:[%s8068_s21 + $0x188] sm:$0xf] }
  0x5e   : > { %v6260_v30 = vor.u32 %v6958_v26, %v6257_v27  ;;  %v6968_v44 = vld [vmem:[%s8068_s21 + $0x1a4] sm:$0xf0]  ;;  %v6971_v26 = vld [vmem:[%s8068_s21 + $0x1c4] sm:$0xf]  ;;  %s13687_s29 = sld [smem:[#allocation13_spill]]  ;;  %s5878_s25 = sshll.u32 %s12020_s20, 4  ;;  %s5879_s25 = int_to_ptr.vmem [resolvable:$true] %s5878_s25 }
  0x5f   : > { %v6284_v50 = vor.u32 %v6968_v44, %v6283_v43  ;;  %s13688_s12 = sld [smem:[#allocation14_spill]]  ;;  %s5864_s9 = scalar_lea.sflag [#allocation4], %s8064_s1 }
  0x60   : > { %s13689_s6 = sld [smem:[#allocation252_spill]] }
  0x64   : > { %6085 = vmatmul.msk.bf16.vlgmr.msra.gmra.mxu0 %vm531_vm0, %v6900_v49  ;;  %6086 = vmatmul.msk.bf16.vlgmr.msra.gmra.mxu1 %vm531_vm0, %v6900_v49  ;;  %s6894_s15 = sshll.u32 %s13687_s29, 3 }
  0x65   : > { %6087 = vmatmul.msk.bf16.vlgmr.msra.gmra.mxu2 %vm531_vm0, %v6900_v49  ;;  %862 = vmatpush.bf16.msra.mxu0 %v6100_v58  ;;  %v6212_v58 = vor.u32 %v6954_v53, %v6211_v52  ;;  %s6895_s8 = sshll.u32 %s13688_s12, 6 }
  0x66   : > { %6088 = vmatmul.msk.bf16.vlgmr.msra.gmra.mxu3 %vm531_vm0, %v6900_v49  ;;  %876 = vmatpush.bf16.msra.mxu1 %v6104_v59  ;;  %v6216_v59 = vor.u32 %v6950_v55, %v6213_v56  ;;  %s5875_s13 = sadd.s32 %s6895_s8, %s6894_s15  ;;  %s7812_s19 = scalar_lea.hbm %s13689_s6, 512 }
  0x67   : > { %890 = vmatpush.bf16.msra.mxu2 %v6108_v60  ;;  %904 = vmatpush.bf16.msra.mxu3 %v6112_v61  ;;  %v6903_v60 = vld [vmem:[#allocation5 + $0x20] sm:$0xff]  ;;  %s6896_s30 = sshll.u32 %s5875_s13, 2 }
  0x68   : > { %v6231_v61 = vld [vmem:[%s8068_s21 + $0x140] sm:$0xf]  ;;  %s5877_s24 = scalar_lea.hbm %s13689_s6, %s6896_s30 }
  0x69   : > { %v6232_v5 = vor.u32 %v6959_v62, %v6231_v61  ;;  %v6293_v62 = vld [vmem:[%s8068_s21 + $0x1b0] sm:$0xf0]  ;;  %s5880_s7 = sshll.u32 %s5877_s24, 4  ;;  %s5881_s7 = int_to_ptr.hbm [resolvable:$true] %s5880_s7 }
  0x6a   : > { %s7806_s14 = sshra.s32 %s5881_s7, 4  ;;  %s7807_s14 = int_to_ptr.hbm [resolvable:$true] %s7806_s14 }
  0x6b   : > { %s7808_s17 = scalar_lea.hbm %s7807_s14, 128  ;;  %p7813_p10 = scmp.lt.s32.totalorder %s7807_s14, %s13689_s6 }
  0x6c   : > { %p7809_p1 = scmp.ne.s32.totalorder %s7807_s14, %s7808_s17  ;;  %p7814_p11 = scmp.lt.s32.totalorder %s7812_s19, %s7808_s17 }
  0x6e   : > { %p7810_p4 = pnand %p7809_p1, %p8039_p5  ;;  %p7815_p12 = por %p7814_p11, %p7813_p10 }
  0x70   : > { %p7811_p8 = pneg %p7810_p4 }
  0x72   : > { %p7816_p13 = pnand %p7815_p12, %p7811_p8 }
  0x74   : > { %6089 = vmatmul.msk.bf16.vlgmr.msrb.gmra.mxu0 %vm531_vm0, %v6900_v49  ;;  %6090 = vmatmul.msk.bf16.vlgmr.msrb.gmra.mxu1 %vm531_vm0, %v6900_v49 }
  0x75   : > { %6091 = vmatmul.msk.bf16.vlgmr.msrb.gmra.mxu2 %vm531_vm0, %v6900_v49  ;;  %918 = vmatpush.bf16.msrb.mxu0 %v6116_v6  ;;  %v6956_v6 = vld [vmem:[%s8068_s21 + $0x14c] sm:$0xf] }
  0x76   : > { %6092 = vmatmul.msk.bf16.vlgmr.msrb.gmra.mxu3 %vm531_vm0, %v6900_v49  ;;  %932 = vmatpush.bf16.msrb.mxu1 %v6120_v7  ;;  %v6953_v49 = vld [vmem:[%s8068_s21 + $0x12c] sm:$0xf0]  ;;  %v6241_v7 = vld [vmem:[%s8068_s21 + $0x168] sm:$0xf0] }
  0x77   : > { %946 = vmatpush.bf16.msrb.mxu2 %v6124_v8  ;;  %960 = vmatpush.bf16.msrb.mxu3 %v6128_v9  ;;  %v6204_v54 = vor.u32 %v6953_v49, %v6203_v48  ;;  %v6236_v8 = vor.u32 %v6955_v63, %v6233_v1  ;;  %v6240_v9 = vor.u32 %v6960_v3, %v6239_v2  ;;  %v6285_v48 = vld [vmem:[%s8068_s21 + $0x1a8] sm:$0xf0]  ;;  %v6299_v63 = vld [vmem:[%s8068_s21 + $0x198] sm:$0xf] }
  0x78   : > { %v6970_v1 = vld [vmem:[%s8068_s21 + $0x1b4] sm:$0xf0] }
  0x84   : > { %6129 = vmatmul.msk.bf16.vlgmr.msra.gmra.mxu0 %vm531_vm0, %v6901_v10  ;;  %6130 = vmatmul.msk.bf16.vlgmr.msra.gmra.mxu1 %vm531_vm0, %v6901_v10 }
  0x85   : > { %6131 = vmatmul.msk.bf16.vlgmr.msra.gmra.mxu2 %vm531_vm0, %v6901_v10  ;;  %1022 = vmatpush.bf16.msra.mxu0 %v6144_v19 }
  0x86   : > { %6132 = vmatmul.msk.bf16.vlgmr.msra.gmra.mxu3 %vm531_vm0, %v6901_v10  ;;  %1036 = vmatpush.bf16.msra.mxu1 %v6148_v20 }
  0x87   : > { %1050 = vmatpush.bf16.msra.mxu2 %v6152_v21  ;;  %1064 = vmatpush.bf16.msra.mxu3 %v6156_v22  ;;  %v6249_v21 = vld [vmem:[%s8068_s21 + $0x170] sm:$0xf0]  ;;  %v6255_v22 = vld [vmem:[%s8068_s21 + $0x158] sm:$0xf] }
  0x88   : > { %v6252_v28 = vor.u32 %v6957_v18, %v6249_v21  ;;  %v6256_v29 = vor.u32 %v6962_v23, %v6255_v22  ;;  %v6905_v21 = vld [vmem:[#allocation5 + $0x30] sm:$0xff]  ;;  %v6319_v23 = vld [vmem:[%s8068_s21 + $0x1c0] sm:$0xf] }
  0x94   : > { %6133 = vmatmul.msk.bf16.vlgmr.msrb.gmra.mxu0 %vm531_vm0, %v6901_v10  ;;  %6134 = vmatmul.msk.bf16.vlgmr.msrb.gmra.mxu1 %vm531_vm0, %v6901_v10 }
  0x95   : > { %6135 = vmatmul.msk.bf16.vlgmr.msrb.gmra.mxu2 %vm531_vm0, %v6901_v10  ;;  %1078 = vmatpush.bf16.msrb.mxu0 %v6160_v31 }
  0x96   : > { %6136 = vmatmul.msk.bf16.vlgmr.msrb.gmra.mxu3 %vm531_vm0, %v6901_v10  ;;  %1092 = vmatpush.bf16.msrb.mxu1 %v6164_v32  ;;  %v6244_v10 = vor.u32 %v6956_v6, %v6241_v7  ;;  %v6301_v6 = vld [vmem:[%s8068_s21 + $0x1b8] sm:$0xf0] }
  0x97   : > { %1106 = vmatpush.bf16.msrb.mxu2 %v6168_v33  ;;  %1120 = vmatpush.bf16.msrb.mxu3 %v6172_v34 }
  0xa4   : > { %6173 = vmatmul.msk.bf16.vlgmr.msra.gmra.mxu0 %vm531_vm0, %v6902_v35  ;;  %6174 = vmatmul.msk.bf16.vlgmr.msra.gmra.mxu1 %vm531_vm0, %v6902_v35 }
  0xa5   : > { %6175 = vmatmul.msk.bf16.vlgmr.msra.gmra.mxu2 %vm531_vm0, %v6902_v35  ;;  %1182 = vmatpush.bf16.msra.mxu0 %v6188_v42  ;;  %v6277_v42 = vld [vmem:[%s8068_s21 + $0x1a0] sm:$0xf0] }
  0xa6   : > { %6176 = vmatmul.msk.bf16.vlgmr.msra.gmra.mxu3 %vm531_vm0, %v6902_v35  ;;  %1196 = vmatpush.bf16.msra.mxu1 %v6192_v45  ;;  %v6280_v49 = vor.u32 %v6963_v39, %v6277_v42  ;;  %v6972_v39 = vld [vmem:[%s8068_s21 + $0x1cc] sm:$0xf] }
  0xa7   : > { %1210 = vmatpush.bf16.msra.mxu2 %v6196_v46  ;;  %1224 = vmatpush.bf16.msra.mxu3 %v6200_v47  ;;  %v6276_v46 = vor.u32 %v6967_v38, %v6275_v37  ;;  %v6964_v47 = vld [vmem:[%s8068_s21 + $0x18c] sm:$0xf] }
  0xa8   : > { %v6288_v51 = vor.u32 %v6964_v47, %v6285_v48  ;;  %v6329_v42 = vld [vmem:[%s8068_s21 + $0x1e8] sm:$0xf0] }
  0xb4   : > { %6177 = vmatmul.msk.bf16.vlgmr.msrb.gmra.mxu0 %vm531_vm0, %v6902_v35  ;;  %6178 = vmatmul.msk.bf16.vlgmr.msrb.gmra.mxu1 %vm531_vm0, %v6902_v35 }
  0xb5   : > { %6179 = vmatmul.msk.bf16.vlgmr.msrb.gmra.mxu2 %vm531_vm0, %v6902_v35  ;;  %1238 = vmatpush.bf16.msrb.mxu0 %v6204_v54 }
  0xb6   : > { %6180 = vmatmul.msk.bf16.vlgmr.msrb.gmra.mxu3 %vm531_vm0, %v6902_v35  ;;  %1252 = vmatpush.bf16.msrb.mxu1 %v6208_v57  ;;  %v6904_v35 = vld [vmem:[#allocation5 + $0x28] sm:$0xff]  ;;  %v6291_v57 = vld [vmem:[%s8068_s21 + $0x190] sm:$0xf] }
  0xb7   : > { %1266 = vmatpush.bf16.msrb.mxu2 %v6212_v58  ;;  %1280 = vmatpush.bf16.msrb.mxu3 %v6216_v59  ;;  %v6969_v58 = vld [vmem:[%s8068_s21 + $0x1ac] sm:$0xf0]  ;;  %v6965_v59 = vld [vmem:[%s8068_s21 + $0x194] sm:$0xf] }
  0xb8   : > { %v6292_v3 = vor.u32 %v6969_v58, %v6291_v57  ;;  %v6296_v7 = vor.u32 %v6965_v59, %v6293_v62  ;;  %v6335_v57 = vld [vmem:[%s8068_s21 + $0x1d0] sm:$0xf]  ;;  %v6973_v59 = vld [vmem:[%s8068_s21 + $0x1d4] sm:$0xf] }
  0xb9   : > { %v6977_v58 = vld [vmem:[%s8068_s21 + $0x1ec] sm:$0xf0] }
  0xc1   : > { %v8193_v0 = vpop.f32.mrf.mxu0  ;;  %v8198_v4 = vpop.f32.mrf.mxu1 }
  0xc2   : > { %12588 = vst [vmem:[#allocation19_spill] sm:$0xff] %v8198_v4 }
  0xc4   : > { %6217 = vmatmul.msk.bf16.vlgmr.msra.gmra.mxu0 %vm531_vm0, %v6903_v60  ;;  %6218 = vmatmul.msk.bf16.vlgmr.msra.gmra.mxu1 %vm531_vm0, %v6903_v60 }
  0xc5   : > { %6219 = vmatmul.msk.bf16.vlgmr.msra.gmra.mxu2 %vm531_vm0, %v6903_v60  ;;  %1342 = vmatpush.bf16.msra.mxu0 %v6232_v5  ;;  %v6966_v5 = vld [vmem:[%s8068_s21 + $0x19c] sm:$0xf] }
  0xc6   : > { %6220 = vmatmul.msk.bf16.vlgmr.msra.gmra.mxu3 %vm531_vm0, %v6903_v60  ;;  %1356 = vmatpush.bf16.msra.mxu1 %v6236_v8  ;;  %v6300_v8 = vor.u32 %v6970_v1, %v6299_v63  ;;  %v6337_v1 = vld [vmem:[%s8068_s21 + $0x1f0] sm:$0xf0] }
  0xc7   : > { %1370 = vmatpush.bf16.msra.mxu2 %v6240_v9  ;;  %1384 = vmatpush.bf16.msra.mxu3 %v6244_v10  ;;  %v6304_v9 = vor.u32 %v6966_v5, %v6301_v6  ;;  %v6978_v5 = vld [vmem:[%s8068_s21 + $0x1f4] sm:$0xf0] }
  0xc8   : > { %v8206_v11 = vpop.f32.mrf.mxu2 }
  0xc9   : > { %12589 = vst [vmem:[#allocation20_spill] sm:$0xff] %v8206_v11  ;;  %v8208_v12 = vpop.f32.mrf.mxu3  ;;  %v8210_v13 = vpop.f32.mrf.mxu0 }
  0xca   : > { %12590 = vst [vmem:[#allocation21_spill] sm:$0xff] %v8208_v12  ;;  %v8212_v14 = vpop.f32.mrf.mxu1 }
  0xcb   : > { %12591 = vst [vmem:[#allocation22_spill] sm:$0xff] %v8210_v13 }
  0xcc   : > { %12592 = vst [vmem:[#allocation23_spill] sm:$0xff] %v8212_v14 }
  0xd0   : > { %v8214_v15 = vpop.f32.mrf.mxu2 }
  0xd1   : > { %12593 = vst [vmem:[#allocation24_spill] sm:$0xff] %v8214_v15  ;;  %v8219_v19 = vpop.f32.mrf.mxu3  ;;  %v8221_v20 = vpop.f32.mrf.mxu0 }
  0xd2   : > { %12594 = vst [vmem:[#allocation25_spill] sm:$0xff] %v8219_v19  ;;  %v8226_v24 = vpop.f32.mrf.mxu1 }
  0xd3   : > { %12595 = vst [vmem:[#allocation26_spill] sm:$0xff] %v8221_v20 }
  0xd4   : > { %12596 = vst [vmem:[#allocation27_spill] sm:$0xff] %v8226_v24  ;;  %6221 = vmatmul.msk.bf16.vlgmr.msrb.gmra.mxu0 %vm531_vm0, %v6903_v60  ;;  %6222 = vmatmul.msk.bf16.vlgmr.msrb.gmra.mxu1 %vm531_vm0, %v6903_v60 }
  0xd5   : > { %6223 = vmatmul.msk.bf16.vlgmr.msrb.gmra.mxu2 %vm531_vm0, %v6903_v60  ;;  %1398 = vmatpush.bf16.msrb.mxu0 %v6248_v25  ;;  %v6975_v25 = vld [vmem:[%s8068_s21 + $0x1dc] sm:$0xf0] }
  0xd6   : > { %6224 = vmatmul.msk.bf16.vlgmr.msrb.gmra.mxu3 %vm531_vm0, %v6903_v60  ;;  %1412 = vmatpush.bf16.msrb.mxu1 %v6252_v28  ;;  %v6320_v38 = vor.u32 %v6975_v25, %v6319_v23  ;;  %v6340_v23 = vor.u32 %v6973_v59, %v6337_v1  ;;  %v6371_v59 = vld [vmem:[%s8068_s21 + $0x208] sm:$0xf] }
  0xd7   : > { %1426 = vmatpush.bf16.msrb.mxu2 %v6256_v29  ;;  %1440 = vmatpush.bf16.msrb.mxu3 %v6260_v30  ;;  %v6321_v29 = vld [vmem:[%s8068_s21 + $0x1e0] sm:$0xf0]  ;;  %v6327_v30 = vld [vmem:[%s8068_s21 + $0x1c8] sm:$0xf] }
  0xd8   : > { %v8234_v31 = vpop.f32.mrf.mxu2  ;;  %v6324_v43 = vor.u32 %v6971_v26, %v6321_v29  ;;  %v6984_v1 = vld [vmem:[%s8068_s21 + $0x224] sm:$0xf0] }
  0xd9   : > { %12597 = vst [vmem:[#allocation28_spill] sm:$0xff] %v8234_v31  ;;  %v8236_v32 = vpop.f32.mrf.mxu3  ;;  %v8238_v33 = vpop.f32.mrf.mxu0 }
  0xda   : > { %12598 = vst [vmem:[#allocation29_spill] sm:$0xff] %v8236_v32  ;;  %v8240_v34 = vpop.f32.mrf.mxu1 }
  0xdb   : > { %12599 = vst [vmem:[#allocation30_spill] sm:$0xff] %v8238_v33 }
  0xdc   : > { %12600 = vst [vmem:[#allocation31_spill] sm:$0xff] %v8240_v34 }
  0xe0   : > { %v8242_v36 = vpop.f32.mrf.mxu2 }
  0xe1   : > { %12601 = vst [vmem:[#allocation32_spill] sm:$0xff] %v8242_v36  ;;  %v8247_v40 = vpop.f32.mrf.mxu3  ;;  %v8249_v41 = vpop.f32.mrf.mxu0 }
  0xe2   : > { %12602 = vst [vmem:[#allocation33_spill] sm:$0xff] %v8247_v40  ;;  %v8254_v45 = vpop.f32.mrf.mxu1 }
  0xe3   : > { %12603 = vst [vmem:[#allocation34_spill] sm:$0xff] %v8254_v45 }
  0xe4   : > { %6261 = vmatmul.msk.bf16.vlgmr.msra.gmra.mxu0 %vm531_vm0, %v6904_v35  ;;  %6262 = vmatmul.msk.bf16.vlgmr.msra.gmra.mxu1 %vm531_vm0, %v6904_v35 }
  0xe5   : > { %6263 = vmatmul.msk.bf16.vlgmr.msra.gmra.mxu2 %vm531_vm0, %v6904_v35  ;;  %1502 = vmatpush.bf16.msra.mxu0 %v6276_v46  ;;  %v6332_v46 = vor.u32 %v6972_v39, %v6329_v42  ;;  %v6906_v39 = vld [vmem:[#allocation5 + $0x38] sm:$0xff] }
  0xe6   : > { %6264 = vmatmul.msk.bf16.vlgmr.msra.gmra.mxu3 %vm531_vm0, %v6904_v35  ;;  %1516 = vmatpush.bf16.msra.mxu1 %v6280_v49 }
  0xe7   : > { %1530 = vmatpush.bf16.msra.mxu2 %v6284_v50  ;;  %1544 = vmatpush.bf16.msra.mxu3 %v6288_v51 }
  0xe8   : > { %v8262_v52 = vpop.f32.mrf.mxu2 }
  0xe9   : > { %12604 = vst [vmem:[#allocation35_spill] sm:$0xff] %v8262_v52  ;;  %v8264_v53 = vpop.f32.mrf.mxu3  ;;  %v8266_v54 = vpop.f32.mrf.mxu0 }
  0xea   : > { %12605 = vst [vmem:[#allocation36_spill] sm:$0xff] %v8264_v53  ;;  %v8268_v55 = vpop.f32.mrf.mxu1 }
  0xeb   : > { %12606 = vst [vmem:[#allocation37_spill] sm:$0xff] %v8266_v54 }
  0xec   : > { %12607 = vst [vmem:[#allocation38_spill] sm:$0xff] %v8268_v55 }
  0xf0   : > { %v8270_v56 = vpop.f32.mrf.mxu2 }
  0xf1   : > { %12608 = vst [vmem:[#allocation39_spill] sm:$0xff] %v8270_v56  ;;  %v8275_v60 = vpop.f32.mrf.mxu3  ;;  %v8277_v61 = vpop.f32.mrf.mxu0 }
  0xf2   : > { %12609 = vst [vmem:[#allocation40_spill] sm:$0xff] %v8275_v60  ;;  %v8282_v2 = vpop.f32.mrf.mxu1 }
  0xf3   : > { %12610 = vst [vmem:[#allocation41_spill] sm:$0xff] %v8277_v61 }
  0xf4   : > { %12611 = vst [vmem:[#allocation42_spill] sm:$0xff] %v8282_v2  ;;  %6265 = vmatmul.msk.bf16.vlgmr.msrb.gmra.mxu0 %vm531_vm0, %v6904_v35  ;;  %6266 = vmatmul.msk.bf16.vlgmr.msrb.gmra.mxu1 %vm531_vm0, %v6904_v35 }
  0xf5   : > { %6267 = vmatmul.msk.bf16.vlgmr.msrb.gmra.mxu2 %vm531_vm0, %v6904_v35  ;;  %1558 = vmatpush.bf16.msrb.mxu0 %v6292_v3  ;;  %v6343_v3 = vld [vmem:[%s8068_s21 + $0x1d8] sm:$0xf] }
  0xf6   : > { %6268 = vmatmul.msk.bf16.vlgmr.msrb.gmra.mxu3 %vm531_vm0, %v6904_v35  ;;  %1572 = vmatpush.bf16.msrb.mxu1 %v6296_v7  ;;  %v6976_v35 = vld [vmem:[%s8068_s21 + $0x1e4] sm:$0xf0]  ;;  %v6336_v7 = vor.u32 %v6977_v58, %v6335_v57  ;;  %v6344_v25 = vor.u32 %v6978_v5, %v6343_v3  ;;  %v6365_v58 = vld [vmem:[%s8068_s21 + $0x220] sm:$0xf0] }
  0xf7   : > { %1586 = vmatpush.bf16.msrb.mxu2 %v6300_v8  ;;  %1600 = vmatpush.bf16.msrb.mxu3 %v6304_v9  ;;  %v6328_v44 = vor.u32 %v6976_v35, %v6327_v30  ;;  %v6974_v8 = vld [vmem:[%s8068_s21 + $0x1dc] sm:$0xf] }
  0xf8   : > { %v8290_v10 = vpop.f32.mrf.mxu2  ;;  %v6345_v9 = vld [vmem:[%s8068_s21 + $0x1f8] sm:$0xf0] }
  0xf9   : > { %12612 = vst [vmem:[#allocation43_spill] sm:$0xff] %v8290_v10  ;;  %v8292_v16 = vpop.f32.mrf.mxu3  ;;  %v8294_v17 = vpop.f32.mrf.mxu0  ;;  %v6348_v26 = vor.u32 %v6974_v8, %v6345_v9  ;;  %v6373_v8 = vld [vmem:[%s8068_s21 + $0x228] sm:$0xf0] }
  0xfa   : > { %12613 = vst [vmem:[#allocation44_spill] sm:$0xff] %v8292_v16  ;;  %v8296_v18 = vpop.f32.mrf.mxu1 }
  0xfb   : > { %12614 = vst [vmem:[#allocation45_spill] sm:$0xff] %v8294_v17 }
  0xfc   : > { %12615 = vst [vmem:[#allocation46_spill] sm:$0xff] %v8296_v18 }
 0x100   : > { %v8298_v22 = vpop.f32.mrf.mxu2 }
 0x101   : > { %12616 = vst [vmem:[#allocation47_spill] sm:$0xff] %v8298_v22  ;;  %v8303_v27 = vpop.f32.mrf.mxu3  ;;  %v8305_v28 = vpop.f32.mrf.mxu0 }
 0x102   : > { %12617 = vst [vmem:[#allocation48_spill] sm:$0xff] %v8303_v27  ;;  %v8310_v37 = vpop.f32.mrf.mxu1 }
 0x103   : > { %12618 = vst [vmem:[#allocation49_spill] sm:$0xff] %v8310_v37 }
 0x104   : > { %6305 = vmatmul.msk.bf16.vlgmr.msra.gmra.mxu0 %vm531_vm0, %v6905_v21  ;;  %6306 = vmatmul.msk.bf16.vlgmr.msra.gmra.mxu1 %vm531_vm0, %v6905_v21 }
 0x105   : > { %6307 = vmatmul.msk.bf16.vlgmr.msra.gmra.mxu2 %vm531_vm0, %v6905_v21  ;;  %1662 = vmatpush.bf16.msra.mxu0 %v6320_v38 }
 0x106   : > { %6308 = vmatmul.msk.bf16.vlgmr.msra.gmra.mxu3 %vm531_vm0, %v6905_v21  ;;  %1676 = vmatpush.bf16.msra.mxu1 %v6324_v43  ;;  %v6983_v43 = vld [vmem:[%s8068_s21 + $0x21c] sm:$0xf0] }
 0x107   : > { %1690 = vmatpush.bf16.msra.mxu2 %v6328_v44  ;;  %1704 = vmatpush.bf16.msra.mxu3 %v6332_v46  ;;  %v6979_v44 = vld [vmem:[%s8068_s21 + $0x204] sm:$0xf] }
 0x108   : > { %v8318_v47 = vpop.f32.mrf.mxu2  ;;  %v6368_v9 = vor.u32 %v6979_v44, %v6365_v58 }
 0x109   : > { %12619 = vst [vmem:[#allocation50_spill] sm:$0xff] %v8318_v47  ;;  %v8320_v48 = vpop.f32.mrf.mxu3  ;;  %v8322_v49 = vpop.f32.mrf.mxu0 }
 0x10a   : > { %12620 = vst [vmem:[#allocation51_spill] sm:$0xff] %v8320_v48  ;;  %v8324_v50 = vpop.f32.mrf.mxu1 }
 0x10b   : > { %12621 = vst [vmem:[#allocation52_spill] sm:$0xff] %v8322_v49 }
 0x10c   : > { %12622 = vst [vmem:[#allocation53_spill] sm:$0xff] %v8324_v50 }
 0x110   : > { %v8326_v51 = vpop.f32.mrf.mxu2 }
 0x111   : > { %12623 = vst [vmem:[#allocation54_spill] sm:$0xff] %v8326_v51  ;;  %v8331_v62 = vpop.f32.mrf.mxu3  ;;  %v8333_v63 = vpop.f32.mrf.mxu0 }
 0x112   : > { %12624 = vst [vmem:[#allocation55_spill] sm:$0xff] %v8331_v62  ;;  %v8338_v6 = vpop.f32.mrf.mxu1 }
 0x113   : > { %12625 = vst [vmem:[#allocation56_spill] sm:$0xff] %v8333_v63 }
 0x114   : > { %12626 = vst [vmem:[#allocation57_spill] sm:$0xff] %v8338_v6  ;;  %6309 = vmatmul.msk.bf16.vlgmr.msrb.gmra.mxu0 %vm531_vm0, %v6905_v21  ;;  %6310 = vmatmul.msk.bf16.vlgmr.msrb.gmra.mxu1 %vm531_vm0, %v6905_v21 }
 0x115   : > { %6311 = vmatmul.msk.bf16.vlgmr.msrb.gmra.mxu2 %vm531_vm0, %v6905_v21  ;;  %1718 = vmatpush.bf16.msrb.mxu0 %v6336_v7  ;;  %v6980_v7 = vld [vmem:[%s8068_s21 + $0x20c] sm:$0xf] }
 0x116   : > { %6312 = vmatmul.msk.bf16.vlgmr.msrb.gmra.mxu3 %vm531_vm0, %v6905_v21  ;;  %1732 = vmatpush.bf16.msrb.mxu1 %v6340_v23  ;;  %v6363_v21 = vld [vmem:[%s8068_s21 + $0x200] sm:$0xf]  ;;  %v6372_v23 = vor.u32 %v6984_v1, %v6371_v59  ;;  %v6379_v59 = vld [vmem:[%s8068_s21 + $0x210] sm:$0xf] }
 0x117   : > { %1746 = vmatpush.bf16.msrb.mxu2 %v6344_v25  ;;  %1760 = vmatpush.bf16.msrb.mxu3 %v6348_v26  ;;  %v6364_v5 = vor.u32 %v6983_v43, %v6363_v21  ;;  %v6376_v25 = vor.u32 %v6980_v7, %v6373_v8  ;;  %v6985_v1 = vld [vmem:[%s8068_s21 + $0x22c] sm:$0xf0]  ;;  %v6981_v7 = vld [vmem:[%s8068_s21 + $0x214] sm:$0xf] }
 0x118   : > { %v8346_v29 = vpop.f32.mrf.mxu2 }
 0x119   : > { %12627 = vst [vmem:[#allocation58_spill] sm:$0xff] %v8346_v29  ;;  %v8348_v30 = vpop.f32.mrf.mxu3  ;;  %v8350_v35 = vpop.f32.mrf.mxu0 }
 0x11a   : > { %12628 = vst [vmem:[#allocation59_spill] sm:$0xff] %v8348_v30  ;;  %v8352_v38 = vpop.f32.mrf.mxu1 }
 0x11b   : > { %12629 = vst [vmem:[#allocation60_spill] sm:$0xff] %v8350_v35 }
 0x11c   : > { %12630 = vst [vmem:[#allocation61_spill] sm:$0xff] %v8352_v38 }
 0x120   : > { %v8354_v42 = vpop.f32.mrf.mxu2 }
 0x121   : > { %12631 = vst [vmem:[#allocation62_spill] sm:$0xff] %v8354_v42  ;;  %v8359_v46 = vpop.f32.mrf.mxu3  ;;  %v8361_v57 = vpop.f32.mrf.mxu0 }
 0x122   : > { %12632 = vst [vmem:[#allocation63_spill] sm:$0xff] %v8359_v46  ;;  %v8366_v3 = vpop.f32.mrf.mxu1 }
 0x123   : > { %12633 = vst [vmem:[#allocation64_spill] sm:$0xff] %v8361_v57  ;;  %v6389_v57 = vld [vmem:[%s8068_s21 + $0x238] sm:$0xf0] }
 0x124   : > { %12634 = vst [vmem:[#allocation65_spill] sm:$0xff] %v8366_v3  ;;  %6349 = vmatmul.msk.bf16.vlgmr.msra.gmra.mxu0 %vm531_vm0, %v6906_v39  ;;  %6350 = vmatmul.msk.bf16.vlgmr.msra.gmra.mxu1 %vm531_vm0, %v6906_v39  ;;  %v6380_v3 = vor.u32 %v6985_v1, %v6379_v59  ;;  %v6907_v1 = vld [vmem:[#allocation5 + $0x40] sm:$0xff] }
 0x125   : > { %6351 = vmatmul.msk.bf16.vlgmr.msra.gmra.mxu2 %vm531_vm0, %v6906_v39  ;;  %1822 = vmatpush.bf16.msra.mxu0 %v6364_v5 }
 0x126   : > { %6352 = vmatmul.msk.bf16.vlgmr.msra.gmra.mxu3 %vm531_vm0, %v6906_v39  ;;  %1836 = vmatpush.bf16.msra.mxu1 %v6368_v9  ;;  %v6381_v9 = vld [vmem:[%s8068_s21 + $0x230] sm:$0xf0] }
 0x127   : > { %1850 = vmatpush.bf16.msra.mxu2 %v6372_v23  ;;  %1864 = vmatpush.bf16.msra.mxu3 %v6376_v25  ;;  %v6387_v23 = vld [vmem:[%s8068_s21 + $0x218] sm:$0xf] }
 0x128   : > { %v8374_v26 = vpop.f32.mrf.mxu2 }
 0x129   : > { %12635 = vst [vmem:[#allocation66_spill] sm:$0xff] %v8374_v26  ;;  %v8376_v21 = vpop.f32.mrf.mxu3  ;;  %v8378_v43 = vpop.f32.mrf.mxu0  ;;  %v6986_v26 = vld [vmem:[%s8068_s21 + $0x234] sm:$0xf0] }
 0x12a   : > { %12636 = vst [vmem:[#allocation67_spill] sm:$0xff] %v8376_v21  ;;  %v8380_v44 = vpop.f32.mrf.mxu1  ;;  %v6982_v21 = vld [vmem:[%s8068_s21 + $0x21c] sm:$0xf]  ;;  %v6388_v46 = vor.u32 %v6986_v26, %v6387_v23  ;;  %v6409_v23 = vld [vmem:[%s8068_s21 + $0x260] sm:$0xf0] }
 0x12b   : > { %12637 = vst [vmem:[#allocation68_spill] sm:$0xff] %v8378_v43  ;;  %v6384_v43 = vor.u32 %v6981_v7, %v6381_v9  ;;  %v6987_v9 = vld [vmem:[%s8068_s21 + $0x244] sm:$0xf] }
 0x12c   : > { %12638 = vst [vmem:[#allocation69_spill] sm:$0xff] %v8380_v44 }
 0x130   : > { %v8382_v58 = vpop.f32.mrf.mxu2 }
 0x131   : > { %12639 = vst [vmem:[#allocation70_spill] sm:$0xff] %v8382_v58  ;;  %v8387_v5 = vpop.f32.mrf.mxu3  ;;  %v8389_v8 = vpop.f32.mrf.mxu0  ;;  %v6392_v58 = vor.u32 %v6982_v21, %v6389_v57 }
 0x132   : > { %12640 = vst [vmem:[#allocation71_spill] sm:$0xff] %v8387_v5  ;;  %v8394_v25 = vpop.f32.mrf.mxu1  ;;  %v6412_v5 = vor.u32 %v6987_v9, %v6409_v23  ;;  %v6423_v9 = vld [vmem:[%s8068_s21 + $0x250] sm:$0xf] }
 0x133   : > { %12641 = vst [vmem:[#allocation72_spill] sm:$0xff] %v8389_v8  ;;  %v6988_v8 = vld [vmem:[%s8068_s21 + $0x24c] sm:$0xf]  ;;  %v6993_v23 = vld [vmem:[%s8068_s21 + $0x26c] sm:$0xf0] }
 0x134   : > { %12642 = vst [vmem:[#allocation73_spill] sm:$0xff] %v8394_v25  ;;  %6353 = vmatmul.msk.bf16.vlgmr.msrb.gmra.mxu0 %vm531_vm0, %v6906_v39  ;;  %6354 = vmatmul.msk.bf16.vlgmr.msrb.gmra.mxu1 %vm531_vm0, %v6906_v39 }
 0x135   : > { %6355 = vmatmul.msk.bf16.vlgmr.msrb.gmra.mxu2 %vm531_vm0, %v6906_v39  ;;  %1878 = vmatpush.bf16.msrb.mxu0 %v6380_v3  ;;  %v6991_v3 = vld [vmem:[%s8068_s21 + $0x25c] sm:$0xf0] }
 0x136   : > { %6356 = vmatmul.msk.bf16.vlgmr.msrb.gmra.mxu3 %vm531_vm0, %v6906_v39  ;;  %1892 = vmatpush.bf16.msrb.mxu1 %v6384_v43  ;;  %v6407_v39 = vld [vmem:[%s8068_s21 + $0x240] sm:$0xf] }
 0x137   : > { %1906 = vmatpush.bf16.msrb.mxu2 %v6388_v46  ;;  %1920 = vmatpush.bf16.msrb.mxu3 %v6392_v58  ;;  %v6415_v58 = vld [vmem:[%s8068_s21 + $0x248] sm:$0xf] }
 0x138   : > { %v8402_v59 = vpop.f32.mrf.mxu2 }
 0x139   : > { %12643 = vst [vmem:[#allocation74_spill] sm:$0xff] %v8402_v59  ;;  %v8404_v26 = vpop.f32.mrf.mxu3  ;;  %v8406_v57 = vpop.f32.mrf.mxu0  ;;  %v6992_v59 = vld [vmem:[%s8068_s21 + $0x264] sm:$0xf0] }
 0x13a   : > { %12644 = vst [vmem:[#allocation75_spill] sm:$0xff] %v8404_v26  ;;  %v8408_v21 = vpop.f32.mrf.mxu1  ;;  %v6408_v26 = vor.u32 %v6991_v3, %v6407_v39 }
 0x13b   : > { %12645 = vst [vmem:[#allocation76_spill] sm:$0xff] %v8406_v57  ;;  %v6417_v57 = vld [vmem:[%s8068_s21 + $0x268] sm:$0xf0] }
 0x13c   : > { %12646 = vst [vmem:[#allocation77_spill] sm:$0xff] %v8408_v21  ;;  %v6416_v21 = vor.u32 %v6992_v59, %v6415_v58  ;;  %v6989_v58 = vld [vmem:[%s8068_s21 + $0x254] sm:$0xf] }
 0x140   : > { %v8410_v7 = vpop.f32.mrf.mxu2 }
 0x141   : > { %12647 = vst [vmem:[#allocation78_spill] sm:$0xff] %v8410_v7  ;;  %v8415_v43 = vpop.f32.mrf.mxu3  ;;  %v8417_v46 = vpop.f32.mrf.mxu0  ;;  %v6420_v7 = vor.u32 %v6988_v8, %v6417_v57 }
 0x142   : > { %12648 = vst [vmem:[#allocation79_spill] sm:$0xff] %v8415_v43  ;;  %v8422_v25 = vpop.f32.mrf.mxu1  ;;  %v6433_v43 = vld [vmem:[%s8068_s21 + $0x278] sm:$0xf0] }
 0x143   : > { %12649 = vst [vmem:[#allocation80_spill] sm:$0xff] %v8417_v46  ;;  %v6424_v46 = vor.u32 %v6993_v23, %v6423_v9 }
 0x144   : > { %12650 = vst [vmem:[#allocation81_spill] sm:$0xff] %v8422_v25  ;;  %6393 = vmatmul.msk.bf16.vlgmr.msra.gmra.mxu0 %vm531_vm0, %v6907_v1  ;;  %6394 = vmatmul.msk.bf16.vlgmr.msra.gmra.mxu1 %vm531_vm0, %v6907_v1  ;;  %v6994_v25 = vld [vmem:[%s8068_s21 + $0x274] sm:$0xf0] }
 0x145   : > { %6395 = vmatmul.msk.bf16.vlgmr.msra.gmra.mxu2 %vm531_vm0, %v6907_v1  ;;  %1982 = vmatpush.bf16.msra.mxu0 %v6408_v26 }
 0x146   : > { %6396 = vmatmul.msk.bf16.vlgmr.msra.gmra.mxu3 %vm531_vm0, %v6907_v1  ;;  %1996 = vmatpush.bf16.msra.mxu1 %v6412_v5 }
 0x147   : > { %2010 = vmatpush.bf16.msra.mxu2 %v6416_v21  ;;  %2024 = vmatpush.bf16.msra.mxu3 %v6420_v7  ;;  %v6425_v21 = vld [vmem:[%s8068_s21 + $0x270] sm:$0xf0] }
 0x148   : > { %v8430_v39 = vpop.f32.mrf.mxu2 }
 0x149   : > { %12651 = vst [vmem:[#allocation82_spill] sm:$0xff] %v8430_v39  ;;  %v8432_v59 = vpop.f32.mrf.mxu3  ;;  %v8434_v8 = vpop.f32.mrf.mxu0  ;;  %v6431_v39 = vld [vmem:[%s8068_s21 + $0x258] sm:$0xf] }
 0x14a   : > { %12652 = vst [vmem:[#allocation83_spill] sm:$0xff] %v8432_v59  ;;  %v8436_v57 = vpop.f32.mrf.mxu1  ;;  %v6990_v59 = vld [vmem:[%s8068_s21 + $0x25c] sm:$0xf]  ;;  %v6432_v44 = vor.u32 %v6994_v25, %v6431_v39 }
 0x14b   : > { %12653 = vst [vmem:[#allocation84_spill] sm:$0xff] %v8434_v8  ;;  %v6428_v8 = vor.u32 %v6989_v58, %v6425_v21  ;;  %v6995_v58 = vld [vmem:[%s8068_s21 + $0x284] sm:$0xf] }
 0x14c   : > { %12654 = vst [vmem:[#allocation85_spill] sm:$0xff] %v8436_v57  ;;  %v6453_v21 = vld [vmem:[%s8068_s21 + $0x2a0] sm:$0xf0] }
 0x150   : > { %v8438_v3 = vpop.f32.mrf.mxu2 }
 0x151   : > { %12655 = vst [vmem:[#allocation86_spill] sm:$0xff] %v8438_v3  ;;  %v8443_v26 = vpop.f32.mrf.mxu3  ;;  %v8445_v5 = vpop.f32.mrf.mxu0  ;;  %v6436_v3 = vor.u32 %v6990_v59, %v6433_v43  ;;  %v6908_v59 = vld [vmem:[#allocation5 + $0x48] sm:$0xff] }
 0x152   : > { %12656 = vst [vmem:[#allocation87_spill] sm:$0xff] %v8443_v26  ;;  %v8450_v7 = vpop.f32.mrf.mxu1  ;;  %v6456_v26 = vor.u32 %v6995_v58, %v6453_v21  ;;  %v6467_v58 = vld [vmem:[%s8068_s21 + $0x290] sm:$0xf] }
 0x153   : > { %12657 = vst [vmem:[#allocation88_spill] sm:$0xff] %v8445_v5  ;;  %v6996_v5 = vld [vmem:[%s8068_s21 + $0x28c] sm:$0xf]  ;;  %v7001_v21 = vld [vmem:[%s8068_s21 + $0x2ac] sm:$0xf0] }
 0x154   : > { %12658 = vst [vmem:[#allocation89_spill] sm:$0xff] %v8450_v7  ;;  %6397 = vmatmul.msk.bf16.vlgmr.msrb.gmra.mxu0 %vm531_vm0, %v6907_v1  ;;  %6398 = vmatmul.msk.bf16.vlgmr.msrb.gmra.mxu1 %vm531_vm0, %v6907_v1 }
 0x155   : > { %6399 = vmatmul.msk.bf16.vlgmr.msrb.gmra.mxu2 %vm531_vm0, %v6907_v1  ;;  %2038 = vmatpush.bf16.msrb.mxu0 %v6424_v46  ;;  %v6999_v46 = vld [vmem:[%s8068_s21 + $0x29c] sm:$0xf0] }
 0x156   : > { %6400 = vmatmul.msk.bf16.vlgmr.msrb.gmra.mxu3 %vm531_vm0, %v6907_v1  ;;  %2052 = vmatpush.bf16.msrb.mxu1 %v6428_v8  ;;  %v6451_v1 = vld [vmem:[%s8068_s21 + $0x280] sm:$0xf] }
 0x157   : > { %2066 = vmatpush.bf16.msrb.mxu2 %v6432_v44  ;;  %2080 = vmatpush.bf16.msrb.mxu3 %v6436_v3  ;;  %v6459_v3 = vld [vmem:[%s8068_s21 + $0x288] sm:$0xf] }
 0x158   : > { %v8458_v9 = vpop.f32.mrf.mxu2 }
 0x159   : > { %12659 = vst [vmem:[#allocation90_spill] sm:$0xff] %v8458_v9  ;;  %v8460_v25 = vpop.f32.mrf.mxu3  ;;  %v8462_v43 = vpop.f32.mrf.mxu0  ;;  %v7000_v9 = vld [vmem:[%s8068_s21 + $0x2a4] sm:$0xf0] }
 0x15a   : > { %12660 = vst [vmem:[#allocation91_spill] sm:$0xff] %v8460_v25  ;;  %v8464_v39 = vpop.f32.mrf.mxu1  ;;  %v6452_v25 = vor.u32 %v6999_v46, %v6451_v1 }
 0x15b   : > { %12661 = vst [vmem:[#allocation92_spill] sm:$0xff] %v8462_v43  ;;  %v6461_v43 = vld [vmem:[%s8068_s21 + $0x2a8] sm:$0xf0] }
 0x15c   : > { %12662 = vst [vmem:[#allocation93_spill] sm:$0xff] %v8464_v39  ;;  %v6460_v39 = vor.u32 %v7000_v9, %v6459_v3  ;;  %v6997_v3 = vld [vmem:[%s8068_s21 + $0x294] sm:$0xf] }
 0x160   : > { %v8466_v23 = vpop.f32.mrf.mxu2 }
 0x161   : > { %12663 = vst [vmem:[#allocation94_spill] sm:$0xff] %v8466_v23  ;;  %v8471_v8 = vpop.f32.mrf.mxu3  ;;  %v8473_v44 = vpop.f32.mrf.mxu0  ;;  %v6464_v23 = vor.u32 %v6996_v5, %v6461_v43 }
 0x162   : > { %12664 = vst [vmem:[#allocation95_spill] sm:$0xff] %v8471_v8  ;;  %v8478_v7 = vpop.f32.mrf.mxu1  ;;  %v6477_v8 = vld [vmem:[%s8068_s21 + $0x2b8] sm:$0xf0] }
 0x163   : > { %12665 = vst [vmem:[#allocation96_spill] sm:$0xff] %v8473_v44  ;;  %v6468_v44 = vor.u32 %v7001_v21, %v6467_v58 }
 0x164   : > { %12666 = vst [vmem:[#allocation97_spill] sm:$0xff] %v8478_v7  ;;  %6437 = vmatmul.msk.bf16.vlgmr.msra.gmra.mxu0 %vm531_vm0, %v6908_v59  ;;  %6438 = vmatmul.msk.bf16.vlgmr.msra.gmra.mxu1 %vm531_vm0, %v6908_v59  ;;  %v7002_v7 = vld [vmem:[%s8068_s21 + $0x2b4] sm:$0xf0] }
 0x165   : > { %6439 = vmatmul.msk.bf16.vlgmr.msra.gmra.mxu2 %vm531_vm0, %v6908_v59  ;;  %2142 = vmatpush.bf16.msra.mxu0 %v6452_v25 }
 0x166   : > { %6440 = vmatmul.msk.bf16.vlgmr.msra.gmra.mxu3 %vm531_vm0, %v6908_v59  ;;  %2156 = vmatpush.bf16.msra.mxu1 %v6456_v26 }
 0x167   : > { %2170 = vmatpush.bf16.msra.mxu2 %v6460_v39  ;;  %2184 = vmatpush.bf16.msra.mxu3 %v6464_v23  ;;  %v6469_v39 = vld [vmem:[%s8068_s21 + $0x2b0] sm:$0xf0] }
 0x168   : > { %v8486_v1 = vpop.f32.mrf.mxu2 }
 0x169   : > { %12667 = vst [vmem:[#allocation98_spill] sm:$0xff] %v8486_v1  ;;  %v8488_v9 = vpop.f32.mrf.mxu3  ;;  %v8490_v5 = vpop.f32.mrf.mxu0  ;;  %v6475_v1 = vld [vmem:[%s8068_s21 + $0x298] sm:$0xf] }
 0x16a   : > { %12668 = vst [vmem:[#allocation99_spill] sm:$0xff] %v8488_v9  ;;  %v8492_v43 = vpop.f32.mrf.mxu1  ;;  %v6998_v9 = vld [vmem:[%s8068_s21 + $0x29c] sm:$0xf]  ;;  %v6476_v57 = vor.u32 %v7002_v7, %v6475_v1 }
 0x16b   : > { %12669 = vst [vmem:[#allocation100_spill] sm:$0xff] %v8490_v5  ;;  %v6472_v5 = vor.u32 %v6997_v3, %v6469_v39  ;;  %v7003_v3 = vld [vmem:[%s8068_s21 + $0x2c4] sm:$0xf] }
 0x16c   : > { %12670 = vst [vmem:[#allocation101_spill] sm:$0xff] %v8492_v43  ;;  %v6497_v39 = vld [vmem:[%s8068_s21 + $0x2e0] sm:$0xf0] }
 0x170   : > { %v8494_v46 = vpop.f32.mrf.mxu2 }
 0x171   : > { %12671 = vst [vmem:[#allocation102_spill] sm:$0xff] %v8494_v46  ;;  %v8499_v25 = vpop.f32.mrf.mxu3  ;;  %v8501_v26 = vpop.f32.mrf.mxu0  ;;  %v6480_v46 = vor.u32 %v6998_v9, %v6477_v8  ;;  %v6909_v9 = vld [vmem:[#allocation5 + $0x50] sm:$0xff] }
 0x172   : > { %12672 = vst [vmem:[#allocation103_spill] sm:$0xff] %v8499_v25  ;;  %v8506_v23 = vpop.f32.mrf.mxu1  ;;  %v6500_v25 = vor.u32 %v7003_v3, %v6497_v39  ;;  %v6511_v3 = vld [vmem:[%s8068_s21 + $0x2d0] sm:$0xf] }
 0x173   : > { %12673 = vst [vmem:[#allocation104_spill] sm:$0xff] %v8501_v26  ;;  %v7004_v26 = vld [vmem:[%s8068_s21 + $0x2cc] sm:$0xf]  ;;  %v7009_v39 = vld [vmem:[%s8068_s21 + $0x2ec] sm:$0xf0] }
 0x174   : > { %12674 = vst [vmem:[#allocation105_spill] sm:$0xff] %v8506_v23  ;;  %6441 = vmatmul.msk.bf16.vlgmr.msrb.gmra.mxu0 %vm531_vm0, %v6908_v59  ;;  %6442 = vmatmul.msk.bf16.vlgmr.msrb.gmra.mxu1 %vm531_vm0, %v6908_v59 }
 0x175   : > { %6443 = vmatmul.msk.bf16.vlgmr.msrb.gmra.mxu2 %vm531_vm0, %v6908_v59  ;;  %2198 = vmatpush.bf16.msrb.mxu0 %v6468_v44  ;;  %v7007_v44 = vld [vmem:[%s8068_s21 + $0x2dc] sm:$0xf0] }
 0x176   : > { %6444 = vmatmul.msk.bf16.vlgmr.msrb.gmra.mxu3 %vm531_vm0, %v6908_v59  ;;  %2212 = vmatpush.bf16.msrb.mxu1 %v6472_v5  ;;  %v6495_v59 = vld [vmem:[%s8068_s21 + $0x2c0] sm:$0xf] }
 0x177   : > { %2226 = vmatpush.bf16.msrb.mxu2 %v6476_v57  ;;  %2240 = vmatpush.bf16.msrb.mxu3 %v6480_v46  ;;  %v6503_v46 = vld [vmem:[%s8068_s21 + $0x2c8] sm:$0xf] }
 0x178   : > { %v8514_v58 = vpop.f32.mrf.mxu2 }
 0x179   : > { %12675 = vst [vmem:[#allocation106_spill] sm:$0xff] %v8514_v58  ;;  %v8516_v7 = vpop.f32.mrf.mxu3  ;;  %v8518_v8 = vpop.f32.mrf.mxu0  ;;  %v7008_v58 = vld [vmem:[%s8068_s21 + $0x2e4] sm:$0xf0] }
 0x17a   : > { %12676 = vst [vmem:[#allocation107_spill] sm:$0xff] %v8516_v7  ;;  %v8520_v1 = vpop.f32.mrf.mxu1  ;;  %v6496_v7 = vor.u32 %v7007_v44, %v6495_v59 }
 0x17b   : > { %12677 = vst [vmem:[#allocation108_spill] sm:$0xff] %v8518_v8  ;;  %v6505_v8 = vld [vmem:[%s8068_s21 + $0x2e8] sm:$0xf0] }
 0x17c   : > { %12678 = vst [vmem:[#allocation109_spill] sm:$0xff] %v8520_v1  ;;  %v6504_v1 = vor.u32 %v7008_v58, %v6503_v46  ;;  %v7005_v46 = vld [vmem:[%s8068_s21 + $0x2d4] sm:$0xf] }
 0x180   : > { %v8522_v21 = vpop.f32.mrf.mxu2 }
 0x181   : > { %12679 = vst [vmem:[#allocation110_spill] sm:$0xff] %v8522_v21  ;;  %v8527_v5 = vpop.f32.mrf.mxu3  ;;  %v8529_v57 = vpop.f32.mrf.mxu0  ;;  %v6508_v21 = vor.u32 %v7004_v26, %v6505_v8 }
 0x182   : > { %12680 = vst [vmem:[#allocation111_spill] sm:$0xff] %v8527_v5  ;;  %v8534_v23 = vpop.f32.mrf.mxu1  ;;  %v6521_v5 = vld [vmem:[%s8068_s21 + $0x2f8] sm:$0xf0] }
 0x183   : > { %12681 = vst [vmem:[#allocation112_spill] sm:$0xff] %v8529_v57  ;;  %v6512_v57 = vor.u32 %v7009_v39, %v6511_v3 }
 0x184   : > { %12682 = vst [vmem:[#allocation113_spill] sm:$0xff] %v8534_v23  ;;  %6481 = vmatmul.msk.bf16.vlgmr.msra.gmra.mxu0 %vm531_vm0, %v6909_v9  ;;  %6482 = vmatmul.msk.bf16.vlgmr.msra.gmra.mxu1 %vm531_vm0, %v6909_v9  ;;  %v7010_v23 = vld [vmem:[%s8068_s21 + $0x2f4] sm:$0xf0] }
 0x185   : > { %6483 = vmatmul.msk.bf16.vlgmr.msra.gmra.mxu2 %vm531_vm0, %v6909_v9  ;;  %2302 = vmatpush.bf16.msra.mxu0 %v6496_v7 }
 0x186   : > { %6484 = vmatmul.msk.bf16.vlgmr.msra.gmra.mxu3 %vm531_vm0, %v6909_v9  ;;  %2316 = vmatpush.bf16.msra.mxu1 %v6500_v25 }
 0x187   : > { %2330 = vmatpush.bf16.msra.mxu2 %v6504_v1  ;;  %2344 = vmatpush.bf16.msra.mxu3 %v6508_v21  ;;  %v6513_v1 = vld [vmem:[%s8068_s21 + $0x2f0] sm:$0xf0] }
 0x188   : > { %v8542_v59 = vpop.f32.mrf.mxu2 }
 0x189   : > { %12683 = vst [vmem:[#allocation114_spill] sm:$0xff] %v8542_v59  ;;  %v8544_v58 = vpop.f32.mrf.mxu3  ;;  %v8546_v26 = vpop.f32.mrf.mxu0  ;;  %v6519_v59 = vld [vmem:[%s8068_s21 + $0x2d8] sm:$0xf] }
 0x18a   : > { %12684 = vst [vmem:[#allocation115_spill] sm:$0xff] %v8544_v58  ;;  %v8548_v8 = vpop.f32.mrf.mxu1  ;;  %v7006_v58 = vld [vmem:[%s8068_s21 + $0x2dc] sm:$0xf]  ;;  %v6520_v43 = vor.u32 %v7010_v23, %v6519_v59 }
 0x18b   : > { %12685 = vst [vmem:[#allocation116_spill] sm:$0xff] %v8546_v26  ;;  %v6516_v26 = vor.u32 %v7005_v46, %v6513_v1  ;;  %v7011_v46 = vld [vmem:[%s8068_s21 + $0x304] sm:$0xf] }
 0x18c   : > { %12686 = vst [vmem:[#allocation117_spill] sm:$0xff] %v8548_v8  ;;  %v6541_v1 = vld [vmem:[%s8068_s21 + $0x320] sm:$0xf0] }
 0x190   : > { %v8550_v44 = vpop.f32.mrf.mxu2 }
 0x191   : > { %12687 = vst [vmem:[#allocation118_spill] sm:$0xff] %v8550_v44  ;;  %v8555_v7 = vpop.f32.mrf.mxu3  ;;  %v8557_v25 = vpop.f32.mrf.mxu0  ;;  %v6524_v44 = vor.u32 %v7006_v58, %v6521_v5  ;;  %v6910_v58 = vld [vmem:[#allocation5 + $0x58] sm:$0xff] }
 0x192   : > { %12688 = vst [vmem:[#allocation119_spill] sm:$0xff] %v8555_v7  ;;  %v8562_v21 = vpop.f32.mrf.mxu1  ;;  %v6544_v7 = vor.u32 %v7011_v46, %v6541_v1  ;;  %v6555_v46 = vld [vmem:[%s8068_s21 + $0x310] sm:$0xf] }
 0x193   : > { %12689 = vst [vmem:[#allocation120_spill] sm:$0xff] %v8557_v25  ;;  %v7012_v25 = vld [vmem:[%s8068_s21 + $0x30c] sm:$0xf]  ;;  %v7017_v1 = vld [vmem:[%s8068_s21 + $0x32c] sm:$0xf0] }
 0x194   : > { %12690 = vst [vmem:[#allocation121_spill] sm:$0xff] %v8562_v21  ;;  %6485 = vmatmul.msk.bf16.vlgmr.msrb.gmra.mxu0 %vm531_vm0, %v6909_v9  ;;  %6486 = vmatmul.msk.bf16.vlgmr.msrb.gmra.mxu1 %vm531_vm0, %v6909_v9 }
 0x195   : > { %6487 = vmatmul.msk.bf16.vlgmr.msrb.gmra.mxu2 %vm531_vm0, %v6909_v9  ;;  %2358 = vmatpush.bf16.msrb.mxu0 %v6512_v57  ;;  %v7015_v57 = vld [vmem:[%s8068_s21 + $0x31c] sm:$0xf0] }
 0x196   : > { %6488 = vmatmul.msk.bf16.vlgmr.msrb.gmra.mxu3 %vm531_vm0, %v6909_v9  ;;  %2372 = vmatpush.bf16.msrb.mxu1 %v6516_v26  ;;  %v6539_v9 = vld [vmem:[%s8068_s21 + $0x300] sm:$0xf] }
 0x197   : > { %2386 = vmatpush.bf16.msrb.mxu2 %v6520_v43  ;;  %2400 = vmatpush.bf16.msrb.mxu3 %v6524_v44  ;;  %v6547_v44 = vld [vmem:[%s8068_s21 + $0x308] sm:$0xf] }
 0x198   : > { %v8570_v3 = vpop.f32.mrf.mxu2 }
 0x199   : > { %12691 = vst [vmem:[#allocation122_spill] sm:$0xff] %v8570_v3  ;;  %v8572_v23 = vpop.f32.mrf.mxu3  ;;  %v8574_v5 = vpop.f32.mrf.mxu0  ;;  %v7016_v3 = vld [vmem:[%s8068_s21 + $0x324] sm:$0xf0] }
 0x19a   : > { %12692 = vst [vmem:[#allocation123_spill] sm:$0xff] %v8572_v23  ;;  %v8576_v59 = vpop.f32.mrf.mxu1  ;;  %v6540_v23 = vor.u32 %v7015_v57, %v6539_v9 }
 0x19b   : > { %12693 = vst [vmem:[#allocation124_spill] sm:$0xff] %v8574_v5  ;;  %v6549_v5 = vld [vmem:[%s8068_s21 + $0x328] sm:$0xf0] }
 0x19c   : > { %12694 = vst [vmem:[#allocation125_spill] sm:$0xff] %v8576_v59  ;;  %v6548_v59 = vor.u32 %v7016_v3, %v6547_v44  ;;  %v7013_v44 = vld [vmem:[%s8068_s21 + $0x314] sm:$0xf] }
 0x1a0   : > { %v8578_v39 = vpop.f32.mrf.mxu2 }
 0x1a1   : > { %12695 = vst [vmem:[#allocation126_spill] sm:$0xff] %v8578_v39  ;;  %v8583_v26 = vpop.f32.mrf.mxu3  ;;  %v8585_v43 = vpop.f32.mrf.mxu0  ;;  %v6552_v39 = vor.u32 %v7012_v25, %v6549_v5 }
 0x1a2   : > { %12696 = vst [vmem:[#allocation127_spill] sm:$0xff] %v8583_v26  ;;  %v8590_v21 = vpop.f32.mrf.mxu1  ;;  %v6565_v26 = vld [vmem:[%s8068_s21 + $0x338] sm:$0xf0] }
 0x1a3   : > { %12697 = vst [vmem:[#allocation128_spill] sm:$0xff] %v8585_v43  ;;  %v6556_v43 = vor.u32 %v7017_v1, %v6555_v46 }
 0x1a4   : > { %12698 = vst [vmem:[#allocation129_spill] sm:$0xff] %v8590_v21  ;;  %6525 = vmatmul.msk.bf16.vlgmr.msra.gmra.mxu0 %vm531_vm0, %v6910_v58  ;;  %6526 = vmatmul.msk.bf16.vlgmr.msra.gmra.mxu1 %vm531_vm0, %v6910_v58  ;;  %v7018_v21 = vld [vmem:[%s8068_s21 + $0x334] sm:$0xf0] }
 0x1a5   : > { %6527 = vmatmul.msk.bf16.vlgmr.msra.gmra.mxu2 %vm531_vm0, %v6910_v58  ;;  %2462 = vmatpush.bf16.msra.mxu0 %v6540_v23 }
 0x1a6   : > { %6528 = vmatmul.msk.bf16.vlgmr.msra.gmra.mxu3 %vm531_vm0, %v6910_v58  ;;  %2476 = vmatpush.bf16.msra.mxu1 %v6544_v7 }
 0x1a7   : > { %2490 = vmatpush.bf16.msra.mxu2 %v6548_v59  ;;  %2504 = vmatpush.bf16.msra.mxu3 %v6552_v39  ;;  %v6557_v59 = vld [vmem:[%s8068_s21 + $0x330] sm:$0xf0] }
 0x1a8   : > { %v8598_v9 = vpop.f32.mrf.mxu2 }
 0x1a9   : > { %12699 = vst [vmem:[#allocation130_spill] sm:$0xff] %v8598_v9  ;;  %v8600_v3 = vpop.f32.mrf.mxu3  ;;  %v8602_v25 = vpop.f32.mrf.mxu0  ;;  %v6563_v9 = vld [vmem:[%s8068_s21 + $0x318] sm:$0xf] }
 0x1aa   : > { %12700 = vst [vmem:[#allocation131_spill] sm:$0xff] %v8600_v3  ;;  %v8604_v5 = vpop.f32.mrf.mxu1  ;;  %v7014_v3 = vld [vmem:[%s8068_s21 + $0x31c] sm:$0xf]  ;;  %v6564_v8 = vor.u32 %v7018_v21, %v6563_v9 }
 0x1ab   : > { %12701 = vst [vmem:[#allocation132_spill] sm:$0xff] %v8602_v25  ;;  %v6560_v25 = vor.u32 %v7013_v44, %v6557_v59  ;;  %v7019_v44 = vld [vmem:[%s8068_s21 + $0x344] sm:$0xf] }
 0x1ac   : > { %12702 = vst [vmem:[#allocation133_spill] sm:$0xff] %v8604_v5  ;;  %v6585_v59 = vld [vmem:[%s8068_s21 + $0x360] sm:$0xf0] }
 0x1b0   : > { %v8606_v57 = vpop.f32.mrf.mxu2 }
 0x1b1   : > { %12703 = vst [vmem:[#allocation134_spill] sm:$0xff] %v8606_v57  ;;  %v8611_v23 = vpop.f32.mrf.mxu3  ;;  %v8613_v7 = vpop.f32.mrf.mxu0  ;;  %v6568_v57 = vor.u32 %v7014_v3, %v6565_v26  ;;  %v6911_v3 = vld [vmem:[#allocation5 + $0x60] sm:$0xff] }
 0x1b2   : > { %12704 = vst [vmem:[#allocation135_spill] sm:$0xff] %v8611_v23  ;;  %v8618_v39 = vpop.f32.mrf.mxu1  ;;  %v6588_v23 = vor.u32 %v7019_v44, %v6585_v59  ;;  %v6599_v44 = vld [vmem:[%s8068_s21 + $0x350] sm:$0xf] }
 0x1b3   : > { %12705 = vst [vmem:[#allocation136_spill] sm:$0xff] %v8613_v7  ;;  %v7020_v7 = vld [vmem:[%s8068_s21 + $0x34c] sm:$0xf]  ;;  %v7025_v59 = vld [vmem:[%s8068_s21 + $0x36c] sm:$0xf0] }
 0x1b4   : > { %12706 = vst [vmem:[#allocation137_spill] sm:$0xff] %v8618_v39  ;;  %6529 = vmatmul.msk.bf16.vlgmr.msrb.gmra.mxu0 %vm531_vm0, %v6910_v58  ;;  %6530 = vmatmul.msk.bf16.vlgmr.msrb.gmra.mxu1 %vm531_vm0, %v6910_v58 }
 0x1b5   : > { %6531 = vmatmul.msk.bf16.vlgmr.msrb.gmra.mxu2 %vm531_vm0, %v6910_v58  ;;  %2518 = vmatpush.bf16.msrb.mxu0 %v6556_v43  ;;  %v7023_v43 = vld [vmem:[%s8068_s21 + $0x35c] sm:$0xf0] }
 0x1b6   : > { %6532 = vmatmul.msk.bf16.vlgmr.msrb.gmra.mxu3 %vm531_vm0, %v6910_v58  ;;  %2532 = vmatpush.bf16.msrb.mxu1 %v6560_v25  ;;  %v6583_v58 = vld [vmem:[%s8068_s21 + $0x340] sm:$0xf] }
 0x1b7   : > { %2546 = vmatpush.bf16.msrb.mxu2 %v6564_v8  ;;  %2560 = vmatpush.bf16.msrb.mxu3 %v6568_v57  ;;  %v6591_v57 = vld [vmem:[%s8068_s21 + $0x348] sm:$0xf] }
 0x1b8   : > { %v8626_v46 = vpop.f32.mrf.mxu2 }
 0x1b9   : > { %12707 = vst [vmem:[#allocation138_spill] sm:$0xff] %v8626_v46  ;;  %v8628_v21 = vpop.f32.mrf.mxu3  ;;  %v8630_v26 = vpop.f32.mrf.mxu0  ;;  %v7024_v46 = vld [vmem:[%s8068_s21 + $0x364] sm:$0xf0] }
 0x1ba   : > { %12708 = vst [vmem:[#allocation139_spill] sm:$0xff] %v8628_v21  ;;  %v8632_v9 = vpop.f32.mrf.mxu1  ;;  %v6584_v21 = vor.u32 %v7023_v43, %v6583_v58 }
 0x1bb   : > { %12709 = vst [vmem:[#allocation140_spill] sm:$0xff] %v8630_v26  ;;  %v6593_v26 = vld [vmem:[%s8068_s21 + $0x368] sm:$0xf0] }
 0x1bc   : > { %12710 = vst [vmem:[#allocation141_spill] sm:$0xff] %v8632_v9  ;;  %v6592_v9 = vor.u32 %v7024_v46, %v6591_v57  ;;  %v7021_v57 = vld [vmem:[%s8068_s21 + $0x354] sm:$0xf] }
 0x1c0   : > { %v8634_v1 = vpop.f32.mrf.mxu2 }
 0x1c1   : > { %12711 = vst [vmem:[#allocation142_spill] sm:$0xff] %v8634_v1  ;;  %v8639_v25 = vpop.f32.mrf.mxu3  ;;  %v8641_v8 = vpop.f32.mrf.mxu0  ;;  %v6596_v1 = vor.u32 %v7020_v7, %v6593_v26 }
 0x1c2   : > { %12712 = vst [vmem:[#allocation143_spill] sm:$0xff] %v8639_v25  ;;  %v8646_v39 = vpop.f32.mrf.mxu1  ;;  %v6609_v25 = vld [vmem:[%s8068_s21 + $0x378] sm:$0xf0] }
 0x1c3   : > { %12713 = vst [vmem:[#allocation144_spill] sm:$0xff] %v8641_v8  ;;  %v6600_v8 = vor.u32 %v7025_v59, %v6599_v44 }
 0x1c4   : > { %12714 = vst [vmem:[#allocation145_spill] sm:$0xff] %v8646_v39  ;;  %6569 = vmatmul.msk.bf16.vlgmr.msra.gmra.mxu0 %vm531_vm0, %v6911_v3  ;;  %6570 = vmatmul.msk.bf16.vlgmr.msra.gmra.mxu1 %vm531_vm0, %v6911_v3  ;;  %v7026_v39 = vld [vmem:[%s8068_s21 + $0x374] sm:$0xf0] }
 0x1c5   : > { %6571 = vmatmul.msk.bf16.vlgmr.msra.gmra.mxu2 %vm531_vm0, %v6911_v3  ;;  %2622 = vmatpush.bf16.msra.mxu0 %v6584_v21 }
 0x1c6   : > { %6572 = vmatmul.msk.bf16.vlgmr.msra.gmra.mxu3 %vm531_vm0, %v6911_v3  ;;  %2636 = vmatpush.bf16.msra.mxu1 %v6588_v23 }
 0x1c7   : > { %2650 = vmatpush.bf16.msra.mxu2 %v6592_v9  ;;  %2664 = vmatpush.bf16.msra.mxu3 %v6596_v1  ;;  %v6601_v9 = vld [vmem:[%s8068_s21 + $0x370] sm:$0xf0] }
 0x1c8   : > { %v8654_v58 = vpop.f32.mrf.mxu2 }
 0x1c9   : > { %12715 = vst [vmem:[#allocation146_spill] sm:$0xff] %v8654_v58  ;;  %v8656_v46 = vpop.f32.mrf.mxu3  ;;  %v8658_v7 = vpop.f32.mrf.mxu0  ;;  %v6607_v58 = vld [vmem:[%s8068_s21 + $0x358] sm:$0xf] }
 0x1ca   : > { %12716 = vst [vmem:[#allocation147_spill] sm:$0xff] %v8656_v46  ;;  %v8660_v26 = vpop.f32.mrf.mxu1  ;;  %v7022_v46 = vld [vmem:[%s8068_s21 + $0x35c] sm:$0xf]  ;;  %v6608_v5 = vor.u32 %v7026_v39, %v6607_v58 }
 0x1cb   : > { %12717 = vst [vmem:[#allocation148_spill] sm:$0xff] %v8658_v7  ;;  %v6604_v7 = vor.u32 %v7021_v57, %v6601_v9  ;;  %v7027_v57 = vld [vmem:[%s8068_s21 + $0x384] sm:$0xf] }
 0x1cc   : > { %12718 = vst [vmem:[#allocation149_spill] sm:$0xff] %v8660_v26  ;;  %v6629_v9 = vld [vmem:[%s8068_s21 + $0x3a0] sm:$0xf0] }
 0x1d0   : > { %v8662_v43 = vpop.f32.mrf.mxu2 }
 0x1d1   : > { %12719 = vst [vmem:[#allocation150_spill] sm:$0xff] %v8662_v43  ;;  %v8667_v21 = vpop.f32.mrf.mxu3  ;;  %v8669_v23 = vpop.f32.mrf.mxu0  ;;  %v6612_v43 = vor.u32 %v7022_v46, %v6609_v25  ;;  %v6912_v46 = vld [vmem:[#allocation5 + $0x68] sm:$0xff] }
 0x1d2   : > { %12720 = vst [vmem:[#allocation151_spill] sm:$0xff] %v8667_v21  ;;  %v8674_v1 = vpop.f32.mrf.mxu1  ;;  %v6632_v21 = vor.u32 %v7027_v57, %v6629_v9  ;;  %v6643_v57 = vld [vmem:[%s8068_s21 + $0x390] sm:$0xf] }
 0x1d3   : > { %12721 = vst [vmem:[#allocation152_spill] sm:$0xff] %v8669_v23  ;;  %v7028_v23 = vld [vmem:[%s8068_s21 + $0x38c] sm:$0xf]  ;;  %v7033_v9 = vld [vmem:[%s8068_s21 + $0x3ac] sm:$0xf0] }
 0x1d4   : > { %12722 = vst [vmem:[#allocation153_spill] sm:$0xff] %v8674_v1  ;;  %6573 = vmatmul.msk.bf16.vlgmr.msrb.gmra.mxu0 %vm531_vm0, %v6911_v3  ;;  %6574 = vmatmul.msk.bf16.vlgmr.msrb.gmra.mxu1 %vm531_vm0, %v6911_v3 }
 0x1d5   : > { %6575 = vmatmul.msk.bf16.vlgmr.msrb.gmra.mxu2 %vm531_vm0, %v6911_v3  ;;  %2678 = vmatpush.bf16.msrb.mxu0 %v6600_v8  ;;  %v7031_v8 = vld [vmem:[%s8068_s21 + $0x39c] sm:$0xf0] }
 0x1d6   : > { %6576 = vmatmul.msk.bf16.vlgmr.msrb.gmra.mxu3 %vm531_vm0, %v6911_v3  ;;  %2692 = vmatpush.bf16.msrb.mxu1 %v6604_v7  ;;  %v6627_v3 = vld [vmem:[%s8068_s21 + $0x380] sm:$0xf] }
 0x1d7   : > { %2706 = vmatpush.bf16.msrb.mxu2 %v6608_v5  ;;  %2720 = vmatpush.bf16.msrb.mxu3 %v6612_v43  ;;  %v6635_v43 = vld [vmem:[%s8068_s21 + $0x388] sm:$0xf] }
 0x1d8   : > { %v8682_v44 = vpop.f32.mrf.mxu2 }
 0x1d9   : > { %12723 = vst [vmem:[#allocation154_spill] sm:$0xff] %v8682_v44  ;;  %v8684_v39 = vpop.f32.mrf.mxu3  ;;  %v8686_v25 = vpop.f32.mrf.mxu0  ;;  %v7032_v44 = vld [vmem:[%s8068_s21 + $0x3a4] sm:$0xf0] }
 0x1da   : > { %12724 = vst [vmem:[#allocation155_spill] sm:$0xff] %v8684_v39  ;;  %v8688_v58 = vpop.f32.mrf.mxu1  ;;  %v6628_v39 = vor.u32 %v7031_v8, %v6627_v3 }
 0x1db   : > { %12725 = vst [vmem:[#allocation156_spill] sm:$0xff] %v8686_v25  ;;  %v6637_v25 = vld [vmem:[%s8068_s21 + $0x3a8] sm:$0xf0] }
 0x1dc   : > { %12726 = vst [vmem:[#allocation157_spill] sm:$0xff] %v8688_v58  ;;  %v6636_v58 = vor.u32 %v7032_v44, %v6635_v43  ;;  %v7029_v43 = vld [vmem:[%s8068_s21 + $0x394] sm:$0xf] }
 0x1e0   : > { %v8690_v59 = vpop.f32.mrf.mxu2 }
 0x1e1   : > { %12727 = vst [vmem:[#allocation158_spill] sm:$0xff] %v8690_v59  ;;  %v8695_v7 = vpop.f32.mrf.mxu3  ;;  %v8697_v5 = vpop.f32.mrf.mxu0  ;;  %v6640_v59 = vor.u32 %v7028_v23, %v6637_v25 }
 0x1e2   : > { %12728 = vst [vmem:[#allocation159_spill] sm:$0xff] %v8695_v7  ;;  %v8702_v1 = vpop.f32.mrf.mxu1  ;;  %v6653_v7 = vld [vmem:[%s8068_s21 + $0x3b8] sm:$0xf0] }
 0x1e3   : > { %12729 = vst [vmem:[#allocation160_spill] sm:$0xff] %v8697_v5  ;;  %v6644_v5 = vor.u32 %v7033_v9, %v6643_v57 }
 0x1e4   : > { %12730 = vst [vmem:[#allocation161_spill] sm:$0xff] %v8702_v1  ;;  %6613 = vmatmul.msk.bf16.vlgmr.msra.gmra.mxu0 %vm531_vm0, %v6912_v46  ;;  %6614 = vmatmul.msk.bf16.vlgmr.msra.gmra.mxu1 %vm531_vm0, %v6912_v46  ;;  %v7034_v1 = vld [vmem:[%s8068_s21 + $0x3b4] sm:$0xf0] }
 0x1e5   : > { %6615 = vmatmul.msk.bf16.vlgmr.msra.gmra.mxu2 %vm531_vm0, %v6912_v46  ;;  %2782 = vmatpush.bf16.msra.mxu0 %v6628_v39 }
 0x1e6   : > { %6616 = vmatmul.msk.bf16.vlgmr.msra.gmra.mxu3 %vm531_vm0, %v6912_v46  ;;  %2796 = vmatpush.bf16.msra.mxu1 %v6632_v21 }
 0x1e7   : > { %2810 = vmatpush.bf16.msra.mxu2 %v6636_v58  ;;  %2824 = vmatpush.bf16.msra.mxu3 %v6640_v59  ;;  %v6645_v58 = vld [vmem:[%s8068_s21 + $0x3b0] sm:$0xf0] }
 0x1e8   : > { %v8710_v3 = vpop.f32.mrf.mxu2 }
 0x1e9   : > { %12731 = vst [vmem:[#allocation162_spill] sm:$0xff] %v8710_v3  ;;  %v8712_v44 = vpop.f32.mrf.mxu3  ;;  %v8714_v23 = vpop.f32.mrf.mxu0  ;;  %v6651_v3 = vld [vmem:[%s8068_s21 + $0x398] sm:$0xf] }
 0x1ea   : > { %12732 = vst [vmem:[#allocation163_spill] sm:$0xff] %v8712_v44  ;;  %v8716_v25 = vpop.f32.mrf.mxu1  ;;  %v7030_v44 = vld [vmem:[%s8068_s21 + $0x39c] sm:$0xf]  ;;  %v6652_v26 = vor.u32 %v7034_v1, %v6651_v3 }
 0x1eb   : > { %12733 = vst [vmem:[#allocation164_spill] sm:$0xff] %v8714_v23  ;;  %v6648_v23 = vor.u32 %v7029_v43, %v6645_v58  ;;  %v7035_v43 = vld [vmem:[%s8068_s21 + $0x3c4] sm:$0xf] }
 0x1ec   : > { %12734 = vst [vmem:[#allocation165_spill] sm:$0xff] %v8716_v25  ;;  %v6673_v58 = vld [vmem:[%s8068_s21 + $0x3e0] sm:$0xf0] }
 0x1f0   : > { %v8718_v8 = vpop.f32.mrf.mxu2 }
 0x1f1   : > { %12735 = vst [vmem:[#allocation166_spill] sm:$0xff] %v8718_v8  ;;  %v8723_v39 = vpop.f32.mrf.mxu3  ;;  %v8725_v21 = vpop.f32.mrf.mxu0  ;;  %v6656_v8 = vor.u32 %v7030_v44, %v6653_v7  ;;  %v6913_v44 = vld [vmem:[#allocation5 + $0x70] sm:$0xff] }
 0x1f2   : > { %12736 = vst [vmem:[#allocation167_spill] sm:$0xff] %v8723_v39  ;;  %v8730_v59 = vpop.f32.mrf.mxu1  ;;  %v6676_v39 = vor.u32 %v7035_v43, %v6673_v58  ;;  %v6687_v43 = vld [vmem:[%s8068_s21 + $0x3d0] sm:$0xf] }
 0x1f3   : > { %12737 = vst [vmem:[#allocation168_spill] sm:$0xff] %v8725_v21  ;;  %v7036_v21 = vld [vmem:[%s8068_s21 + $0x3cc] sm:$0xf]  ;;  %v7041_v58 = vld [vmem:[%s8068_s21 + $0x3ec] sm:$0xf0] }
 0x1f4   : > { %12738 = vst [vmem:[#allocation169_spill] sm:$0xff] %v8730_v59  ;;  %6617 = vmatmul.msk.bf16.vlgmr.msrb.gmra.mxu0 %vm531_vm0, %v6912_v46  ;;  %6618 = vmatmul.msk.bf16.vlgmr.msrb.gmra.mxu1 %vm531_vm0, %v6912_v46 }
 0x1f5   : > { %6619 = vmatmul.msk.bf16.vlgmr.msrb.gmra.mxu2 %vm531_vm0, %v6912_v46  ;;  %2838 = vmatpush.bf16.msrb.mxu0 %v6644_v5  ;;  %v7039_v5 = vld [vmem:[%s8068_s21 + $0x3dc] sm:$0xf0] }
 0x1f6   : > { %6620 = vmatmul.msk.bf16.vlgmr.msrb.gmra.mxu3 %vm531_vm0, %v6912_v46  ;;  %2852 = vmatpush.bf16.msrb.mxu1 %v6648_v23  ;;  %v6671_v46 = vld [vmem:[%s8068_s21 + $0x3c0] sm:$0xf] }
 0x1f7   : > { %2866 = vmatpush.bf16.msrb.mxu2 %v6652_v26  ;;  %2880 = vmatpush.bf16.msrb.mxu3 %v6656_v8  ;;  %v6679_v8 = vld [vmem:[%s8068_s21 + $0x3c8] sm:$0xf] }
 0x1f8   : > { %v8738_v57 = vpop.f32.mrf.mxu2 }
 0x1f9   : > { %12739 = vst [vmem:[#allocation170_spill] sm:$0xff] %v8738_v57  ;;  %v8740_v1 = vpop.f32.mrf.mxu3  ;;  %v8742_v7 = vpop.f32.mrf.mxu0  ;;  %v7040_v57 = vld [vmem:[%s8068_s21 + $0x3e4] sm:$0xf0] }
 0x1fa   : > { %12740 = vst [vmem:[#allocation171_spill] sm:$0xff] %v8740_v1  ;;  %v8744_v3 = vpop.f32.mrf.mxu1  ;;  %v6672_v1 = vor.u32 %v7039_v5, %v6671_v46 }
 0x1fb   : > { %12741 = vst [vmem:[#allocation172_spill] sm:$0xff] %v8742_v7  ;;  %v6681_v7 = vld [vmem:[%s8068_s21 + $0x3e8] sm:$0xf0] }
 0x1fc   : > { %12742 = vst [vmem:[#allocation173_spill] sm:$0xff] %v8744_v3  ;;  %v6680_v3 = vor.u32 %v7040_v57, %v6679_v8  ;;  %v7037_v8 = vld [vmem:[%s8068_s21 + $0x3d4] sm:$0xf] }
 0x200   : > { %v8746_v9 = vpop.f32.mrf.mxu2 }
 0x201   : > { %12743 = vst [vmem:[#allocation174_spill] sm:$0xff] %v8746_v9  ;;  %v8751_v23 = vpop.f32.mrf.mxu3  ;;  %v8753_v26 = vpop.f32.mrf.mxu0  ;;  %v6684_v9 = vor.u32 %v7036_v21, %v6681_v7 }
 0x202   : > { %12744 = vst [vmem:[#allocation175_spill] sm:$0xff] %v8751_v23  ;;  %v8758_v59 = vpop.f32.mrf.mxu1  ;;  %v6697_v23 = vld [vmem:[%s8068_s21 + $0x3f8] sm:$0xf0] }
 0x203   : > { %12745 = vst [vmem:[#allocation176_spill] sm:$0xff] %v8753_v26  ;;  %v6688_v26 = vor.u32 %v7041_v58, %v6687_v43 }
 0x204   : > { %12746 = vst [vmem:[#allocation177_spill] sm:$0xff] %v8758_v59  ;;  %6657 = vmatmul.msk.bf16.vlgmr.msra.gmra.mxu0 %vm531_vm0, %v6913_v44  ;;  %6658 = vmatmul.msk.bf16.vlgmr.msra.gmra.mxu1 %vm531_vm0, %v6913_v44  ;;  %v7042_v59 = vld [vmem:[%s8068_s21 + $0x3f4] sm:$0xf0] }
 0x205   : > { %6659 = vmatmul.msk.bf16.vlgmr.msra.gmra.mxu2 %vm531_vm0, %v6913_v44  ;;  %2942 = vmatpush.bf16.msra.mxu0 %v6672_v1 }
 0x206   : > { %6660 = vmatmul.msk.bf16.vlgmr.msra.gmra.mxu3 %vm531_vm0, %v6913_v44  ;;  %2956 = vmatpush.bf16.msra.mxu1 %v6676_v39 }
 0x207   : > { %2970 = vmatpush.bf16.msra.mxu2 %v6680_v3  ;;  %2984 = vmatpush.bf16.msra.mxu3 %v6684_v9  ;;  %v6689_v3 = vld [vmem:[%s8068_s21 + $0x3f0] sm:$0xf0] }
 0x208   : > { %v8766_v46 = vpop.f32.mrf.mxu2 }
 0x209   : > { %12747 = vst [vmem:[#allocation178_spill] sm:$0xff] %v8766_v46  ;;  %v8768_v57 = vpop.f32.mrf.mxu3  ;;  %v8770_v21 = vpop.f32.mrf.mxu0  ;;  %v6695_v46 = vld [vmem:[%s8068_s21 + $0x3d8] sm:$0xf] }
 0x20a   : > { %12748 = vst [vmem:[#allocation179_spill] sm:$0xff] %v8768_v57  ;;  %v8772_v7 = vpop.f32.mrf.mxu1  ;;  %v7038_v57 = vld [vmem:[%s8068_s21 + $0x3dc] sm:$0xf]  ;;  %v6696_v25 = vor.u32 %v7042_v59, %v6695_v46 }
 0x20b   : > { %12749 = vst [vmem:[#allocation180_spill] sm:$0xff] %v8770_v21  ;;  %v6692_v21 = vor.u32 %v7037_v8, %v6689_v3 }
 0x20c   : > { %12750 = vst [vmem:[#allocation181_spill] sm:$0xff] %v8772_v7 }
 0x210   : > { %v8774_v5 = vpop.f32.mrf.mxu2 }
 0x211   : > { %12751 = vst [vmem:[#allocation182_spill] sm:$0xff] %v8774_v5  ;;  %v8779_v1 = vpop.f32.mrf.mxu3  ;;  %v8781_v39 = vpop.f32.mrf.mxu0  ;;  %v6700_v5 = vor.u32 %v7038_v57, %v6697_v23  ;;  %v6914_v23 = vld [vmem:[#allocation5 + $0x78] sm:$0xff] }
 0x212   : > { %12752 = vst [vmem:[#allocation183_spill] sm:$0xff] %v8779_v1  ;;  %v8786_v9 = vpop.f32.mrf.mxu1 }
 0x213   : > { %12753 = vst [vmem:[#allocation184_spill] sm:$0xff] %v8781_v39 }
 0x214   : > { %12754 = vst [vmem:[#allocation185_spill] sm:$0xff] %v8786_v9  ;;  %6661 = vmatmul.msk.bf16.vlgmr.msrb.gmra.mxu0 %vm531_vm0, %v6913_v44  ;;  %6662 = vmatmul.msk.bf16.vlgmr.msrb.gmra.mxu1 %vm531_vm0, %v6913_v44 }
 0x215   : > { %6663 = vmatmul.msk.bf16.vlgmr.msrb.gmra.mxu2 %vm531_vm0, %v6913_v44  ;;  %2998 = vmatpush.bf16.msrb.mxu0 %v6688_v26 }
 0x216   : > { %6664 = vmatmul.msk.bf16.vlgmr.msrb.gmra.mxu3 %vm531_vm0, %v6913_v44  ;;  %3012 = vmatpush.bf16.msrb.mxu1 %v6692_v21 }
 0x217   : > { %3026 = vmatpush.bf16.msrb.mxu2 %v6696_v25  ;;  %3040 = vmatpush.bf16.msrb.mxu3 %v6700_v5 }
 0x218   : > { %v8794_v39 = vpop.f32.mrf.mxu2 }
 0x219   : > { %12755 = vst [vmem:[#allocation186_spill] sm:$0xff] %v8794_v39  ;;  %v8796_v43 = vpop.f32.mrf.mxu3  ;;  %v8798_v58 = vpop.f32.mrf.mxu0 }
 0x21a   : > { %12756 = vst [vmem:[#allocation187_spill] sm:$0xff] %v8796_v43  ;;  %v8800_v59 = vpop.f32.mrf.mxu1 }
 0x21b   : > { %12757 = vst [vmem:[#allocation188_spill] sm:$0xff] %v8798_v58 }
 0x21c   : > { %12758 = vst [vmem:[#allocation189_spill] sm:$0xff] %v8800_v59 }
 0x220   : > { %v8802_v46 = vpop.f32.mrf.mxu2 }
 0x221   : > { %12759 = vst [vmem:[#allocation190_spill] sm:$0xff] %v8802_v46  ;;  %v8804_v57 = vpop.f32.mrf.mxu3  ;;  %v8806_v8 = vpop.f32.mrf.mxu0 }
 0x222   : > { %12760 = vst [vmem:[#allocation191_spill] sm:$0xff] %v8804_v57  ;;  %v8808_v44 = vpop.f32.mrf.mxu1 }
 0x223   : > { %12761 = vst [vmem:[#allocation192_spill] sm:$0xff] %v8808_v44 }
 0x224   : > { %6701 = vmatmul.msk.bf16.vlgmr.msra.gmra.mxu0 %vm531_vm0, %v6914_v23  ;;  %6702 = vmatmul.msk.bf16.vlgmr.msra.gmra.mxu1 %vm531_vm0, %v6914_v23 }
 0x225   : > { %6703 = vmatmul.msk.bf16.vlgmr.msra.gmra.mxu2 %vm531_vm0, %v6914_v23 }
 0x226   : > { %6704 = vmatmul.msk.bf16.vlgmr.msra.gmra.mxu3 %vm531_vm0, %v6914_v23 }
 0x228   : > { %v8814_v25 = vpop.f32.mrf.mxu2 }
 0x229   : > { %12762 = vst [vmem:[#allocation193_spill] sm:$0xff] %v8814_v25  ;;  %v8816_v26 = vpop.f32.mrf.mxu3  ;;  %v8818_v21 = vpop.f32.mrf.mxu0 }
 0x22a   : > { %12763 = vst [vmem:[#allocation194_spill] sm:$0xff] %v8816_v26  ;;  %v8820_v5 = vpop.f32.mrf.mxu1 }
 0x22b   : > { %12764 = vst [vmem:[#allocation195_spill] sm:$0xff] %v8818_v21 }
 0x22c   : > { %12765 = vst [vmem:[#allocation196_spill] sm:$0xff] %v8820_v5 }
 0x230   : > { %v8822_v3 = vpop.f32.mrf.mxu2 }
 0x231   : > { %12766 = vst [vmem:[#allocation197_spill] sm:$0xff] %v8822_v3  ;;  %v8824_v57 = vpop.f32.mrf.mxu0  ;;  %v8826_v44 = vpop.f32.mrf.mxu3 }
 0x232   : > { %12767 = vst [vmem:[#allocation198_spill] sm:$0xff] %v8824_v57  ;;  %v8828_v46 = vpop.f32.mrf.mxu1 }
 0x233   : > { %12768 = vst [vmem:[#allocation199_spill] sm:$0xff] %v8826_v44 }
 0x234   : > { %12769 = vst [vmem:[#allocation200_spill] sm:$0xff] %v8828_v46  ;;  %6705 = vmatmul.msk.bf16.vlgmr.msrb.gmra.mxu0 %vm531_vm0, %v6914_v23  ;;  %6706 = vmatmul.msk.bf16.vlgmr.msrb.gmra.mxu1 %vm531_vm0, %v6914_v23 }
 0x235   : > { %6707 = vmatmul.msk.bf16.vlgmr.msrb.gmra.mxu2 %vm531_vm0, %v6914_v23 }
 0x236   : > { %6708 = vmatmul.msk.bf16.vlgmr.msrb.gmra.mxu3 %vm531_vm0, %v6914_v23 }
 0x238   : > { %v8834_v26 = vpop.f32.mrf.mxu2 }
 0x239   : > { %12770 = vst [vmem:[#allocation201_spill] sm:$0xff] %v8834_v26  ;;  %v8836_v21 = vpop.f32.mrf.mxu0  ;;  %v8840_v3 = vpop.f32.mrf.mxu3 }
 0x23a   : > { %12771 = vst [vmem:[#allocation202_spill] sm:$0xff] %v8836_v21  ;;  %v8838_v5 = vpop.f32.mrf.mxu1 }
 0x23b   : > { %12772 = vst [vmem:[#allocation203_spill] sm:$0xff] %v8838_v5 }
 0x23c   : > { %12773 = vst [vmem:[#allocation204_spill] sm:$0xff] %v8840_v3 }
 0x240   : > { %v8842_v57 = vpop.f32.mrf.mxu2 }
 0x241   : > { %12774 = vst [vmem:[#allocation205_spill] sm:$0xff] %v8842_v57  ;;  %v8844_v44 = vpop.f32.mrf.mxu0  ;;  %v8848_v25 = vpop.f32.mrf.mxu3 }
 0x242   : > { %12775 = vst [vmem:[#allocation206_spill] sm:$0xff] %v8844_v44  ;;  %v8846_v46 = vpop.f32.mrf.mxu1 }
 0x243   : > { %12776 = vst [vmem:[#allocation207_spill] sm:$0xff] %v8846_v46 }
 0x244   : > { %12777 = vst [vmem:[#allocation208_spill] sm:$0xff] %v8848_v25 }
 0x248   : > { %v8850_v59 = vpop.f32.mrf.mxu2 }
 0x249   : > { %12778 = vst [vmem:[#allocation209_spill] sm:$0xff] %v8850_v59  ;;  %v8852_v58 = vpop.f32.mrf.mxu0  ;;  %v8856_v26 = vpop.f32.mrf.mxu3 }
 0x24a   : > { %12779 = vst [vmem:[#allocation210_spill] sm:$0xff] %v8852_v58  ;;  %v8854_v23 = vpop.f32.mrf.mxu1 }
 0x24b   : > { %12780 = vst [vmem:[#allocation211_spill] sm:$0xff] %v8854_v23 }
 0x24c   : > { %12781 = vst [vmem:[#allocation212_spill] sm:$0xff] %v8856_v26 }
 0x250   : > { %v8858_v21 = vpop.f32.mrf.mxu2 }
 0x251   : > { %12782 = vst [vmem:[#allocation213_spill] sm:$0xff] %v8858_v21  ;;  %v8860_v5 = vpop.f32.mrf.mxu0  ;;  %v8868_v46 = vpop.f32.mrf.mxu3 }
 0x252   : > { %12783 = vst [vmem:[#allocation214_spill] sm:$0xff] %v8860_v5  ;;  %v8862_v3 = vpop.f32.mrf.mxu1 }
 0x253   : > { %12784 = vst [vmem:[#allocation215_spill] sm:$0xff] %v8862_v3 }
 0x254   : > { %12787 = vst [vmem:[#allocation218_spill] sm:$0xff] %v8868_v46 }
 0x258   : > { %v8864_v57 = vpop.f32.mrf.mxu2 }
 0x259   : > { %12785 = vst [vmem:[#allocation216_spill] sm:$0xff] %v8864_v57  ;;  %v8866_v44 = vpop.f32.mrf.mxu0  ;;  %v8878_v26 = vpop.f32.mrf.mxu3 }
 0x25a   : > { %12786 = vst [vmem:[#allocation217_spill] sm:$0xff] %v8866_v44  ;;  %v8870_v25 = vpop.f32.mrf.mxu1 }
 0x25b   : > { %12788 = vst [vmem:[#allocation219_spill] sm:$0xff] %v8870_v25 }
 0x25c   : > { %12791 = vst [vmem:[#allocation222_spill] sm:$0xff] %v8878_v26 }
 0x260   : > { %v8872_v59 = vpop.f32.mrf.mxu2 }
 0x261   : > { %12789 = vst [vmem:[#allocation220_spill] sm:$0xff] %v8872_v59  ;;  %v8874_v58 = vpop.f32.mrf.mxu0  ;;  %v8886_v57 = vpop.f32.mrf.mxu3  ;;  %v3047_v59 = vmax.f32 %v8193_v0, %v8249_v41 }
 0x262   : > { %v8876_v23 = vpop.f32.mrf.mxu1  ;;  %12795 = vst [vmem:[#allocation226_spill] sm:$0xff] %v8886_v57 }
 0x263   : > { %12790 = vst [vmem:[#allocation221_spill] sm:$0xff] %v8876_v23  ;;  %v3062_v23 = vmax.f32 %v8198_v4, %v8254_v45  ;;  %v3107_v45 = vmax.f32 %v8221_v20, %v8277_v61  ;;  %v3272_v61 = vmax.f32 %v8247_v40, %v8303_v27  ;;  %v12803_v20 = vld [vmem:[#allocation65_spill] sm:$0xff]  ;;  %v12902_v4 = vld [vmem:[#allocation159_spill] sm:$0xff] }
 0x268   : > { %v8880_v21 = vpop.f32.mrf.mxu2 }
 0x269   : > { %12792 = vst [vmem:[#allocation223_spill] sm:$0xff] %v8880_v21  ;;  %v8882_v5 = vpop.f32.mrf.mxu0  ;;  %v3077_v21 = vmax.f32 %v8206_v11, %v8262_v52  ;;  %v3122_v52 = vmax.f32 %v8226_v24, %v8282_v2  ;;  %v3048_v2 = vmax.f32 %v3047_v59, %v8305_v28  ;;  %v8927_v24 = vpop.f32.mrf.mxu3  ;;  %v3108_v59 = vmax.f32 %v3107_v45, %v8333_v63  ;;  %v12804_v63 = vld [vmem:[#allocation66_spill] sm:$0xff]  ;;  %v12846_v11 = vld [vmem:[#allocation108_spill] sm:$0xff] }
 0x26a   : > { %12793 = vst [vmem:[#allocation224_spill] sm:$0xff] %v8882_v5  ;;  %v8884_v3 = vpop.f32.mrf.mxu1  ;;  %v3167_v5 = vmax.f32 %v8210_v13, %v8266_v54  ;;  %v3152_v54 = vmax.f32 %v8236_v32, %v8292_v16  ;;  %v12829_v13 = vld [vmem:[#allocation91_spill] sm:$0xff] }
 0x26b   : > { %12794 = vst [vmem:[#allocation225_spill] sm:$0xff] %v8884_v3  ;;  %v3092_v3 = vmax.f32 %v8208_v12, %v8264_v53  ;;  %v3137_v53 = vmax.f32 %v8234_v31, %v8290_v10  ;;  %v3063_v10 = vmax.f32 %v3062_v23, %v8310_v37  ;;  %v3078_v16 = vmax.f32 %v3077_v21, %v8318_v47  ;;  %v12802_v31 = vld [vmem:[#allocation64_spill] sm:$0xff]  ;;  %v12836_v12 = vld [vmem:[#allocation98_spill] sm:$0xff]  ;;  %v12845_v47 = vld [vmem:[#allocation107_spill] sm:$0xff] }
 0x26c   : > { %12799 = vst [vmem:[#allocation230_spill] sm:$0xff] %v8927_v24  ;;  %v3123_v23 = vmax.f32 %v3122_v52, %v8338_v6  ;;  %v12806_v6 = vld [vmem:[#allocation68_spill] sm:$0xff]  ;;  %v12880_v37 = vld [vmem:[#allocation139_spill] sm:$0xff] }
 0x26d   : > { %v3093_v32 = vmax.f32 %v3092_v3, %v8320_v48  ;;  %v3138_v21 = vmax.f32 %v3137_v53, %v8346_v29  ;;  %v3153_v3 = vmax.f32 %v3152_v54, %v8348_v30  ;;  %v3064_v45 = vmax.f32 %v3063_v10, %v12803_v20  ;;  %v12807_v54 = vld [vmem:[#allocation69_spill] sm:$0xff]  ;;  %v12812_v30 = vld [vmem:[#allocation74_spill] sm:$0xff] }
 0x26e   : > { %v12879_v20 = vld [vmem:[#allocation138_spill] sm:$0xff] }
 0x26f   : > { %v3139_v10 = vmax.f32 %v3138_v21, %v12812_v30 }
 0x270   : > { %v8892_v25 = vpop.f32.mrf.mxu2 }
 0x271   : > { %v8888_v44 = vpop.f32.mrf.mxu0  ;;  %12798 = vst [vmem:[#allocation229_spill] sm:$0xff] %v8892_v25  ;;  %v3212_v25 = vmax.f32 %v8219_v19, %v8275_v60  ;;  %v3257_v60 = vmax.f32 %v8242_v36, %v8298_v22  ;;  %v12805_v19 = vld [vmem:[#allocation67_spill] sm:$0xff] }
 0x272   : > { %12796 = vst [vmem:[#allocation227_spill] sm:$0xff] %v8888_v44  ;;  %v8890_v46 = vpop.f32.mrf.mxu1  ;;  %v3197_v44 = vmax.f32 %v8214_v15, %v8270_v56  ;;  %v3242_v56 = vmax.f32 %v8240_v34, %v8296_v18  ;;  %v12801_v34 = vld [vmem:[#allocation63_spill] sm:$0xff]  ;;  %v3094_v52 = vmax.f32 %v3093_v32, %v12805_v19  ;;  %v12814_v15 = vld [vmem:[#allocation76_spill] sm:$0xff]  ;;  %v12831_v19 = vld [vmem:[#allocation93_spill] sm:$0xff] }
 0x273   : > { %12797 = vst [vmem:[#allocation228_spill] sm:$0xff] %v8890_v46  ;;  %v3182_v46 = vmax.f32 %v8212_v14, %v8268_v55  ;;  %v3227_v55 = vmax.f32 %v8238_v33, %v8294_v17  ;;  %v3168_v17 = vmax.f32 %v3167_v5, %v8322_v49  ;;  %v3213_v27 = vmax.f32 %v3212_v25, %v8331_v62  ;;  %v12816_v14 = vld [vmem:[#allocation78_spill] sm:$0xff]  ;;  %v12817_v49 = vld [vmem:[#allocation79_spill] sm:$0xff] }
 0x274   : > { %v3198_v22 = vmax.f32 %v3197_v44, %v8326_v51  ;;  %v3243_v36 = vmax.f32 %v3242_v56, %v8352_v38  ;;  %v3273_v44 = vmax.f32 %v3272_v61, %v12801_v34  ;;  %v3049_v25 = vmax.f32 %v3048_v2, %v12802_v31  ;;  %v12809_v38 = vld [vmem:[#allocation71_spill] sm:$0xff]  ;;  %v12811_v34 = vld [vmem:[#allocation73_spill] sm:$0xff] }
 0x275   : > { %v3183_v18 = vmax.f32 %v3182_v46, %v8324_v50  ;;  %v3228_v5 = vmax.f32 %v3227_v55, %v8350_v35  ;;  %v3258_v46 = vmax.f32 %v3257_v60, %v8354_v42  ;;  %v3079_v62 = vmax.f32 %v3078_v16, %v12804_v63  ;;  %v12808_v35 = vld [vmem:[#allocation70_spill] sm:$0xff]  ;;  %v12810_v42 = vld [vmem:[#allocation72_spill] sm:$0xff]  ;;  %v12813_v51 = vld [vmem:[#allocation75_spill] sm:$0xff] }
 0x276   : > { %v3169_v53 = vmax.f32 %v3168_v17, %v12806_v6  ;;  %v3199_v56 = vmax.f32 %v3198_v22, %v12808_v35  ;;  %v3214_v60 = vmax.f32 %v3213_v27, %v12809_v38  ;;  %v3109_v61 = vmax.f32 %v3108_v59, %v12810_v42  ;;  %v12815_v50 = vld [vmem:[#allocation77_spill] sm:$0xff]  ;;  %v12820_v38 = vld [vmem:[#allocation82_spill] sm:$0xff]  ;;  %v12821_v42 = vld [vmem:[#allocation83_spill] sm:$0xff] }
 0x277   : > { %v3184_v55 = vmax.f32 %v3183_v18, %v12807_v54  ;;  %v3124_v2 = vmax.f32 %v3123_v23, %v12811_v34  ;;  %v3154_v16 = vmax.f32 %v3153_v3, %v12813_v51  ;;  %v3229_v32 = vmax.f32 %v3228_v5, %v12814_v15  ;;  %v12818_v54 = vld [vmem:[#allocation80_spill] sm:$0xff]  ;;  %v12819_v35 = vld [vmem:[#allocation81_spill] sm:$0xff]  ;;  %v12824_v15 = vld [vmem:[#allocation86_spill] sm:$0xff] }
 0x278   : > { %v8953_v29 = vpop.f32.mrf.mxu2  ;;  %v3244_v17 = vmax.f32 %v3243_v36, %v12815_v50  ;;  %v3259_v6 = vmax.f32 %v3258_v46, %v12816_v14  ;;  %v3274_v18 = vmax.f32 %v3273_v44, %v12817_v49  ;;  %v3050_v22 = vmax.f32 %v3049_v25, %v12818_v54  ;;  %v12822_v34 = vld [vmem:[#allocation84_spill] sm:$0xff]  ;;  %v12823_v3 = vld [vmem:[#allocation85_spill] sm:$0xff]  ;;  %v12825_v50 = vld [vmem:[#allocation87_spill] sm:$0xff]  ;;  %v8977_v49 = vpop.f32.mrf.mxu3 }
 0x279   : > { %v8933_v33 = vpop.f32.mrf.mxu0  ;;  %v3065_v27 = vmax.f32 %v3064_v45, %v12819_v35  ;;  %v3080_v59 = vmax.f32 %v3079_v62, %v12820_v38  ;;  %v3095_v23 = vmax.f32 %v3094_v52, %v12821_v42  ;;  %v3170_v21 = vmax.f32 %v3169_v53, %v12822_v34  ;;  %v12826_v14 = vld [vmem:[#allocation88_spill] sm:$0xff]  ;;  %v12827_v45 = vld [vmem:[#allocation89_spill] sm:$0xff]  ;;  %v12828_v51 = vld [vmem:[#allocation90_spill] sm:$0xff] }
 0x27a   : > { %v8939_v40 = vpop.f32.mrf.mxu1  ;;  %v3185_v5 = vmax.f32 %v3184_v55, %v12823_v3  ;;  %v3200_v36 = vmax.f32 %v3199_v56, %v12824_v15  ;;  %v3215_v46 = vmax.f32 %v3214_v60, %v12825_v50  ;;  %v3110_v44 = vmax.f32 %v3109_v61, %v12826_v14  ;;  %v12830_v34 = vld [vmem:[#allocation92_spill] sm:$0xff]  ;;  %v12832_v3 = vld [vmem:[#allocation94_spill] sm:$0xff]  ;;  %v12833_v15 = vld [vmem:[#allocation95_spill] sm:$0xff] }
 0x27b   : > { %12800 = vst [vmem:[#allocation231_spill] sm:$0xff] %v8939_v40  ;;  %v3125_v62 = vmax.f32 %v3124_v2, %v12827_v45  ;;  %v3140_v52 = vmax.f32 %v3139_v10, %v12828_v51  ;;  %v3155_v53 = vmax.f32 %v3154_v16, %v12829_v13  ;;  %v3230_v42 = vmax.f32 %v3229_v32, %v12830_v34  ;;  %v12834_v50 = vld [vmem:[#allocation96_spill] sm:$0xff]  ;;  %v12835_v14 = vld [vmem:[#allocation97_spill] sm:$0xff]  ;;  %v12837_v63 = vld [vmem:[#allocation99_spill] sm:$0xff] }
 0x27c   : > { %v3245_v55 = vmax.f32 %v3244_v17, %v12831_v19  ;;  %v3260_v56 = vmax.f32 %v3259_v6, %v12832_v3  ;;  %v3275_v60 = vmax.f32 %v3274_v18, %v12833_v15  ;;  %v3051_v61 = vmax.f32 %v3050_v22, %v12834_v50  ;;  %v12838_v45 = vld [vmem:[#allocation100_spill] sm:$0xff]  ;;  %v12839_v51 = vld [vmem:[#allocation101_spill] sm:$0xff]  ;;  %v12840_v13 = vld [vmem:[#allocation102_spill] sm:$0xff] }
 0x27d   : > { %v3066_v48 = vmax.f32 %v3065_v27, %v12835_v14  ;;  %v3081_v38 = vmax.f32 %v3080_v59, %v12836_v12  ;;  %v3096_v2 = vmax.f32 %v3095_v23, %v12837_v63  ;;  %v3171_v10 = vmax.f32 %v3170_v21, %v12838_v45  ;;  %v12841_v34 = vld [vmem:[#allocation103_spill] sm:$0xff]  ;;  %v12842_v19 = vld [vmem:[#allocation104_spill] sm:$0xff]  ;;  %v12843_v3 = vld [vmem:[#allocation105_spill] sm:$0xff] }
 0x27e   : > { %v3186_v16 = vmax.f32 %v3185_v5, %v12839_v51  ;;  %v3201_v32 = vmax.f32 %v3200_v36, %v12840_v13  ;;  %v3216_v17 = vmax.f32 %v3215_v46, %v12841_v34  ;;  %v3111_v6 = vmax.f32 %v3110_v44, %v12842_v19  ;;  %v12844_v15 = vld [vmem:[#allocation106_spill] sm:$0xff]  ;;  %v12848_v23 = vld [vmem:[#allocation109_spill] sm:$0xff]  ;;  %v12850_v51 = vld [vmem:[#allocation111_spill] sm:$0xff] }
 0x27f   : > { %v3126_v18 = vmax.f32 %v3125_v62, %v12843_v3  ;;  %v3141_v22 = vmax.f32 %v3140_v52, %v12844_v15  ;;  %v3156_v27 = vmax.f32 %v3155_v53, %v12845_v47  ;;  %v3231_v59 = vmax.f32 %v3230_v42, %v12846_v11  ;;  %v12849_v45 = vld [vmem:[#allocation110_spill] sm:$0xff]  ;;  %v12851_v13 = vld [vmem:[#allocation112_spill] sm:$0xff]  ;;  %v12852_v34 = vld [vmem:[#allocation113_spill] sm:$0xff] }
 0x280   : > { %v9001_v12 = vpop.f32.mrf.mxu2  ;;  %v3246_v21 = vmax.f32 %v3245_v55, %v12848_v23  ;;  %v3261_v5 = vmax.f32 %v3260_v56, %v12849_v45  ;;  %v3276_v36 = vmax.f32 %v3275_v60, %v12850_v51  ;;  %v3052_v46 = vmax.f32 %v3051_v61, %v12851_v13  ;;  %v12853_v19 = vld [vmem:[#allocation114_spill] sm:$0xff]  ;;  %v12854_v3 = vld [vmem:[#allocation115_spill] sm:$0xff]  ;;  %v12855_v15 = vld [vmem:[#allocation116_spill] sm:$0xff] }
 0x281   : > { %v8971_v30 = vpop.f32.mrf.mxu0  ;;  %12847 = vst [vmem:[#allocation64_spill] sm:$0xff] %v9001_v12  ;;  %v3067_v44 = vmax.f32 %v3066_v48, %v12852_v34  ;;  %v3082_v62 = vmax.f32 %v3081_v38, %v12853_v19  ;;  %v3097_v52 = vmax.f32 %v3096_v2, %v12854_v3  ;;  %v3172_v53 = vmax.f32 %v3171_v10, %v12855_v15  ;;  %v12857_v42 = vld [vmem:[#allocation117_spill] sm:$0xff]  ;;  %v12858_v63 = vld [vmem:[#allocation118_spill] sm:$0xff]  ;;  %v12859_v23 = vld [vmem:[#allocation119_spill] sm:$0xff] }
 0x282   : > { %v8979_v25 = vpop.f32.mrf.mxu1  ;;  %v3187_v11 = vmax.f32 %v3186_v16, %v12857_v42  ;;  %v3202_v55 = vmax.f32 %v3201_v32, %v12858_v63  ;;  %v3217_v56 = vmax.f32 %v3216_v17, %v12859_v23  ;;  %v12860_v45 = vld [vmem:[#allocation120_spill] sm:$0xff]  ;;  %v12861_v51 = vld [vmem:[#allocation121_spill] sm:$0xff]  ;;  %v12862_v14 = vld [vmem:[#allocation122_spill] sm:$0xff]  ;;  %v9027_v23 = vpop.f32.mrf.mxu3 }
 0x283   : > { %v3112_v60 = vmax.f32 %v3111_v6, %v12860_v45  ;;  %v3127_v61 = vmax.f32 %v3126_v18, %v12861_v51  ;;  %v3142_v48 = vmax.f32 %v3141_v22, %v12862_v14  ;;  %v12863_v34 = vld [vmem:[#allocation123_spill] sm:$0xff]  ;;  %v12864_v19 = vld [vmem:[#allocation124_spill] sm:$0xff]  ;;  %v12866_v10 = vld [vmem:[#allocation125_spill] sm:$0xff] }
 0x284   : > { %v3157_v38 = vmax.f32 %v3156_v27, %v12863_v34  ;;  %v3232_v2 = vmax.f32 %v3231_v59, %v12864_v19  ;;  %v3247_v15 = vmax.f32 %v3246_v21, %v12866_v10  ;;  %v12867_v35 = vld [vmem:[#allocation126_spill] sm:$0xff]  ;;  %v12868_v42 = vld [vmem:[#allocation127_spill] sm:$0xff]  ;;  %v12869_v63 = vld [vmem:[#allocation128_spill] sm:$0xff] }
 0x285   : > { %v3262_v16 = vmax.f32 %v3261_v5, %v12867_v35  ;;  %v3277_v32 = vmax.f32 %v3276_v36, %v12868_v42  ;;  %v3053_v17 = vmax.f32 %v3052_v46, %v12869_v63  ;;  %v12870_v6 = vld [vmem:[#allocation129_spill] sm:$0xff]  ;;  %v12871_v51 = vld [vmem:[#allocation130_spill] sm:$0xff]  ;;  %v12872_v14 = vld [vmem:[#allocation131_spill] sm:$0xff] }
 0x286   : > { %v3068_v18 = vmax.f32 %v3067_v44, %v12870_v6  ;;  %v3083_v22 = vmax.f32 %v3082_v62, %v12871_v51  ;;  %v3098_v27 = vmax.f32 %v3097_v52, %v12872_v14  ;;  %v12873_v34 = vld [vmem:[#allocation132_spill] sm:$0xff]  ;;  %v12874_v19 = vld [vmem:[#allocation133_spill] sm:$0xff]  ;;  %v12876_v10 = vld [vmem:[#allocation135_spill] sm:$0xff]  ;;  %v3158_v44 = vmax.f32 %v3157_v38, %v12880_v37 }
 0x287   : > { %v3173_v59 = vmax.f32 %v3172_v53, %v12873_v34  ;;  %v3188_v45 = vmax.f32 %v3187_v11, %v12874_v19  ;;  %v3218_v5 = vmax.f32 %v3217_v56, %v12876_v10  ;;  %v12877_v35 = vld [vmem:[#allocation136_spill] sm:$0xff]  ;;  %v12878_v42 = vld [vmem:[#allocation137_spill] sm:$0xff]  ;;  %v12883_v14 = vld [vmem:[#allocation142_spill] sm:$0xff] }
 0x288   : > { %v3113_v36 = vmax.f32 %v3112_v60, %v12877_v35  ;;  %v3128_v46 = vmax.f32 %v3127_v61, %v12878_v42  ;;  %v12881_v6 = vld [vmem:[#allocation140_spill] sm:$0xff]  ;;  %v12882_v51 = vld [vmem:[#allocation141_spill] sm:$0xff]  ;;  %v3263_v53 = vmax.f32 %v3262_v16, %v12883_v14  ;;  %v12884_v34 = vld [vmem:[#allocation143_spill] sm:$0xff] }
 0x289   : > { %v9011_v47 = vpop.f32.mrf.mxu0  ;;  %v3233_v62 = vmax.f32 %v3232_v2, %v12881_v6  ;;  %v3248_v52 = vmax.f32 %v3247_v15, %v12882_v51  ;;  %v3278_v11 = vmax.f32 %v3277_v32, %v12884_v34  ;;  %v12885_v19 = vld [vmem:[#allocation144_spill] sm:$0xff]  ;;  %v12887_v10 = vld [vmem:[#allocation146_spill] sm:$0xff]  ;;  %v12888_v35 = vld [vmem:[#allocation147_spill] sm:$0xff] }
 0x28a   : > { %12856 = vst [vmem:[#allocation80_spill] sm:$0xff] %v9011_v47  ;;  %v9021_v3 = vpop.f32.mrf.mxu1  ;;  %v3143_v47 = vmax.f32 %v3142_v48, %v12879_v20  ;;  %v3084_v60 = vmax.f32 %v3083_v22, %v12887_v10  ;;  %v3099_v61 = vmax.f32 %v3098_v27, %v12888_v35  ;;  %v12889_v42 = vld [vmem:[#allocation148_spill] sm:$0xff]  ;;  %v9049_v20 = vpop.f32.mrf.mxu2  ;;  %v12892_v2 = vld [vmem:[#allocation149_spill] sm:$0xff]  ;;  %v12893_v51 = vld [vmem:[#allocation150_spill] sm:$0xff] }
 0x28b   : > { %12865 = vst [vmem:[#allocation96_spill] sm:$0xff] %v9021_v3  ;;  %v12875_v3 = vld [vmem:[#allocation134_spill] sm:$0xff]  ;;  %v3174_v48 = vmax.f32 %v3173_v59, %v12889_v42  ;;  %v3189_v15 = vmax.f32 %v3188_v45, %v12892_v2  ;;  %v12894_v14 = vld [vmem:[#allocation151_spill] sm:$0xff]  ;;  %v12895_v34 = vld [vmem:[#allocation152_spill] sm:$0xff]  ;;  %v3279_v45 = vmax.f32 %v3278_v11, %v12902_v4  ;;  %v9075_v4 = vpop.f32.mrf.mxu3 }
 0x28c   : > { %v3203_v21 = vmax.f32 %v3202_v55, %v12875_v3  ;;  %v3054_v55 = vmax.f32 %v3053_v17, %v12885_v19  ;;  %v12886_v3 = vld [vmem:[#allocation145_spill] sm:$0xff]  ;;  %12890 = vst [vmem:[#allocation112_spill] sm:$0xff] %v9049_v20  ;;  %v3219_v32 = vmax.f32 %v3218_v5, %v12894_v14  ;;  %v3114_v17 = vmax.f32 %v3113_v36, %v12895_v34  ;;  %v12897_v37 = vld [vmem:[#allocation154_spill] sm:$0xff]  ;;  %v12898_v10 = vld [vmem:[#allocation155_spill] sm:$0xff] }
 0x28d   : > { %v3069_v56 = vmax.f32 %v3068_v18, %v12886_v3  ;;  %v12896_v6 = vld [vmem:[#allocation153_spill] sm:$0xff]  ;;  %v3144_v22 = vmax.f32 %v3143_v47, %v12897_v37  ;;  %v3159_v27 = vmax.f32 %v3158_v44, %v12898_v10  ;;  %v12899_v35 = vld [vmem:[#allocation156_spill] sm:$0xff]  ;;  %v12901_v20 = vld [vmem:[#allocation158_spill] sm:$0xff] }
 0x28e   : > { %v3204_v16 = vmax.f32 %v3203_v21, %v12893_v51  ;;  %v3129_v18 = vmax.f32 %v3128_v46, %v12896_v6  ;;  %v3234_v59 = vmax.f32 %v3233_v62, %v12899_v35  ;;  %v12900_v42 = vld [vmem:[#allocation157_spill] sm:$0xff]  ;;  %v12903_v2 = vld [vmem:[#allocation160_spill] sm:$0xff]  ;;  %v12905_v14 = vld [vmem:[#allocation162_spill] sm:$0xff] }
 0x28f   : > { %v3249_v3 = vmax.f32 %v3248_v52, %v12900_v42  ;;  %v3055_v21 = vmax.f32 %v3054_v55, %v12903_v2  ;;  %v12904_v51 = vld [vmem:[#allocation161_spill] sm:$0xff]  ;;  %v3085_v36 = vmax.f32 %v3084_v60, %v12905_v14  ;;  %v12906_v34 = vld [vmem:[#allocation163_spill] sm:$0xff]  ;;  %v12907_v6 = vld [vmem:[#allocation164_spill] sm:$0xff]  ;;  %12913 = vst [vmem:[#allocation160_spill] sm:$0xff] %v9075_v4 }
 0x290   : > { %v3070_v5 = vmax.f32 %v3069_v56, %v12904_v51  ;;  %v3100_v46 = vmax.f32 %v3099_v61, %v12906_v34  ;;  %v3175_v47 = vmax.f32 %v3174_v48, %v12907_v6  ;;  %v12909_v44 = vld [vmem:[#allocation165_spill] sm:$0xff]  ;;  %v12910_v35 = vld [vmem:[#allocation166_spill] sm:$0xff]  ;;  %v12911_v42 = vld [vmem:[#allocation167_spill] sm:$0xff] }
 0x291   : > { %v9051_v38 = vpop.f32.mrf.mxu0  ;;  %v3190_v62 = vmax.f32 %v3189_v15, %v12909_v44  ;;  %v3205_v52 = vmax.f32 %v3204_v16, %v12910_v35  ;;  %v12914_v55 = vld [vmem:[#allocation169_spill] sm:$0xff]  ;;  %v12915_v10 = vld [vmem:[#allocation170_spill] sm:$0xff]  ;;  %v12916_v14 = vld [vmem:[#allocation171_spill] sm:$0xff] }
 0x292   : > { %12891 = vst [vmem:[#allocation128_spill] sm:$0xff] %v9051_v38  ;;  %v3264_v38 = vmax.f32 %v3263_v53, %v12901_v20  ;;  %v9069_v37 = vpop.f32.mrf.mxu1  ;;  %v3220_v53 = vmax.f32 %v3219_v32, %v12911_v42  ;;  %v12912_v20 = vld [vmem:[#allocation168_spill] sm:$0xff]  ;;  %v3130_v56 = vmax.f32 %v3129_v18, %v12914_v55  ;;  %v3145_v60 = vmax.f32 %v3144_v22, %v12915_v10  ;;  %v12918_v6 = vld [vmem:[#allocation173_spill] sm:$0xff]  ;;  %v12919_v51 = vld [vmem:[#allocation174_spill] sm:$0xff] }
 0x293   : > { %12908 = vst [vmem:[#allocation144_spill] sm:$0xff] %v9069_v37  ;;  %v3115_v11 = vmax.f32 %v3114_v17, %v12912_v20  ;;  %v3160_v61 = vmax.f32 %v3159_v27, %v12916_v14  ;;  %v12917_v34 = vld [vmem:[#allocation172_spill] sm:$0xff]  ;;  %v3250_v37 = vmax.f32 %v3249_v3, %v12918_v6  ;;  %v12920_v44 = vld [vmem:[#allocation175_spill] sm:$0xff]  ;;  %v12922_v42 = vld [vmem:[#allocation177_spill] sm:$0xff]  ;;  %v3191_v27 = vmax.f32 %v3190_v62, %v8772_v7 }
 0x294   : > { %v3235_v48 = vmax.f32 %v3234_v59, %v12917_v34  ;;  %v3265_v15 = vmax.f32 %v3264_v38, %v12919_v51  ;;  %v3280_v16 = vmax.f32 %v3279_v45, %v12920_v44  ;;  %v12921_v35 = vld [vmem:[#allocation176_spill] sm:$0xff]  ;;  %v3071_v17 = vmax.f32 %v3070_v5, %v12922_v42  ;;  %v12923_v20 = vld [vmem:[#allocation178_spill] sm:$0xff]  ;;  %v12924_v12 = vld [vmem:[#allocation179_spill] sm:$0xff]  ;;  %v9099_v51 = vpop.f32.mrf.mxu2 }
 0x295   : > { %v3056_v32 = vmax.f32 %v3055_v21, %v12921_v35  ;;  %v3086_v4 = vmax.f32 %v3085_v36, %v12923_v20  ;;  %v3101_v18 = vmax.f32 %v3100_v46, %v12924_v12  ;;  %v12925_v55 = vld [vmem:[#allocation180_spill] sm:$0xff]  ;;  %v12927_v59 = vld [vmem:[#allocation182_spill] sm:$0xff]  ;;  %v3221_v38 = vmax.f32 %v3220_v53, %v8779_v1  ;;  %12929 = vst [vmem:[#allocation177_spill] sm:$0xff] %v9099_v51  ;;  %v12931_v34 = vld [vmem:[#allocation189_spill] sm:$0xff] }
 0x296   : > { %v3176_v22 = vmax.f32 %v3175_v47, %v12925_v55  ;;  %v3206_v3 = vmax.f32 %v3205_v52, %v12927_v59  ;;  %v12928_v44 = vld [vmem:[#allocation184_spill] sm:$0xff]  ;;  %v3131_v5 = vmax.f32 %v3130_v56, %v8786_v9  ;;  %v3146_v36 = vmax.f32 %v3145_v60, %v8794_v39  ;;  %v12932_v14 = vld [vmem:[#allocation190_spill] sm:$0xff]  ;;  %v12934_v1 = vld [vmem:[#allocation191_spill] sm:$0xff] }
 0x297   : > { %v3057_v45 = vmax.f32 %v3056_v32, %v8806_v8  ;;  %v3116_v21 = vmax.f32 %v3115_v11, %v12928_v44  ;;  %v3161_v46 = vmax.f32 %v3160_v61, %v8796_v43  ;;  %v12930_v47 = vld [vmem:[#allocation188_spill] sm:$0xff]  ;;  %v3251_v62 = vmax.f32 %v3250_v37, %v12931_v34  ;;  %v12933_v59 = vld [vmem:[#allocation206_spill] sm:$0xff]  ;;  %v12936_v44 = vld [vmem:[#allocation193_spill] sm:$0xff] }
 0x298   : > { %v3236_v6 = vmax.f32 %v3235_v48, %v12930_v47  ;;  %v3266_v52 = vmax.f32 %v3265_v15, %v12932_v14  ;;  %v3281_v32 = vmax.f32 %v3280_v16, %v12934_v1  ;;  %v12935_v7 = vld [vmem:[#allocation192_spill] sm:$0xff]  ;;  %v3087_v56 = vmax.f32 %v3086_v4, %v12936_v44  ;;  %v12937_v9 = vld [vmem:[#allocation194_spill] sm:$0xff]  ;;  %v12938_v39 = vld [vmem:[#allocation195_spill] sm:$0xff] }
 0x299   : > { %v9089_v10 = vpop.f32.mrf.mxu0  ;;  %v3058_v53 = vmax.f32 %v3057_v45, %v12933_v59  ;;  %v3072_v11 = vmax.f32 %v3071_v17, %v12935_v7  ;;  %v3102_v60 = vmax.f32 %v3101_v18, %v12937_v9  ;;  %v3177_v61 = vmax.f32 %v3176_v22, %v12938_v39  ;;  %v12939_v43 = vld [vmem:[#allocation196_spill] sm:$0xff]  ;;  %v12940_v12 = vld [vmem:[#allocation197_spill] sm:$0xff]  ;;  %v12941_v34 = vld [vmem:[#allocation199_spill] sm:$0xff] }
 0x29a   : > { %12926 = vst [vmem:[#allocation176_spill] sm:$0xff] %v9089_v10  ;;  %v3192_v55 = vmax.f32 %v3191_v27, %v12939_v43  ;;  %v3207_v48 = vmax.f32 %v3206_v3, %v12940_v12  ;;  %v3222_v15 = vmax.f32 %v3221_v38, %v12941_v34  ;;  %v12942_v14 = vld [vmem:[#allocation198_spill] sm:$0xff]  ;;  %v12943_v47 = vld [vmem:[#allocation200_spill] sm:$0xff]  ;;  %v12944_v1 = vld [vmem:[#allocation201_spill] sm:$0xff]  ;;  %v9117_v10 = vpop.f32.mrf.mxu1  ;;  %v9123_v12 = vpop.f32.mrf.mxu3 }
 0x29b   : > { %v3059_v37 = vmax.f32 %v3058_v53, %v8874_v58  ;;  %v3117_v45 = vmax.f32 %v3116_v21, %v12942_v14  ;;  %v3132_v16 = vmax.f32 %v3131_v5, %v12943_v47  ;;  %v3147_v17 = vmax.f32 %v3146_v36, %v12944_v1  ;;  %v12945_v4 = vld [vmem:[#allocation204_spill] sm:$0xff]  ;;  %v12946_v9 = vld [vmem:[#allocation202_spill] sm:$0xff]  ;;  %v12947_v39 = vld [vmem:[#allocation203_spill] sm:$0xff] }
 0x29c   : > { %v3162_v18 = vmax.f32 %v3161_v46, %v12945_v4  ;;  %v3237_v22 = vmax.f32 %v3236_v6, %v12946_v9  ;;  %v3252_v27 = vmax.f32 %v3251_v62, %v12947_v39  ;;  %v12948_v53 = vld [vmem:[#allocation205_spill] sm:$0xff]  ;;  %v12949_v34 = vld [vmem:[#allocation208_spill] sm:$0xff]  ;;  %v12950_v14 = vld [vmem:[#allocation207_spill] sm:$0xff] }
 0x29d   : > { %v3060_v3 = vmax.f32 %v3059_v37, %v8971_v30  ;;  %v3267_v38 = vmax.f32 %v3266_v52, %v12948_v53  ;;  %v3282_v21 = vmax.f32 %v3281_v32, %v12949_v34  ;;  %v3073_v5 = vmax.f32 %v3072_v11, %v12950_v14  ;;  %v12951_v47 = vld [vmem:[#allocation209_spill] sm:$0xff]  ;;  %v12952_v46 = vld [vmem:[#allocation212_spill] sm:$0xff]  ;;  %v12953_v6 = vld [vmem:[#allocation210_spill] sm:$0xff] }
 0x29e   : > { %v9129_v36 = vmax.f32 %v3087_v56, %v12951_v47  ;;  %v9134_v4 = vmax.f32 %v3102_v60, %v12952_v46  ;;  %v9137_v62 = vmax.f32 %v3177_v61, %v12953_v6  ;;  %v12954_v37 = vld [vmem:[#allocation211_spill] sm:$0xff]  ;;  %v12955_v32 = vld [vmem:[#allocation213_spill] sm:$0xff]  ;;  %v12956_v11 = vld [vmem:[#allocation218_spill] sm:$0xff] }
 0x29f   : > { %v9140_v39 = vmax.f32 %v3192_v55, %v12954_v37  ;;  %v9146_v34 = vmax.f32 %v3207_v48, %v12955_v32  ;;  %v9149_v56 = vmax.f32 %v3222_v15, %v12956_v11  ;;  %v12957_v53 = vld [vmem:[#allocation214_spill] sm:$0xff]  ;;  %v12958_v60 = vld [vmem:[#allocation215_spill] sm:$0xff]  ;;  %v12959_v61 = vld [vmem:[#allocation216_spill] sm:$0xff]  ;;  %v9167_v15 = vmax.f32 %v3162_v18, %v8878_v26 }
 0x2a0   : > { %v9152_v9 = vmax.f32 %v3117_v45, %v12957_v53  ;;  %v9155_v43 = vmax.f32 %v3132_v16, %v12958_v60  ;;  %v9158_v6 = vmax.f32 %v3147_v17, %v12959_v61  ;;  %v12960_v45 = vld [vmem:[#allocation217_spill] sm:$0xff]  ;;  %v12961_v16 = vld [vmem:[#allocation219_spill] sm:$0xff]  ;;  %v9175_v17 = vpop.f32.mrf.mxu2  ;;  %v12963_v61 = vld [vmem:[#allocation220_spill] sm:$0xff] }
 0x2a1   : > { %v9131_v1 = vpop.f32.mrf.mxu0  ;;  %v9170_v53 = vmax.f32 %v3237_v22, %v12960_v45  ;;  %v9173_v60 = vmax.f32 %v3252_v27, %v12961_v16  ;;  %v9180_v11 = vmax.f32 %v3267_v38, %v12963_v61  ;;  %v12965_v26 = vld [vmem:[#allocation221_spill] sm:$0xff]  ;;  %v12966_v22 = vld [vmem:[#allocation223_spill] sm:$0xff]  ;;  %v12967_v37 = vld [vmem:[#allocation224_spill] sm:$0xff] }
 0x2a2   : > { %v9143_v52 = vmax.f32 %v3060_v3, %v9131_v1  ;;  %v3074_v32 = vmax.f32 %v3073_v5, %v12965_v26  ;;  %v3089_v45 = vmax.f32 %v9129_v36, %v12966_v22  ;;  %v3179_v38 = vmax.f32 %v9137_v62, %v12967_v37  ;;  %v12968_v61 = vld [vmem:[#allocation225_spill] sm:$0xff]  ;;  %v12971_v5 = vld [vmem:[#allocation228_spill] sm:$0xff] }
 0x2a3   : > { %12962 = vst [vmem:[#allocation178_spill] sm:$0xff] %v9173_v60 }
 0x2a4   : > { %v3287_v55 = vsub.f32 %v8193_v0, %v9143_v52  ;;  %v3407_v3 = vsub.f32 %v8249_v41, %v9143_v52  ;;  %v3528_v48 = vsub.f32 %v8305_v28, %v9143_v52  ;;  %v3649_v0 = vsub.f32 %v12802_v31, %v9143_v52  ;;  %12964 = vst [vmem:[#allocation206_spill] sm:$0xff] %v9180_v11 }
 0x2a5   : > { %v9183_v41 = vmax.f32 %v3282_v21, %v8886_v57  ;;  %v3770_v16 = vsub.f32 %v12818_v54, %v9143_v52  ;;  %v3104_v31 = vmax.f32 %v9134_v4, %v8927_v24  ;;  %v3891_v36 = vsub.f32 %v12834_v50, %v9143_v52  ;;  %v12970_v4 = vld [vmem:[#allocation227_spill] sm:$0xff]  ;;  %v9207_v21 = vpop.f32.mrf.mxu3 }
 0x2a6   : > { %v3303_v28 = vmul.f32 1.442695, %v3287_v55  ;;  %v3423_v18 = vmul.f32 1.442695, %v3407_v3  ;;  %v3544_v27 = vmul.f32 1.442695, %v3528_v48  ;;  %v9200_v48 = vpop.f32.mrf.mxu1  ;;  %v3075_v57 = vmax.f32 %v3074_v32, %v8979_v25 }
 0x2a7   : > { %v12969_v55 = vld [vmem:[#allocation229_spill] sm:$0xff]  ;;  %v3665_v3 = vmul.f32 1.442695, %v3649_v0  ;;  %v3786_v0 = vmul.f32 1.442695, %v3770_v16  ;;  %v4133_v50 = vsub.f32 %v12869_v63, %v9143_v52  ;;  %v4254_v32 = vsub.f32 %v12885_v19, %v9143_v52 }
 0x2a8   : > { %7156 = vpow2.f32 %v3303_v28  ;;  %v4012_v28 = vsub.f32 %v12851_v13, %v9143_v52  ;;  %v9222_v37 = vmax.f32 %v3075_v57, %v9200_v48  ;;  %v3907_v63 = vmul.f32 1.442695, %v3891_v36  ;;  %v9240_v36 = vpop.f32.mrf.mxu2 }
 0x2a9   : > { %7158 = vpow2.f32 %v3423_v18  ;;  %v4375_v16 = vsub.f32 %v12903_v2, %v9143_v52  ;;  %v4496_v57 = vsub.f32 %v12921_v35, %v9143_v52  ;;  %v4149_v2 = vmul.f32 1.442695, %v4133_v50  ;;  %v12976_v35 = vld [vmem:[#allocation19_spill] sm:$0xff]  ;;  %v12979_v50 = vld [vmem:[#allocation34_spill] sm:$0xff] }
 0x2aa   : > { %7160 = vpow2.f32 %v3544_v27  ;;  %v4028_v19 = vmul.f32 1.442695, %v4012_v28  ;;  %v4617_v24 = vsub.f32 %v8806_v8, %v9143_v52  ;;  %v4270_v62 = vmul.f32 1.442695, %v4254_v32 }
 0x2ab   : > { %7162 = vpow2.f32 %v3665_v3  ;;  %v3288_v40 = vsub.f32 %v12976_v35, %v9222_v37  ;;  %v12978_v3 = vld [vmem:[#allocation112_spill] sm:$0xff]  ;;  %v3408_v11 = vsub.f32 %v12979_v50, %v9222_v37  ;;  %v4512_v46 = vmul.f32 1.442695, %v4496_v57 }
 0x2ac   : > { %7164 = vpow2.f32 %v3786_v0  ;;  %v3090_v13 = vmax.f32 %v3089_v45, %v12978_v3  ;;  %v4391_v0 = vmul.f32 1.442695, %v4375_v16  ;;  %v9261_v35 = vmax.f32 %v3104_v31, %v9123_v12  ;;  %v12981_v45 = vld [vmem:[#allocation49_spill] sm:$0xff] }
 0x2ad   : > { %7166 = vpow2.f32 %v3907_v63  ;;  %v3529_v63 = vsub.f32 %v12981_v45, %v9222_v37  ;;  %v9265_v16 = vpop.f32.mrf.mxu3  ;;  %v3305_v57 = vmul.f32 1.442695, %v3288_v40  ;;  %v3425_v31 = vmul.f32 1.442695, %v3408_v11 }
 0x2ae   : > { %v9228_v27 = vpop.eup %7156  ;;  %7168 = vpow2.f32 %v4028_v19  ;;  %v4859_v19 = vsub.f32 %v8874_v58, %v9143_v52  ;;  %v12986_v58 = vld [vmem:[#allocation81_spill] sm:$0xff] }
 0x2af   : > { %12972 = vst [vmem:[#allocation192_spill] sm:$0xff] %v9228_v27  ;;  %v9236_v18 = vpop.eup %7158  ;;  %7170 = vpow2.f32 %v4149_v2  ;;  %v3546_v40 = vmul.f32 1.442695, %v3529_v63  ;;  %v12991_v63 = vmax.f32 %v9146_v34, %v12969_v55 }
 0x2b0   : > { %12973 = vst [vmem:[#allocation193_spill] sm:$0xff] %v9236_v18  ;;  %v3455_v28 = vadd.f32 %v9236_v18, %v9228_v27  ;;  %v9250_v60 = vpop.eup %7160  ;;  %v4738_v18 = vsub.f32 %v12933_v59, %v9143_v52  ;;  %v4633_v27 = vmul.f32 1.442695, %v4617_v24  ;;  %7172 = vpow2.f32 %v4270_v62  ;;  %v12984_v24 = vld [vmem:[#allocation65_spill] sm:$0xff] }
 0x2b1   : > { %12977 = vst [vmem:[#allocation207_spill] sm:$0xff] %v9250_v60  ;;  %v9258_v32 = vpop.eup %7162  ;;  %7174 = vpow2.f32 %v4391_v0  ;;  %v3650_v2 = vsub.f32 %v12984_v24, %v9222_v37  ;;  %v4980_v62 = vsub.f32 %v8971_v30, %v9143_v52  ;;  %v12988_v24 = vld [vmem:[#allocation96_spill] sm:$0xff] }
 0x2b2   : > { %v3576_v8 = vadd.f32 %v9250_v60, %v3455_v28  ;;  %12980 = vst [vmem:[#allocation209_spill] sm:$0xff] %v9258_v32  ;;  %v9270_v59 = vpop.eup %7164  ;;  %v12983_v28 = vld [vmem:[#allocation80_spill] sm:$0xff]  ;;  %7176 = vpow2.f32 %v4512_v46  ;;  %v4754_v54 = vmul.f32 1.442695, %v4738_v18  ;;  %v12989_v46 = vmax.f32 %v9140_v39, %v12968_v61  ;;  %v9305_v39 = vpop.f32.mrf.mxu2 }
 0x2b3   : > { %12982 = vst [vmem:[#allocation221_spill] sm:$0xff] %v9270_v59  ;;  %v9273_v60 = vmax.f32 %v3179_v38, %v12983_v28  ;;  %7178 = vpow2.f32 %v4633_v27  ;;  %v3771_v38 = vsub.f32 %v12986_v58, %v9222_v37  ;;  %v9301_v58 = vmax.f32 %v12991_v63, %v9099_v51 }
 0x2b4   : > { %v3697_v50 = vadd.f32 %v9258_v32, %v3576_v8  ;;  %v9280_v8 = vpop.eup %7166  ;;  %v9292_v18 = vmax.f32 %v12989_v46, %v12988_v24  ;;  %7180 = vpow2.f32 %v3305_v57  ;;  %v3667_v11 = vmul.f32 1.442695, %v3650_v2 }
 0x2b5   : > { %12985 = vst [vmem:[#allocation223_spill] sm:$0xff] %v9280_v8  ;;  %v9286_v0 = vpop.eup %7168  ;;  %7182 = vpow2.f32 %v3425_v31  ;;  %v4996_v57 = vmul.f32 1.442695, %v4980_v62  ;;  %v3788_v34 = vmul.f32 1.442695, %v3771_v38  ;;  %v12996_v31 = vld [vmem:[#allocation129_spill] sm:$0xff] }
 0x2b6   : > { %v3818_v45 = vadd.f32 %v9270_v59, %v3697_v50  ;;  %12987 = vst [vmem:[#allocation225_spill] sm:$0xff] %v9286_v0  ;;  %v4875_v50 = vmul.f32 1.442695, %v4859_v19  ;;  %v9295_v27 = vpop.eup %7170  ;;  %v12992_v59 = vld [vmem:[#allocation97_spill] sm:$0xff]  ;;  %7184 = vpow2.f32 %v4754_v54  ;;  %v4134_v2 = vsub.f32 %v12996_v31, %v9222_v37 }
 0x2b7   : > { %12990 = vst [vmem:[#allocation227_spill] sm:$0xff] %v9295_v27  ;;  %v3892_v32 = vsub.f32 %v12992_v59, %v9222_v37  ;;  %v9307_v46 = vpop.eup %7172  ;;  %7186 = vpow2.f32 %v3546_v40  ;;  %v12997_v59 = vld [vmem:[#allocation145_spill] sm:$0xff]  ;;  %v12999_v54 = vsub.f32 %v9131_v1, %v9143_v52  ;;  %v13003_v1 = vmax.f32 %v9149_v56, %v8977_v49 }
 0x2b8   : > { %v3939_v30 = vadd.f32 %v9280_v8, %v3818_v45  ;;  %12993 = vst [vmem:[#allocation228_spill] sm:$0xff] %v9307_v46  ;;  %v12994_v45 = vld [vmem:[#allocation113_spill] sm:$0xff]  ;;  %v9312_v24 = vpop.eup %7174  ;;  %v4255_v63 = vsub.f32 %v12997_v59, %v9222_v37  ;;  %7188 = vpow2.f32 %v4875_v50  ;;  %v4497_v59 = vsub.f32 %v12922_v42, %v9222_v37 }
 0x2b9   : > { %v4013_v8 = vsub.f32 %v12994_v45, %v9222_v37  ;;  %12995 = vst [vmem:[#allocation19_spill] sm:$0xff] %v9312_v24  ;;  %v9318_v51 = vpop.eup %7176  ;;  %v5117_v62 = vmul.f32 1.442695, %v12999_v54  ;;  %7190 = vpow2.f32 %v3667_v11  ;;  %v3909_v38 = vmul.f32 1.442695, %v3892_v32  ;;  %v13001_v45 = vld [vmem:[#allocation161_spill] sm:$0xff] }
 0x2ba   : > { %v4060_v19 = vadd.f32 %v9286_v0, %v3939_v30  ;;  %12998 = vst [vmem:[#allocation112_spill] sm:$0xff] %v9318_v51  ;;  %v9325_v30 = vmax.f32 %v3090_v13, %v9305_v39  ;;  %v9327_v40 = vpop.eup %7178  ;;  %v4376_v31 = vsub.f32 %v13001_v45, %v9222_v37  ;;  %v9339_v52 = vmax.f32 %v13003_v1, %v9207_v21  ;;  %v9341_v13 = vpop.f32.mrf.mxu3 }
 0x2bb   : > { %13000 = vst [vmem:[#allocation34_spill] sm:$0xff] %v9327_v40  ;;  %v9333_v0 = vpop.eup %7180  ;;  %7192 = vpow2.f32 %v4996_v57  ;;  %v4030_v32 = vmul.f32 1.442695, %v4013_v8  ;;  %v4272_v54 = vmul.f32 1.442695, %v4255_v63  ;;  %v4618_v42 = vsub.f32 %v12935_v7, %v9222_v37  ;;  %v13009_v63 = vld [vmem:[#allocation35_spill] sm:$0xff] }
 0x2bc   : > { %v4181_v55 = vadd.f32 %v9295_v27, %v4060_v19  ;;  %13002 = vst [vmem:[#allocation49_spill] sm:$0xff] %v9333_v0  ;;  %v9344_v11 = vpop.eup %7182  ;;  %7194 = vpow2.f32 %v3788_v34  ;;  %v4151_v19 = vmul.f32 1.442695, %v4134_v2  ;;  %v4393_v34 = vmul.f32 1.442695, %v4376_v31  ;;  %v13012_v31 = vld [vmem:[#allocation50_spill] sm:$0xff] }
 0x2bd   : > { %13004 = vst [vmem:[#allocation80_spill] sm:$0xff] %v9341_v13  ;;  %v9348_v45 = vpop.eup %7184  ;;  %7196 = vpow2.f32 %v5117_v62  ;;  %v3456_v1 = vadd.f32 %v9344_v11, %v9333_v0  ;;  %v4514_v2 = vmul.f32 1.442695, %v4497_v59  ;;  %v3530_v59 = vsub.f32 %v13012_v31, %v9325_v30 }
 0x2be   : > { %v4302_v50 = vadd.f32 %v9307_v46, %v4181_v55  ;;  %13005 = vst [vmem:[#allocation65_spill] sm:$0xff] %v9344_v11  ;;  %v13007_v55 = vld [vmem:[#allocation20_spill] sm:$0xff]  ;;  %v9355_v8 = vpop.eup %7186  ;;  %7198 = vpow2.f32 %v3909_v38  ;;  %v3409_v46 = vsub.f32 %v13009_v63, %v9325_v30  ;;  %v4860_v38 = vsub.f32 %v12965_v26, %v9222_v37  ;;  %v13015_v26 = vld [vmem:[#allocation66_spill] sm:$0xff] }
 0x2bf   : > { %13006 = vst [vmem:[#allocation81_spill] sm:$0xff] %v9348_v45  ;;  %v3289_v57 = vsub.f32 %v13007_v55, %v9325_v30  ;;  %v9359_v7 = vpop.eup %7188  ;;  %v3577_v62 = vadd.f32 %v9355_v8, %v3456_v1  ;;  %7200 = vpow2.f32 %v4030_v32  ;;  %v4635_v55 = vmul.f32 1.442695, %v4618_v42 }
 0x2c0   : > { %v4423_v56 = vadd.f32 %v9312_v24, %v4302_v50  ;;  %13008 = vst [vmem:[#allocation97_spill] sm:$0xff] %v9355_v8  ;;  %v4739_v50 = vsub.f32 %v12950_v14, %v9222_v37  ;;  %v9365_v24 = vpop.eup %7190  ;;  %7202 = vpow2.f32 %v4151_v19  ;;  %v4981_v14 = vsub.f32 %v8979_v25, %v9222_v37 }
 0x2c1   : > { %13010 = vst [vmem:[#allocation113_spill] sm:$0xff] %v9359_v7  ;;  %v9371_v63 = vpop.eup %7192  ;;  %v3698_v1 = vadd.f32 %v9365_v24, %v3577_v62  ;;  %7204 = vpow2.f32 %v4272_v54  ;;  %v3307_v32 = vmul.f32 1.442695, %v3289_v57  ;;  %v3427_v19 = vmul.f32 1.442695, %v3409_v46  ;;  %v13018_v57 = vld [vmem:[#allocation128_spill] sm:$0xff] }
 0x2c2   : > { %v4544_v27 = vadd.f32 %v9318_v51, %v4423_v56  ;;  %13011 = vst [vmem:[#allocation129_spill] sm:$0xff] %v9365_v24  ;;  %v9375_v51 = vpop.eup %7194  ;;  %7206 = vpow2.f32 %v4393_v34  ;;  %v3651_v42 = vsub.f32 %v13015_v26, %v9325_v30  ;;  %v4756_v62 = vmul.f32 1.442695, %v4739_v50  ;;  %v13020_v46 = vld [vmem:[#allocation82_spill] sm:$0xff] }
 0x2c3   : > { %13013 = vst [vmem:[#allocation145_spill] sm:$0xff] %v9371_v63  ;;  %v9381_v8 = vpop.eup %7196  ;;  %7208 = vpow2.f32 %v4514_v2  ;;  %v13019_v34 = vmax.f32 %v9152_v9, %v12970_v4  ;;  %v3548_v25 = vmul.f32 1.442695, %v3530_v59  ;;  %v3772_v26 = vsub.f32 %v13020_v46, %v9325_v30 }
 0x2c4   : > { %v4665_v56 = vadd.f32 %v9327_v40, %v4544_v27  ;;  %13014 = vst [vmem:[#allocation161_spill] sm:$0xff] %v9375_v51  ;;  %v3819_v27 = vadd.f32 %v9375_v51, %v3698_v1  ;;  %v9385_v54 = vpop.eup %7198  ;;  %7210 = vpow2.f32 %v4635_v55  ;;  %v4877_v50 = vmul.f32 1.442695, %v4860_v38  ;;  %v9399_v1 = vpop.f32.mrf.mxu3  ;;  %v13023_v55 = vld [vmem:[#allocation98_spill] sm:$0xff] }
 0x2c5   : > { %13016 = vst [vmem:[#allocation20_spill] sm:$0xff] %v9381_v8  ;;  %v9391_v24 = vmax.f32 %v13019_v34, %v13018_v57  ;;  %v9395_v40 = vpop.eup %7200  ;;  %7212 = vpow2.f32 %v3307_v32  ;;  %v4998_v9 = vmul.f32 1.442695, %v4981_v14  ;;  %v3669_v34 = vmul.f32 1.442695, %v3651_v42 }
 0x2c6   : > { %v4786_v31 = vadd.f32 %v9348_v45, %v4665_v56  ;;  %13017 = vst [vmem:[#allocation35_spill] sm:$0xff] %v9385_v54  ;;  %v3940_v2 = vadd.f32 %v9385_v54, %v3819_v27  ;;  %v9401_v51 = vpop.eup %7202  ;;  %7214 = vpow2.f32 %v3427_v19  ;;  %v3893_v59 = vsub.f32 %v13023_v55, %v9325_v30  ;;  %v13027_v19 = vld [vmem:[#allocation114_spill] sm:$0xff] }
 0x2c7   : > { %13021 = vst [vmem:[#allocation50_spill] sm:$0xff] %v9395_v40  ;;  %v9405_v45 = vpop.eup %7204  ;;  %7216 = vpow2.f32 %v4756_v62  ;;  %v13025_v38 = vsub.f32 %v9200_v48, %v9222_v37  ;;  %v3790_v14 = vmul.f32 1.442695, %v3772_v26  ;;  %v4014_v42 = vsub.f32 %v13027_v19, %v9325_v30  ;;  %v13029_v37 = vld [vmem:[#allocation130_spill] sm:$0xff] }
 0x2c8   : > { %v4907_v56 = vadd.f32 %v9359_v7, %v4786_v31  ;;  %13022 = vst [vmem:[#allocation66_spill] sm:$0xff] %v9401_v51  ;;  %v4061_v31 = vadd.f32 %v9395_v40, %v3940_v2  ;;  %v9412_v27 = vpop.eup %7206  ;;  %7218 = vpow2.f32 %v3548_v25  ;;  %v9418_v55 = vmax.f32 %v9261_v35, %v9399_v1  ;;  %v13031_v26 = vld [vmem:[#allocation146_spill] sm:$0xff] }
 0x2c9   : > { %13024 = vst [vmem:[#allocation128_spill] sm:$0xff] %v9405_v45  ;;  %v5119_v32 = vmul.f32 1.442695, %v13025_v38  ;;  %v9420_v54 = vpop.eup %7208  ;;  %7220 = vpow2.f32 %v4877_v50  ;;  %v4135_v48 = vsub.f32 %v13029_v37, %v9325_v30  ;;  %v3911_v25 = vmul.f32 1.442695, %v3893_v59  ;;  %v13032_v35 = vld [vmem:[#allocation162_spill] sm:$0xff] }
 0x2ca   : > { %v5028_v46 = vadd.f32 %v9371_v63, %v4907_v56  ;;  %13026 = vst [vmem:[#allocation82_spill] sm:$0xff] %v9412_v27  ;;  %v4182_v62 = vadd.f32 %v9401_v51, %v4061_v31  ;;  %v9426_v2 = vpop.eup %7210  ;;  %7222 = vpow2.f32 %v3669_v34  ;;  %v4256_v38 = vsub.f32 %v13031_v26, %v9325_v30  ;;  %v13034_v63 = vld [vmem:[#allocation144_spill] sm:$0xff] }
 0x2cb   : > { %13028 = vst [vmem:[#allocation98_spill] sm:$0xff] %v9420_v54  ;;  %v4377_v19 = vsub.f32 %v13032_v35, %v9325_v30  ;;  %v9432_v40 = vpop.eup %7212  ;;  %v13036_v31 = vmax.f32 %v9158_v6, %v8953_v29  ;;  %7224 = vpow2.f32 %v4998_v9  ;;  %v4032_v26 = vmul.f32 1.442695, %v4014_v42 }
 0x2cc   : > { %v5149_v56 = vadd.f32 %v9381_v8, %v5028_v46  ;;  %13030 = vst [vmem:[#allocation114_spill] sm:$0xff] %v9426_v2  ;;  %v13035_v46 = vmax.f32 %v9155_v43, %v12971_v5  ;;  %v4303_v59 = vadd.f32 %v9405_v45, %v4182_v62  ;;  %v9447_v37 = vpop.eup %7214  ;;  %7226 = vpow2.f32 %v3790_v14 }
 0x2cd   : > { %13033 = vst [vmem:[#allocation130_spill] sm:$0xff] %v9432_v40  ;;  %v9444_v34 = vmax.f32 %v13036_v31, %v9175_v17  ;;  %v4498_v35 = vsub.f32 %v12923_v20, %v9325_v30  ;;  %v4619_v43 = vsub.f32 %v12936_v44, %v9325_v30  ;;  %7228 = vpow2.f32 %v5119_v32  ;;  %v13040_v31 = vld [vmem:[#allocation21_spill] sm:$0xff]  ;;  %v13042_v32 = vld [vmem:[#allocation36_spill] sm:$0xff] }
 0x2ce   : > { %v9438_v50 = vmax.f32 %v13035_v46, %v13034_v63  ;;  %13037 = vst [vmem:[#allocation146_spill] sm:$0xff] %v9447_v37  ;;  %v9453_v46 = vpop.eup %7216  ;;  %v4424_v51 = vadd.f32 %v9412_v27, %v4303_v59  ;;  %v3457_v6 = vadd.f32 %v9447_v37, %v9432_v40  ;;  %v4153_v62 = vmul.f32 1.442695, %v4135_v48 }
 0x2cf   : > { %13038 = vst [vmem:[#allocation162_spill] sm:$0xff] %v9453_v46  ;;  %v9458_v9 = vpop.eup %7218  ;;  %7230 = vpow2.f32 %v3911_v25  ;;  %v4274_v14 = vmul.f32 1.442695, %v4256_v38  ;;  %v4395_v42 = vmul.f32 1.442695, %v4377_v19  ;;  %v3290_v20 = vsub.f32 %v13040_v31, %v9418_v55 }
 0x2d0   : > { %13039 = vst [vmem:[#allocation144_spill] sm:$0xff] %v9458_v9  ;;  %v9462_v45 = vpop.eup %7220  ;;  %7232 = vrcp.f32 %v5149_v56  ;;  %v4545_v44 = vadd.f32 %v9420_v54, %v4424_v51  ;;  %v3578_v59 = vadd.f32 %v9458_v9, %v3457_v6  ;;  %v3410_v27 = vsub.f32 %v13042_v32, %v9418_v55  ;;  %v13045_v51 = vld [vmem:[#allocation51_spill] sm:$0xff] }
 0x2d1   : > { %13041 = vst [vmem:[#allocation21_spill] sm:$0xff] %v9462_v45  ;;  %v9468_v37 = vpop.eup %7222  ;;  %7234 = vpow2.f32 %v4032_v26  ;;  %v4516_v48 = vmul.f32 1.442695, %v4498_v35  ;;  %v4637_v25 = vmul.f32 1.442695, %v4619_v43  ;;  %v4740_v38 = vsub.f32 %v12951_v47, %v9325_v30  ;;  %v13047_v43 = vld [vmem:[#allocation67_spill] sm:$0xff] }
 0x2d2   : > { %13043 = vst [vmem:[#allocation36_spill] sm:$0xff] %v9468_v37  ;;  %v9472_v19 = vpop.eup %7224  ;;  %v4666_v31 = vadd.f32 %v9426_v2, %v4545_v44  ;;  %v3699_v56 = vadd.f32 %v9468_v37, %v3578_v59  ;;  %7236 = vpow2.f32 %v4153_v62  ;;  %v3531_v6 = vsub.f32 %v13045_v51, %v9418_v55 }
 0x2d3   : > { %13044 = vst [vmem:[#allocation232_spill] sm:$0xff] %v9472_v19  ;;  %v9478_v9 = vpop.eup %7226  ;;  %7238 = vpow2.f32 %v4274_v14  ;;  %v4861_v26 = vsub.f32 %v12966_v22, %v9325_v30  ;;  %v3309_v35 = vmul.f32 1.442695, %v3290_v20  ;;  %v3652_v47 = vsub.f32 %v13047_v43, %v9418_v55  ;;  %v13050_v22 = vld [vmem:[#allocation83_spill] sm:$0xff] }
 0x2d4   : > { %13046 = vst [vmem:[#allocation51_spill] sm:$0xff] %v9478_v9  ;;  %v9484_v32 = vpop.eup %7228  ;;  %v4787_v44 = vadd.f32 %v9453_v46, %v4666_v31  ;;  %v3820_v59 = vadd.f32 %v9478_v9, %v3699_v56  ;;  %7240 = vpow2.f32 %v4395_v42  ;;  %v3429_v62 = vmul.f32 1.442695, %v3410_v27 }
 0x2d5   : > { %13048 = vst [vmem:[#allocation67_spill] sm:$0xff] %v9484_v32  ;;  %v9488_v37 = vpop.eup %7230  ;;  %7242 = vpow2.f32 %v4516_v48  ;;  %v4758_v51 = vmul.f32 1.442695, %v4740_v38  ;;  %v4982_v14 = vsub.f32 %v12978_v3, %v9325_v30  ;;  %v3773_v20 = vsub.f32 %v13050_v22, %v9418_v55 }
 0x2d6   : > { %13049 = vst [vmem:[#allocation233_spill] sm:$0xff] %v9488_v37  ;;  %v9494_v40 = vpop.eup %7232  ;;  %v4908_v43 = vadd.f32 %v9462_v45, %v4787_v44  ;;  %v3941_v31 = vadd.f32 %v9488_v37, %v3820_v59  ;;  %7244 = vpow2.f32 %v4637_v25  ;;  %v3550_v56 = vmul.f32 1.442695, %v3531_v6  ;;  %v13054_v44 = vld [vmem:[#allocation99_spill] sm:$0xff] }
 0x2d7   : > { %13051 = vst [vmem:[#allocation83_spill] sm:$0xff] %v9494_v40  ;;  %v9498_v42 = vpop.eup %7234  ;;  %v4879_v27 = vmul.f32 1.442695, %v4861_v26  ;;  %v5103_v48 = vsub.f32 %v9305_v39, %v9325_v30  ;;  %7246 = vpow2.f32 %v3309_v35  ;;  %v3671_v38 = vmul.f32 1.442695, %v3652_v47  ;;  %v9516_v35 = vpop.f32.mrf.mxu0 }
 0x2d8   : > { %13052 = vst [vmem:[#allocation234_spill] sm:$0xff] %v9498_v42  ;;  %v9502_v3 = vpop.eup %7236  ;;  %v5029_v22 = vadd.f32 %v9472_v19, %v4908_v43  ;;  %v4062_v9 = vadd.f32 %v9498_v42, %v3941_v31  ;;  %7248 = vpow2.f32 %v3429_v62  ;;  %v3894_v59 = vsub.f32 %v13054_v44, %v9418_v55  ;;  %v13058_v31 = vld [vmem:[#allocation115_spill] sm:$0xff] }
 0x2d9   : > { %13053 = vst [vmem:[#allocation235_spill] sm:$0xff] %v9502_v3  ;;  %v9508_v25 = vpop.eup %7238  ;;  %v13056_v6 = vmax.f32 %v9167_v15, %v9027_v23  ;;  %7250 = vpow2.f32 %v4758_v51  ;;  %v5000_v39 = vmul.f32 1.442695, %v4982_v14  ;;  %v3792_v30 = vmul.f32 1.442695, %v3773_v20  ;;  %v13060_v51 = vld [vmem:[#allocation131_spill] sm:$0xff] }
 0x2da   : > { %13055 = vst [vmem:[#allocation99_spill] sm:$0xff] %v9508_v25  ;;  %v9518_v47 = vpop.eup %7240  ;;  %v5150_v62 = vadd.f32 %v9484_v32, %v5029_v22  ;;  %v4183_v43 = vadd.f32 %v9502_v3, %v4062_v9  ;;  %7252 = vpow2.f32 %v3550_v56  ;;  %v4015_v44 = vsub.f32 %v13058_v31, %v9418_v55  ;;  %v13061_v20 = vld [vmem:[#allocation147_spill] sm:$0xff] }
 0x2db   : > { %v9514_v26 = vmax.f32 %v13056_v6, %v9265_v16  ;;  %13057 = vst [vmem:[#allocation236_spill] sm:$0xff] %v9518_v47  ;;  %v9524_v42 = vpop.eup %7242  ;;  %7254 = vpow2.f32 %v4879_v27  ;;  %v5121_v15 = vmul.f32 1.442695, %v5103_v48  ;;  %v4136_v14 = vsub.f32 %v13060_v51, %v9418_v55  ;;  %v13064_v27 = vld [vmem:[#allocation176_spill] sm:$0xff]  ;;  %v13067_v3 = vld [vmem:[#allocation231_spill] sm:$0xff] }
 0x2dc   : > { %13059 = vst [vmem:[#allocation115_spill] sm:$0xff] %v9524_v42  ;;  %v4257_v6 = vsub.f32 %v13061_v20, %v9418_v55  ;;  %v9530_v37 = vpop.eup %7244  ;;  %v4304_v22 = vadd.f32 %v9508_v25, %v4183_v43  ;;  %7256 = vpow2.f32 %v3671_v38  ;;  %v3913_v9 = vmul.f32 1.442695, %v3894_v59  ;;  %v13066_v20 = vld [vmem:[#allocation178_spill] sm:$0xff]  ;;  %v13069_v38 = vld [vmem:[#allocation163_spill] sm:$0xff] }
 0x2dd   : > { %13062 = vst [vmem:[#allocation131_spill] sm:$0xff] %v9530_v37  ;;  %v9535_v56 = vmax.f32 %v9273_v60, %v9516_v35  ;;  %v9537_v31 = vpop.eup %7246  ;;  %v13065_v48 = vmax.f32 %v9170_v53, %v8933_v33  ;;  %v13068_v32 = vmax.f32 %v13066_v20, %v13067_v3  ;;  %7258 = vpow2.f32 %v5000_v39  ;;  %v13071_v53 = vld [vmem:[#allocation179_spill] sm:$0xff]  ;;  %v13073_v39 = vld [vmem:[#allocation194_spill] sm:$0xff] }
 0x2de   : > { %13063 = vst [vmem:[#allocation147_spill] sm:$0xff] %v9537_v31  ;;  %v4378_v59 = vsub.f32 %v13069_v38, %v9418_v55  ;;  %v9553_v60 = vpop.eup %7248  ;;  %v4425_v43 = vadd.f32 %v9518_v47, %v4304_v22  ;;  %7260 = vpow2.f32 %v3792_v30  ;;  %v4034_v25 = vmul.f32 1.442695, %v4015_v44  ;;  %v13075_v44 = vld [vmem:[#allocation22_spill] sm:$0xff] }
 0x2df   : > { %v9543_v51 = vmax.f32 %v13065_v48, %v13064_v27  ;;  %v9549_v40 = vmax.f32 %v13068_v32, %v9117_v10  ;;  %13070 = vst [vmem:[#allocation176_spill] sm:$0xff] %v9553_v60  ;;  %v4499_v48 = vsub.f32 %v13071_v53, %v9418_v55  ;;  %v9558_v19 = vpop.eup %7250  ;;  %7262 = vpow2.f32 %v5121_v15 }
 0x2e0   : > { %13072 = vst [vmem:[#allocation178_spill] sm:$0xff] %v9558_v19  ;;  %v3458_v32 = vadd.f32 %v9553_v60, %v9537_v31  ;;  %v4155_v20 = vmul.f32 1.442695, %v4136_v14  ;;  %v4620_v45 = vsub.f32 %v13073_v39, %v9418_v55  ;;  %v9564_v38 = vpop.eup %7252  ;;  %v4546_v46 = vadd.f32 %v9524_v42, %v4425_v43  ;;  %v13077_v14 = vld [vmem:[#allocation37_spill] sm:$0xff] }
 0x2e1   : > { %13074 = vst [vmem:[#allocation231_spill] sm:$0xff] %v9564_v38  ;;  %7264 = vpow2.f32 %v3913_v9  ;;  %v4276_v30 = vmul.f32 1.442695, %v4257_v6  ;;  %v3295_v22 = vsub.f32 %v13075_v44, %v9535_v56  ;;  %v9569_v53 = vpop.eup %7254  ;;  %v4397_v47 = vmul.f32 1.442695, %v4378_v59  ;;  %v13079_v6 = vld [vmem:[#allocation212_spill] sm:$0xff] }
 0x2e2   : > { %13076 = vst [vmem:[#allocation163_spill] sm:$0xff] %v9569_v53  ;;  %7266 = vrcp.f32 %v5150_v62  ;;  %v3579_v15 = vadd.f32 %v9564_v38, %v3458_v32  ;;  %v3415_v60 = vsub.f32 %v13077_v14, %v9535_v56  ;;  %v9574_v31 = vpop.eup %7256  ;;  %v4667_v39 = vadd.f32 %v9530_v37, %v4546_v46  ;;  %v13081_v59 = vld [vmem:[#allocation52_spill] sm:$0xff]  ;;  %v13083_v46 = vld [vmem:[#allocation230_spill] sm:$0xff] }
 0x2e3   : > { %13078 = vst [vmem:[#allocation179_spill] sm:$0xff] %v9574_v31  ;;  %7268 = vpow2.f32 %v4034_v25  ;;  %v4518_v43 = vmul.f32 1.442695, %v4499_v48  ;;  %v4741_v9 = vsub.f32 %v13079_v6, %v9418_v55  ;;  %v9579_v42 = vpop.eup %7258  ;;  %v4639_v62 = vmul.f32 1.442695, %v4620_v45  ;;  %v13085_v45 = vld [vmem:[#allocation68_spill] sm:$0xff] }
 0x2e4   : > { %13080 = vst [vmem:[#allocation194_spill] sm:$0xff] %v9579_v42  ;;  %v3700_v44 = vadd.f32 %v9574_v31, %v3579_v15  ;;  %7270 = vpow2.f32 %v4155_v20  ;;  %v3536_v32 = vsub.f32 %v13081_v59, %v9535_v56  ;;  %v9584_v38 = vpop.eup %7260  ;;  %v4788_v14 = vadd.f32 %v9558_v19, %v4667_v39  ;;  %v13091_v19 = vld [vmem:[#allocation64_spill] sm:$0xff] }
 0x2e5   : > { %13082 = vst [vmem:[#allocation22_spill] sm:$0xff] %v9584_v38  ;;  %7272 = vpow2.f32 %v4276_v30  ;;  %v4862_v25 = vsub.f32 %v13083_v46, %v9418_v55  ;;  %v3319_v48 = vmul.f32 1.442695, %v3295_v22  ;;  %v9589_v37 = vpop.eup %7262  ;;  %v3439_v15 = vmul.f32 1.442695, %v3415_v60 }
 0x2e6   : > { %13084 = vst [vmem:[#allocation37_spill] sm:$0xff] %v9589_v37  ;;  %v3821_v6 = vadd.f32 %v9584_v38, %v3700_v44  ;;  %7274 = vpow2.f32 %v4397_v47  ;;  %v3657_v20 = vsub.f32 %v13085_v45, %v9535_v56  ;;  %v4909_v59 = vadd.f32 %v9569_v53, %v4788_v14  ;;  %v13088_v47 = vld [vmem:[#allocation84_spill] sm:$0xff]  ;;  %v13090_v45 = vld [vmem:[#allocation206_spill] sm:$0xff] }
 0x2e7   : > { %v9594_v31 = vpop.eup %7264  ;;  %7276 = vpow2.f32 %v4518_v43  ;;  %v4760_v39 = vmul.f32 1.442695, %v4741_v9  ;;  %v4983_v30 = vsub.f32 %v9123_v12, %v9418_v55  ;;  %v3560_v44 = vmul.f32 1.442695, %v3536_v32 }
 0x2e8   : > { %13086 = vst [vmem:[#allocation212_spill] sm:$0xff] %v9594_v31  ;;  %v9599_v46 = vpop.eup %7266  ;;  %v3942_v22 = vadd.f32 %v9594_v31, %v3821_v6  ;;  %7278 = vpow2.f32 %v4639_v62  ;;  %v3778_v60 = vsub.f32 %v13088_v47, %v9535_v56  ;;  %v13092_v14 = vmax.f32 %v13090_v45, %v13091_v19  ;;  %v13094_v6 = vld [vmem:[#allocation100_spill] sm:$0xff] }
 0x2e9   : > { %13087 = vst [vmem:[#allocation52_spill] sm:$0xff] %v9599_v46  ;;  %v9604_v38 = vpop.eup %7268  ;;  %v4881_v9 = vmul.f32 1.442695, %v4862_v25  ;;  %v5104_v12 = vsub.f32 %v9399_v1, %v9418_v55  ;;  %7280 = vpow2.f32 %v3319_v48  ;;  %v3681_v32 = vmul.f32 1.442695, %v3657_v20  ;;  %v13096_v25 = vld [vmem:[#allocation116_spill] sm:$0xff]  ;;  %v9624_v1 = vpop.f32.mrf.mxu1 }
 0x2ea   : > { %13089 = vst [vmem:[#allocation230_spill] sm:$0xff] %v9604_v38  ;;  %v9610_v43 = vmax.f32 %v13092_v14, %v9240_v36  ;;  %v9614_v53 = vpop.eup %7270  ;;  %v4063_v62 = vadd.f32 %v9604_v38, %v3942_v22  ;;  %7282 = vpow2.f32 %v3439_v15  ;;  %v3899_v47 = vsub.f32 %v13094_v6, %v9535_v56  ;;  %v13098_v48 = vld [vmem:[#allocation160_spill] sm:$0xff] }
 0x2eb   : > { %13093 = vst [vmem:[#allocation68_spill] sm:$0xff] %v9614_v53  ;;  %v9619_v31 = vpop.eup %7272  ;;  %v5030_v45 = vadd.f32 %v9579_v42, %v4909_v59  ;;  %7284 = vpow2.f32 %v4760_v39  ;;  %v5002_v14 = vmul.f32 1.442695, %v4983_v30  ;;  %v4020_v46 = vsub.f32 %v13096_v25, %v9535_v56  ;;  %v13101_v30 = vld [vmem:[#allocation132_spill] sm:$0xff] }
 0x2ec   : > { %13095 = vst [vmem:[#allocation84_spill] sm:$0xff] %v9619_v31  ;;  %v9626_v55 = vpop.eup %7274  ;;  %v13099_v15 = vmax.f32 %v9183_v41, %v13098_v48  ;;  %v4184_v22 = vadd.f32 %v9614_v53, %v4063_v62  ;;  %7286 = vpow2.f32 %v3560_v44  ;;  %v3802_v6 = vmul.f32 1.442695, %v3778_v60  ;;  %v13102_v38 = vld [vmem:[#allocation148_spill] sm:$0xff] }
 0x2ed   : > { %13097 = vst [vmem:[#allocation206_spill] sm:$0xff] %v9626_v55  ;;  %v9635_v59 = vpop.eup %7276  ;;  %7288 = vpow2.f32 %v4881_v9  ;;  %v5123_v39 = vmul.f32 1.442695, %v5104_v12  ;;  %v4141_v25 = vsub.f32 %v13101_v30, %v9535_v56  ;;  %v4262_v42 = vsub.f32 %v13102_v38, %v9535_v56  ;;  %v13104_v62 = vld [vmem:[#allocation164_spill] sm:$0xff] }
 0x2ee   : > { %v9632_v20 = vmax.f32 %v13099_v15, %v9341_v13  ;;  %13100 = vst [vmem:[#allocation64_spill] sm:$0xff] %v9635_v59  ;;  %v9641_v2 = vpop.eup %7278  ;;  %v4305_v41 = vadd.f32 %v9619_v31, %v4184_v22  ;;  %7290 = vpow2.f32 %v3681_v32  ;;  %v3923_v15 = vmul.f32 1.442695, %v3899_v47  ;;  %v13105_v32 = vld [vmem:[#allocation180_spill] sm:$0xff] }
 0x2ef   : > { %13103 = vst [vmem:[#allocation100_spill] sm:$0xff] %v9641_v2  ;;  %v9646_v44 = vmax.f32 %v9292_v18, %v9624_v1  ;;  %v9648_v60 = vpop.eup %7280  ;;  %v5151_v9 = vadd.f32 %v9589_v37, %v5030_v45  ;;  %7292 = vpow2.f32 %v5002_v14  ;;  %v4044_v12 = vmul.f32 1.442695, %v4020_v46  ;;  %v13106_v18 = vld [vmem:[#allocation195_spill] sm:$0xff] }
 0x2f0   : > { %v4383_v30 = vsub.f32 %v13104_v62, %v9535_v56  ;;  %v9653_v38 = vpop.eup %7282  ;;  %v4426_v53 = vadd.f32 %v9626_v55, %v4305_v41  ;;  %7294 = vpow2.f32 %v3802_v6  ;;  %v4504_v47 = vsub.f32 %v13105_v32, %v9535_v56  ;;  %v13108_v6 = vld [vmem:[#allocation210_spill] sm:$0xff]  ;;  %v13109_v32 = vld [vmem:[#allocation23_spill] sm:$0xff] }
 0x2f1   : > { %v4625_v22 = vsub.f32 %v13106_v18, %v9535_v56  ;;  %v9660_v31 = vpop.eup %7284  ;;  %7296 = vpow2.f32 %v5123_v39  ;;  %v3463_v46 = vadd.f32 %v9653_v38, %v9648_v60  ;;  %v4165_v45 = vmul.f32 1.442695, %v4141_v25  ;;  %v13111_v25 = vld [vmem:[#allocation38_spill] sm:$0xff] }
 0x2f2   : > { %13107 = vst [vmem:[#allocation116_spill] sm:$0xff] %v9660_v31  ;;  %v4286_v14 = vmul.f32 1.442695, %v4262_v42  ;;  %v9664_v62 = vpop.eup %7286  ;;  %v4547_v37 = vadd.f32 %v9635_v59, %v4426_v53  ;;  %7298 = vpow2.f32 %v3923_v15  ;;  %v4746_v41 = vsub.f32 %v13108_v6, %v9535_v56 }
 0x2f3   : > { %v3296_v55 = vsub.f32 %v13109_v32, %v9646_v44  ;;  %v9671_v18 = vpop.eup %7288  ;;  %7300 = vrcp.f32 %v5151_v9  ;;  %v3584_v39 = vadd.f32 %v9664_v62, %v3463_v46  ;;  %v4407_v54 = vmul.f32 1.442695, %v4383_v30  ;;  %v13113_v9 = vld [vmem:[#allocation224_spill] sm:$0xff]  ;;  %v13114_v30 = vld [vmem:[#allocation53_spill] sm:$0xff] }
 0x2f4   : > { %13110 = vst [vmem:[#allocation132_spill] sm:$0xff] %v9671_v18  ;;  %v3416_v42 = vsub.f32 %v13111_v25, %v9646_v44  ;;  %v9676_v8 = vpop.eup %7290  ;;  %v4668_v53 = vadd.f32 %v9641_v2, %v4547_v37  ;;  %7302 = vpow2.f32 %v4044_v12  ;;  %v4528_v15 = vmul.f32 1.442695, %v4504_v47 }
 0x2f5   : > { %v4649_v6 = vmul.f32 1.442695, %v4625_v22  ;;  %v9679_v59 = vpop.eup %7292  ;;  %v3705_v32 = vadd.f32 %v9676_v8, %v3584_v39  ;;  %7304 = vpow2.f32 %v4165_v45  ;;  %v4867_v46 = vsub.f32 %v13113_v9, %v9535_v56  ;;  %v9695_v45 = vld [vmem:[%s8068_s21 + $0x3e0] sm:$0xff]  ;;  %v13116_v9 = vld [vmem:[#allocation69_spill] sm:$0xff] }
 0x2f6   : > { %13112 = vst [vmem:[#allocation148_spill] sm:$0xff] %v9679_v59  ;;  %v3537_v7 = vsub.f32 %v13114_v30, %v9646_v44  ;;  %v9686_v25 = vpop.eup %7294  ;;  %v4789_v11 = vadd.f32 %v9660_v31, %v4668_v53  ;;  %7306 = vpow2.f32 %v4286_v14  ;;  %v4988_v37 = vsub.f32 %v12983_v28, %v9535_v56  ;;  %v13118_v28 = vld [vmem:[#allocation85_spill] sm:$0xff] }
 0x2f7   : > { %v3321_v12 = vmul.f32 1.442695, %v3296_v55  ;;  %v9691_v47 = vpop.eup %7296  ;;  %v3826_v22 = vadd.f32 %v9686_v25, %v3705_v32  ;;  %7308 = vpow2.f32 %v4407_v54  ;;  %v3441_v39 = vmul.f32 1.442695, %v3416_v42 }
 0x2f8   : > { %13115 = vst [vmem:[#allocation164_spill] sm:$0xff] %v9691_v47  ;;  %v3658_v30 = vsub.f32 %v13116_v9, %v9646_v44  ;;  %v9699_v2 = vpop.eup %7298  ;;  %v4910_v53 = vadd.f32 %v9671_v18, %v4789_v11  ;;  %7310 = vpow2.f32 %v4528_v15  ;;  %v4770_v14 = vmul.f32 1.442695, %v4746_v41  ;;  %v13121_v11 = vld [vmem:[#allocation101_spill] sm:$0xff] }
 0x2f9   : > { %13117 = vst [vmem:[#allocation180_spill] sm:$0xff] %v9699_v2  ;;  %v3779_v55 = vsub.f32 %v13118_v28, %v9646_v44  ;;  %v9704_v31 = vpop.eup %7300  ;;  %v3947_v32 = vadd.f32 %v9699_v2, %v3826_v22  ;;  %7312 = vpow2.f32 %v4649_v6  ;;  %v5109_v54 = vsub.f32 %v9516_v35, %v9535_v56  ;;  %v13124_v56 = vld [vmem:[#allocation117_spill] sm:$0xff] }
 0x2fa   : > { %13119 = vst [vmem:[#allocation195_spill] sm:$0xff] %v9704_v31  ;;  %v3562_v42 = vmul.f32 1.442695, %v3537_v7  ;;  %v9709_v0 = vpop.eup %7302  ;;  %v4891_v9 = vmul.f32 1.442695, %v4867_v46  ;;  %7314 = vpow2.f32 %v3321_v12  ;;  %v3900_v41 = vsub.f32 %v13121_v11, %v9646_v44  ;;  %v9722_v12 = vpop.f32.mrf.mxu2 }
 0x2fb   : > { %13120 = vst [vmem:[#allocation210_spill] sm:$0xff] %v9709_v0  ;;  %v9714_v15 = vpop.eup %7304  ;;  %v4068_v28 = vadd.f32 %v9709_v0, %v3947_v32  ;;  %v5012_v31 = vmul.f32 1.442695, %v4988_v37  ;;  %7316 = vpow2.f32 %v3441_v39  ;;  %v3683_v6 = vmul.f32 1.442695, %v3658_v30  ;;  %v13126_v37 = vld [vmem:[#allocation133_spill] sm:$0xff] }
 0x2fc   : > { %13122 = vst [vmem:[#allocation23_spill] sm:$0xff] %v9714_v15  ;;  %v9717_v22 = vpop.eup %7306  ;;  %v5031_v7 = vadd.f32 %v9679_v59, %v4910_v53  ;;  %7318 = vpow2.f32 %v4770_v14  ;;  %v3804_v35 = vmul.f32 1.442695, %v3779_v55  ;;  %v4021_v46 = vsub.f32 %v13124_v56, %v9646_v44  ;;  %v13127_v30 = vld [vmem:[#allocation149_spill] sm:$0xff] }
 0x2fd   : > { %13123 = vst [vmem:[#allocation38_spill] sm:$0xff] %v9717_v22  ;;  %v9724_v13 = vpop.eup %7308  ;;  %v4189_v11 = vadd.f32 %v9714_v15, %v4068_v28  ;;  %7320 = vpow2.f32 %v3562_v42  ;;  %v4142_v39 = vsub.f32 %v13126_v37, %v9646_v44  ;;  %v4263_v32 = vsub.f32 %v13127_v30, %v9646_v44  ;;  %v13129_v55 = vld [vmem:[#allocation165_spill] sm:$0xff] }
 0x2fe   : > { %13125 = vst [vmem:[#allocation224_spill] sm:$0xff] %v9724_v13  ;;  %v9731_v18 = vpop.eup %7310  ;;  %7322 = vpow2.f32 %v4891_v9  ;;  %v5133_v53 = vmul.f32 1.442695, %v5109_v54  ;;  %v3925_v14 = vmul.f32 1.442695, %v3900_v41  ;;  %v4384_v56 = vsub.f32 %v13129_v55, %v9646_v44  ;;  %v13131_v42 = vld [vmem:[#allocation181_spill] sm:$0xff] }
 0x2ff   : > { %13128 = vst [vmem:[#allocation53_spill] sm:$0xff] %v9731_v18  ;;  %v9735_v59 = vpop.eup %7312  ;;  %v4310_v0 = vadd.f32 %v9717_v22, %v4189_v11  ;;  %7324 = vpow2.f32 %v3683_v6  ;;  %v4505_v28 = vsub.f32 %v13131_v42, %v9646_v44  ;;  %v9742_v37 = vmax.f32 %v9301_v58, %v9722_v12  ;;  %v13133_v41 = vld [vmem:[#allocation196_spill] sm:$0xff] }
 0x300   : > { %13130 = vst [vmem:[#allocation69_spill] sm:$0xff] %v9735_v59  ;;  %v9744_v30 = vpop.eup %7314  ;;  %v5152_v54 = vadd.f32 %v9691_v47, %v5031_v7  ;;  %7326 = vpow2.f32 %v5012_v31  ;;  %v4046_v9 = vmul.f32 1.442695, %v4021_v46  ;;  %v4626_v55 = vsub.f32 %v13133_v41, %v9646_v44  ;;  %v13136_v31 = vld [vmem:[#allocation211_spill] sm:$0xff] }
 0x301   : > { %13132 = vst [vmem:[#allocation85_spill] sm:$0xff] %v9744_v30  ;;  %v9749_v15 = vpop.eup %7316  ;;  %v4431_v6 = vadd.f32 %v9724_v13, %v4310_v0  ;;  %7328 = vpow2.f32 %v3804_v35  ;;  %v4167_v11 = vmul.f32 1.442695, %v4142_v39  ;;  %v4288_v42 = vmul.f32 1.442695, %v4263_v32  ;;  %v13138_v0 = vld [vmem:[#allocation24_spill] sm:$0xff] }
 0x302   : > { %13134 = vst [vmem:[#allocation101_spill] sm:$0xff] %v9749_v15  ;;  %v9752_v22 = vpop.eup %7318  ;;  %7330 = vpow2.f32 %v5133_v53  ;;  %v3464_v58 = vadd.f32 %v9749_v15, %v9744_v30  ;;  %v4409_v48 = vmul.f32 1.442695, %v4384_v56  ;;  %v4747_v7 = vsub.f32 %v13136_v31, %v9646_v44  ;;  %v13140_v56 = vld [vmem:[#allocation39_spill] sm:$0xff] }
 0x303   : > { %13135 = vst [vmem:[#allocation117_spill] sm:$0xff] %v9752_v22  ;;  %v9758_v46 = vpop.eup %7320  ;;  %v4552_v41 = vadd.f32 %v9731_v18, %v4431_v6  ;;  %7332 = vpow2.f32 %v3925_v14  ;;  %v4530_v47 = vmul.f32 1.442695, %v4505_v28  ;;  %v3297_v35 = vsub.f32 %v13138_v0, %v9742_v37  ;;  %v13142_v28 = vld [vmem:[#allocation96_spill] sm:$0xff] }
 0x304   : > { %13137 = vst [vmem:[#allocation133_spill] sm:$0xff] %v9758_v46  ;;  %v9763_v39 = vpop.eup %7322  ;;  %7334 = vrcp.f32 %v5152_v54  ;;  %v3585_v32 = vadd.f32 %v9758_v46, %v3464_v58  ;;  %v4651_v53 = vmul.f32 1.442695, %v4626_v55  ;;  %v3417_v15 = vsub.f32 %v13140_v56, %v9742_v37  ;;  %v13144_v58 = vld [vmem:[#allocation54_spill] sm:$0xff] }
 0x305   : > { %13139 = vst [vmem:[#allocation149_spill] sm:$0xff] %v9763_v39  ;;  %v9768_v30 = vpop.eup %7324  ;;  %v4673_v31 = vadd.f32 %v9735_v59, %v4552_v41  ;;  %7336 = vpow2.f32 %v4046_v9  ;;  %v4868_v14 = vsub.f32 %v12968_v61, %v9646_v44  ;;  %v4989_v6 = vsub.f32 %v13142_v28, %v9646_v44  ;;  %v13146_v41 = vld [vmem:[#allocation70_spill] sm:$0xff] }
 0x306   : > { %13141 = vst [vmem:[#allocation165_spill] sm:$0xff] %v9768_v30  ;;  %v9775_v0 = vpop.eup %7326  ;;  %v3706_v54 = vadd.f32 %v9768_v30, %v3585_v32  ;;  %7338 = vpow2.f32 %v4167_v11  ;;  %v5110_v55 = vsub.f32 %v9624_v1, %v9646_v44  ;;  %v3538_v56 = vsub.f32 %v13144_v58, %v9742_v37 }
 0x307   : > { %13143 = vst [vmem:[#allocation181_spill] sm:$0xff] %v9775_v0  ;;  %v9782_v46 = vpop.eup %7328  ;;  %v4794_v9 = vadd.f32 %v9752_v22, %v4673_v31  ;;  %7340 = vpow2.f32 %v4288_v42  ;;  %v3323_v61 = vmul.f32 1.442695, %v3297_v35  ;;  %v3659_v28 = vsub.f32 %v13146_v41, %v9742_v37  ;;  %v13148_v31 = vld [vmem:[#allocation86_spill] sm:$0xff] }
 0x308   : > { %13145 = vst [vmem:[#allocation196_spill] sm:$0xff] %v9782_v46  ;;  %v7331_v59 = vpop.eup %7330  ;;  %v3827_v18 = vadd.f32 %v9782_v46, %v3706_v54  ;;  %7342 = vpow2.f32 %v4409_v48  ;;  %v4772_v11 = vmul.f32 1.442695, %v4747_v7  ;;  %v3443_v32 = vmul.f32 1.442695, %v3417_v15 }
 0x309   : > { %v9788_v30 = vpop.eup %7332  ;;  %v4915_v1 = vadd.f32 %v9763_v39, %v4794_v9  ;;  %7344 = vpow2.f32 %v4530_v47  ;;  %v3780_v42 = vsub.f32 %v13148_v31, %v9742_v37  ;;  %v4893_v41 = vmul.f32 1.442695, %v4868_v14  ;;  %v13152_v31 = vld [vmem:[#allocation102_spill] sm:$0xff] }
 0x30a   : > { %13147 = vst [vmem:[#allocation211_spill] sm:$0xff] %v9788_v30  ;;  %v9794_v35 = vpop.eup %7334  ;;  %v3948_v58 = vadd.f32 %v9788_v30, %v3827_v18  ;;  %7346 = vpow2.f32 %v4651_v53  ;;  %v3564_v54 = vmul.f32 1.442695, %v3538_v56  ;;  %v5014_v15 = vmul.f32 1.442695, %v4989_v6  ;;  %v9806_v53 = vpop.f32.mrf.mxu3  ;;  %v13154_v56 = vld [vmem:[#allocation134_spill] sm:$0xff] }
 0x30b   : > { %13149 = vst [vmem:[#allocation24_spill] sm:$0xff] %v9794_v35  ;;  %v9797_v48 = vpop.eup %7336  ;;  %v5135_v7 = vmul.f32 1.442695, %v5110_v55  ;;  %7348 = vpow2.f32 %v3323_v61  ;;  %v3685_v46 = vmul.f32 1.442695, %v3659_v28  ;;  %v3901_v44 = vsub.f32 %v13152_v31, %v9742_v37  ;;  %v13153_v35 = vld [vmem:[#allocation118_spill] sm:$0xff] }
 0x30c   : > { %13150 = vst [vmem:[#allocation39_spill] sm:$0xff] %v9797_v48  ;;  %v9799_v9 = vpop.eup %7338  ;;  %v4069_v47 = vadd.f32 %v9797_v48, %v3948_v58  ;;  %7350 = vpow2.f32 %v3443_v32  ;;  %v4022_v18 = vsub.f32 %v13153_v35, %v9742_v37  ;;  %v5036_v6 = vadd.f32 %v9775_v0, %v4915_v1  ;;  %v13155_v58 = vld [vmem:[#allocation150_spill] sm:$0xff] }
 0x30d   : > { %13151 = vst [vmem:[#allocation96_spill] sm:$0xff] %v9799_v9  ;;  %v9808_v14 = vpop.eup %7340  ;;  %7352 = vpow2.f32 %v4772_v11  ;;  %v3806_v55 = vmul.f32 1.442695, %v3780_v42  ;;  %v4143_v61 = vsub.f32 %v13154_v56, %v9742_v37  ;;  %v4264_v31 = vsub.f32 %v13155_v58, %v9742_v37  ;;  %v13156_v35 = vld [vmem:[#allocation166_spill] sm:$0xff] }
 0x30e   : > { %v9813_v28 = vpop.eup %7342  ;;  %v4190_v32 = vadd.f32 %v9799_v9, %v4069_v47  ;;  %7354 = vpow2.f32 %v3564_v54  ;;  %v4385_v48 = vsub.f32 %v13156_v35, %v9742_v37  ;;  %v13158_v1 = vunpack.c.l.bf16 %v9695_v45  ;;  %v13160_v42 = vld [vmem:[#allocation182_spill] sm:$0xff] }
 0x30f   : > { %v9820_v30 = vpop.eup %7344  ;;  %7356 = vpow2.f32 %v4893_v41  ;;  %v4506_v56 = vsub.f32 %v13160_v42, %v9742_v37  ;;  %v9830_v47 = vmax.f32 %v9339_v52, %v9806_v53  ;;  %v3927_v35 = vmul.f32 1.442695, %v3901_v44  ;;  %v13163_v41 = vld [vmem:[#allocation197_spill] sm:$0xff] }
 0x310   : > { %13157 = vst [vmem:[#allocation54_spill] sm:$0xff] %v9820_v30  ;;  %v9824_v11 = vmul.f32 %v7331_v59, %v13158_v1  ;;  %v9832_v54 = vpop.eup %7346  ;;  %v4311_v58 = vadd.f32 %v9808_v14, %v4190_v32  ;;  %7358 = vpow2.f32 %v3685_v46  ;;  %v4048_v9 = vmul.f32 1.442695, %v4022_v18 }
 0x311   : > { %13161 = vst [vmem:[#allocation86_spill] sm:$0xff] %v9832_v54  ;;  %v9835_v0 = vpop.eup %7348  ;;  %v5157_v39 = vadd.f32 %v7331_v59, %v5036_v6  ;;  %7360 = vpow2.f32 %v5014_v15  ;;  %v4169_v1 = vmul.f32 1.442695, %v4143_v61  ;;  %v4290_v22 = vmul.f32 1.442695, %v4264_v31  ;;  %v13166_v59 = vld [vmem:[#allocation213_spill] sm:$0xff] }
 0x312   : > { %13159 = vst [vmem:[#allocation70_spill] sm:$0xff] %v9824_v11  ;;  %v4627_v11 = vsub.f32 %v13163_v41, %v9742_v37  ;;  %v9839_v42 = vpop.eup %7350  ;;  %v4432_v52 = vadd.f32 %v9813_v28, %v4311_v58  ;;  %7362 = vpow2.f32 %v3806_v55  ;;  %v4411_v13 = vmul.f32 1.442695, %v4385_v48  ;;  %v13168_v61 = vld [vmem:[#allocation229_spill] sm:$0xff]  ;;  %v13171_v58 = vld [vmem:[#allocation40_spill] sm:$0xff] }
 0x313   : > { %13162 = vst [vmem:[#allocation102_spill] sm:$0xff] %v9835_v0  ;;  %v9842_v2 = vpop.eup %7352  ;;  %7364 = vpow2.f32 %v5135_v7  ;;  %v3465_v46 = vadd.f32 %v9839_v42, %v9835_v0  ;;  %v4532_v44 = vmul.f32 1.442695, %v4506_v56  ;;  %v4748_v15 = vsub.f32 %v13166_v59, %v9742_v37  ;;  %v13169_v48 = vld [vmem:[#allocation25_spill] sm:$0xff] }
 0x314   : > { %13164 = vst [vmem:[#allocation118_spill] sm:$0xff] %v9839_v42  ;;  %v9848_v18 = vpop.eup %7354  ;;  %v4553_v6 = vadd.f32 %v9820_v30, %v4432_v52  ;;  %7366 = vpow2.f32 %v3927_v35  ;;  %v4869_v55 = vsub.f32 %v13168_v61, %v9742_v37  ;;  %v3298_v32 = vsub.f32 %v13169_v48, %v9830_v47  ;;  %v13173_v35 = vld [vmem:[#allocation177_spill] sm:$0xff] }
 0x315   : > { %13165 = vst [vmem:[#allocation134_spill] sm:$0xff] %v9842_v2  ;;  %v9855_v31 = vpop.eup %7356  ;;  %7368 = vrcp.f32 %v5157_v39  ;;  %v3586_v7 = vadd.f32 %v9848_v18, %v3465_v46  ;;  %v4653_v56 = vmul.f32 1.442695, %v4627_v11  ;;  %v3418_v41 = vsub.f32 %v13171_v58, %v9830_v47  ;;  %v13175_v46 = vld [vmem:[#allocation55_spill] sm:$0xff] }
 0x316   : > { %13167 = vst [vmem:[#allocation150_spill] sm:$0xff] %v9848_v18  ;;  %v9860_v59 = vpop.eup %7358  ;;  %v4674_v52 = vadd.f32 %v9832_v54, %v4553_v6  ;;  %7370 = vpow2.f32 %v4048_v9  ;;  %v4990_v61 = vsub.f32 %v13173_v35, %v9742_v37  ;;  %v5111_v48 = vsub.f32 %v9722_v12, %v9742_v37  ;;  %v9877_v12 = vld [vmem:[%s8068_s21 + $0x3e8] sm:$0xff] }
 0x317   : > { %13170 = vst [vmem:[#allocation166_spill] sm:$0xff] %v9855_v31  ;;  %v9867_v42 = vpop.eup %7360  ;;  %v3707_v39 = vadd.f32 %v9860_v59, %v3586_v7  ;;  %7372 = vpow2.f32 %v4169_v1  ;;  %v4774_v11 = vmul.f32 1.442695, %v4748_v15  ;;  %v3539_v58 = vsub.f32 %v13175_v46, %v9830_v47  ;;  %v13177_v1 = vld [vmem:[#allocation71_spill] sm:$0xff] }
 0x318   : > { %13172 = vst [vmem:[#allocation182_spill] sm:$0xff] %v9860_v59  ;;  %v9872_v18 = vpop.eup %7362  ;;  %v4795_v9 = vadd.f32 %v9842_v2, %v4674_v52  ;;  %7374 = vpow2.f32 %v4290_v22  ;;  %v4895_v6 = vmul.f32 1.442695, %v4869_v55  ;;  %v3325_v0 = vmul.f32 1.442695, %v3298_v32  ;;  %v9910_v2 = vpop.f32.mrf.mxu0 }
 0x319   : > { %13174 = vst [vmem:[#allocation197_spill] sm:$0xff] %v9867_v42  ;;  %v7365_v35 = vpop.eup %7364  ;;  %v3828_v54 = vadd.f32 %v9872_v18, %v3707_v39  ;;  %7376 = vpow2.f32 %v4411_v13  ;;  %v3445_v37 = vmul.f32 1.442695, %v3418_v41  ;;  %v3660_v15 = vsub.f32 %v13177_v1, %v9830_v47  ;;  %v13179_v13 = vld [vmem:[#allocation87_spill] sm:$0xff] }
 0x31a   : > { %13176 = vst [vmem:[#allocation213_spill] sm:$0xff] %v9872_v18  ;;  %v9881_v7 = vpop.eup %7366  ;;  %v4916_v46 = vadd.f32 %v9855_v31, %v4795_v9  ;;  %7378 = vpow2.f32 %v4532_v44  ;;  %v5016_v59 = vmul.f32 1.442695, %v4990_v61  ;;  %v5137_v52 = vmul.f32 1.442695, %v5111_v48  ;;  %v13181_v18 = vld [vmem:[#allocation103_spill] sm:$0xff] }
 0x31b   : > { %13178 = vst [vmem:[#allocation229_spill] sm:$0xff] %v9881_v7  ;;  %v9884_v22 = vpop.eup %7368  ;;  %v3949_v55 = vadd.f32 %v9881_v7, %v3828_v54  ;;  %7380 = vpow2.f32 %v4653_v56  ;;  %v3566_v32 = vmul.f32 1.442695, %v3539_v58  ;;  %v3781_v39 = vsub.f32 %v13179_v13, %v9830_v47  ;;  %v13182_v44 = vld [vmem:[#allocation119_spill] sm:$0xff] }
 0x31c   : > { %v9889_v41 = vpop.eup %7370  ;;  %7382 = vpow2.f32 %v3325_v0  ;;  %v3902_v9 = vsub.f32 %v13181_v18, %v9830_v47  ;;  %v4023_v61 = vsub.f32 %v13182_v44, %v9830_v47  ;;  %v3687_v56 = vmul.f32 1.442695, %v3660_v15  ;;  %v13184_v58 = vld [vmem:[#allocation135_spill] sm:$0xff] }
 0x31d   : > { %13180 = vst [vmem:[#allocation25_spill] sm:$0xff] %v9889_v41  ;;  %v9896_v48 = vpop.eup %7372  ;;  %v4070_v54 = vadd.f32 %v9889_v41, %v3949_v55  ;;  %7384 = vpow2.f32 %v3445_v37  ;;  %v4144_v13 = vsub.f32 %v13184_v58, %v9830_v47  ;;  %v5037_v1 = vadd.f32 %v9867_v42, %v4916_v46  ;;  %v13188_v18 = vld [vmem:[#allocation151_spill] sm:$0xff] }
 0x31e   : > { %13183 = vst [vmem:[#allocation40_spill] sm:$0xff] %v9896_v48  ;;  %v9901_v7 = vpop.eup %7374  ;;  %v13186_v0 = vunpack.c.h.bf16 %v9695_v45  ;;  %7386 = vpow2.f32 %v4774_v11  ;;  %v4265_v44 = vsub.f32 %v13188_v18, %v9830_v47  ;;  %v3808_v15 = vmul.f32 1.442695, %v3781_v39  ;;  %v13190_v58 = vld [vmem:[#allocation167_spill] sm:$0xff] }
 0x31f   : > { %13185 = vst [vmem:[#allocation177_spill] sm:$0xff] %v9901_v7  ;;  %v9912_v55 = vpop.eup %7376  ;;  %v4191_v37 = vadd.f32 %v9896_v48, %v4070_v54  ;;  %7388 = vpow2.f32 %v3566_v32  ;;  %v4386_v41 = vsub.f32 %v13190_v58, %v9830_v47  ;;  %v3929_v45 = vmul.f32 1.442695, %v3902_v9  ;;  %v13192_v11 = vld [vmem:[#allocation183_spill] sm:$0xff] }
 0x320   : > { %v9906_v31 = vmul.f32 %v7365_v35, %v13186_v0  ;;  %13189 = vst [vmem:[#allocation71_spill] sm:$0xff] %v9912_v55  ;;  %v9917_v46 = vpop.eup %7378  ;;  %7390 = vpow2.f32 %v4895_v6  ;;  %v4050_v0 = vmul.f32 1.442695, %v4023_v61  ;;  %v13194_v54 = vld [vmem:[#allocation199_spill] sm:$0xff]  ;;  %v9928_v39 = vmax.f32 %v9391_v24, %v9910_v2  ;;  %v13195_v61 = vld [vmem:[#allocation218_spill] sm:$0xff] }
 0x321   : > { %13191 = vst [vmem:[#allocation87_spill] sm:$0xff] %v9917_v46  ;;  %v9921_v18 = vpop.eup %7380  ;;  %v4312_v42 = vadd.f32 %v9901_v7, %v4191_v37  ;;  %7392 = vpow2.f32 %v3687_v56  ;;  %v4628_v32 = vsub.f32 %v13194_v54, %v9830_v47  ;;  %v5158_v6 = vadd.f32 %v7365_v35, %v5037_v1 }
 0x322   : > { %13187 = vst [vmem:[#allocation55_spill] sm:$0xff] %v9906_v31  ;;  %v4507_v31 = vsub.f32 %v13192_v11, %v9830_v47  ;;  %v9930_v58 = vpop.eup %7382  ;;  %7394 = vpow2.f32 %v5016_v59  ;;  %v4171_v9 = vmul.f32 1.442695, %v4144_v13  ;;  %v4749_v11 = vsub.f32 %v13195_v61, %v9830_v47 }
 0x323   : > { %13193 = vst [vmem:[#allocation103_spill] sm:$0xff] %v9921_v18  ;;  %v9934_v48 = vpop.eup %7384  ;;  %v4433_v37 = vadd.f32 %v9912_v55, %v4312_v42  ;;  %7396 = vpow2.f32 %v3808_v15  ;;  %v4292_v56 = vmul.f32 1.442695, %v4265_v44  ;;  %v4413_v7 = vmul.f32 1.442695, %v4386_v41  ;;  %v13199_v42 = vld [vmem:[#allocation26_spill] sm:$0xff] }
 0x324   : > { %13196 = vst [vmem:[#allocation119_spill] sm:$0xff] %v9934_v48  ;;  %v9937_v54 = vpop.eup %7386  ;;  %7398 = vpow2.f32 %v5137_v52  ;;  %v3466_v24 = vadd.f32 %v9934_v48, %v9930_v58  ;;  %v4534_v30 = vmul.f32 1.442695, %v4507_v31  ;;  %v4870_v59 = vsub.f32 %v8977_v49, %v9830_v47  ;;  %v13201_v31 = vld [vmem:[#allocation41_spill] sm:$0xff] }
 0x325   : > { %13197 = vst [vmem:[#allocation135_spill] sm:$0xff] %v9937_v54  ;;  %v9943_v35 = vpop.eup %7388  ;;  %v4554_v1 = vadd.f32 %v9917_v46, %v4433_v37  ;;  %7400 = vpow2.f32 %v3929_v45  ;;  %v4655_v13 = vmul.f32 1.442695, %v4628_v32  ;;  %v3291_v44 = vsub.f32 %v13199_v42, %v9928_v39 }
 0x326   : > { %13198 = vst [vmem:[#allocation151_spill] sm:$0xff] %v9943_v35  ;;  %v9948_v41 = vpop.eup %7390  ;;  %7402 = vrcp.f32 %v5158_v6  ;;  %v3587_v52 = vadd.f32 %v9943_v35, %v3466_v24  ;;  %v4776_v15 = vmul.f32 1.442695, %v4749_v11  ;;  %v3411_v61 = vsub.f32 %v13201_v31, %v9928_v39  ;;  %v13204_v24 = vld [vmem:[#allocation56_spill] sm:$0xff] }
 0x327   : > { %13200 = vst [vmem:[#allocation167_spill] sm:$0xff] %v9948_v41  ;;  %v9953_v55 = vpop.eup %7392  ;;  %v4675_v49 = vadd.f32 %v9921_v18, %v4554_v1  ;;  %7404 = vpow2.f32 %v4050_v0  ;;  %v4991_v45 = vsub.f32 %v9207_v21, %v9830_v47  ;;  %v5112_v32 = vsub.f32 %v9806_v53, %v9830_v47 }
 0x328   : > { %13202 = vst [vmem:[#allocation183_spill] sm:$0xff] %v9953_v55  ;;  %v9960_v37 = vpop.eup %7394  ;;  %v3708_v6 = vadd.f32 %v9953_v55, %v3587_v52  ;;  %7406 = vpow2.f32 %v4171_v9  ;;  %v4897_v11 = vmul.f32 1.442695, %v4870_v59  ;;  %v3532_v42 = vsub.f32 %v13204_v24, %v9928_v39  ;;  %v13206_v52 = vld [vmem:[#allocation72_spill] sm:$0xff]  ;;  %v9972_v59 = vpop.f32.mrf.mxu1 }
 0x329   : > { %13203 = vst [vmem:[#allocation199_spill] sm:$0xff] %v9960_v37  ;;  %v9965_v31 = vpop.eup %7396  ;;  %v4796_v1 = vadd.f32 %v9937_v54, %v4675_v49  ;;  %7408 = vpow2.f32 %v4292_v56  ;;  %v3311_v21 = vmul.f32 1.442695, %v3291_v44  ;;  %v3431_v47 = vmul.f32 1.442695, %v3411_v61 }
 0x32a   : > { %13205 = vst [vmem:[#allocation218_spill] sm:$0xff] %v9965_v31  ;;  %v7399_v18 = vpop.eup %7398  ;;  %v3829_v53 = vadd.f32 %v9965_v31, %v3708_v6  ;;  %7410 = vpow2.f32 %v4413_v7  ;;  %v3653_v9 = vsub.f32 %v13206_v52, %v9928_v39  ;;  %v5018_v49 = vmul.f32 1.442695, %v4991_v45  ;;  %v13208_v7 = vld [vmem:[#allocation88_spill] sm:$0xff] }
 0x32b   : > { %v9974_v46 = vpop.eup %7400  ;;  %v4917_v24 = vadd.f32 %v9948_v41, %v4796_v1  ;;  %7412 = vpow2.f32 %v4534_v30  ;;  %v5139_v56 = vmul.f32 1.442695, %v5112_v32  ;;  %v3552_v6 = vmul.f32 1.442695, %v3532_v42  ;;  %v13210_v52 = vld [vmem:[#allocation104_spill] sm:$0xff] }
 0x32c   : > { %13207 = vst [vmem:[#allocation26_spill] sm:$0xff] %v9974_v46  ;;  %v9977_v54 = vpop.eup %7402  ;;  %v3950_v44 = vadd.f32 %v9974_v46, %v3829_v53  ;;  %7414 = vpow2.f32 %v4655_v13  ;;  %v3774_v61 = vsub.f32 %v13208_v7, %v9928_v39  ;;  %v3895_v31 = vsub.f32 %v13210_v52, %v9928_v39  ;;  %v13211_v1 = vld [vmem:[#allocation120_spill] sm:$0xff] }
 0x32d   : > { %v9982_v0 = vpop.eup %7404  ;;  %7416 = vpow2.f32 %v3311_v21  ;;  %v4016_v30 = vsub.f32 %v13211_v1, %v9928_v39  ;;  %v9990_v45 = vmax.f32 %v9438_v50, %v9972_v59  ;;  %v3673_v42 = vmul.f32 1.442695, %v3653_v9  ;;  %v13213_v53 = vld [vmem:[#allocation136_spill] sm:$0xff] }
 0x32e   : > { %13209 = vst [vmem:[#allocation41_spill] sm:$0xff] %v9982_v0  ;;  %v9992_v32 = vpop.eup %7406  ;;  %v4071_v13 = vadd.f32 %v9982_v0, %v3950_v44  ;;  %7418 = vpow2.f32 %v3431_v47  ;;  %v4137_v7 = vsub.f32 %v13213_v53, %v9928_v39  ;;  %v5038_v52 = vadd.f32 %v9960_v37, %v4917_v24  ;;  %v13216_v50 = vld [vmem:[#allocation152_spill] sm:$0xff] }
 0x32f   : > { %13212 = vst [vmem:[#allocation56_spill] sm:$0xff] %v9992_v32  ;;  %v9997_v21 = vpop.eup %7408  ;;  %v13214_v41 = vunpack.c.l.bf16 %v9877_v12  ;;  %7420 = vpow2.f32 %v4776_v15  ;;  %v4258_v46 = vsub.f32 %v13216_v50, %v9928_v39  ;;  %v3794_v9 = vmul.f32 1.442695, %v3774_v61  ;;  %v13217_v44 = vld [vmem:[#allocation168_spill] sm:$0xff] }
 0x330   : > { %v10006_v55 = vpop.eup %7410  ;;  %v4192_v47 = vadd.f32 %v9992_v32, %v4071_v13  ;;  %7422 = vpow2.f32 %v3552_v6  ;;  %v4379_v53 = vsub.f32 %v13217_v44, %v9928_v39  ;;  %v3915_v24 = vmul.f32 1.442695, %v3895_v31  ;;  %v13219_v6 = vld [vmem:[#allocation198_spill] sm:$0xff] }
 0x331   : > { %v10002_v1 = vmul.f32 %v7399_v18, %v13214_v41  ;;  %v10011_v0 = vpop.eup %7412  ;;  %7424 = vpow2.f32 %v4897_v11  ;;  %v4036_v37 = vmul.f32 1.442695, %v4016_v30  ;;  %v13218_v41 = vld [vmem:[#allocation184_spill] sm:$0xff]  ;;  %v4157_v35 = vmul.f32 1.442695, %v4137_v7  ;;  %v13221_v11 = vld [vmem:[#allocation214_spill] sm:$0xff] }
 0x332   : > { %v4500_v15 = vsub.f32 %v13218_v41, %v9928_v39  ;;  %v4313_v50 = vadd.f32 %v9997_v21, %v4192_v47  ;;  %7426 = vpow2.f32 %v3673_v42  ;;  %v4621_v61 = vsub.f32 %v13219_v6, %v9928_v39 }
 0x333   : > { %13215 = vst [vmem:[#allocation72_spill] sm:$0xff] %v10002_v1  ;;  %v10015_v1 = vpop.eup %7414  ;;  %v5159_v44 = vadd.f32 %v7399_v18, %v5038_v52  ;;  %7428 = vpow2.f32 %v5018_v49  ;;  %v4278_v32 = vmul.f32 1.442695, %v4258_v46  ;;  %v4742_v31 = vsub.f32 %v13221_v11, %v9928_v39  ;;  %v13224_v46 = vld [vmem:[#allocation27_spill] sm:$0xff] }
 0x334   : > { %v10020_v13 = vpop.eup %7416  ;;  %v4434_v41 = vadd.f32 %v10006_v55, %v4313_v50  ;;  %7430 = vpow2.f32 %v3794_v9  ;;  %v4399_v48 = vmul.f32 1.442695, %v4379_v53  ;;  %v4863_v42 = vsub.f32 %v12970_v4, %v9928_v39 }
 0x335   : > { %13220 = vst [vmem:[#allocation88_spill] sm:$0xff] %v10020_v13  ;;  %v10024_v30 = vpop.eup %7418  ;;  %7432 = vpow2.f32 %v5139_v56  ;;  %v4520_v49 = vmul.f32 1.442695, %v4500_v15  ;;  %v3292_v52 = vsub.f32 %v13224_v46, %v9990_v45  ;;  %v4641_v9 = vmul.f32 1.442695, %v4621_v61  ;;  %v13227_v15 = vld [vmem:[#allocation42_spill] sm:$0xff] }
 0x336   : > { %13222 = vst [vmem:[#allocation104_spill] sm:$0xff] %v10024_v30  ;;  %v10029_v7 = vpop.eup %7420  ;;  %v3459_v18 = vadd.f32 %v10024_v30, %v10020_v13  ;;  %v4555_v6 = vadd.f32 %v10011_v0, %v4434_v41  ;;  %7434 = vpow2.f32 %v3915_v24  ;;  %v4984_v53 = vsub.f32 %v13018_v57, %v9928_v39 }
 0x337   : > { %13223 = vst [vmem:[#allocation120_spill] sm:$0xff] %v10029_v7  ;;  %v10035_v47 = vpop.eup %7422  ;;  %7436 = vrcp.f32 %v5159_v44  ;;  %v4762_v50 = vmul.f32 1.442695, %v4742_v31  ;;  %v3412_v11 = vsub.f32 %v13227_v15, %v9990_v45  ;;  %v4883_v41 = vmul.f32 1.442695, %v4863_v42  ;;  %v13230_v31 = vld [vmem:[#allocation57_spill] sm:$0xff] }
 0x338   : > { %13225 = vst [vmem:[#allocation136_spill] sm:$0xff] %v10035_v47  ;;  %v10040_v4 = vpop.eup %7424  ;;  %v3580_v56 = vadd.f32 %v10035_v47, %v3459_v18  ;;  %v4676_v46 = vadd.f32 %v10015_v1, %v4555_v6  ;;  %7438 = vpow2.f32 %v4036_v37  ;;  %v5105_v24 = vsub.f32 %v9910_v2, %v9928_v39  ;;  %v13232_v37 = vld [vmem:[#allocation73_spill] sm:$0xff] }
 0x339   : > { %13226 = vst [vmem:[#allocation152_spill] sm:$0xff] %v10040_v4  ;;  %v10045_v30 = vpop.eup %7426  ;;  %7440 = vpow2.f32 %v4157_v35  ;;  %v3313_v44 = vmul.f32 1.442695, %v3292_v52  ;;  %v3533_v18 = vsub.f32 %v13230_v31, %v9990_v45  ;;  %v3654_v42 = vsub.f32 %v13232_v37, %v9990_v45  ;;  %v13233_v6 = vld [vmem:[#allocation89_spill] sm:$0xff] }
 0x33a   : > { %13228 = vst [vmem:[#allocation168_spill] sm:$0xff] %v10045_v30  ;;  %v10050_v61 = vpop.eup %7428  ;;  %v3701_v57 = vadd.f32 %v10045_v30, %v3580_v56  ;;  %v4797_v15 = vadd.f32 %v10029_v7, %v4676_v46  ;;  %7442 = vpow2.f32 %v4278_v32  ;;  %v3775_v2 = vsub.f32 %v13233_v6, %v9990_v45  ;;  %v13235_v32 = vld [vmem:[#allocation105_spill] sm:$0xff] }
 0x33b   : > { %13229 = vst [vmem:[#allocation184_spill] sm:$0xff] %v10050_v61  ;;  %v10055_v47 = vpop.eup %7430  ;;  %7444 = vpow2.f32 %v4399_v48  ;;  %v5004_v35 = vmul.f32 1.442695, %v4984_v53  ;;  %v3433_v52 = vmul.f32 1.442695, %v3412_v11  ;;  %v3896_v46 = vsub.f32 %v13235_v32, %v9990_v45 }
 0x33c   : > { %13231 = vst [vmem:[#allocation198_spill] sm:$0xff] %v10055_v47  ;;  %v7433_v39 = vpop.eup %7432  ;;  %v3822_v13 = vadd.f32 %v10055_v47, %v3701_v57  ;;  %v4918_v31 = vadd.f32 %v10040_v4, %v4797_v15  ;;  %7446 = vpow2.f32 %v4520_v49  ;;  %v5125_v30 = vmul.f32 1.442695, %v5105_v24  ;;  %v13237_v57 = vld [vmem:[#allocation121_spill] sm:$0xff] }
 0x33d   : > { %v10063_v56 = vpop.eup %7434  ;;  %7448 = vpow2.f32 %v4641_v9  ;;  %v3554_v6 = vmul.f32 1.442695, %v3533_v18  ;;  %v4017_v48 = vsub.f32 %v13237_v57, %v9990_v45  ;;  %v3675_v11 = vmul.f32 1.442695, %v3654_v42  ;;  %v13239_v49 = vld [vmem:[#allocation137_spill] sm:$0xff]  ;;  %v10086_v57 = vpop.f32.mrf.mxu2 }
 0x33e   : > { %13234 = vst [vmem:[#allocation214_spill] sm:$0xff] %v10063_v56  ;;  %v10068_v7 = vpop.eup %7436  ;;  %v3943_v37 = vadd.f32 %v10063_v56, %v3822_v13  ;;  %7450 = vpow2.f32 %v3313_v44  ;;  %v3796_v47 = vmul.f32 1.442695, %v3775_v2  ;;  %v4138_v24 = vsub.f32 %v13239_v49, %v9990_v45  ;;  %v13243_v9 = vld [vmem:[#allocation153_spill] sm:$0xff] }
 0x33f   : > { %13236 = vst [vmem:[#allocation27_spill] sm:$0xff] %v10068_v7  ;;  %v10073_v53 = vpop.eup %7438  ;;  %v13241_v32 = vunpack.c.h.bf16 %v9877_v12  ;;  %7452 = vpow2.f32 %v3433_v52  ;;  %v4259_v18 = vsub.f32 %v13243_v9, %v9990_v45  ;;  %v5039_v42 = vadd.f32 %v10050_v61, %v4918_v31  ;;  %v13245_v49 = vld [vmem:[#allocation169_spill] sm:$0xff]  ;;  %v13249_v31 = vld [vmem:[#allocation200_spill] sm:$0xff] }
 0x340   : > { %13238 = vst [vmem:[#allocation42_spill] sm:$0xff] %v10073_v53  ;;  %v10077_v15 = vpop.eup %7440  ;;  %v4064_v13 = vadd.f32 %v10073_v53, %v3943_v37  ;;  %7454 = vpow2.f32 %v4762_v50  ;;  %v3917_v2 = vmul.f32 1.442695, %v3896_v46  ;;  %v4380_v56 = vsub.f32 %v13245_v49, %v9990_v45  ;;  %v13247_v37 = vld [vmem:[#allocation185_spill] sm:$0xff] }
 0x341   : > { %13240 = vst [vmem:[#allocation57_spill] sm:$0xff] %v10077_v15  ;;  %v10081_v4 = vmul.f32 %v7433_v39, %v13241_v32  ;;  %v10088_v44 = vpop.eup %7442  ;;  %7456 = vpow2.f32 %v3554_v6  ;;  %v4038_v52 = vmul.f32 1.442695, %v4017_v48  ;;  %v4501_v9 = vsub.f32 %v13247_v37, %v9990_v45  ;;  %v13251_v48 = vld [vmem:[#allocation215_spill] sm:$0xff] }
 0x342   : > { %13244 = vst [vmem:[#allocation89_spill] sm:$0xff] %v10088_v44  ;;  %v10093_v12 = vpop.eup %7444  ;;  %v4185_v32 = vadd.f32 %v10077_v15, %v4064_v13  ;;  %7458 = vpow2.f32 %v4883_v41  ;;  %v4622_v50 = vsub.f32 %v13249_v31, %v9990_v45  ;;  %v10104_v46 = vmax.f32 %v9444_v34, %v10086_v57 }
 0x343   : > { %13242 = vst [vmem:[#allocation73_spill] sm:$0xff] %v10081_v4  ;;  %v10098_v53 = vpop.eup %7446  ;;  %v4159_v4 = vmul.f32 1.442695, %v4138_v24  ;;  %7460 = vpow2.f32 %v3675_v11  ;;  %v4280_v6 = vmul.f32 1.442695, %v4259_v18  ;;  %v4743_v37 = vsub.f32 %v13251_v48, %v9990_v45 }
 0x344   : > { %13246 = vst [vmem:[#allocation105_spill] sm:$0xff] %v10093_v12  ;;  %v10106_v49 = vpop.eup %7448  ;;  %v4306_v13 = vadd.f32 %v10088_v44, %v4185_v32  ;;  %v5160_v41 = vadd.f32 %v7433_v39, %v5039_v42  ;;  %7462 = vpow2.f32 %v5004_v35  ;;  %v4401_v24 = vmul.f32 1.442695, %v4380_v56  ;;  %v13255_v56 = vld [vmem:[#allocation28_spill] sm:$0xff] }
 0x345   : > { %13248 = vst [vmem:[#allocation121_spill] sm:$0xff] %v10098_v53  ;;  %v10111_v15 = vpop.eup %7450  ;;  %v4864_v31 = vsub.f32 %v12971_v5, %v9990_v45  ;;  %7464 = vpow2.f32 %v3796_v47  ;;  %v4522_v7 = vmul.f32 1.442695, %v4501_v9  ;;  %v4985_v11 = vsub.f32 %v13034_v63, %v9990_v45 }
 0x346   : > { %13250 = vst [vmem:[#allocation137_spill] sm:$0xff] %v10106_v49  ;;  %v10115_v61 = vpop.eup %7452  ;;  %v4427_v34 = vadd.f32 %v10093_v12, %v4306_v13  ;;  %7466 = vpow2.f32 %v5125_v30  ;;  %v4643_v35 = vmul.f32 1.442695, %v4622_v50  ;;  %v3293_v42 = vsub.f32 %v13255_v56, %v10104_v46  ;;  %v13258_v50 = vld [vmem:[#allocation43_spill] sm:$0xff] }
 0x347   : > { %13252 = vst [vmem:[#allocation153_spill] sm:$0xff] %v10111_v15  ;;  %v10120_v18 = vpop.eup %7454  ;;  %v3460_v39 = vadd.f32 %v10115_v61, %v10111_v15  ;;  %7468 = vpow2.f32 %v3917_v2  ;;  %v4764_v47 = vmul.f32 1.442695, %v4743_v37  ;;  %v5106_v9 = vsub.f32 %v9972_v59, %v9990_v45  ;;  %v13260_v2 = vld [vmem:[#allocation58_spill] sm:$0xff] }
 0x348   : > { %13253 = vst [vmem:[#allocation169_spill] sm:$0xff] %v10115_v61  ;;  %v10126_v5 = vpop.eup %7456  ;;  %v4548_v32 = vadd.f32 %v10098_v53, %v4427_v34  ;;  %7470 = vrcp.f32 %v5160_v41  ;;  %v4885_v13 = vmul.f32 1.442695, %v4864_v31  ;;  %v3413_v48 = vsub.f32 %v13258_v50, %v10104_v46  ;;  %v13262_v41 = vld [vmem:[#allocation74_spill] sm:$0xff] }
 0x349   : > { %13254 = vst [vmem:[#allocation185_spill] sm:$0xff] %v10120_v18  ;;  %v10131_v63 = vpop.eup %7458  ;;  %v3581_v30 = vadd.f32 %v10126_v5, %v3460_v39  ;;  %7472 = vpow2.f32 %v4038_v52  ;;  %v5006_v34 = vmul.f32 1.442695, %v4985_v11  ;;  %v3534_v37 = vsub.f32 %v13260_v2, %v10104_v46  ;;  %v13264_v52 = vld [vmem:[#allocation90_spill] sm:$0xff] }
 0x34a   : > { %13256 = vst [vmem:[#allocation200_spill] sm:$0xff] %v10126_v5  ;;  %v10136_v12 = vpop.eup %7460  ;;  %v4669_v56 = vadd.f32 %v10106_v49, %v4548_v32  ;;  %7474 = vpow2.f32 %v4159_v4  ;;  %v3315_v45 = vmul.f32 1.442695, %v3293_v42  ;;  %v3655_v31 = vsub.f32 %v13262_v41, %v10104_v46  ;;  %v13265_v32 = vld [vmem:[#allocation106_spill] sm:$0xff] }
 0x34b   : > { %13257 = vst [vmem:[#allocation215_spill] sm:$0xff] %v10131_v63  ;;  %v10141_v53 = vpop.eup %7462  ;;  %v3702_v59 = vadd.f32 %v10136_v12, %v3581_v30  ;;  %7476 = vpow2.f32 %v4280_v6  ;;  %v3776_v11 = vsub.f32 %v13264_v52, %v10104_v46  ;;  %v3897_v2 = vsub.f32 %v13265_v32, %v10104_v46  ;;  %v13268_v6 = vld [vmem:[#allocation122_spill] sm:$0xff] }
 0x34c   : > { %13259 = vst [vmem:[#allocation28_spill] sm:$0xff] %v10136_v12  ;;  %v10146_v39 = vpop.eup %7464  ;;  %v4790_v50 = vadd.f32 %v10120_v18, %v4669_v56  ;;  %7478 = vpow2.f32 %v4401_v24  ;;  %v5127_v4 = vmul.f32 1.442695, %v5106_v9  ;;  %v3435_v42 = vmul.f32 1.442695, %v3413_v48  ;;  %v13381_v15 = vld [vmem:[#allocation142_spill] sm:$0xff] }
 0x34d   : > { %13261 = vst [vmem:[#allocation43_spill] sm:$0xff] %v10141_v53  ;;  %v10153_v49 = vpop.eup %7466  ;;  %v3823_v30 = vadd.f32 %v10146_v39, %v3702_v59  ;;  %7480 = vpow2.f32 %v4522_v7  ;;  %v3556_v56 = vmul.f32 1.442695, %v3534_v37  ;;  %v4018_v18 = vsub.f32 %v13268_v6, %v10104_v46  ;;  %v13269_v59 = vld [vmem:[#allocation138_spill] sm:$0xff] }
 0x34e   : > { %13263 = vst [vmem:[#allocation58_spill] sm:$0xff] %v10146_v39  ;;  %v10156_v12 = vpop.eup %7468  ;;  %v4911_v41 = vadd.f32 %v10131_v63, %v4790_v50  ;;  %7482 = vpow2.f32 %v4643_v35  ;;  %v3677_v5 = vmul.f32 1.442695, %v3655_v31  ;;  %v4139_v24 = vsub.f32 %v13269_v59, %v10104_v46  ;;  %v13271_v7 = vld [vmem:[#allocation154_spill] sm:$0xff]  ;;  %v10177_v59 = vpop.f32.mrf.mxu3 }
 0x34f   : > { %13266 = vst [vmem:[#allocation74_spill] sm:$0xff] %v10153_v49  ;;  %v10161_v52 = vpop.eup %7470  ;;  %v3944_v32 = vadd.f32 %v10156_v12, %v3823_v30  ;;  %7484 = vpow2.f32 %v3315_v45  ;;  %v3798_v48 = vmul.f32 1.442695, %v3776_v11  ;;  %v3919_v39 = vmul.f32 1.442695, %v3897_v2  ;;  %v13273_v30 = vld [vmem:[#allocation170_spill] sm:$0xff] }
 0x350   : > { %13267 = vst [vmem:[#allocation90_spill] sm:$0xff] %v10156_v12  ;;  %v10166_v9 = vpop.eup %7472  ;;  %v4260_v37 = vsub.f32 %v13271_v7, %v10104_v46  ;;  %7486 = vpow2.f32 %v3435_v42  ;;  %v4381_v35 = vsub.f32 %v13273_v30, %v10104_v46  ;;  %v13274_v31 = vld [vmem:[#allocation186_spill] sm:$0xff]  ;;  %v5032_v45 = vadd.f32 %v10141_v53, %v4911_v41  ;;  %v13276_v2 = vld [vmem:[#allocation201_spill] sm:$0xff]  ;;  %v13278_v30 = vld [vmem:[#allocation216_spill] sm:$0xff] }
 0x351   : > { %13270 = vst [vmem:[#allocation106_spill] sm:$0xff] %v10166_v9  ;;  %v10170_v50 = vpop.eup %7474  ;;  %v4065_v6 = vadd.f32 %v10166_v9, %v3944_v32  ;;  %v4502_v12 = vsub.f32 %v13274_v31, %v10104_v46  ;;  %7488 = vpow2.f32 %v4764_v47  ;;  %v4040_v11 = vmul.f32 1.442695, %v4018_v18 }
 0x352   : > { %13272 = vst [vmem:[#allocation122_spill] sm:$0xff] %v10170_v50  ;;  %v10179_v63 = vpop.eup %7476  ;;  %v4623_v7 = vsub.f32 %v13276_v2, %v10104_v46  ;;  %7490 = vpow2.f32 %v3556_v56  ;;  %v4161_v32 = vmul.f32 1.442695, %v4139_v24  ;;  %v4744_v31 = vsub.f32 %v13278_v30, %v10104_v46 }
 0x353   : > { %13275 = vst [vmem:[#allocation138_spill] sm:$0xff] %v10179_v63  ;;  %v10184_v44 = vpop.eup %7478  ;;  %v4186_v42 = vadd.f32 %v10170_v50, %v4065_v6  ;;  %7492 = vpow2.f32 %v4885_v13  ;;  %v4282_v61 = vmul.f32 1.442695, %v4260_v37  ;;  %v4865_v47 = vsub.f32 %v8953_v29, %v10104_v46 }
 0x354   : > { %13277 = vst [vmem:[#allocation154_spill] sm:$0xff] %v10184_v44  ;;  %v10189_v9 = vpop.eup %7480  ;;  %v10195_v18 = vmax.f32 %v9514_v26, %v10177_v59  ;;  %7494 = vpow2.f32 %v3677_v5  ;;  %v4403_v56 = vmul.f32 1.442695, %v4381_v35  ;;  %v4524_v24 = vmul.f32 1.442695, %v4502_v12 }
 0x355   : > { %13279 = vst [vmem:[#allocation170_spill] sm:$0xff] %v10189_v9  ;;  %v10197_v41 = vpop.eup %7482  ;;  %v4307_v6 = vadd.f32 %v10179_v63, %v4186_v42  ;;  %v5153_v30 = vadd.f32 %v10153_v49, %v5032_v45  ;;  %7496 = vpow2.f32 %v5006_v34  ;;  %v4645_v13 = vmul.f32 1.442695, %v4623_v7  ;;  %v13284_v45 = vld [vmem:[#allocation29_spill] sm:$0xff] }
 0x356   : > { %13280 = vst [vmem:[#allocation186_spill] sm:$0xff] %v10197_v41  ;;  %v10200_v2 = vpop.eup %7484  ;;  %v4986_v29 = vsub.f32 %v9175_v17, %v10104_v46  ;;  %7498 = vpow2.f32 %v3798_v48  ;;  %v4766_v50 = vmul.f32 1.442695, %v4744_v31  ;;  %v5107_v5 = vsub.f32 %v10086_v57, %v10104_v46  ;;  %v13286_v48 = vld [vmem:[#allocation44_spill] sm:$0xff]  ;;  %v13287_v57 = vld [vmem:[#allocation59_spill] sm:$0xff] }
 0x357   : > { %13281 = vst [vmem:[#allocation201_spill] sm:$0xff] %v10200_v2  ;;  %v10205_v37 = vpop.eup %7486  ;;  %v4428_v26 = vadd.f32 %v10184_v44, %v4307_v6  ;;  %7500 = vpow2.f32 %v5127_v4  ;;  %v10214_v34 = vmul.f32 1.442695, %v4865_v47  ;;  %v3294_v17 = vsub.f32 %v13284_v45, %v10195_v18  ;;  %v13289_v45 = vld [vmem:[#allocation75_spill] sm:$0xff] }
 0x358   : > { %13282 = vst [vmem:[#allocation216_spill] sm:$0xff] %v10205_v37  ;;  %v10210_v35 = vpop.eup %7488  ;;  %v3461_v12 = vadd.f32 %v10205_v37, %v10200_v2  ;;  %7502 = vpow2.f32 %v3919_v39  ;;  %v3414_v31 = vsub.f32 %v13286_v48, %v10195_v18  ;;  %v3535_v46 = vsub.f32 %v13287_v57, %v10195_v18  ;;  %v13291_v48 = vld [vmem:[#allocation91_spill] sm:$0xff] }
 0x359   : > { %13283 = vst [vmem:[#allocation237_spill] sm:$0xff] %v10210_v35  ;;  %v10218_v7 = vpop.eup %7490  ;;  %v4549_v42 = vadd.f32 %v10189_v9, %v4428_v26  ;;  %7504 = vrcp.f32 %v5153_v30  ;;  %v10228_v6 = vmul.f32 1.442695, %v4986_v29  ;;  %v3656_v37 = vsub.f32 %v13289_v45, %v10195_v18 }
 0x35a   : > { %13285 = vst [vmem:[#allocation29_spill] sm:$0xff] %v10218_v7  ;;  %v10225_v4 = vpop.eup %7492  ;;  %v3582_v47 = vadd.f32 %v10218_v7, %v3461_v12  ;;  %7506 = vpow2.f32 %v4040_v11  ;;  %v10235_v26 = vmul.f32 1.442695, %v5107_v5  ;;  %v3777_v57 = vsub.f32 %v13291_v48, %v10195_v18  ;;  %v13293_v12 = vld [vmem:[#allocation107_spill] sm:$0xff] }
 0x35b   : > { %13288 = vst [vmem:[#allocation44_spill] sm:$0xff] %v10225_v4  ;;  %v10232_v2 = vpop.eup %7494  ;;  %v4670_v39 = vadd.f32 %v10197_v41, %v4549_v42  ;;  %7508 = vpow2.f32 %v4161_v32  ;;  %v3317_v29 = vmul.f32 1.442695, %v3294_v17  ;;  %v3898_v7 = vsub.f32 %v13293_v12, %v10195_v18 }
 0x35c   : > { %13290 = vst [vmem:[#allocation59_spill] sm:$0xff] %v10232_v2  ;;  %v10239_v9 = vpop.eup %7496  ;;  %v3703_v30 = vadd.f32 %v10232_v2, %v3582_v47  ;;  %7510 = vpow2.f32 %v4282_v61  ;;  %v3437_v11 = vmul.f32 1.442695, %v3414_v31  ;;  %v3558_v5 = vmul.f32 1.442695, %v3535_v46  ;;  %v13296_v47 = vld [vmem:[#allocation123_spill] sm:$0xff] }
 0x35d   : > { %13292 = vst [vmem:[#allocation75_spill] sm:$0xff] %v10239_v9  ;;  %v10244_v45 = vpop.eup %7498  ;;  %v4791_v44 = vadd.f32 %v10210_v35, %v4670_v39  ;;  %7512 = vpow2.f32 %v4403_v56  ;;  %v3679_v41 = vmul.f32 1.442695, %v3656_v37  ;;  %v4019_v32 = vsub.f32 %v13296_v47, %v10195_v18  ;;  %v13298_v39 = vld [vmem:[#allocation139_spill] sm:$0xff] }
 0x35e   : > { %13294 = vst [vmem:[#allocation91_spill] sm:$0xff] %v10244_v45  ;;  %v10247_v42 = vpop.eup %7500  ;;  %v3824_v48 = vadd.f32 %v10244_v45, %v3703_v30  ;;  %7514 = vpow2.f32 %v4524_v24  ;;  %v3800_v2 = vmul.f32 1.442695, %v3777_v57  ;;  %v4140_v61 = vsub.f32 %v13298_v39, %v10195_v18  ;;  %v13300_v56 = vld [vmem:[#allocation155_spill] sm:$0xff]  ;;  %v10262_v45 = vpop.f32.mrf.mxu0 }
 0x35f   : > { %13295 = vst [vmem:[#allocation107_spill] sm:$0xff] %v10247_v42  ;;  %v10252_v17 = vpop.eup %7502  ;;  %v4912_v12 = vadd.f32 %v10225_v4, %v4791_v44  ;;  %7516 = vpow2.f32 %v4645_v13  ;;  %v3921_v30 = vmul.f32 1.442695, %v3898_v7  ;;  %v4261_v37 = vsub.f32 %v13300_v56, %v10195_v18  ;;  %v13302_v44 = vld [vmem:[#allocation171_spill] sm:$0xff]  ;;  %v13304_v4 = vld [vmem:[#allocation204_spill] sm:$0xff]  ;;  %v13306_v56 = vld [vmem:[#allocation222_spill] sm:$0xff] }
 0x360   : > { %13297 = vst [vmem:[#allocation123_spill] sm:$0xff] %v10252_v17  ;;  %v10257_v31 = vpop.eup %7504  ;;  %v3945_v46 = vadd.f32 %v10252_v17, %v3824_v48  ;;  %7518 = vpow2.f32 %v3317_v29  ;;  %v4382_v24 = vsub.f32 %v13302_v44, %v10195_v18  ;;  %v13303_v57 = vld [vmem:[#allocation187_spill] sm:$0xff]  ;;  %v4042_v7 = vmul.f32 1.442695, %v4019_v32 }
 0x361   : > { %13299 = vst [vmem:[#allocation139_spill] sm:$0xff] %v10257_v31  ;;  %v10264_v47 = vpop.eup %7506  ;;  %v4503_v39 = vsub.f32 %v13303_v57, %v10195_v18  ;;  %v4624_v31 = vsub.f32 %v13304_v4, %v10195_v18  ;;  %7520 = vpow2.f32 %v3437_v11  ;;  %v4745_v17 = vsub.f32 %v13306_v56, %v10195_v18 }
 0x362   : > { %13301 = vst [vmem:[#allocation155_spill] sm:$0xff] %v10264_v47  ;;  %v10272_v48 = vpop.eup %7508  ;;  %v4066_v13 = vadd.f32 %v10264_v47, %v3945_v46  ;;  %v5033_v29 = vadd.f32 %v10239_v9, %v4912_v12  ;;  %7522 = vpow2.f32 %v4766_v50  ;;  %v4163_v44 = vmul.f32 1.442695, %v4140_v61 }
 0x363   : > { %13305 = vst [vmem:[#allocation171_spill] sm:$0xff] %v10272_v48  ;;  %v10277_v35 = vpop.eup %7510  ;;  %v10282_v57 = vmax.f32 %v9543_v51, %v10262_v45  ;;  %7524 = vpow2.f32 %v3558_v5  ;;  %v4284_v11 = vmul.f32 1.442695, %v4261_v37  ;;  %v4866_v32 = vsub.f32 %v9027_v23, %v10195_v18 }
 0x364   : > { %13307 = vst [vmem:[#allocation187_spill] sm:$0xff] %v10277_v35  ;;  %v10284_v4 = vpop.eup %7512  ;;  %v4187_v63 = vadd.f32 %v10272_v48, %v4066_v13  ;;  %7526 = vpow2.f32 %v10214_v34  ;;  %v4405_v12 = vmul.f32 1.442695, %v4382_v24  ;;  %v4526_v50 = vmul.f32 1.442695, %v4503_v39 }
 0x365   : > { %13308 = vst [vmem:[#allocation204_spill] sm:$0xff] %v10284_v4  ;;  %v10289_v46 = vpop.eup %7514  ;;  %v4647_v61 = vmul.f32 1.442695, %v4624_v31  ;;  %7528 = vpow2.f32 %v3679_v41  ;;  %v10295_v47 = vmul.f32 1.442695, %v4745_v17  ;;  %v4987_v5 = vsub.f32 %v9265_v16, %v10195_v18  ;;  %v13312_v31 = vld [vmem:[#allocation30_spill] sm:$0xff] }
 0x366   : > { %13309 = vst [vmem:[#allocation222_spill] sm:$0xff] %v10289_v46  ;;  %v10292_v56 = vpop.eup %7516  ;;  %v4308_v51 = vadd.f32 %v10277_v35, %v4187_v63  ;;  %v5154_v23 = vadd.f32 %v10247_v42, %v5033_v29  ;;  %7530 = vpow2.f32 %v10228_v6  ;;  %v5108_v34 = vsub.f32 %v10177_v59, %v10195_v18  ;;  %v13314_v16 = vld [vmem:[#allocation45_spill] sm:$0xff]  ;;  %v13316_v18 = vld [vmem:[#allocation60_spill] sm:$0xff] }
 0x367   : > { %13310 = vst [vmem:[#allocation238_spill] sm:$0xff] %v10292_v56  ;;  %v10299_v37 = vpop.eup %7518  ;;  %v3299_v24 = vsub.f32 %v13312_v31, %v10282_v57  ;;  %7532 = vpow2.f32 %v3800_v2  ;;  %v10310_v41 = vmul.f32 1.442695, %v4866_v32  ;;  %v3419_v17 = vsub.f32 %v13314_v16, %v10282_v57  ;;  %v13317_v29 = vld [vmem:[#allocation76_spill] sm:$0xff] }
 0x368   : > { %13311 = vst [vmem:[#allocation239_spill] sm:$0xff] %v10299_v37  ;;  %v10307_v39 = vpop.eup %7520  ;;  %v4429_v63 = vadd.f32 %v10284_v4, %v4308_v51  ;;  %7534 = vpow2.f32 %v10235_v26  ;;  %v3540_v6 = vsub.f32 %v13316_v18, %v10282_v57  ;;  %v3661_v31 = vsub.f32 %v13317_v29, %v10282_v57  ;;  %v13319_v32 = vld [vmem:[#allocation92_spill] sm:$0xff] }
 0x369   : > { %13313 = vst [vmem:[#allocation30_spill] sm:$0xff] %v10307_v39  ;;  %v10314_v13 = vpop.eup %7522  ;;  %v3462_v59 = vadd.f32 %v10307_v39, %v10299_v37  ;;  %7536 = vpow2.f32 %v3921_v30  ;;  %v10325_v2 = vmul.f32 1.442695, %v4987_v5  ;;  %v3782_v16 = vsub.f32 %v13319_v32, %v10282_v57  ;;  %v13320_v4 = vld [vmem:[#allocation108_spill] sm:$0xff] }
 0x36a   : > { %13315 = vst [vmem:[#allocation45_spill] sm:$0xff] %v10314_v13  ;;  %v10323_v51 = vpop.eup %7524  ;;  %v3903_v26 = vsub.f32 %v13320_v4, %v10282_v57  ;;  %7538 = vrcp.f32 %v5154_v23  ;;  %v10334_v18 = vmul.f32 1.442695, %v5108_v34  ;;  %v3327_v48 = vmul.f32 1.442695, %v3299_v24  ;;  %v13324_v37 = vld [vmem:[#allocation124_spill] sm:$0xff] }
 0x36b   : > { %13318 = vst [vmem:[#allocation60_spill] sm:$0xff] %v10323_v51  ;;  %v10331_v35 = vpop.eup %7526  ;;  %v3583_v39 = vadd.f32 %v10323_v51, %v3462_v59  ;;  %v4550_v30 = vadd.f32 %v10289_v46, %v4429_v63  ;;  %7540 = vpow2.f32 %v4042_v7  ;;  %v3447_v5 = vmul.f32 1.442695, %v3419_v17  ;;  %v13327_v63 = vld [vmem:[#allocation140_spill] sm:$0xff] }
 0x36c   : > { %13321 = vst [vmem:[#allocation76_spill] sm:$0xff] %v10331_v35  ;;  %v10336_v29 = vpop.eup %7528  ;;  %v4024_v32 = vsub.f32 %v13324_v37, %v10282_v57  ;;  %7542 = vpow2.f32 %v4163_v44  ;;  %v3568_v23 = vmul.f32 1.442695, %v3540_v6  ;;  %v3689_v9 = vmul.f32 1.442695, %v3661_v31  ;;  %v13330_v44 = vld [vmem:[#allocation172_spill] sm:$0xff]  ;;  %v10357_v31 = vpop.f32.mrf.mxu1 }
 0x36d   : > { %13322 = vst [vmem:[#allocation92_spill] sm:$0xff] %v10334_v18  ;;  %v10341_v42 = vpop.eup %7530  ;;  %v3704_v4 = vadd.f32 %v10336_v29, %v3583_v39  ;;  %7544 = vpow2.f32 %v4284_v11  ;;  %v3810_v34 = vmul.f32 1.442695, %v3782_v16  ;;  %v10346_v24 = vmul.f32 1.442695, %v3903_v26  ;;  %v13329_v18 = vld [vmem:[#allocation156_spill] sm:$0xff] }
 0x36e   : > { %13323 = vst [vmem:[#allocation108_spill] sm:$0xff] %v10336_v29  ;;  %v10344_v59 = vpop.eup %7532  ;;  %v4145_v7 = vsub.f32 %v13327_v63, %v10282_v57  ;;  %7546 = vpow2.f32 %v4405_v12  ;;  %v4266_v39 = vsub.f32 %v13329_v18, %v10282_v57  ;;  %v4387_v6 = vsub.f32 %v13330_v44, %v10282_v57  ;;  %v13332_v63 = vld [vmem:[#allocation188_spill] sm:$0xff]  ;;  %v13334_v18 = vld [vmem:[#allocation202_spill] sm:$0xff]  ;;  %v13335_v44 = vld [vmem:[#allocation217_spill] sm:$0xff] }
 0x36f   : > { %13325 = vst [vmem:[#allocation124_spill] sm:$0xff] %v10341_v42  ;;  %v10350_v17 = vpop.eup %7534  ;;  %v3825_v37 = vadd.f32 %v10344_v59, %v3704_v4  ;;  %v4671_v16 = vadd.f32 %v10292_v56, %v4550_v30  ;;  %7548 = vpow2.f32 %v4526_v50  ;;  %v4052_v26 = vmul.f32 1.442695, %v4024_v32 }
 0x370   : > { %13326 = vst [vmem:[#allocation240_spill] sm:$0xff] %v10344_v59  ;;  %v10359_v11 = vpop.eup %7536  ;;  %v4508_v46 = vsub.f32 %v13332_v63, %v10282_v57  ;;  %7550 = vpow2.f32 %v4647_v61  ;;  %v4629_v4 = vsub.f32 %v13334_v18, %v10282_v57  ;;  %v4750_v59 = vsub.f32 %v13335_v44, %v10282_v57 }
 0x371   : > { %13328 = vst [vmem:[#allocation140_spill] sm:$0xff] %v10350_v17  ;;  %v10364_v17 = vpop.eup %7538  ;;  %v3946_v12 = vadd.f32 %v10359_v11, %v3825_v37  ;;  %7552 = vpow2.f32 %v3327_v48  ;;  %v4173_v30 = vmul.f32 1.442695, %v4145_v7  ;;  %v4871_v50 = vsub.f32 %v8933_v33, %v10282_v57 }
 0x372   : > { %13331 = vst [vmem:[#allocation156_spill] sm:$0xff] %v10359_v11  ;;  %v10371_v29 = vpop.eup %7540  ;;  %v10377_v32 = vmax.f32 %v9549_v40, %v10357_v31  ;;  %7554 = vpow2.f32 %v3447_v5  ;;  %v4294_v63 = vmul.f32 1.442695, %v4266_v39  ;;  %v4415_v18 = vmul.f32 1.442695, %v4387_v6  ;;  %v10395_v39 = vld [vmem:[%s8068_s21 + $0x3f0] sm:$0xff] }
 0x373   : > { %13333 = vst [vmem:[#allocation172_spill] sm:$0xff] %v10364_v17  ;;  %v10379_v37 = vpop.eup %7542  ;;  %v4067_v61 = vadd.f32 %v10371_v29, %v3946_v12  ;;  %v4792_v48 = vadd.f32 %v10314_v13, %v4671_v16  ;;  %7556 = vpow2.f32 %v10295_v47  ;;  %v4536_v7 = vmul.f32 1.442695, %v4508_v46 }
 0x374   : > { %13336 = vst [vmem:[#allocation188_spill] sm:$0xff] %v10371_v29  ;;  %v10382_v44 = vpop.eup %7544  ;;  %v4992_v33 = vsub.f32 %v13064_v27, %v10282_v57  ;;  %7558 = vpow2.f32 %v3568_v23  ;;  %v4657_v11 = vmul.f32 1.442695, %v4629_v4  ;;  %v10390_v56 = vmul.f32 1.442695, %v4750_v59  ;;  %v13341_v27 = vld [vmem:[#allocation31_spill] sm:$0xff] }
 0x375   : > { %13337 = vst [vmem:[#allocation202_spill] sm:$0xff] %v10379_v37  ;;  %v10388_v40 = vpop.eup %7546  ;;  %v5113_v5 = vsub.f32 %v10262_v45, %v10282_v57  ;;  %v4188_v16 = vadd.f32 %v10379_v37, %v4067_v61  ;;  %7560 = vpow2.f32 %v10310_v41  ;;  %v10401_v47 = vmul.f32 1.442695, %v4871_v50  ;;  %v13343_v59 = vld [vmem:[#allocation46_spill] sm:$0xff]  ;;  %v13344_v45 = vld [vmem:[#allocation61_spill] sm:$0xff] }
 0x376   : > { %13338 = vst [vmem:[#allocation217_spill] sm:$0xff] %v10382_v44  ;;  %v10397_v6 = vpop.eup %7548  ;;  %v3300_v46 = vsub.f32 %v13341_v27, %v10377_v32  ;;  %7562 = vpow2.f32 %v3689_v9  ;;  %v3420_v12 = vsub.f32 %v13343_v59, %v10377_v32  ;;  %v3541_v57 = vsub.f32 %v13344_v45, %v10377_v32  ;;  %v13345_v4 = vld [vmem:[#allocation77_spill] sm:$0xff] }
 0x377   : > { %13339 = vst [vmem:[#allocation241_spill] sm:$0xff] %v10388_v40  ;;  %v10405_v23 = vpop.eup %7550  ;;  %v3662_v29 = vsub.f32 %v13345_v4, %v10377_v32  ;;  %v4913_v41 = vadd.f32 %v10331_v35, %v4792_v48  ;;  %7564 = vpow2.f32 %v10325_v2  ;;  %v10417_v50 = vmul.f32 1.442695, %v4992_v33  ;;  %v13348_v45 = vld [vmem:[#allocation93_spill] sm:$0xff] }
 0x378   : > { %13340 = vst [vmem:[#allocation242_spill] sm:$0xff] %v10397_v6  ;;  %v10413_v61 = vpop.eup %7552  ;;  %7566 = vpow2.f32 %v3810_v34  ;;  %v10422_v59 = vmul.f32 1.442695, %v5113_v5  ;;  %v3783_v37 = vsub.f32 %v13348_v45, %v10377_v32  ;;  %v13349_v4 = vld [vmem:[#allocation109_spill] sm:$0xff]  ;;  %v4309_v48 = vadd.f32 %v10382_v44, %v4188_v16 }
 0x379   : > { %13342 = vst [vmem:[#allocation31_spill] sm:$0xff] %v10405_v23  ;;  %v10420_v9 = vpop.eup %7554  ;;  %v3904_v13 = vsub.f32 %v13349_v4, %v10377_v32  ;;  %v3329_v33 = vmul.f32 1.442695, %v3300_v46  ;;  %v13351_v27 = vld [vmem:[#allocation125_spill] sm:$0xff]  ;;  %7568 = vpow2.f32 %v10346_v24  ;;  %v3449_v5 = vmul.f32 1.442695, %v3420_v12 }
 0x37a   : > { %13346 = vst [vmem:[#allocation46_spill] sm:$0xff] %v10413_v61  ;;  %v10428_v51 = vpop.eup %7556  ;;  %v3467_v2 = vadd.f32 %v10420_v9, %v10413_v61  ;;  %v4025_v35 = vsub.f32 %v13351_v27, %v10377_v32  ;;  %v3570_v45 = vmul.f32 1.442695, %v3541_v57  ;;  %v10438_v17 = vmul.f32 1.442695, %v3662_v29  ;;  %v13355_v46 = vld [vmem:[#allocation141_spill] sm:$0xff] }
 0x37b   : > { %13347 = vst [vmem:[#allocation61_spill] sm:$0xff] %v10420_v9  ;;  %v10435_v34 = vpop.eup %7558  ;;  %7570 = vpow2.f32 %v4052_v26  ;;  %v4146_v44 = vsub.f32 %v13355_v46, %v10377_v32  ;;  %v10450_v49 = vmul.f32 1.442695, %v3783_v37  ;;  %v10452_v24 = vmul.f32 1.442695, %v3904_v13  ;;  %v13357_v29 = vld [vmem:[#allocation157_spill] sm:$0xff] }
 0x37c   : > { %13350 = vst [vmem:[#allocation77_spill] sm:$0xff] %v10428_v51  ;;  %v10440_v4 = vpop.eup %7560  ;;  %v10443_v51 = vadd.f32 %v10341_v42, %v4913_v41  ;;  %v3588_v16 = vadd.f32 %v10435_v34, %v3467_v2  ;;  %7572 = vpow2.f32 %v4173_v30  ;;  %v4267_v12 = vsub.f32 %v13357_v29, %v10377_v32  ;;  %v13360_v30 = vld [vmem:[#allocation173_spill] sm:$0xff]  ;;  %v13362_v29 = vld [vmem:[#allocation203_spill] sm:$0xff] }
 0x37d   : > { %13352 = vst [vmem:[#allocation93_spill] sm:$0xff] %v10435_v34  ;;  %v10448_v27 = vpop.eup %7562  ;;  %v4430_v41 = vadd.f32 %v10388_v40, %v4309_v48  ;;  %7574 = vpow2.f32 %v4294_v63  ;;  %v10460_v26 = vmul.f32 1.442695, %v4025_v35  ;;  %v4388_v37 = vsub.f32 %v13360_v30, %v10377_v32  ;;  %v13361_v13 = vld [vmem:[#allocation189_spill] sm:$0xff]  ;;  %v13363_v35 = vld [vmem:[#allocation219_spill] sm:$0xff] }
 0x37e   : > { %13353 = vst [vmem:[#allocation109_spill] sm:$0xff] %v10440_v4  ;;  %v10456_v57 = vpop.eup %7564  ;;  %v3709_v2 = vadd.f32 %v10448_v27, %v3588_v16  ;;  %7576 = vpow2.f32 %v4415_v18  ;;  %v4509_v42 = vsub.f32 %v13361_v13, %v10377_v32  ;;  %v4630_v4 = vsub.f32 %v13362_v29, %v10377_v32 }
 0x37f   : > { %13354 = vst [vmem:[#allocation125_spill] sm:$0xff] %v10443_v51  ;;  %v10462_v46 = vpop.eup %7566  ;;  %7578 = vpow2.f32 %v4536_v7  ;;  %v10473_v63 = vmul.f32 1.442695, %v4146_v44  ;;  %v4751_v16 = vsub.f32 %v13363_v35, %v10377_v32  ;;  %v10479_v30 = vmul.f32 1.442695, %v4267_v12 }
 0x380   : > { %13356 = vst [vmem:[#allocation141_spill] sm:$0xff] %v10448_v27  ;;  %v3830_v48 = vadd.f32 %v10462_v46, %v3709_v2  ;;  %v10477_v18 = vpop.eup %7568  ;;  %7580 = vpow2.f32 %v4657_v11  ;;  %v4872_v13 = vsub.f32 %v13067_v3, %v10377_v32  ;;  %v4993_v29 = vsub.f32 %v9117_v10, %v10377_v32 }
 0x381   : > { %13358 = vst [vmem:[#allocation157_spill] sm:$0xff] %v10456_v57  ;;  %v10470_v57 = vpop.f32.mrf.mxu2  ;;  %v10485_v40 = vpop.eup %7570  ;;  %v4551_v7 = vadd.f32 %v10397_v6, %v4430_v41  ;;  %7582 = vpow2.f32 %v10390_v56  ;;  %v10496_v12 = vmul.f32 1.442695, %v4388_v37  ;;  %v10498_v3 = vmul.f32 1.442695, %v4509_v42  ;;  %v13375_v6 = vld [vmem:[#allocation78_spill] sm:$0xff] }
 0x382   : > { %13359 = vst [vmem:[#allocation243_spill] sm:$0xff] %v10462_v46  ;;  %v3951_v44 = vadd.f32 %v10477_v18, %v3830_v48  ;;  %v10492_v2 = vmax.f32 %v9610_v43, %v10470_v57  ;;  %v10494_v11 = vpop.eup %7572  ;;  %7584 = vpow2.f32 %v3329_v33  ;;  %v10500_v10 = vmul.f32 1.442695, %v4630_v4 }
 0x383   : > { %13364 = vst [vmem:[#allocation173_spill] sm:$0xff] %v10477_v18  ;;  %v10502_v35 = vpop.eup %7574  ;;  %7586 = vpow2.f32 %v3449_v5  ;;  %v10505_v48 = vmul.f32 1.442695, %v4751_v16  ;;  %v5114_v43 = vsub.f32 %v10357_v31, %v10377_v32  ;;  %v10512_v33 = vmul.f32 1.442695, %v4872_v13  ;;  %v13371_v31 = vld [vmem:[#allocation32_spill] sm:$0xff] }
 0x384   : > { %13365 = vst [vmem:[#allocation189_spill] sm:$0xff] %v10485_v40  ;;  %v4072_v41 = vadd.f32 %v10485_v40, %v3951_v44  ;;  %v10509_v56 = vpop.eup %7576  ;;  %7588 = vpow2.f32 %v10401_v47  ;;  %v10514_v42 = vmul.f32 1.442695, %v4993_v29  ;;  %v10520_v44 = vadd.f32 %v10405_v23, %v4551_v7  ;;  %v13373_v47 = vld [vmem:[#allocation47_spill] sm:$0xff]  ;;  %v13374_v29 = vld [vmem:[#allocation62_spill] sm:$0xff]  ;;  %v10534_v23 = vpop.f32.mrf.mxu3 }
 0x385   : > { %13366 = vst [vmem:[#allocation203_spill] sm:$0xff] %v10494_v11  ;;  %v10517_v37 = vpop.eup %7578  ;;  %7590 = vpow2.f32 %v3570_v45  ;;  %v3301_v32 = vsub.f32 %v13371_v31, %v10492_v2  ;;  %v3421_v13 = vsub.f32 %v13373_v47, %v10492_v2  ;;  %v3542_v4 = vsub.f32 %v13374_v29, %v10492_v2  ;;  %v13377_v31 = vld [vmem:[#allocation94_spill] sm:$0xff] }
 0x386   : > { %13367 = vst [vmem:[#allocation219_spill] sm:$0xff] %v10502_v35  ;;  %v4193_v5 = vadd.f32 %v10494_v11, %v4072_v41  ;;  %v10525_v16 = vpop.eup %7580  ;;  %7592 = vpow2.f32 %v10422_v59  ;;  %v3663_v7 = vsub.f32 %v13375_v6, %v10492_v2  ;;  %v3784_v59 = vsub.f32 %v13377_v31, %v10492_v2  ;;  %v13380_v6 = vld [vmem:[#allocation126_spill] sm:$0xff] }
 0x387   : > { %13368 = vst [vmem:[#allocation244_spill] sm:$0xff] %v10509_v56  ;;  %v10536_v41 = vpop.eup %7582  ;;  %7594 = vpow2.f32 %v10438_v17  ;;  %v10547_v29 = vmul.f32 1.442695, %v5114_v43  ;;  %v4026_v53 = vsub.f32 %v13380_v6, %v10492_v2  ;;  %v3331_v31 = vmul.f32 1.442695, %v3301_v32 }
 0x388   : > { %13369 = vst [vmem:[#allocation245_spill] sm:$0xff] %v10517_v37  ;;  %v4314_v45 = vadd.f32 %v10502_v35, %v4193_v5  ;;  %v10544_v51 = vpop.eup %7584  ;;  %7596 = vpow2.f32 %v10417_v50  ;;  %v4147_v5 = vsub.f32 %v13381_v15, %v10492_v2  ;;  %v3451_v6 = vmul.f32 1.442695, %v3421_v13 }
 0x389   : > { %13370 = vst [vmem:[#allocation246_spill] sm:$0xff] %v10520_v44  ;;  %v13378_v44 = vld [vmem:[#allocation110_spill] sm:$0xff]  ;;  %v10553_v35 = vpop.eup %7586  ;;  %7598 = vpow2.f32 %v10450_v49  ;;  %v3572_v11 = vmul.f32 1.442695, %v3542_v4  ;;  %v10565_v40 = vmul.f32 1.442695, %v3663_v7 }
 0x38a   : > { %13372 = vst [vmem:[#allocation32_spill] sm:$0xff] %v10525_v16  ;;  %v3905_v47 = vsub.f32 %v13378_v44, %v10492_v2  ;;  %v4435_v17 = vadd.f32 %v10509_v56, %v4314_v45  ;;  %v10559_v44 = vmax.f32 %v9632_v20, %v10534_v23  ;;  %v10561_v50 = vpop.eup %7588  ;;  %v3468_v43 = vadd.f32 %v10553_v35, %v10544_v51 }
 0x38b   : > { %13376 = vst [vmem:[#allocation47_spill] sm:$0xff] %v10536_v41  ;;  %v10567_v15 = vpop.eup %7590  ;;  %7600 = vpow2.f32 %v10452_v24  ;;  %v10571_v49 = vmul.f32 1.442695, %v3784_v59  ;;  %v10579_v13 = vmul.f32 1.442695, %v4026_v53  ;;  %v13386_v24 = vld [vmem:[#allocation158_spill] sm:$0xff] }
 0x38c   : > { %13379 = vst [vmem:[#allocation62_spill] sm:$0xff] %v10544_v51  ;;  %v4556_v45 = vadd.f32 %v10517_v37, %v4435_v17  ;;  %v10573_v32 = vmul.f32 1.442695, %v3905_v47  ;;  %v10575_v20 = vpop.eup %7592  ;;  %v3589_v56 = vadd.f32 %v10567_v15, %v3468_v43  ;;  %7602 = vpow2.f32 %v10460_v26  ;;  %v13387_v47 = vld [vmem:[#allocation174_spill] sm:$0xff]  ;;  %v13390_v43 = vld [vmem:[#allocation205_spill] sm:$0xff]  ;;  %v10720_v51 = vld [vmem:[%s8068_s21 + $0xa0] sm:$0xff] }
 0x38d   : > { %13382 = vst [vmem:[#allocation78_spill] sm:$0xff] %v10553_v35  ;;  %v10581_v4 = vmul.f32 1.442695, %v4147_v5  ;;  %v10583_v7 = vpop.eup %7594  ;;  %7604 = vpow2.f32 %v10473_v63  ;;  %v4268_v59 = vsub.f32 %v13386_v24, %v10492_v2  ;;  %v4389_v37 = vsub.f32 %v13387_v47, %v10492_v2  ;;  %v13389_v53 = vld [vmem:[#allocation190_spill] sm:$0xff]  ;;  %v13392_v47 = vld [vmem:[#allocation220_spill] sm:$0xff] }
 0x38e   : > { %13383 = vst [vmem:[#allocation94_spill] sm:$0xff] %v10561_v50  ;;  %v4677_v17 = vadd.f32 %v10525_v16, %v4556_v45  ;;  %v10591_v35 = vpop.eup %7596  ;;  %v3710_v26 = vadd.f32 %v10583_v7, %v3589_v56  ;;  %7606 = vpow2.f32 %v10479_v30  ;;  %v4510_v5 = vsub.f32 %v13389_v53, %v10492_v2 }
 0x38f   : > { %13384 = vst [vmem:[#allocation110_spill] sm:$0xff] %v10567_v15  ;;  %v4631_v45 = vsub.f32 %v13390_v43, %v10492_v2  ;;  %v10599_v63 = vpop.eup %7598  ;;  %7608 = vpow2.f32 %v10496_v12  ;;  %v4752_v16 = vsub.f32 %v13392_v47, %v10492_v2  ;;  %v4873_v56 = vsub.f32 %v13091_v19, %v10492_v2 }
 0x390   : > { %13385 = vst [vmem:[#allocation126_spill] sm:$0xff] %v10583_v7  ;;  %v4798_v24 = vadd.f32 %v10536_v41, %v4677_v17  ;;  %v13393_v30 = vunpack.c.l.bf16 %v10395_v39  ;;  %v3831_v7 = vadd.f32 %v10599_v63, %v3710_v26  ;;  %7610 = vpow2.f32 %v10498_v3  ;;  %v10625_v41 = vld [vmem:[%s8068_s21 + $0x3f8] sm:$0xff] }
 0x391   : > { %13388 = vst [vmem:[#allocation142_spill] sm:$0xff] %v10591_v35  ;;  %v4994_v17 = vsub.f32 %v9240_v36, %v10492_v2  ;;  %v10616_v43 = vpop.eup %7600  ;;  %7612 = vpow2.f32 %v10500_v10  ;;  %v10620_v47 = vmul.f32 1.442695, %v4268_v59  ;;  %v10622_v19 = vmul.f32 1.442695, %v4389_v37 }
 0x392   : > { %13391 = vst [vmem:[#allocation158_spill] sm:$0xff] %v10599_v63  ;;  %v10610_v53 = vmul.f32 %v10575_v20, %v13393_v30  ;;  %v4919_v12 = vadd.f32 %v10561_v50, %v4798_v24  ;;  %v10627_v30 = vpop.eup %7602  ;;  %v3952_v26 = vadd.f32 %v10616_v43, %v3831_v7  ;;  %7614 = vpow2.f32 %v10505_v48 }
 0x393   : > { %13395 = vst [vmem:[#allocation190_spill] sm:$0xff] %v10616_v43  ;;  %v10631_v3 = vmul.f32 1.442695, %v4510_v5  ;;  %v10633_v36 = vmul.f32 1.442695, %v4631_v45  ;;  %7616 = vpow2.f32 %v3331_v31  ;;  %v5115_v37 = vsub.f32 %v10470_v57, %v10492_v2  ;;  %v13401_v57 = vld [vmem:[#allocation48_spill] sm:$0xff] }
 0x394   : > { %13394 = vst [vmem:[#allocation174_spill] sm:$0xff] %v10610_v53  ;;  %v10635_v53 = vpop.eup %7604  ;;  %v10637_v10 = vmul.f32 1.442695, %v4752_v16  ;;  %v10639_v59 = vmul.f32 1.442695, %v4873_v56  ;;  %v4073_v7 = vadd.f32 %v10627_v30, %v3952_v26  ;;  %7618 = vpow2.f32 %v3451_v6  ;;  %v13400_v16 = vld [vmem:[#allocation33_spill] sm:$0xff] }
 0x395   : > { %13396 = vst [vmem:[#allocation205_spill] sm:$0xff] %v10627_v30  ;;  %v10643_v24 = vpop.eup %7606  ;;  %v10646_v48 = vmul.f32 1.442695, %v4994_v17  ;;  %v5040_v31 = vadd.f32 %v10591_v35, %v4919_v12  ;;  %7620 = vpow2.f32 %v10512_v33  ;;  %v3302_v56 = vsub.f32 %v13400_v16, %v10559_v44  ;;  %v13403_v17 = vld [vmem:[#allocation63_spill] sm:$0xff] }
 0x396   : > { %13397 = vst [vmem:[#allocation220_spill] sm:$0xff] %v10635_v53  ;;  %v10649_v45 = vpop.eup %7608  ;;  %v3422_v2 = vsub.f32 %v13401_v57, %v10559_v44  ;;  %v4194_v6 = vadd.f32 %v10635_v53, %v4073_v7  ;;  %7622 = vpow2.f32 %v3572_v11  ;;  %v3543_v26 = vsub.f32 %v13403_v17, %v10559_v44  ;;  %v13404_v5 = vld [vmem:[#allocation79_spill] sm:$0xff] }
 0x397   : > { %13398 = vst [vmem:[#allocation247_spill] sm:$0xff] %v10643_v24  ;;  %v10657_v50 = vpop.eup %7610  ;;  %v3664_v30 = vsub.f32 %v13404_v5, %v10559_v44  ;;  %7624 = vpow2.f32 %v10514_v42  ;;  %v13406_v33 = vld [vmem:[#allocation95_spill] sm:$0xff]  ;;  %v10677_v5 = vmul.f32 1.442695, %v5115_v37  ;;  %v3609_v27 = vunpack.c.l.bf16 %v10720_v51 }
 0x398   : > { %13399 = vst [vmem:[#allocation248_spill] sm:$0xff] %v10649_v45  ;;  %v10664_v12 = vpop.eup %7612  ;;  %v3785_v16 = vsub.f32 %v13406_v33, %v10559_v44  ;;  %v13407_v57 = vld [vmem:[#allocation111_spill] sm:$0xff]  ;;  %v4315_v17 = vadd.f32 %v10643_v24, %v4194_v6  ;;  %7626 = vpow2.f32 %v10565_v40  ;;  %v10685_v63 = vmul.f32 1.442695, %v3422_v2 }
 0x399   : > { %13402 = vst [vmem:[#allocation33_spill] sm:$0xff] %v10657_v50  ;;  %v3906_v35 = vsub.f32 %v13407_v57, %v10559_v44  ;;  %v13408_v43 = vld [vmem:[#allocation127_spill] sm:$0xff]  ;;  %v10673_v11 = vpop.eup %7614  ;;  %v5161_v57 = vadd.f32 %v10575_v20, %v5040_v31  ;;  %7628 = vpow2.f32 %v10547_v29  ;;  %v10691_v40 = vmul.f32 1.442695, %v3543_v26 }
 0x39a   : > { %13405 = vst [vmem:[#allocation48_spill] sm:$0xff] %v10664_v12  ;;  %v4027_v7 = vsub.f32 %v13408_v43, %v10559_v44  ;;  %v13409_v42 = vld [vmem:[#allocation143_spill] sm:$0xff]  ;;  %v10681_v33 = vpop.eup %7616  ;;  %v3333_v43 = vmul.f32 1.442695, %v3302_v56  ;;  %v4436_v6 = vadd.f32 %v10649_v45, %v4315_v17  ;;  %7630 = vpow2.f32 %v10571_v49 }
 0x39b   : > { %v4148_v53 = vsub.f32 %v13409_v42, %v10559_v44  ;;  %13410 = vst [vmem:[#allocation63_spill] sm:$0xff] %v10681_v33  ;;  %v10687_v15 = vpop.eup %7618  ;;  %v10693_v37 = vmul.f32 1.442695, %v3664_v30  ;;  %v10696_v42 = vld [vmem:[%s8068_s21 + $0x20] sm:$0xff]  ;;  %v10705_v31 = vmul.f32 1.442695, %v3785_v16  ;;  %7632 = vpow2.f32 %v10573_v32 }
 0x39c   : > { %13411 = vst [vmem:[#allocation79_spill] sm:$0xff] %v10687_v15  ;;  %v10699_v24 = vld [vmem:[%s8068_s21 + $0x60] sm:$0xff]  ;;  %v10701_v20 = vpop.eup %7620  ;;  %v3469_v29 = vadd.f32 %v10687_v15, %v10681_v33  ;;  %v10707_v56 = vmul.f32 1.442695, %v3906_v35  ;;  %v10709_v2 = vmul.f32 1.442695, %v4027_v7  ;;  %v4557_v30 = vadd.f32 %v10657_v50, %v4436_v6 }
 0x39d   : > { %v10711_v49 = vpop.eup %7622  ;;  %v10715_v26 = vmul.f32 1.442695, %v4148_v53  ;;  %v13413_v17 = vld [vmem:[#allocation159_spill] sm:$0xff]  ;;  %7634 = vrcp.f32 %v5161_v57  ;;  %v3367_v18 = vunpack.c.l.bf16 %v10696_v42  ;;  %v3488_v57 = vunpack.c.l.bf16 %v10699_v24 }
 0x39e   : > { %13412 = vst [vmem:[#allocation95_spill] sm:$0xff] %v10711_v49  ;;  %v4269_v45 = vsub.f32 %v13413_v17, %v10559_v44  ;;  %v10722_v15 = vpop.eup %7624  ;;  %v3590_v35 = vadd.f32 %v10711_v49, %v3469_v29  ;;  %v13415_v16 = vld [vmem:[#allocation175_spill] sm:$0xff]  ;;  %7636 = vpow2.f32 %v10579_v13  ;;  %v13418_v17 = vld [vmem:[#allocation208_spill] sm:$0xff]  ;;  %v13419_v49 = vld [vmem:[#allocation226_spill] sm:$0xff] }
 0x39f   : > { %13414 = vst [vmem:[#allocation111_spill] sm:$0xff] %v10722_v15  ;;  %v4390_v7 = vsub.f32 %v13415_v16, %v10559_v44  ;;  %v13416_v6 = vld [vmem:[#allocation191_spill] sm:$0xff]  ;;  %v10732_v53 = vpop.eup %7626  ;;  %v4632_v50 = vsub.f32 %v13418_v17, %v10559_v44  ;;  %v4678_v16 = vadd.f32 %v10664_v12, %v4557_v30  ;;  %v4753_v46 = vsub.f32 %v13419_v49, %v10559_v44 }
 0x3a0   : > { %v4511_v33 = vsub.f32 %v13416_v6, %v10559_v44  ;;  %v10730_v32 = vld [vmem:[%s8068_s21 + $0xe0] sm:$0xff]  ;;  %13417 = vst [vmem:[#allocation127_spill] sm:$0xff] %v10732_v53  ;;  %v10739_v29 = vpop.eup %7628  ;;  %v3711_v6 = vadd.f32 %v10732_v53, %v3590_v35  ;;  %7638 = vpow2.f32 %v10581_v4  ;;  %v3383_v17 = vmul.f32 %v9648_v60, %v3367_v18 }
 0x3a1   : > { %v10747_v13 = vld [vmem:[%s8068_s21 + $0x120] sm:$0xff]  ;;  %v10749_v34 = vpop.eup %7630  ;;  %v3504_v9 = vmul.f32 %v9653_v38, %v3488_v57  ;;  %v3730_v61 = vunpack.c.l.bf16 %v10730_v32  ;;  %7640 = vpow2.f32 %v10620_v47  ;;  %v10757_v49 = vmul.f32 1.442695, %v4269_v45 }
 0x3a2   : > { %13420 = vst [vmem:[#allocation143_spill] sm:$0xff] %v10749_v34  ;;  %v3832_v30 = vadd.f32 %v10749_v34, %v3711_v6  ;;  %v10759_v35 = vmul.f32 1.442695, %v4390_v7  ;;  %v10762_v53 = vld [vmem:[%s8068_s21 + $0x160] sm:$0xff]  ;;  %v10764_v12 = vpop.eup %7632  ;;  %7642 = vpow2.f32 %v10622_v19  ;;  %v3625_v38 = vmul.f32 %v9664_v62, %v3609_v27 }
 0x3a3   : > { %13421 = vst [vmem:[#allocation159_spill] sm:$0xff] %v10764_v12  ;;  %v3520_v60 = vadd.f32 %v3504_v9, %v3383_v17  ;;  %v3851_v18 = vunpack.c.l.bf16 %v10747_v13  ;;  %v10769_v4 = vpop.eup %7634  ;;  %v4799_v47 = vadd.f32 %v10673_v11, %v4678_v16  ;;  %v13422_v45 = vunpack.c.h.bf16 %v10395_v39  ;;  %v10780_v19 = vld [vmem:[%s8068_s21 + $0x1a0] sm:$0xff] }
 0x3a4   : > { %v3953_v57 = vadd.f32 %v10764_v12, %v3832_v30  ;;  %7644 = vpow2.f32 %v10631_v3  ;;  %v10782_v9 = vpop.eup %7636  ;;  %v3746_v27 = vmul.f32 %v9676_v8, %v3730_v61  ;;  %v3972_v6 = vunpack.c.l.bf16 %v10762_v53  ;;  %v10793_v3 = vld [vmem:[%s8068_s21 + $0x1e0] sm:$0xff] }
 0x3a5   : > { %v10775_v7 = vmul.f32 %v10739_v29, %v13422_v45  ;;  %13424 = vst [vmem:[#allocation191_spill] sm:$0xff] %v10782_v9  ;;  %7646 = vpow2.f32 %v3333_v43  ;;  %v3641_v62 = vadd.f32 %v3625_v38, %v3520_v60  ;;  %v10788_v16 = vmul.f32 1.442695, %v4511_v33  ;;  %v10808_v38 = vld [vmem:[%s8068_s21 + $0x220] sm:$0xff] }
 0x3a6   : > { %v4074_v39 = vadd.f32 %v10782_v9, %v3953_v57  ;;  %7648 = vpow2.f32 %v10685_v63  ;;  %v10790_v17 = vmul.f32 1.442695, %v4632_v50  ;;  %v10795_v30 = vpop.eup %7638  ;;  %v3867_v8 = vmul.f32 %v9686_v25, %v3851_v18  ;;  %v10832_v9 = vld [vmem:[%s8068_s21 + $0x2a0] sm:$0xff] }
 0x3a7   : > { %13423 = vst [vmem:[#allocation175_spill] sm:$0xff] %v10775_v7  ;;  %7650 = vpow2.f32 %v10633_v36  ;;  %v3762_v43 = vadd.f32 %v3746_v27, %v3641_v62  ;;  %v4093_v61 = vunpack.c.l.bf16 %v10780_v19  ;;  %v10800_v60 = vpop.eup %7640  ;;  %v4920_v63 = vadd.f32 %v10701_v20, %v4799_v47  ;;  %v13428_v36 = vld [vmem:[#allocation180_spill] sm:$0xff]  ;;  %v10816_v62 = vld [vmem:[%s8068_s21 + $0x260] sm:$0xff] }
 0x3a8   : > { %13425 = vst [vmem:[#allocation208_spill] sm:$0xff] %v10795_v30  ;;  %v4195_v33 = vadd.f32 %v10795_v30, %v4074_v39  ;;  %7652 = vpow2.f32 %v10691_v40  ;;  %v10805_v50 = vmul.f32 1.442695, %v4753_v46  ;;  %v10810_v45 = vpop.eup %7642  ;;  %v3988_v18 = vmul.f32 %v13428_v36, %v3972_v6  ;;  %v13430_v46 = vld [vmem:[#allocation160_spill] sm:$0xff] }
 0x3a9   : > { %13426 = vst [vmem:[#allocation226_spill] sm:$0xff] %v10800_v60  ;;  %7654 = vpow2.f32 %v10637_v10  ;;  %v3883_v25 = vadd.f32 %v3867_v8, %v3762_v43  ;;  %v4214_v57 = vunpack.c.l.bf16 %v10793_v3  ;;  %v4874_v27 = vsub.f32 %v13430_v46, %v10559_v44  ;;  %v13431_v39 = vld [vmem:[#allocation80_spill] sm:$0xff]  ;;  %v13433_v43 = vld [vmem:[#allocation210_spill] sm:$0xff] }
 0x3aa   : > { %13427 = vst [vmem:[#allocation249_spill] sm:$0xff] %v10810_v45  ;;  %v10818_v47 = vpop.eup %7644  ;;  %v4316_v40 = vadd.f32 %v10800_v60, %v4195_v33  ;;  %7656 = vpow2.f32 %v10693_v37  ;;  %v4109_v8 = vmul.f32 %v13433_v43, %v4093_v61  ;;  %v4335_v36 = vunpack.c.l.bf16 %v10808_v38 }
 0x3ab   : > { %13429 = vst [vmem:[#allocation180_spill] sm:$0xff] %v10818_v47  ;;  %v10826_v10 = vpop.eup %7646  ;;  %7658 = vpow2.f32 %v10639_v59  ;;  %v4004_v6 = vadd.f32 %v3988_v18, %v3883_v25  ;;  %v5041_v37 = vadd.f32 %v10722_v15, %v4920_v63  ;;  %v4456_v30 = vunpack.c.l.bf16 %v10816_v62  ;;  %v13436_v25 = vld [vmem:[#allocation23_spill] sm:$0xff] }
 0x3ac   : > { %13432 = vst [vmem:[#allocation160_spill] sm:$0xff] %v10826_v10  ;;  %v10834_v33 = vpop.eup %7648  ;;  %v4437_v46 = vadd.f32 %v10810_v45, %v4316_v40  ;;  %7660 = vpow2.f32 %v10705_v31  ;;  %v4230_v18 = vmul.f32 %v13436_v25, %v4214_v57  ;;  %v10849_v63 = vmul.f32 1.442695, %v4874_v27  ;;  %v10855_v45 = vld [vmem:[%s8068_s21 + $0x2e0] sm:$0xff]  ;;  %v13438_v25 = vld [vmem:[#allocation38_spill] sm:$0xff] }
 0x3ad   : > { %13434 = vst [vmem:[#allocation80_spill] sm:$0xff] %v10834_v33  ;;  %v10840_v60 = vpop.eup %7650  ;;  %7662 = vpow2.f32 %v10646_v48  ;;  %v3470_v59 = vadd.f32 %v10834_v33, %v10826_v10  ;;  %v4125_v61 = vadd.f32 %v4109_v8, %v4004_v6  ;;  %v4577_v40 = vunpack.c.l.bf16 %v10832_v9  ;;  %v13440_v10 = vld [vmem:[#allocation224_spill] sm:$0xff] }
 0x3ae   : > { %13435 = vst [vmem:[#allocation210_spill] sm:$0xff] %v10840_v60  ;;  %v10846_v43 = vpop.eup %7652  ;;  %7664 = vpow2.f32 %v10707_v56  ;;  %v4558_v6 = vadd.f32 %v10818_v47, %v4437_v46  ;;  %v4351_v33 = vmul.f32 %v13438_v25, %v4335_v36  ;;  %v10863_v56 = vld [vmem:[%s8068_s21 + $0x320] sm:$0xff]  ;;  %v5162_v31 = vadd.f32 %v10739_v29, %v5041_v37  ;;  %v13444_v47 = vld [vmem:[#allocation101_spill] sm:$0xff] }
 0x3af   : > { %13437 = vst [vmem:[#allocation23_spill] sm:$0xff] %v10846_v43  ;;  %v10857_v48 = vpop.eup %7654  ;;  %v3591_v57 = vadd.f32 %v10846_v43, %v3470_v59  ;;  %v4246_v8 = vadd.f32 %v4230_v18, %v4125_v61  ;;  %7666 = vpow2.f32 %v10709_v2  ;;  %v4472_v12 = vmul.f32 %v13440_v10, %v4456_v30  ;;  %v10876_v36 = vld [vmem:[%s8068_s21 + $0x360] sm:$0xff]  ;;  %v13442_v2 = vld [vmem:[#allocation53_spill] sm:$0xff] }
 0x3b0   : > { %v10865_v27 = vpop.eup %7656  ;;  %v3368_v34 = vunpack.c.h.bf16 %v10696_v42  ;;  %v4698_v61 = vunpack.c.l.bf16 %v10855_v45  ;;  %v3489_v18 = vunpack.c.h.bf16 %v10699_v24  ;;  %7668 = vpow2.f32 %v10715_v26  ;;  %v13443_v30 = vld [vmem:[#allocation85_spill] sm:$0xff] }
 0x3b1   : > { %13439 = vst [vmem:[#allocation38_spill] sm:$0xff] %v10865_v27  ;;  %v10871_v7 = vpop.eup %7658  ;;  %v3712_v46 = vadd.f32 %v10865_v27, %v3591_v57  ;;  %v4367_v59 = vadd.f32 %v4351_v33, %v4246_v8  ;;  %v4593_v29 = vmul.f32 %v13442_v2, %v4577_v40  ;;  %v4819_v42 = vunpack.c.l.bf16 %v10863_v56  ;;  %v10895_v40 = vld [vmem:[%s8068_s21 + $0x3a0] sm:$0xff] }
 0x3b2   : > { %v10879_v25 = vpop.eup %7660  ;;  %v3384_v10 = vmul.f32 %v13443_v30, %v3368_v34  ;;  %v4679_v33 = vadd.f32 %v10840_v60, %v4558_v6  ;;  %v3505_v27 = vmul.f32 %v13444_v47, %v3489_v18  ;;  %7670 = vpow2.f32 %v10757_v49  ;;  %v13445_v60 = vld [vmem:[#allocation69_spill] sm:$0xff] }
 0x3b3   : > { %13441 = vst [vmem:[#allocation224_spill] sm:$0xff] %v10879_v25  ;;  %v10885_v37 = vpop.eup %7662  ;;  %v3833_v57 = vadd.f32 %v10879_v25, %v3712_v46  ;;  %v4488_v8 = vadd.f32 %v4472_v12, %v4367_v59  ;;  %v4940_v26 = vunpack.c.l.bf16 %v10876_v36  ;;  %v3610_v2 = vunpack.c.h.bf16 %v10720_v51  ;;  %v13446_v47 = vld [vmem:[#allocation117_spill] sm:$0xff] }
 0x3b4   : > { %v10890_v24 = vpop.eup %7664  ;;  %v3731_v34 = vunpack.c.h.bf16 %v10730_v32  ;;  %v4714_v46 = vmul.f32 %v13445_v60, %v4698_v61  ;;  %v3521_v12 = vadd.f32 %v3505_v27, %v3384_v10  ;;  %7672 = vpow2.f32 %v10759_v35  ;;  %v13447_v18 = vld [vmem:[#allocation133_spill] sm:$0xff] }
 0x3b5   : > { %v3954_v30 = vadd.f32 %v10890_v24, %v3833_v57  ;;  %v4609_v6 = vadd.f32 %v4593_v29, %v4488_v8  ;;  %v10901_v59 = vpop.eup %7666  ;;  %v4835_v49 = vmul.f32 %v13446_v47, %v4819_v42  ;;  %v3626_v25 = vmul.f32 %v13447_v18, %v3610_v2  ;;  %v13448_v27 = vld [vmem:[#allocation165_spill] sm:$0xff] }
 0x3b6   : > { %v3852_v43 = vunpack.c.h.bf16 %v10747_v13  ;;  %v4800_v51 = vadd.f32 %v10857_v48, %v4679_v33  ;;  %v5061_v29 = vunpack.c.l.bf16 %v10895_v40  ;;  %v10910_v57 = vpop.eup %7668  ;;  %7674 = vpow2.f32 %v10677_v5  ;;  %v13449_v10 = vld [vmem:[#allocation149_spill] sm:$0xff] }
 0x3b7   : > { %v4075_v32 = vadd.f32 %v10901_v59, %v3954_v30  ;;  %v4730_v15 = vadd.f32 %v4714_v46, %v4609_v6  ;;  %v3642_v60 = vadd.f32 %v3626_v25, %v3521_v12  ;;  %v3747_v35 = vmul.f32 %v13448_v27, %v3731_v34  ;;  %v13450_v30 = vld [vmem:[#allocation196_spill] sm:$0xff]  ;;  %v13451_v34 = vld [vmem:[#allocation181_spill] sm:$0xff]  ;;  %v13452_v12 = vld [vmem:[#allocation211_spill] sm:$0xff] }
 0x3b8   : > { %v3973_v61 = vunpack.c.h.bf16 %v10762_v53  ;;  %7676 = vrcp.f32 %v5162_v31  ;;  %v4956_v33 = vmul.f32 %v13449_v10, %v4940_v26  ;;  %v10917_v8 = vpop.eup %7670  ;;  %v3868_v6 = vmul.f32 %v13450_v30, %v3852_v43  ;;  %v10931_v43 = vld [vmem:[%s8068_s21] sm:$0xff] }
 0x3b9   : > { %v4196_v42 = vadd.f32 %v10910_v57, %v4075_v32  ;;  %v4851_v13 = vadd.f32 %v4835_v49, %v4730_v15  ;;  %7678 = vpow2.f32 %v10788_v16  ;;  %v3763_v2 = vadd.f32 %v3747_v35, %v3642_v60  ;;  %v13454_v60 = vld [vmem:[#allocation39_spill] sm:$0xff] }
 0x3ba   : > { %v4094_v5 = vunpack.c.h.bf16 %v10780_v19  ;;  %v4921_v25 = vadd.f32 %v10871_v7, %v4800_v51  ;;  %v5077_v15 = vmul.f32 %v13451_v34, %v5061_v29  ;;  %v10925_v46 = vpop.eup %7672  ;;  %7680 = vpow2.f32 %v10790_v17  ;;  %v10937_v51 = vld [vmem:[%s8068_s21 + $0x40] sm:$0xff] }
 0x3bb   : > { %v4317_v53 = vadd.f32 %v10917_v8, %v4196_v42  ;;  %v4972_v31 = vadd.f32 %v4956_v33, %v4851_v13  ;;  %v3884_v26 = vadd.f32 %v3868_v6, %v3763_v2  ;;  %v3989_v16 = vmul.f32 %v13452_v12, %v3973_v61  ;;  %v13455_v61 = vld [vmem:[#allocation70_spill] sm:$0xff]  ;;  %v10953_v10 = vld [vmem:[%s8068_s21 + $0x80] sm:$0xff]  ;;  %v13457_v2 = vld [vmem:[#allocation96_spill] sm:$0xff] }
 0x3bc   : > { %v4215_v47 = vunpack.c.h.bf16 %v10793_v3  ;;  %7682 = vpow2.f32 %v10805_v50  ;;  %v4336_v18 = vunpack.c.h.bf16 %v10808_v38  ;;  %v10939_v32 = vpop.eup %7674  ;;  %v13453_v17 = vsub.f32 %v13431_v39, %v10559_v44 }
 0x3bd   : > { %v4438_v19 = vadd.f32 %v10925_v46, %v4317_v53  ;;  %v5093_v49 = vadd.f32 %v5077_v15, %v4972_v31  ;;  %7684 = vpow2.f32 %v10849_v63  ;;  %v4005_v29 = vadd.f32 %v3989_v16, %v3884_v26  ;;  %v10956_v63 = vld [vmem:[%s8068_s21 + $0xc0] sm:$0xff]  ;;  %v13458_v31 = vld [vmem:[#allocation192_spill] sm:$0xff]  ;;  %v13460_v16 = vld [vmem:[#allocation193_spill] sm:$0xff] }
 0x3be   : > { %v5026_v3 = vmul.f32 1.442695, %v13453_v17  ;;  %v4110_v27 = vmul.f32 %v13454_v60, %v4094_v5  ;;  %v10946_v35 = vpop.eup %7676  ;;  %v5042_v50 = vadd.f32 %v10885_v37, %v4921_v25  ;;  %v4457_v42 = vunpack.c.h.bf16 %v10816_v62  ;;  %v10968_v15 = vld [vmem:[%s8068_s21 + $0x100] sm:$0xff] }
 0x3bf   : > { %v5214_v38 = vadd.f32 %v13455_v61, %v5093_v49  ;;  %v3359_v13 = vunpack.c.l.bf16 %v10931_v43  ;;  %v10958_v39 = vpop.eup %7678  ;;  %v4231_v30 = vmul.f32 %v13457_v2, %v4215_v47  ;;  %v4578_v6 = vunpack.c.h.bf16 %v10832_v9 }
 0x3c0   : > { %13456 = vst [vmem:[#allocation53_spill] sm:$0xff] %v10958_v39  ;;  %v4126_v33 = vadd.f32 %v4110_v27, %v4005_v29  ;;  %v3480_v5 = vunpack.c.l.bf16 %v10937_v51  ;;  %v4559_v25 = vadd.f32 %v10958_v39, %v4438_v19  ;;  %v4352_v53 = vmul.f32 %v9808_v14, %v4336_v18  ;;  %v10970_v26 = vpop.eup %7680  ;;  %v10983_v29 = vld [vmem:[%s8068_s21 + $0x140] sm:$0xff] }
 0x3c1   : > { %v5246_v62 = vmul.f32 %v9884_v22, %v5214_v38  ;;  %v3375_v34 = vmul.f32 %v13458_v31, %v3359_v13  ;;  %13459 = vst [vmem:[#allocation85_spill] sm:$0xff] %v10970_v26  ;;  %v3601_v9 = vunpack.c.l.bf16 %v10953_v10  ;;  %v3722_v49 = vunpack.c.l.bf16 %v10956_v63  ;;  %v13464_v38 = vld [vmem:[#allocation207_spill] sm:$0xff]  ;;  %v13467_v31 = vld [vmem:[#allocation86_spill] sm:$0xff] }
 0x3c2   : > { %v4247_v12 = vadd.f32 %v4231_v30, %v4126_v33  ;;  %v3496_v47 = vmul.f32 %v13460_v16, %v3480_v5  ;;  %v10975_v17 = vpop.eup %7682  ;;  %7686 = vpow2.f32 %v5026_v3  ;;  %v13462_v14 = vsub.f32 %v10534_v23, %v10559_v44  ;;  %v13465_v44 = vld [vmem:[#allocation54_spill] sm:$0xff]  ;;  %v13466_v5 = vld [vmem:[#allocation209_spill] sm:$0xff] }
 0x3c3   : > { %13461 = vst [vmem:[#allocation101_spill] sm:$0xff] %v10975_v17  ;;  %5308 = vmatpush.msra.mxu0 %v5246_v62  ;;  %v4473_v19 = vmul.f32 %v9813_v28, %v4457_v42  ;;  %v4699_v18 = vunpack.c.h.bf16 %v10855_v45  ;;  %v10985_v60 = vpop.eup %7684  ;;  %v3617_v13 = vmul.f32 %v13464_v38, %v3601_v9  ;;  %v3843_v3 = vunpack.c.l.bf16 %v10968_v15  ;;  %v10994_v45 = vld [vmem:[%s8068_s21 + $0x180] sm:$0xff]  ;;  %v13468_v16 = vld [vmem:[#allocation221_spill] sm:$0xff] }
 0x3c4   : > { %v5147_v22 = vmul.f32 1.442695, %v13462_v14  ;;  %13463 = vst [vmem:[#allocation69_spill] sm:$0xff] %v10985_v60  ;;  %v4368_v27 = vadd.f32 %v4352_v53, %v4247_v12  ;;  %v3512_v61 = vadd.f32 %v3496_v47, %v3375_v34  ;;  %v5163_v33 = vadd.f32 %v10939_v32, %v5042_v50  ;;  %v13470_v38 = vld [vmem:[#allocation223_spill] sm:$0xff] }
 0x3c5   : > { %v4680_v23 = vadd.f32 %v10970_v26, %v4559_v25  ;;  %v4594_v2 = vmul.f32 %v13465_v44, %v4578_v6  ;;  %v4820_v28 = vunpack.c.h.bf16 %v10863_v56  ;;  %v3738_v62 = vmul.f32 %v13466_v5, %v3722_v49  ;;  %v11002_v6 = vld [vmem:[%s8068_s21 + $0x1c0] sm:$0xff]  ;;  %v13484_v26 = vld [vmem:[#allocation129_spill] sm:$0xff] }
 0x3c6   : > { %v4489_v42 = vadd.f32 %v4473_v19, %v4368_v27  ;;  %v3633_v30 = vadd.f32 %v3617_v13, %v3512_v61  ;;  %v3964_v53 = vunpack.c.l.bf16 %v10983_v29  ;;  %7688 = vpow2.f32 %v5147_v22  ;;  %v11007_v49 = vld [vmem:[%s8068_s21 + $0x200] sm:$0xff]  ;;  %v13469_v19 = vld [vmem:[#allocation134_spill] sm:$0xff] }
 0x3c7   : > { %v4715_v34 = vmul.f32 %v13467_v31, %v4699_v18  ;;  %v4941_v50 = vunpack.c.h.bf16 %v10876_v36  ;;  %v5062_v25 = vunpack.c.h.bf16 %v10895_v40  ;;  %v3859_v47 = vmul.f32 %v13468_v16, %v3843_v3  ;;  %v11015_v18 = vld [vmem:[%s8068_s21 + $0x240] sm:$0xff]  ;;  %v13473_v31 = vld [vmem:[#allocation225_spill] sm:$0xff] }
 0x3c8   : > { %v4610_v56 = vadd.f32 %v4594_v2, %v4489_v42  ;;  %v3754_v12 = vadd.f32 %v3738_v62, %v3633_v30  ;;  %v4085_v9 = vunpack.c.l.bf16 %v10994_v45  ;;  %v11009_v14 = vpop.eup %7686  ;;  %7690 = vrcp.f32 %v5163_v33  ;;  %v11020_v44 = vld [vmem:[%s8068_s21 + $0x280] sm:$0xff]  ;;  %v13471_v2 = vld [vmem:[#allocation166_spill] sm:$0xff]  ;;  %v13472_v42 = vld [vmem:[#allocation197_spill] sm:$0xff] }
 0x3c9   : > { %v4801_v22 = vadd.f32 %v10975_v17, %v4680_v23  ;;  %v4836_v40 = vmul.f32 %v13469_v19, %v4820_v28  ;;  %v3980_v13 = vmul.f32 %v13470_v38, %v3964_v53  ;;  %v4206_v3 = vunpack.c.l.bf16 %v11002_v6  ;;  %v11029_v53 = vld [vmem:[%s8068_s21 + $0x2c0] sm:$0xff] }
 0x3ca   : > { %v4731_v27 = vadd.f32 %v4715_v34, %v4610_v56  ;;  %v3875_v61 = vadd.f32 %v3859_v47, %v3754_v12  ;;  %v4957_v33 = vmul.f32 %v13471_v2, %v4941_v50  ;;  %v5078_v23 = vmul.f32 %v13472_v42, %v5062_v25  ;;  %v11038_v16 = vld [vmem:[%s8068_s21 + $0x300] sm:$0xff]  ;;  %v13474_v47 = vld [vmem:[#allocation49_spill] sm:$0xff] }
 0x3cb   : > { %v4327_v30 = vunpack.c.l.bf16 %v11007_v49  ;;  %v3360_v28 = vunpack.c.h.bf16 %v10931_v43  ;;  %v4101_v34 = vmul.f32 %v13473_v31, %v4085_v9  ;;  %v4448_v56 = vunpack.c.l.bf16 %v11015_v18  ;;  %v11044_v38 = vld [vmem:[%s8068_s21 + $0x340] sm:$0xff] }
 0x3cc   : > { %v4852_v5 = vadd.f32 %v4836_v40, %v4731_v27  ;;  %v3996_v62 = vadd.f32 %v3980_v13, %v3875_v61  ;;  %v11031_v12 = vpop.eup %7688  ;;  %v11034_v50 = vadd.f32 %v10985_v60, %v4801_v22  ;;  %v4569_v25 = vunpack.c.l.bf16 %v11020_v44  ;;  %v13475_v27 = vld [vmem:[#allocation227_spill] sm:$0xff]  ;;  %v13477_v22 = vld [vmem:[#allocation228_spill] sm:$0xff] }
 0x3cd   : > { %v3376_v43 = vmul.f32 %v13474_v47, %v3360_v28  ;;  %v3481_v19 = vunpack.c.h.bf16 %v10937_v51  ;;  %v4222_v61 = vmul.f32 %v13475_v27, %v4206_v3  ;;  %v3602_v13 = vunpack.c.h.bf16 %v10953_v10  ;;  %v11052_v36 = vld [vmem:[%s8068_s21 + $0x380] sm:$0xff]  ;;  %v13478_v28 = vld [vmem:[#allocation65_spill] sm:$0xff] }
 0x3ce   : > { %v4973_v40 = vadd.f32 %v4957_v33, %v4852_v5  ;;  %v4117_v9 = vadd.f32 %v4101_v34, %v3996_v62  ;;  %v11047_v2 = vpop.eup %7690  ;;  %v4343_v42 = vmul.f32 %v13477_v22, %v4327_v30  ;;  %v4690_v31 = vunpack.c.l.bf16 %v11029_v53  ;;  %v13479_v62 = vld [vmem:[#allocation19_spill] sm:$0xff]  ;;  %v13480_v22 = vld [vmem:[#allocation97_spill] sm:$0xff] }
 0x3cf   : > { %13476 = vst [vmem:[#allocation117_spill] sm:$0xff] %v11047_v2  ;;  %v3497_v47 = vmul.f32 %v13478_v28, %v3481_v19  ;;  %v3723_v51 = vunpack.c.h.bf16 %v10956_v63  ;;  %v4464_v3 = vmul.f32 %v13479_v62, %v4448_v56  ;;  %v4811_v34 = vunpack.c.l.bf16 %v11038_v16  ;;  %v11060_v27 = vld [vmem:[%s8068_s21 + $0x3c0] sm:$0xff] }
 0x3d0   : > { %v5094_v33 = vadd.f32 %v5078_v23, %v4973_v40  ;;  %v4238_v5 = vadd.f32 %v4222_v61, %v4117_v9  ;;  %v4932_v10 = vunpack.c.l.bf16 %v11044_v38  ;;  %v3618_v60 = vmul.f32 %v13480_v22, %v3602_v13  ;;  %v13481_v19 = vld [vmem:[#allocation55_spill] sm:$0xff]  ;;  %v13482_v40 = vld [vmem:[#allocation112_spill] sm:$0xff]  ;;  %v13483_v61 = vld [vmem:[#allocation34_spill] sm:$0xff] }
 0x3d1   : > { %v3513_v30 = vadd.f32 %v3497_v47, %v3376_v43  ;;  %v3844_v17 = vunpack.c.h.bf16 %v10968_v15  ;;  %v5053_v23 = vunpack.c.l.bf16 %v11052_v36  ;;  %v3965_v56 = vunpack.c.h.bf16 %v10983_v29  ;;  %v13485_v29 = vld [vmem:[#allocation81_spill] sm:$0xff]  ;;  %v13489_v22 = vld [vmem:[#allocation35_spill] sm:$0xff] }
 0x3d2   : > { %v5215_v28 = vadd.f32 %v13481_v19, %v5094_v33  ;;  %v4359_v63 = vadd.f32 %v4343_v42, %v4238_v5  ;;  %v4585_v9 = vmul.f32 %v13482_v40, %v4569_v25  ;;  %v4706_v62 = vmul.f32 %v13483_v61, %v4690_v31  ;;  %v11074_v42 = vld [vmem:[%s8068_s21 + $0x28] sm:$0xff]  ;;  %v13486_v5 = vld [vmem:[#allocation113_spill] sm:$0xff] }
 0x3d3   : > { %v3634_v2 = vadd.f32 %v3618_v60, %v3513_v30  ;;  %v3739_v39 = vmul.f32 %v13484_v26, %v3723_v51  ;;  %v5174_v13 = vunpack.c.l.bf16 %v11060_v27  ;;  %v4086_v15 = vunpack.c.h.bf16 %v10994_v45  ;;  %v11077_v33 = vld [vmem:[%s8068_s21 + $0x68] sm:$0xff]  ;;  %v13487_v30 = vld [vmem:[#allocation161_spill] sm:$0xff] }
 0x3d4   : > { %v5247_v43 = vmul.f32 %v9977_v54, %v5215_v28  ;;  %v4480_v47 = vadd.f32 %v4464_v3, %v4359_v63  ;;  %v4827_v25 = vmul.f32 %v13485_v29, %v4811_v34  ;;  %v4948_v31 = vmul.f32 %v13486_v5, %v4932_v10  ;;  %v13488_v51 = vld [vmem:[#allocation145_spill] sm:$0xff]  ;;  %v11089_v10 = vld [vmem:[%s8068_s21 + $0xa8] sm:$0xff]  ;;  %v13493_v29 = vld [vmem:[#allocation118_spill] sm:$0xff] }
 0x3d5   : > { %v3755_v60 = vadd.f32 %v3739_v39, %v3634_v2  ;;  %v3860_v26 = vmul.f32 %v13487_v30, %v3844_v17  ;;  %v5069_v3 = vmul.f32 %v13488_v51, %v5053_v23  ;;  %v3981_v19 = vmul.f32 %v13489_v22, %v3965_v56  ;;  %v11092_v39 = vld [vmem:[%s8068_s21 + $0xe8] sm:$0xff]  ;;  %v13491_v23 = vld [vmem:[#allocation50_spill] sm:$0xff] }
 0x3d6   : > { %5337 = vmatpush.msra.mxu1 %v5247_v43  ;;  %v4601_v54 = vadd.f32 %v4585_v9, %v4480_v47  ;;  %v4207_v45 = vunpack.c.h.bf16 %v11002_v6  ;;  %v4328_v63 = vunpack.c.h.bf16 %v11007_v49  ;;  %v3369_v40 = vunpack.c.l.bf16 %v11074_v42  ;;  %v13490_v2 = vld [vmem:[#allocation20_spill] sm:$0xff]  ;;  %v13492_v49 = vld [vmem:[#allocation102_spill] sm:$0xff] }
 0x3d7   : > { %v3876_v28 = vadd.f32 %v3860_v26, %v3755_v60  ;;  %v3490_v34 = vunpack.c.l.bf16 %v11077_v33  ;;  %v5190_v9 = vmul.f32 %v13490_v2, %v5174_v13  ;;  %v4102_v56 = vmul.f32 %v13491_v23, %v4086_v15  ;;  %v11101_v60 = vld [vmem:[%s8068_s21 + $0x128] sm:$0xff]  ;;  %v13497_v2 = vld [vmem:[#allocation150_spill] sm:$0xff] }
 0x3d8   : > { %v4722_v17 = vadd.f32 %v4706_v62, %v4601_v54  ;;  %v4449_v61 = vunpack.c.h.bf16 %v11015_v18  ;;  %v4570_v43 = vunpack.c.h.bf16 %v11020_v44  ;;  %v3385_v47 = vmul.f32 %v13492_v49, %v3369_v40  ;;  %v13494_v54 = vld [vmem:[#allocation66_spill] sm:$0xff]  ;;  %v13495_v51 = vld [vmem:[#allocation128_spill] sm:$0xff] }
 0x3d9   : > { %v3997_v6 = vadd.f32 %v3981_v19, %v3876_v28  ;;  %v3506_v5 = vmul.f32 %v13493_v29, %v3490_v34  ;;  %v4691_v26 = vunpack.c.h.bf16 %v11029_v53  ;;  %v3611_v62 = vunpack.c.l.bf16 %v11089_v10  ;;  %v11109_v19 = vld [vmem:[%s8068_s21 + $0x168] sm:$0xff]  ;;  %v13496_v40 = vld [vmem:[#allocation82_spill] sm:$0xff] }
 0x3da   : > { %v4843_v30 = vadd.f32 %v4827_v25, %v4722_v17  ;;  %v3732_v13 = vunpack.c.l.bf16 %v11092_v39  ;;  %v4223_v18 = vmul.f32 %v13494_v54, %v4207_v45  ;;  %v4344_v22 = vmul.f32 %v13495_v51, %v4328_v63  ;;  %v11126_v54 = vld [vmem:[%s8068_s21 + $0x1e8] sm:$0xff] }
 0x3db   : > { %v4118_v15 = vadd.f32 %v4102_v56, %v3997_v6  ;;  %v3522_v44 = vadd.f32 %v3506_v5, %v3385_v47  ;;  %v4465_v34 = vmul.f32 %v13496_v40, %v4449_v61  ;;  %v3627_v25 = vmul.f32 %v13497_v2, %v3611_v62  ;;  %v11118_v6 = vld [vmem:[%s8068_s21 + $0x1a8] sm:$0xff]  ;;  %v13498_v47 = vld [vmem:[#allocation182_spill] sm:$0xff] }
 0x3dc   : > { %v4964_v28 = vadd.f32 %v4948_v31, %v4843_v30  ;;  %v3853_v53 = vunpack.c.l.bf16 %v11101_v60  ;;  %v4812_v23 = vunpack.c.h.bf16 %v11038_v16  ;;  %v4933_v56 = vunpack.c.h.bf16 %v11044_v38  ;;  %v13499_v5 = vld [vmem:[#allocation98_spill] sm:$0xff] }
 0x3dd   : > { %v4239_v17 = vadd.f32 %v4223_v18, %v4118_v15  ;;  %v5054_v45 = vunpack.c.h.bf16 %v11052_v36  ;;  %v3643_v49 = vadd.f32 %v3627_v25, %v3522_v44  ;;  %v3748_v31 = vmul.f32 %v13498_v47, %v3732_v13  ;;  %v13500_v62 = vld [vmem:[#allocation114_spill] sm:$0xff]  ;;  %v13501_v18 = vld [vmem:[#allocation213_spill] sm:$0xff]  ;;  %v11149_v47 = vld [vmem:[%s8068_s21 + $0x2a8] sm:$0xff] }
 0x3de   : > { %v5085_v63 = vadd.f32 %v5069_v3, %v4964_v28  ;;  %v3974_v61 = vunpack.c.l.bf16 %v11109_v19  ;;  %v4586_v30 = vmul.f32 %v13499_v5, %v4570_v43  ;;  %v4707_v15 = vmul.f32 %v13500_v62, %v4691_v26  ;;  %v13502_v44 = vld [vmem:[#allocation162_spill] sm:$0xff]  ;;  %v13504_v43 = vld [vmem:[#allocation232_spill] sm:$0xff]  ;;  %v13508_v62 = vld [vmem:[#allocation25_spill] sm:$0xff] }
 0x3df   : > { %v4360_v29 = vadd.f32 %v4344_v22, %v4239_v17  ;;  %v5175_v16 = vunpack.c.h.bf16 %v11060_v27  ;;  %v3764_v36 = vadd.f32 %v3748_v31, %v3643_v49  ;;  %v3869_v3 = vmul.f32 %v13501_v18, %v3853_v53  ;;  %v13503_v22 = vld [vmem:[#allocation21_spill] sm:$0xff]  ;;  %v11134_v26 = vld [vmem:[%s8068_s21 + $0x228] sm:$0xff]  ;;  %v13505_v27 = vld [vmem:[#allocation83_spill] sm:$0xff] }
 0x3e0   : > { %v5206_v38 = vadd.f32 %v5190_v9, %v5085_v63  ;;  %v4095_v51 = vunpack.c.l.bf16 %v11118_v6  ;;  %v4828_v28 = vmul.f32 %v13502_v44, %v4812_v23  ;;  %v4949_v40 = vmul.f32 %v13503_v22, %v4933_v56  ;;  %v11140_v9 = vld [vmem:[%s12105_s2] sm:$0xff]  ;;  %v13506_v53 = vld [vmem:[#allocation229_spill] sm:$0xff]  ;;  %v11162_v18 = vld [vmem:[%s8068_s21 + $0x328] sm:$0xff] }
 0x3e1   : > { %v4481_v13 = vadd.f32 %v4465_v34, %v4360_v29  ;;  %v5070_v2 = vmul.f32 %v13504_v43, %v5054_v45  ;;  %v3885_v17 = vadd.f32 %v3869_v3, %v3764_v36  ;;  %v3990_v63 = vmul.f32 %v13506_v53, %v3974_v61  ;;  %v13507_v56 = vld [vmem:[#allocation67_spill] sm:$0xff]  ;;  %v11146_v45 = vld [vmem:[%s8068_s21 + $0x268] sm:$0xff] }
 0x3e2   : > { %v5238_v25 = vmul.f32 %v13505_v27, %v5206_v38  ;;  %v4216_v34 = vunpack.c.l.bf16 %v11126_v54  ;;  %v5191_v49 = vmul.f32 %v13507_v56, %v5175_v16  ;;  %v3370_v31 = vunpack.c.h.bf16 %v11074_v42  ;;  %v11159_v16 = vld [vmem:[%s8068_s21 + $0x2e8] sm:$0xff] }
 0x3e3   : > { %v4602_v23 = vadd.f32 %v4586_v30, %v4481_v13  ;;  %v3491_v29 = vunpack.c.h.bf16 %v11077_v33  ;;  %v4006_v5 = vadd.f32 %v3990_v63, %v3885_v17  ;;  %v4111_v38 = vmul.f32 %v13508_v62, %v4095_v51  ;;  %v13509_v33 = vld [vmem:[#allocation119_spill] sm:$0xff]  ;;  %v13510_v44 = vld [vmem:[#allocation40_spill] sm:$0xff] }
 0x3e4   : > { %5309 = vmatpush.msra.mxu0 %v5238_v25  ;;  %v4337_v61 = vunpack.c.l.bf16 %v11134_v26  ;;  %v3612_v36 = vunpack.c.h.bf16 %v11089_v10  ;;  %v3386_v42 = vmul.f32 %v9930_v58, %v3370_v31  ;;  %v3733_v13 = vunpack.c.h.bf16 %v11092_v39  ;;  %v11171_v27 = vld [vmem:[%s8068_s21 + $0x368] sm:$0xff]  ;;  %v13511_v17 = vld [vmem:[#allocation151_spill] sm:$0xff] }
 0x3e5   : > { %v4723_v30 = vadd.f32 %v4707_v15, %v4602_v23  ;;  %6829 = vmatmul.msk.f32.vlgmr.msra.gmra.mxu0 %vm531_vm0, %v11140_v9  ;;  %v3507_v3 = vmul.f32 %v13509_v33, %v3491_v29  ;;  %v4127_v51 = vadd.f32 %v4111_v38, %v4006_v5  ;;  %v4232_v22 = vmul.f32 %v13510_v44, %v4216_v34  ;;  %v13512_v23 = vld [vmem:[#allocation177_spill] sm:$0xff]  ;;  %v11179_v29 = vld [vmem:[%s8068_s21 + $0x3a8] sm:$0xff]  ;;  %v13516_v44 = vld [vmem:[#allocation218_spill] sm:$0xff] }
 0x3e6   : > { %v4458_v10 = vunpack.c.l.bf16 %v11146_v45  ;;  %v4579_v15 = vunpack.c.l.bf16 %v11149_v47  ;;  %v3628_v53 = vmul.f32 %v13511_v17, %v3612_v36  ;;  %v3854_v58 = vunpack.c.h.bf16 %v11101_v60  ;;  %v13518_v17 = vld [vmem:[#allocation135_spill] sm:$0xff] }
 0x3e7   : > { %v4844_v43 = vadd.f32 %v4828_v28, %v4723_v30  ;;  %v3523_v25 = vadd.f32 %v3507_v3, %v3386_v42  ;;  %v4248_v63 = vadd.f32 %v4232_v22, %v4127_v51  ;;  %v4353_v56 = vmul.f32 %v13512_v23, %v4337_v61  ;;  %v13513_v28 = vld [vmem:[#allocation183_spill] sm:$0xff] }
 0x3e8   : > { %v4700_v39 = vunpack.c.l.bf16 %v11159_v16  ;;  %v4821_v34 = vunpack.c.l.bf16 %v11162_v18  ;;  %v3749_v62 = vmul.f32 %v13513_v28, %v3733_v13  ;;  %v3975_v38 = vunpack.c.h.bf16 %v11109_v19  ;;  %v13514_v30 = vld [vmem:[#allocation71_spill] sm:$0xff] }
 0x3e9   : > { %v4965_v31 = vadd.f32 %v4949_v40, %v4844_v43  ;;  %v3644_v5 = vadd.f32 %v3628_v53, %v3523_v25  ;;  %v4369_v36 = vadd.f32 %v4353_v56, %v4248_v63  ;;  %v4474_v60 = vmul.f32 %v13514_v30, %v4458_v10  ;;  %v13515_v42 = vld [vmem:[#allocation87_spill] sm:$0xff]  ;;  %v11189_v43 = vld [vmem:[%s8068_s21 + $0x8] sm:$0xff] }
 0x3ea   : > { %v4595_v33 = vmul.f32 %v13515_v42, %v4579_v15  ;;  %v4942_v61 = vunpack.c.l.bf16 %v11171_v27  ;;  %v3870_v40 = vmul.f32 %v13516_v44, %v3854_v58  ;;  %v4096_v22 = vunpack.c.h.bf16 %v11118_v6  ;;  %v13517_v25 = vld [vmem:[#allocation103_spill] sm:$0xff]  ;;  %v11195_v15 = vld [vmem:[%s8068_s21 + $0x48] sm:$0xff] }
 0x3eb   : > { %v5086_v3 = vadd.f32 %v5070_v2, %v4965_v31  ;;  %v3765_v51 = vadd.f32 %v3749_v62, %v3644_v5  ;;  %v4490_v13 = vadd.f32 %v4474_v60, %v4369_v36  ;;  %v4716_v19 = vmul.f32 %v13517_v25, %v4700_v39  ;;  %v13519_v2 = vld [vmem:[#allocation26_spill] sm:$0xff]  ;;  %v11200_v6 = vld [vmem:[%s8068_s21 + $0x88] sm:$0xff]  ;;  %v13520_v5 = vld [vmem:[#allocation167_spill] sm:$0xff] }
 0x3ec   : > { %v4837_v53 = vmul.f32 %v13518_v17, %v4821_v34  ;;  %v5063_v10 = vunpack.c.l.bf16 %v11179_v29  ;;  %v3991_v56 = vmul.f32 %v13519_v2, %v3975_v38  ;;  %v4217_v58 = vunpack.c.h.bf16 %v11126_v54  ;;  %v11206_v62 = vld [vmem:[%s8068_s21 + $0xc8] sm:$0xff]  ;;  %v13522_v60 = vld [vmem:[#allocation41_spill] sm:$0xff]  ;;  %v13525_v25 = vld [vmem:[#allocation146_spill] sm:$0xff] }
 0x3ed   : > { %v5207_v63 = vadd.f32 %v5191_v49, %v5086_v3  ;;  %v3886_v23 = vadd.f32 %v3870_v40, %v3765_v51  ;;  %v4611_v31 = vadd.f32 %v4595_v33, %v4490_v13  ;;  %v4958_v28 = vmul.f32 %v13520_v5, %v4942_v61  ;;  %v13521_v36 = vld [vmem:[#allocation52_spill] sm:$0xff]  ;;  %v13523_v33 = vld [vmem:[#allocation130_spill] sm:$0xff] }
 0x3ee   : > { %v4338_v39 = vunpack.c.h.bf16 %v11134_v26  ;;  %v3361_v34 = vunpack.c.l.bf16 %v11189_v43  ;;  %v4112_v42 = vmul.f32 %v13522_v60, %v4096_v22  ;;  %v3482_v38 = vunpack.c.l.bf16 %v11195_v15  ;;  %v11215_v26 = vld [vmem:[%s8068_s21 + $0x108] sm:$0xff] }
 0x3ef   : > { %v5239_v30 = vmul.f32 %v13521_v36, %v5207_v63  ;;  %v4007_v49 = vadd.f32 %v3991_v56, %v3886_v23  ;;  %v4732_v54 = vadd.f32 %v4716_v19, %v4611_v31  ;;  %v4459_v3 = vunpack.c.h.bf16 %v11146_v45  ;;  %v13524_v40 = vld [vmem:[#allocation56_spill] sm:$0xff]  ;;  %v13526_v45 = vld [vmem:[#allocation199_spill] sm:$0xff] }
 0x3f0   : > { %v3377_v51 = vmul.f32 %v13523_v33, %v3361_v34  ;;  %v3603_v61 = vunpack.c.l.bf16 %v11200_v6  ;;  %v4233_v13 = vmul.f32 %v13524_v40, %v4217_v58  ;;  %v3498_v17 = vmul.f32 %v13525_v25, %v3482_v38  ;;  %v11226_v56 = vld [vmem:[%s8068_s21 + $0x148] sm:$0xff] }
 0x3f1   : > { %5338 = vmatpush.msra.mxu1 %v5239_v30  ;;  %v4128_v44 = vadd.f32 %v4112_v42, %v4007_v49  ;;  %v3724_v22 = vunpack.c.l.bf16 %v11206_v62  ;;  %v4853_v19 = vadd.f32 %v4837_v53, %v4732_v54  ;;  %v5079_v63 = vmul.f32 %v13526_v45, %v5063_v10  ;;  %v13527_v58 = vld [vmem:[#allocation144_spill] sm:$0xff] }
 0x3f2   : > { %6833 = vmatmul.msk.f32.vlgmr.msra.gmra.mxu1 %vm531_vm0, %v11140_v9  ;;  %v4354_v23 = vmul.f32 %v9997_v21, %v4338_v39  ;;  %v4580_v2 = vunpack.c.h.bf16 %v11149_v47  ;;  %v3514_v5 = vadd.f32 %v3498_v17, %v3377_v51  ;;  %v3619_v34 = vmul.f32 %v13527_v58, %v3603_v61  ;;  %v11234_v21 = vld [vmem:[%s8068_s21 + $0x188] sm:$0xff]  ;;  %v13529_v51 = vld [vmem:[#allocation51_spill] sm:$0xff] }
 0x3f3   : > { %v4249_v31 = vadd.f32 %v4233_v13, %v4128_v44  ;;  %v3845_v36 = vunpack.c.l.bf16 %v11215_v26  ;;  %v4974_v30 = vadd.f32 %v4958_v28, %v4853_v19  ;;  %v4475_v49 = vmul.f32 %v10006_v55, %v4459_v3  ;;  %v13528_v60 = vld [vmem:[#allocation36_spill] sm:$0xff] }
 0x3f4   : > { %v4701_v53 = vunpack.c.h.bf16 %v11159_v16  ;;  %v4822_v10 = vunpack.c.h.bf16 %v11162_v18  ;;  %v3635_v39 = vadd.f32 %v3619_v34, %v3514_v5  ;;  %v3740_v42 = vmul.f32 %v13528_v60, %v3724_v22  ;;  %v11245_v3 = vld [vmem:[%s8068_s21 + $0x1c8] sm:$0xff] }
 0x3f5   : > { %v4370_v47 = vadd.f32 %v4354_v23, %v4249_v31  ;;  %v3966_v38 = vunpack.c.l.bf16 %v11226_v56  ;;  %v11240_v54 = vadd.f32 %v11009_v14, %v11034_v50  ;;  %v5095_v28 = vadd.f32 %v5079_v63, %v4974_v30  ;;  %v11250_v40 = vld [vmem:[%s8068_s21 + $0x208] sm:$0xff]  ;;  %v13532_v63 = vld [vmem:[#allocation233_spill] sm:$0xff]  ;;  %v13533_v31 = vld [vmem:[#allocation27_spill] sm:$0xff] }
 0x3f6   : > { %v4596_v55 = vmul.f32 %v10011_v0, %v4580_v2  ;;  %v4943_v16 = vunpack.c.h.bf16 %v11171_v27  ;;  %v3756_v33 = vadd.f32 %v3740_v42, %v3635_v39  ;;  %v3861_v61 = vmul.f32 %v13529_v51, %v3845_v36  ;;  %v13530_v13 = vld [vmem:[#allocation72_spill] sm:$0xff]  ;;  %v13538_v51 = vld [vmem:[#allocation235_spill] sm:$0xff] }
 0x3f7   : > { %v4491_v18 = vadd.f32 %v4475_v49, %v4370_v47  ;;  %v4087_v44 = vunpack.c.l.bf16 %v11234_v21  ;;  %v5216_v25 = vadd.f32 %v13530_v13, %v5095_v28  ;;  %v4717_v50 = vmul.f32 %v10015_v1, %v4701_v53  ;;  %v13531_v17 = vld [vmem:[#allocation120_spill] sm:$0xff]  ;;  %v13535_v53 = vld [vmem:[#allocation234_spill] sm:$0xff]  ;;  %v13537_v28 = vld [vmem:[#allocation147_spill] sm:$0xff] }
 0x3f8   : > { %v4838_v22 = vmul.f32 %v13531_v17, %v4822_v10  ;;  %v5064_v0 = vunpack.c.h.bf16 %v11179_v29  ;;  %v11257_v27 = vld [vmem:[%s8068_s21 + $0x248] sm:$0xff]  ;;  %v3877_v45 = vadd.f32 %v3861_v61, %v3756_v33  ;;  %v3982_v23 = vmul.f32 %v13532_v63, %v3966_v38 }
 0x3f9   : > { %v4612_v19 = vadd.f32 %v4596_v55, %v4491_v18  ;;  %v4208_v2 = vunpack.c.l.bf16 %v11245_v3  ;;  %v5248_v5 = vmul.f32 %v13533_v31, %v5216_v25  ;;  %v13534_v58 = vld [vmem:[#allocation152_spill] sm:$0xff]  ;;  %v4329_v1 = vunpack.c.l.bf16 %v11250_v40  ;;  %v13539_v25 = vld [vmem:[#allocation99_spill] sm:$0xff] }
 0x3fa   : > { %v4959_v34 = vmul.f32 %v13534_v58, %v4943_v16  ;;  %v11265_v36 = vld [vmem:[%s8068_s21 + $0x288] sm:$0xff]  ;;  %v3362_v30 = vunpack.c.h.bf16 %v11189_v43  ;;  %v3998_v49 = vadd.f32 %v3982_v23, %v3877_v45  ;;  %v4103_v10 = vmul.f32 %v13535_v53, %v4087_v44 }
 0x3fb   : > { %v4733_v29 = vadd.f32 %v4717_v50, %v4612_v19  ;;  %v4450_v47 = vunpack.c.l.bf16 %v11257_v27  ;;  %v11271_v39 = vld [vmem:[%s8068_s21 + $0x2c8] sm:$0xff]  ;;  %5366 = vmatpush.msra.mxu2 %v5248_v5  ;;  %v3483_v16 = vunpack.c.h.bf16 %v11195_v15  ;;  %v3604_v43 = vunpack.c.h.bf16 %v11200_v6 }
 0x3fc   : > { %v13536_v60 = vld [vmem:[#allocation184_spill] sm:$0xff]  ;;  %v3378_v55 = vmul.f32 %v13537_v28, %v3362_v30  ;;  %v4119_v33 = vadd.f32 %v4103_v10, %v3998_v49  ;;  %v4224_v61 = vmul.f32 %v13538_v51, %v4208_v2  ;;  %v4571_v44 = vunpack.c.l.bf16 %v11265_v36  ;;  %v13543_v10 = vld [vmem:[#allocation115_spill] sm:$0xff] }
 0x3fd   : > { %v5080_v42 = vmul.f32 %v13536_v60, %v5064_v0  ;;  %v11275_v38 = vld [vmem:[%s8068_s21 + $0x308] sm:$0xff]  ;;  %v4854_v18 = vadd.f32 %v4838_v22, %v4733_v29  ;;  %v4345_v50 = vmul.f32 %v13539_v25, %v4329_v1  ;;  %v4692_v17 = vunpack.c.l.bf16 %v11271_v39  ;;  %v13542_v1 = vld [vmem:[#allocation231_spill] sm:$0xff]  ;;  %v13547_v25 = vld [vmem:[#allocation178_spill] sm:$0xff] }
 0x3fe   : > { %v11283_v13 = vld [vmem:[%s8068_s21 + $0x348] sm:$0xff]  ;;  %v3725_v15 = vunpack.c.h.bf16 %v11206_v62  ;;  %v4240_v63 = vadd.f32 %v4224_v61, %v4119_v33  ;;  %v4813_v2 = vunpack.c.l.bf16 %v11275_v38  ;;  %v3620_v30 = vmul.f32 %v13542_v1, %v3604_v43  ;;  %v13544_v60 = vld [vmem:[#allocation131_spill] sm:$0xff] }
 0x3ff   : > { %v11288_v0 = vld [vmem:[%s8068_s21 + $0x388] sm:$0xff]  ;;  %v4975_v6 = vadd.f32 %v4959_v34, %v4854_v18  ;;  %v4934_v31 = vunpack.c.l.bf16 %v11283_v13  ;;  %v3846_v29 = vunpack.c.h.bf16 %v11215_v26  ;;  %v4587_v62 = vmul.f32 %v13543_v10, %v4571_v44  ;;  %v11318_v44 = vld [vmem:[%s8068_s21 + $0x30] sm:$0xff] }
 0x400   : > { %v13540_v19 = vld [vmem:[#allocation176_spill] sm:$0xff]  ;;  %v4361_v53 = vadd.f32 %v4345_v50, %v4240_v63  ;;  %v5055_v34 = vunpack.c.l.bf16 %v11288_v0  ;;  %v4708_v28 = vmul.f32 %v13544_v60, %v4692_v17  ;;  %v3967_v26 = vunpack.c.h.bf16 %v11226_v56  ;;  %v13548_v56 = vld [vmem:[#allocation163_spill] sm:$0xff]  ;;  %v13553_v60 = vld [vmem:[#allocation230_spill] sm:$0xff] }
 0x401   : > { %v3499_v45 = vmul.f32 %v13540_v19, %v3483_v16  ;;  %v13541_v22 = vld [vmem:[#allocation236_spill] sm:$0xff]  ;;  %v5096_v49 = vadd.f32 %v5080_v42, %v4975_v6  ;;  %v13545_v16 = vld [vmem:[#allocation179_spill] sm:$0xff]  ;;  %v13546_v42 = vld [vmem:[#allocation73_spill] sm:$0xff]  ;;  %v4088_v61 = vunpack.c.h.bf16 %v11234_v21  ;;  %v4829_v50 = vmul.f32 %v13547_v25, %v4813_v2 }
 0x402   : > { %v4466_v23 = vmul.f32 %v13541_v22, %v4450_v47  ;;  %v11296_v5 = vld [vmem:[%s8068_s21 + $0x3c8] sm:$0xff]  ;;  %v3741_v43 = vmul.f32 %v13545_v16, %v3725_v15  ;;  %v4950_v17 = vmul.f32 %v13548_v56, %v4934_v31  ;;  %v11324_v6 = vld [vmem:[%s8068_s21 + $0x70] sm:$0xff]  ;;  %v4209_v1 = vunpack.c.h.bf16 %v11245_v3 }
 0x403   : > { %v3515_v58 = vadd.f32 %v3499_v45, %v3378_v55  ;;  %v11305_v47 = vld [vmem:[%s12105_s2 + $0x8] sm:$0xff]  ;;  %v5217_v18 = vadd.f32 %v13546_v42, %v5096_v49  ;;  %v5176_v51 = vunpack.c.l.bf16 %v11296_v5  ;;  %v13549_v45 = vld [vmem:[#allocation22_spill] sm:$0xff]  ;;  %v11330_v21 = vld [vmem:[%s8068_s21 + $0xb0] sm:$0xff]  ;;  %v4330_v31 = vunpack.c.h.bf16 %v11250_v40 }
 0x404   : > { %6830 = vmatmul.msk.f32.gmra.mxu0 %vm531_vm0, %v11305_v47  ;;  %6834 = vmatmul.msk.f32.gmra.mxu1 %vm531_vm0, %v11305_v47  ;;  %v4482_v33 = vadd.f32 %v4466_v23, %v4361_v53  ;;  %v3862_v15 = vmul.f32 %v13549_v45, %v3846_v29  ;;  %v13550_v23 = vld [vmem:[#allocation194_spill] sm:$0xff]  ;;  %v13551_v49 = vld [vmem:[#allocation212_spill] sm:$0xff]  ;;  %v3371_v53 = vunpack.c.l.bf16 %v11318_v44  ;;  %v11336_v29 = vld [vmem:[%s8068_s21 + $0xf0] sm:$0xff]  ;;  %v3492_v3 = vunpack.c.l.bf16 %v11324_v6 }
 0x405   : > { %v3636_v55 = vadd.f32 %v3620_v30, %v3515_v58  ;;  %v5249_v63 = vmul.f32 %v10161_v52, %v5217_v18  ;;  %v5071_v58 = vmul.f32 %v13550_v23, %v5055_v34  ;;  %v3983_v2 = vmul.f32 %v13551_v49, %v3967_v26  ;;  %v13552_v52 = vld [vmem:[#allocation37_spill] sm:$0xff] }
 0x406   : > { %v4603_v22 = vadd.f32 %v4587_v62, %v4482_v33  ;;  %v5192_v62 = vmul.f32 %v13552_v52, %v5176_v51  ;;  %v4104_v34 = vmul.f32 %v13553_v60, %v4088_v61  ;;  %v4451_v16 = vunpack.c.h.bf16 %v11257_v27  ;;  %v11345_v42 = vld [vmem:[%s8068_s21 + $0x130] sm:$0xff]  ;;  %v13555_v33 = vld [vmem:[#allocation68_spill] sm:$0xff] }
 0x407   : > { %v3757_v19 = vadd.f32 %v3741_v43, %v3636_v55  ;;  %5395 = vmatpush.msra.mxu3 %v5249_v63  ;;  %v13554_v43 = vld [vmem:[#allocation46_spill] sm:$0xff]  ;;  %v3613_v40 = vunpack.c.l.bf16 %v11330_v21  ;;  %v4225_v25 = vmul.f32 %v13555_v33, %v4209_v1  ;;  %v3734_v56 = vunpack.c.l.bf16 %v11336_v29  ;;  %v11354_v63 = vld [vmem:[%s8068_s21 + $0x170] sm:$0xff] }
 0x408   : > { %v4724_v10 = vadd.f32 %v4708_v28, %v4603_v22  ;;  %v3387_v26 = vmul.f32 %v13554_v43, %v3371_v53  ;;  %v13556_v28 = vld [vmem:[#allocation61_spill] sm:$0xff]  ;;  %v4693_v27 = vunpack.c.h.bf16 %v11271_v39  ;;  %v3855_v1 = vunpack.c.l.bf16 %v11345_v42 }
 0x409   : > { %v3878_v30 = vadd.f32 %v3862_v15, %v3757_v19  ;;  %v3508_v51 = vmul.f32 %v13556_v28, %v3492_v3  ;;  %v13557_v19 = vld [vmem:[#allocation84_spill] sm:$0xff]  ;;  %v4572_v15 = vunpack.c.h.bf16 %v11265_v36  ;;  %v11362_v52 = vld [vmem:[%s8068_s21 + $0x1b0] sm:$0xff] }
 0x40a   : > { %v4845_v18 = vadd.f32 %v4829_v50, %v4724_v10  ;;  %v4346_v45 = vmul.f32 %v13557_v19, %v4330_v31  ;;  %v4814_v10 = vunpack.c.h.bf16 %v11275_v38  ;;  %v4935_v31 = vunpack.c.h.bf16 %v11283_v13  ;;  %v13560_v60 = vld [vmem:[#allocation141_spill] sm:$0xff] }
 0x40b   : > { %v3999_v55 = vadd.f32 %v3983_v2, %v3878_v30  ;;  %v3524_v23 = vadd.f32 %v3508_v51, %v3387_v26  ;;  %v13558_v30 = vld [vmem:[#allocation93_spill] sm:$0xff]  ;;  %v13559_v2 = vld [vmem:[#allocation206_spill] sm:$0xff]  ;;  %v13562_v26 = vld [vmem:[#allocation100_spill] sm:$0xff] }
 0x40c   : > { %v4966_v22 = vadd.f32 %v4950_v17, %v4845_v18  ;;  %v3629_v50 = vmul.f32 %v13558_v30, %v3613_v40  ;;  %v4467_v53 = vmul.f32 %v13559_v2, %v4451_v16  ;;  %v3750_v17 = vmul.f32 %v13560_v60, %v3734_v56  ;;  %v11370_v18 = vld [vmem:[%s8068_s21 + $0x1f0] sm:$0xff]  ;;  %v13564_v51 = vld [vmem:[#allocation116_spill] sm:$0xff] }
 0x40d   : > { %v4120_v61 = vadd.f32 %v4104_v34, %v3999_v55  ;;  %v3976_v34 = vunpack.c.l.bf16 %v11354_v63  ;;  %v13561_v55 = vld [vmem:[#allocation64_spill] sm:$0xff]  ;;  %v4709_v40 = vmul.f32 %v13562_v26, %v4693_v27  ;;  %v5056_v16 = vunpack.c.h.bf16 %v11288_v0  ;;  %v13566_v0 = vld [vmem:[#allocation195_spill] sm:$0xff]  ;;  %v11385_v2 = vld [vmem:[%s8068_s21 + $0x270] sm:$0xff] }
 0x40e   : > { %v5087_v36 = vadd.f32 %v5071_v58, %v4966_v22  ;;  %v3645_v39 = vadd.f32 %v3629_v50, %v3524_v23  ;;  %v4588_v43 = vmul.f32 %v13561_v55, %v4572_v15  ;;  %v13563_v58 = vld [vmem:[#allocation243_spill] sm:$0xff]  ;;  %v4830_v56 = vmul.f32 %v13564_v51, %v4814_v10  ;;  %v11378_v15 = vld [vmem:[%s8068_s21 + $0x230] sm:$0xff]  ;;  %v13570_v55 = vld [vmem:[#allocation62_spill] sm:$0xff] }
 0x40f   : > { %v4241_v49 = vadd.f32 %v4225_v25, %v4120_v61  ;;  %v3871_v33 = vmul.f32 %v13563_v58, %v3855_v1  ;;  %v4097_v25 = vunpack.c.l.bf16 %v11362_v52  ;;  %v13565_v61 = vld [vmem:[#allocation132_spill] sm:$0xff]  ;;  %v13567_v23 = vld [vmem:[#allocation173_spill] sm:$0xff]  ;;  %v4218_v30 = vunpack.c.l.bf16 %v11370_v18 }
 0x410   : > { %v5208_v38 = vadd.f32 %v5192_v62, %v5087_v36  ;;  %v3766_v13 = vadd.f32 %v3750_v17, %v3645_v39  ;;  %v4951_v19 = vmul.f32 %v13565_v61, %v4935_v31  ;;  %v3992_v62 = vmul.f32 %v13567_v23, %v3976_v34  ;;  %v13568_v1 = vld [vmem:[#allocation148_spill] sm:$0xff]  ;;  %v13569_v36 = vld [vmem:[#allocation189_spill] sm:$0xff] }
 0x411   : > { %v4362_v3 = vadd.f32 %v4346_v45, %v4241_v49  ;;  %v5177_v45 = vunpack.c.h.bf16 %v11296_v5  ;;  %v5072_v49 = vmul.f32 %v13568_v1, %v5056_v16  ;;  %v3372_v10 = vunpack.c.h.bf16 %v11318_v44  ;;  %v13571_v44 = vld [vmem:[#allocation78_spill] sm:$0xff]  ;;  %v11418_v1 = vld [vmem:[%s8068_s21 + $0x3b0] sm:$0xff] }
 0x412   : > { %v5240_v27 = vmul.f32 %v13566_v0, %v5208_v38  ;;  %v3887_v22 = vadd.f32 %v3871_v33, %v3766_v13  ;;  %v3493_v5 = vunpack.c.h.bf16 %v11324_v6  ;;  %v4113_v39 = vmul.f32 %v13569_v36, %v4097_v25  ;;  %v13572_v38 = vld [vmem:[#allocation203_spill] sm:$0xff]  ;;  %v11407_v33 = vld [vmem:[%s8068_s21 + $0x330] sm:$0xff]  ;;  %v13574_v0 = vld [vmem:[#allocation164_spill] sm:$0xff] }
 0x413   : > { %v4483_v28 = vadd.f32 %v4467_v53, %v4362_v3  ;;  %v11388_v53 = vld [vmem:[%s8068_s21 + $0x2b0] sm:$0xff]  ;;  %v4339_v60 = vunpack.c.l.bf16 %v11378_v15  ;;  %v3614_v17 = vunpack.c.h.bf16 %v11330_v21  ;;  %v3735_v6 = vunpack.c.h.bf16 %v11336_v29  ;;  %v13575_v29 = vld [vmem:[#allocation219_spill] sm:$0xff] }
 0x414   : > { %5367 = vmatpush.msra.mxu2 %v5240_v27  ;;  %v4008_v31 = vadd.f32 %v3992_v62, %v3887_v22  ;;  %v11398_v3 = vld [vmem:[%s8068_s21 + $0x2f0] sm:$0xff]  ;;  %v3509_v26 = vmul.f32 %v13571_v44, %v3493_v5  ;;  %v4234_v13 = vmul.f32 %v13572_v38, %v4218_v30  ;;  %v4460_v58 = vunpack.c.l.bf16 %v11385_v2 }
 0x415   : > { %v4604_v50 = vadd.f32 %v4588_v43, %v4483_v28  ;;  %6837 = vmatmul.msk.f32.vlgmr.msra.gmra.mxu2 %vm531_vm0, %v11140_v9  ;;  %v3388_v43 = vmul.f32 %v13570_v55, %v3372_v10  ;;  %v4581_v21 = vunpack.c.l.bf16 %v11388_v53  ;;  %v13573_v28 = vld [vmem:[#allocation110_spill] sm:$0xff]  ;;  %v3856_v61 = vunpack.c.h.bf16 %v11345_v42  ;;  %v13577_v42 = vld [vmem:[#allocation244_spill] sm:$0xff] }
 0x416   : > { %v4129_v16 = vadd.f32 %v4113_v39, %v4008_v31  ;;  %v3630_v51 = vmul.f32 %v13573_v28, %v3614_v17  ;;  %v5193_v27 = vmul.f32 %v13574_v0, %v5177_v45  ;;  %v4355_v23 = vmul.f32 %v13575_v29, %v4339_v60  ;;  %v13576_v10 = vld [vmem:[#allocation126_spill] sm:$0xff]  ;;  %v11441_v28 = vld [vmem:[%s8068_s21 + $0x50] sm:$0xff]  ;;  %v13582_v0 = vld [vmem:[#allocation47_spill] sm:$0xff] }
 0x417   : > { %v4725_v34 = vadd.f32 %v4709_v40, %v4604_v50  ;;  %v3525_v25 = vadd.f32 %v3509_v26, %v3388_v43  ;;  %v4702_v62 = vunpack.c.l.bf16 %v11398_v3  ;;  %v11415_v50 = vld [vmem:[%s8068_s21 + $0x370] sm:$0xff]  ;;  %v3751_v5 = vmul.f32 %v13576_v10, %v3735_v6  ;;  %v13579_v43 = vld [vmem:[#allocation158_spill] sm:$0xff] }
 0x418   : > { %v4250_v22 = vadd.f32 %v4234_v13, %v4129_v16  ;;  %v3977_v31 = vunpack.c.h.bf16 %v11354_v63  ;;  %v4476_v39 = vmul.f32 %v13577_v42, %v4460_v58  ;;  %v4823_v45 = vunpack.c.l.bf16 %v11407_v33  ;;  %v13580_v16 = vld [vmem:[#allocation32_spill] sm:$0xff]  ;;  %v11431_v13 = vld [vmem:[%s8068_s21 + $0x10] sm:$0xff] }
 0x419   : > { %v4846_v40 = vadd.f32 %v4830_v56, %v4725_v34  ;;  %v3646_v56 = vadd.f32 %v3630_v51, %v3525_v25  ;;  %v4098_v60 = vunpack.c.h.bf16 %v11362_v52  ;;  %v3872_v44 = vmul.f32 %v13579_v43, %v3856_v61  ;;  %v13581_v52 = vld [vmem:[#allocation190_spill] sm:$0xff]  ;;  %v11444_v51 = vld [vmem:[%s8068_s21 + $0x90] sm:$0xff] }
 0x41a   : > { %v4371_v36 = vadd.f32 %v4355_v23, %v4250_v22  ;;  %v4718_v6 = vmul.f32 %v13580_v16, %v4702_v62  ;;  %v4944_v63 = vunpack.c.l.bf16 %v11415_v50  ;;  %v5065_v38 = vunpack.c.l.bf16 %v11418_v1  ;;  %v13583_v22 = vld [vmem:[#allocation205_spill] sm:$0xff]  ;;  %v13584_v23 = vld [vmem:[#allocation24_spill] sm:$0xff] }
 0x41b   : > { %v4967_v30 = vadd.f32 %v4951_v19, %v4846_v40  ;;  %v13578_v19 = vld [vmem:[#allocation245_spill] sm:$0xff]  ;;  %v3767_v55 = vadd.f32 %v3751_v5, %v3646_v56  ;;  %v4219_v25 = vunpack.c.h.bf16 %v11370_v18  ;;  %v4114_v29 = vmul.f32 %v13583_v22, %v4098_v60  ;;  %v13586_v60 = vld [vmem:[#allocation220_spill] sm:$0xff] }
 0x41c   : > { %v4597_v34 = vmul.f32 %v13578_v19, %v4581_v21  ;;  %v4492_v26 = vadd.f32 %v4476_v39, %v4371_v36  ;;  %v5259_v21 = vld [vmem:[%s12106_s3 + $0x8] sm:$0xff]  ;;  %v4340_v18 = vunpack.c.h.bf16 %v11378_v15  ;;  %v7905_v56 = vmov 0   ;;  %v11452_v5 = vld [vmem:[%s8068_s21 + $0xd0] sm:$0xff]  ;;  %v13585_v36 = vld [vmem:[#allocation94_spill] sm:$0xff] }
 0x41d   : > { %v5088_v17 = vadd.f32 %v5072_v49, %v4967_v30  ;;  %v3888_v40 = vadd.f32 %v3872_v44, %v3767_v55  ;;  %v3993_v49 = vmul.f32 %v13581_v52, %v3977_v31  ;;  %6838 = vmatmul.msk.f32.gmra.mxu2 %vm531_vm0, %v11305_v47  ;;  %7154 = vset.pattern.permute.xlu1 %v7905_v56  ;;  %v3363_v10 = vunpack.c.l.bf16 %v11431_v13  ;;  %v11461_v43 = vld [vmem:[%s8068_s21 + $0x110] sm:$0xff]  ;;  %v13590_v52 = vld [vmem:[#allocation247_spill] sm:$0xff] }
 0x41e   : > { %v4613_v61 = vadd.f32 %v4597_v34, %v4492_v26  ;;  %7153 = vset.pattern.permute.xlu0 %v7905_v56  ;;  %v4960_v42 = vmul.f32 %v13585_v36, %v4944_v63  ;;  %5269 = vperm.xlu1 %7154, %v5259_v21   ;;  %v3484_v39 = vunpack.c.l.bf16 %v11441_v28  ;;  %v4461_v19 = vunpack.c.h.bf16 %v11385_v2  ;;  %v13587_v34 = vld [vmem:[#allocation88_spill] sm:$0xff]  ;;  %v13588_v26 = vld [vmem:[#allocation142_spill] sm:$0xff]  ;;  %v11472_v21 = vld [vmem:[%s8068_s21 + $0x150] sm:$0xff] }
 0x41f   : > { %v5209_v58 = vadd.f32 %v5193_v27, %v5088_v17  ;;  %v4839_v27 = vmul.f32 %v13582_v0, %v4823_v45  ;;  %v4009_v30 = vadd.f32 %v3993_v49, %v3888_v40  ;;  %v3605_v45 = vunpack.c.l.bf16 %v11444_v51  ;;  %7155 = vset.pattern.permute.xlu2 %v7905_v56  ;;  %v13591_v0 = vld [vmem:[#allocation136_spill] sm:$0xff]  ;;  %v11485_v36 = vld [vmem:[%s8068_s21 + $0x1d0] sm:$0xff] }
 0x420   : > { %v4734_v31 = vadd.f32 %v4718_v6, %v4613_v61  ;;  %v4235_v17 = vmul.f32 %v13586_v60, %v4219_v25  ;;  %v3379_v55 = vmul.f32 %v13587_v34, %v3363_v10  ;;  %v5081_v16 = vmul.f32 %v13588_v26, %v5065_v38  ;;  %v13589_v6 = vld [vmem:[#allocation104_spill] sm:$0xff] }
 0x421   : > { %v5241_v62 = vmul.f32 %v13584_v23, %v5209_v58  ;;  %v4130_v15 = vadd.f32 %v4114_v29, %v4009_v30  ;;  %v3500_v63 = vmul.f32 %v13589_v6, %v3484_v39  ;;  %v3726_v58 = vunpack.c.l.bf16 %v11452_v5  ;;  %v13592_v29 = vld [vmem:[#allocation248_spill] sm:$0xff] }
 0x422   : > { %v4855_v44 = vadd.f32 %v4839_v27, %v4734_v31  ;;  %v4356_v49 = vmul.f32 %v13590_v52, %v4340_v18  ;;  %v4582_v2 = vunpack.c.h.bf16 %v11388_v53  ;;  %v4703_v25 = vunpack.c.h.bf16 %v11398_v3  ;;  %v11480_v53 = vld [vmem:[%s8068_s21 + $0x190] sm:$0xff]  ;;  %v13593_v56 = vld [vmem:[#allocation168_spill] sm:$0xff]  ;;  %v13598_v52 = vld [vmem:[#allocation214_spill] sm:$0xff] }
 0x423   : > { %5396 = vmatpush.msra.mxu3 %v5241_v62  ;;  %v4251_v40 = vadd.f32 %v4235_v17, %v4130_v15  ;;  %v3621_v27 = vmul.f32 %v13591_v0, %v3605_v45  ;;  %v3847_v38 = vunpack.c.l.bf16 %v11461_v43  ;;  %v4477_v23 = vmul.f32 %v13592_v29, %v4461_v19  ;;  %v13594_v45 = vld [vmem:[#allocation33_spill] sm:$0xff]  ;;  %v13595_v15 = vld [vmem:[#allocation174_spill] sm:$0xff] }
 0x424   : > { %6841 = vmatmul.msk.f32.vlgmr.msra.gmra.mxu3 %vm531_vm0, %v11140_v9  ;;  %v4976_v61 = vadd.f32 %v4960_v42, %v4855_v44  ;;  %v3516_v9 = vadd.f32 %v3500_v63, %v3379_v55  ;;  %v4824_v62 = vunpack.c.h.bf16 %v11407_v33  ;;  %v4945_v30 = vunpack.c.h.bf16 %v11415_v50  ;;  %v13596_v19 = vld [vmem:[#allocation198_spill] sm:$0xff]  ;;  %v11497_v44 = vld [vmem:[%s8068_s21 + $0x210] sm:$0xff] }
 0x425   : > { %v4372_v22 = vadd.f32 %v4356_v49, %v4251_v40  ;;  %v3742_v10 = vmul.f32 %v13593_v56, %v3726_v58  ;;  %v3968_v31 = vunpack.c.l.bf16 %v11472_v21  ;;  %v11489_v42 = vadd.f32 %v11031_v12, %v11240_v54  ;;  %v11513_v0 = vld [vmem:[%s8068_s21 + $0x290] sm:$0xff] }
 0x426   : > { %v5097_v18 = vadd.f32 %v5081_v16, %v4976_v61  ;;  %v3637_v3 = vadd.f32 %v3621_v27, %v3516_v9  ;;  %v4598_v33 = vmul.f32 %v13594_v45, %v4582_v2  ;;  %v5066_v50 = vunpack.c.h.bf16 %v11418_v1  ;;  %v13597_v16 = vld [vmem:[#allocation48_spill] sm:$0xff]  ;;  %v11508_v2 = vld [vmem:[%s8068_s21 + $0x250] sm:$0xff]  ;;  %v13600_v27 = vld [vmem:[#allocation42_spill] sm:$0xff] }
 0x427   : > { %v4493_v39 = vadd.f32 %v4477_v23, %v4372_v22  ;;  %v3863_v34 = vmul.f32 %v13596_v19, %v3847_v38  ;;  %v4089_v55 = vunpack.c.l.bf16 %v11480_v53  ;;  %v4719_v54 = vmul.f32 %v13597_v16, %v4703_v25  ;;  %v13599_v25 = vld [vmem:[#allocation111_spill] sm:$0xff]  ;;  %v11518_v38 = vld [vmem:[%s8068_s21 + $0x2d0] sm:$0xff] }
 0x428   : > { %v5218_v60 = vadd.f32 %v13595_v15, %v5097_v18  ;;  %v3758_v17 = vadd.f32 %v3742_v10, %v3637_v3  ;;  %v4840_v6 = vmul.f32 %v10673_v11, %v4824_v62  ;;  %v4210_v63 = vunpack.c.l.bf16 %v11485_v36  ;;  %v11521_v22 = vld [vmem:[%s8068_s21 + $0x310] sm:$0xff] }
 0x429   : > { %v4614_v26 = vadd.f32 %v4598_v33, %v4493_v39  ;;  %v4961_v58 = vmul.f32 %v10701_v20, %v4945_v30  ;;  %v3984_v49 = vmul.f32 %v13598_v52, %v3968_v31  ;;  %v5082_v9 = vmul.f32 %v13599_v25, %v5066_v50  ;;  %v13601_v30 = vld [vmem:[#allocation57_spill] sm:$0xff] }
 0x42a   : > { %v5250_v1 = vmul.f32 %v10769_v4, %v5218_v60  ;;  %v3879_v40 = vadd.f32 %v3863_v34, %v3758_v17  ;;  %v4331_v11 = vunpack.c.l.bf16 %v11497_v44  ;;  %v3364_v4 = vunpack.c.h.bf16 %v11431_v13  ;;  %v13602_v56 = vld [vmem:[#allocation153_spill] sm:$0xff] }
 0x42b   : > { %v4735_v61 = vadd.f32 %v4719_v54, %v4614_v26  ;;  %v3485_v29 = vunpack.c.h.bf16 %v11441_v28  ;;  %v3606_v23 = vunpack.c.h.bf16 %v11444_v51  ;;  %v4226_v18 = vmul.f32 %v13601_v30, %v4210_v63  ;;  %v11530_v39 = vld [vmem:[%s8068_s21 + $0x350] sm:$0xff]  ;;  %v13605_v26 = vld [vmem:[#allocation200_spill] sm:$0xff] }
 0x42c   : > { %6842 = vmatmul.msk.f32.gmra.mxu3 %vm531_vm0, %v11305_v47  ;;  %5424 = vmatpush.msrb.mxu0 %v5250_v1  ;;  %v4000_v20 = vadd.f32 %v3984_v49, %v3879_v40  ;;  %v4105_v47 = vmul.f32 %v13600_v27, %v4089_v55  ;;  %v4452_v3 = vunpack.c.l.bf16 %v11508_v2  ;;  %v3380_v10 = vmul.f32 %v13602_v56, %v3364_v4  ;;  %v11533_v45 = vld [vmem:[%s8068_s21 + $0x390] sm:$0xff] }
 0x42d   : > { %v4856_v62 = vadd.f32 %v4840_v6, %v4735_v61  ;;  %v4573_v31 = vunpack.c.l.bf16 %v11513_v0  ;;  %v13603_v33 = vld [vmem:[#allocation169_spill] sm:$0xff]  ;;  %v3727_v28 = vunpack.c.h.bf16 %v11452_v5  ;;  %v4694_v17 = vunpack.c.l.bf16 %v11518_v38  ;;  %v13607_v61 = vld [vmem:[#allocation28_spill] sm:$0xff] }
 0x42e   : > { %v4121_v13 = vadd.f32 %v4105_v47, %v4000_v20  ;;  %v3501_v50 = vmul.f32 %v13603_v33, %v3485_v29  ;;  %v13604_v51 = vld [vmem:[#allocation89_spill] sm:$0xff]  ;;  %v4815_v19 = vunpack.c.l.bf16 %v11521_v22  ;;  %v3622_v16 = vmul.f32 %v13605_v26, %v3606_v23  ;;  %v11585_v26 = vld [vmem:[%s8068_s21 + $0xf8] sm:$0xff] }
 0x42f   : > { %v4977_v15 = vadd.f32 %v4961_v58, %v4856_v62  ;;  %v4347_v60 = vmul.f32 %v13604_v51, %v4331_v11  ;;  %v3848_v54 = vunpack.c.h.bf16 %v11461_v43  ;;  %v11545_v6 = vld [vmem:[%s12105_s2 + $0x10] sm:$0xff]  ;;  %v4936_v58 = vunpack.c.l.bf16 %v11530_v39  ;;  %v13608_v11 = vld [vmem:[#allocation175_spill] sm:$0xff] }
 0x430   : > { %v4242_v34 = vadd.f32 %v4226_v18, %v4121_v13  ;;  %v3517_v55 = vadd.f32 %v3501_v50, %v3380_v10  ;;  %v13606_v63 = vld [vmem:[#allocation105_spill] sm:$0xff]  ;;  %v5057_v40 = vunpack.c.l.bf16 %v11533_v45  ;;  %6831 = vmatmul.msk.f32.gmra.mxu0 %vm531_vm0, %v11545_v6  ;;  %6835 = vmatmul.msk.f32.gmra.mxu1 %vm531_vm0, %v11545_v6  ;;  %v3743_v25 = vmul.f32 %v13607_v61, %v3727_v28  ;;  %v11570_v10 = vld [vmem:[%s8068_s21 + $0x38] sm:$0xff]  ;;  %v13613_v50 = vld [vmem:[#allocation215_spill] sm:$0xff] }
 0x431   : > { %v5098_v5 = vadd.f32 %v5082_v9, %v4977_v15  ;;  %v4468_v1 = vmul.f32 %v13606_v63, %v4452_v3  ;;  %v11555_v52 = vld [vmem:[%s8068_s21 + $0x3d0] sm:$0xff]  ;;  %v3969_v9 = vunpack.c.h.bf16 %v11472_v21  ;;  %6839 = vmatmul.msk.f32.gmra.mxu2 %vm531_vm0, %v11545_v6  ;;  %v4090_v23 = vunpack.c.h.bf16 %v11480_v53  ;;  %v13612_v3 = vld [vmem:[#allocation58_spill] sm:$0xff] }
 0x432   : > { %v4363_v43 = vadd.f32 %v4347_v60, %v4242_v34  ;;  %v3638_v49 = vadd.f32 %v3622_v16, %v3517_v55  ;;  %v13609_v20 = vld [vmem:[#allocation121_spill] sm:$0xff]  ;;  %v3864_v56 = vmul.f32 %v13612_v3, %v3848_v54  ;;  %v11573_v13 = vld [vmem:[%s8068_s21 + $0x78] sm:$0xff]  ;;  %v4952_v28 = vmul.f32 %v13613_v50, %v4936_v58  ;;  %v13614_v60 = vld [vmem:[#allocation43_spill] sm:$0xff] }
 0x433   : > { %v5219_v4 = vadd.f32 %v13608_v11, %v5098_v5  ;;  %v4589_v27 = vmul.f32 %v13609_v20, %v4573_v31  ;;  %v13610_v47 = vld [vmem:[#allocation137_spill] sm:$0xff]  ;;  %v5178_v31 = vunpack.c.l.bf16 %v11555_v52  ;;  %v4211_v15 = vunpack.c.h.bf16 %v11485_v36  ;;  %v11580_v53 = vld [vmem:[%s8068_s21 + $0xb8] sm:$0xff]  ;;  %v13619_v11 = vld [vmem:[#allocation79_spill] sm:$0xff] }
 0x434   : > { %6843 = vmatmul.msk.f32.gmra.mxu3 %vm531_vm0, %v11545_v6  ;;  %v4710_v29 = vmul.f32 %v13610_v47, %v4694_v17  ;;  %v4484_v62 = vadd.f32 %v4468_v1, %v4363_v43  ;;  %v13611_v30 = vld [vmem:[#allocation185_spill] sm:$0xff]  ;;  %v3759_v21 = vadd.f32 %v3743_v25, %v3638_v49  ;;  %v5073_v17 = vmul.f32 %v13614_v60, %v5057_v40  ;;  %v13615_v34 = vld [vmem:[#allocation90_spill] sm:$0xff]  ;;  %v13618_v25 = vld [vmem:[#allocation63_spill] sm:$0xff] }
 0x435   : > { %v4831_v18 = vmul.f32 %v13611_v30, %v4815_v19  ;;  %v5251_v33 = vmul.f32 %v10946_v35, %v5219_v4  ;;  %v3985_v55 = vmul.f32 %v13615_v34, %v3969_v9  ;;  %v13616_v16 = vld [vmem:[#allocation106_spill] sm:$0xff]  ;;  %v4332_v54 = vunpack.c.h.bf16 %v11497_v44  ;;  %v13624_v34 = vld [vmem:[#allocation127_spill] sm:$0xff] }
 0x436   : > { %v4605_v51 = vadd.f32 %v4589_v27, %v4484_v62  ;;  %v3880_v19 = vadd.f32 %v3864_v56, %v3759_v21  ;;  %v4106_v35 = vmul.f32 %v13616_v16, %v4090_v23  ;;  %v3373_v5 = vunpack.c.l.bf16 %v11570_v10  ;;  %v11594_v43 = vld [vmem:[%s8068_s21 + $0x138] sm:$0xff]  ;;  %v13621_v21 = vld [vmem:[#allocation95_spill] sm:$0xff] }
 0x437   : > { %5453 = vmatpush.msrb.mxu1 %v5251_v33  ;;  %v3494_v36 = vunpack.c.l.bf16 %v11573_v13  ;;  %v4453_v58 = vunpack.c.h.bf16 %v11508_v2  ;;  %v3615_v40 = vunpack.c.l.bf16 %v11580_v53  ;;  %v13617_v49 = vld [vmem:[#allocation122_spill] sm:$0xff]  ;;  %v3736_v4 = vunpack.c.l.bf16 %v11585_v26 }
 0x438   : > { %v4726_v63 = vadd.f32 %v4710_v29, %v4605_v51  ;;  %v4001_v1 = vadd.f32 %v3985_v55, %v3880_v19  ;;  %v4227_v61 = vmul.f32 %v13617_v49, %v4211_v15  ;;  %v3389_v9 = vmul.f32 %v13618_v25, %v3373_v5  ;;  %v11603_v2 = vld [vmem:[%s8068_s21 + $0x178] sm:$0xff] }
 0x439   : > { %v3510_v44 = vmul.f32 %v13619_v11, %v3494_v36  ;;  %v4574_v47 = vunpack.c.h.bf16 %v11513_v0  ;;  %v4695_v29 = vunpack.c.h.bf16 %v11518_v38  ;;  %v13620_v23 = vld [vmem:[#allocation74_spill] sm:$0xff]  ;;  %v3631_v3 = vmul.f32 %v13621_v21, %v3615_v40  ;;  %v13627_v40 = vld [vmem:[#allocation143_spill] sm:$0xff] }
 0x43a   : > { %v4847_v20 = vadd.f32 %v4831_v18, %v4726_v63  ;;  %v4122_v27 = vadd.f32 %v4106_v35, %v4001_v1  ;;  %v5194_v62 = vmul.f32 %v13620_v23, %v5178_v31  ;;  %v3857_v56 = vunpack.c.l.bf16 %v11594_v43  ;;  %v13622_v15 = vld [vmem:[#allocation138_spill] sm:$0xff]  ;;  %v13630_v23 = vld [vmem:[#allocation139_spill] sm:$0xff] }
 0x43b   : > { %v3526_v30 = vadd.f32 %v3510_v44, %v3389_v9  ;;  %v4348_v51 = vmul.f32 %v13622_v15, %v4332_v54  ;;  %v4816_v18 = vunpack.c.h.bf16 %v11521_v22  ;;  %v11611_v0 = vld [vmem:[%s8068_s21 + $0x1b8] sm:$0xff]  ;;  %v3752_v31 = vmul.f32 %v13624_v34, %v3736_v4  ;;  %v13628_v9 = vld [vmem:[#allocation237_spill] sm:$0xff] }
 0x43c   : > { %v4968_v33 = vadd.f32 %v4952_v28, %v4847_v20  ;;  %v4243_v50 = vadd.f32 %v4227_v61, %v4122_v27  ;;  %v13623_v38 = vld [vmem:[#allocation154_spill] sm:$0xff]  ;;  %v3978_v55 = vunpack.c.l.bf16 %v11603_v2  ;;  %v4937_v22 = vunpack.c.h.bf16 %v11530_v39  ;;  %v13629_v27 = vld [vmem:[#allocation159_spill] sm:$0xff] }
 0x43d   : > { %v4469_v60 = vmul.f32 %v13623_v38, %v4453_v58  ;;  %v3647_v19 = vadd.f32 %v3631_v3, %v3526_v30  ;;  %v13625_v5 = vld [vmem:[#allocation170_spill] sm:$0xff]  ;;  %v3873_v49 = vmul.f32 %v13627_v40, %v3857_v56  ;;  %v4099_v58 = vunpack.c.l.bf16 %v11611_v0  ;;  %v13631_v56 = vld [vmem:[#allocation44_spill] sm:$0xff] }
 0x43e   : > { %v5089_v16 = vadd.f32 %v5073_v17, %v4968_v33  ;;  %v4364_v35 = vadd.f32 %v4348_v51, %v4243_v50  ;;  %v4590_v36 = vmul.f32 %v13625_v5, %v4574_v47  ;;  %v13626_v28 = vld [vmem:[#allocation186_spill] sm:$0xff]  ;;  %v4832_v11 = vmul.f32 %v13628_v9, %v4816_v18 }
 0x43f   : > { %v4711_v63 = vmul.f32 %v13626_v28, %v4695_v29  ;;  %v11619_v54 = vld [vmem:[%s8068_s21 + $0x1f8] sm:$0xff]  ;;  %v3768_v1 = vadd.f32 %v3752_v31, %v3647_v19  ;;  %v5058_v44 = vunpack.c.h.bf16 %v11533_v45  ;;  %v5179_v4 = vunpack.c.h.bf16 %v11555_v52  ;;  %v13632_v45 = vld [vmem:[#allocation191_spill] sm:$0xff]  ;;  %v13633_v19 = vld [vmem:[#allocation160_spill] sm:$0xff] }
 0x440   : > { %v11625_v61 = vld [vmem:[%s8068_s21 + $0x238] sm:$0xff]  ;;  %v5210_v25 = vadd.f32 %v5194_v62, %v5089_v16  ;;  %v4485_v17 = vadd.f32 %v4469_v60, %v4364_v35  ;;  %v3994_v39 = vmul.f32 %v13629_v27, %v3978_v55  ;;  %v4220_v47 = vunpack.c.l.bf16 %v11619_v54  ;;  %v13634_v55 = vld [vmem:[#allocation208_spill] sm:$0xff] }
 0x441   : > { %v3889_v20 = vadd.f32 %v3873_v49, %v3768_v1  ;;  %v11633_v29 = vld [vmem:[%s8068_s21 + $0x278] sm:$0xff]  ;;  %v4341_v62 = vunpack.c.l.bf16 %v11625_v61  ;;  %v3374_v3 = vunpack.c.h.bf16 %v11570_v10  ;;  %v4953_v33 = vmul.f32 %v13631_v56, %v4937_v22  ;;  %v13635_v35 = vld [vmem:[#allocation80_spill] sm:$0xff] }
 0x442   : > { %v5242_v30 = vmul.f32 %v13630_v23, %v5210_v25  ;;  %v4606_v21 = vadd.f32 %v4590_v36, %v4485_v17  ;;  %v4115_v15 = vmul.f32 %v13632_v45, %v4099_v58  ;;  %v11641_v52 = vld [vmem:[%s8068_s21 + $0x2b8] sm:$0xff]  ;;  %v3495_v18 = vunpack.c.h.bf16 %v11573_v13  ;;  %v13637_v58 = vld [vmem:[#allocation23_spill] sm:$0xff]  ;;  %v13640_v23 = vld [vmem:[#allocation249_spill] sm:$0xff] }
 0x443   : > { %v4010_v50 = vadd.f32 %v3994_v39, %v3889_v20  ;;  %v11644_v51 = vld [vmem:[%s8068_s21 + $0x2f8] sm:$0xff]  ;;  %v4462_v60 = vunpack.c.l.bf16 %v11633_v29  ;;  %v3390_v34 = vmul.f32 %v13633_v19, %v3374_v3  ;;  %v3616_v10 = vunpack.c.h.bf16 %v11580_v53  ;;  %v13644_v19 = vld [vmem:[#allocation224_spill] sm:$0xff] }
 0x444   : > { %5425 = vmatpush.msrb.mxu0 %v5242_v30  ;;  %v4727_v38 = vadd.f32 %v4711_v63, %v4606_v21  ;;  %v4236_v16 = vmul.f32 %v13634_v55, %v4220_v47  ;;  %v3511_v5 = vmul.f32 %v13635_v35, %v3495_v18  ;;  %v3737_v36 = vunpack.c.h.bf16 %v11585_v26  ;;  %v13636_v22 = vld [vmem:[#allocation226_spill] sm:$0xff]  ;;  %v13638_v26 = vld [vmem:[#allocation75_spill] sm:$0xff] }
 0x445   : > { %v4131_v31 = vadd.f32 %v4115_v15, %v4010_v50  ;;  %v4357_v13 = vmul.f32 %v13636_v22, %v4341_v62  ;;  %v4583_v63 = vunpack.c.l.bf16 %v11641_v52  ;;  %v4704_v1 = vunpack.c.l.bf16 %v11644_v51  ;;  %v11657_v49 = vld [vmem:[%s8068_s21 + $0x338] sm:$0xff] }
 0x446   : > { %v4848_v28 = vadd.f32 %v4832_v11, %v4727_v38  ;;  %v3527_v53 = vadd.f32 %v3511_v5, %v3390_v34  ;;  %v3632_v25 = vmul.f32 %v13637_v58, %v3616_v10  ;;  %v3858_v17 = vunpack.c.h.bf16 %v11594_v43  ;;  %v13639_v11 = vld [vmem:[#allocation107_spill] sm:$0xff]  ;;  %v11666_v21 = vld [vmem:[%s8068_s21 + $0x378] sm:$0xff]  ;;  %v13642_v43 = vld [vmem:[#allocation180_spill] sm:$0xff] }
 0x447   : > { %v4252_v40 = vadd.f32 %v4236_v16, %v4131_v31  ;;  %v5074_v20 = vmul.f32 %v13638_v26, %v5058_v44  ;;  %v5195_v27 = vmul.f32 %v13639_v11, %v5179_v4  ;;  %v3979_v39 = vunpack.c.h.bf16 %v11603_v2  ;;  %v11669_v62 = vld [vmem:[%s8068_s21 + $0x3b8] sm:$0xff]  ;;  %v13647_v11 = vld [vmem:[#allocation216_spill] sm:$0xff] }
 0x448   : > { %v4969_v9 = vadd.f32 %v4953_v33, %v4848_v28  ;;  %v4478_v30 = vmul.f32 %v13640_v23, %v4462_v60  ;;  %v3648_v3 = vadd.f32 %v3632_v25, %v3527_v53  ;;  %v13641_v56 = vld [vmem:[#allocation38_spill] sm:$0xff]  ;;  %v4599_v33 = vmul.f32 %v13642_v43, %v4583_v63  ;;  %v13645_v63 = vld [vmem:[#allocation172_spill] sm:$0xff] }
 0x449   : > { %v4373_v47 = vadd.f32 %v4357_v13, %v4252_v40  ;;  %v3753_v50 = vmul.f32 %v13641_v56, %v3737_v36  ;;  %v4825_v44 = vunpack.c.l.bf16 %v11657_v49  ;;  %v4100_v4 = vunpack.c.h.bf16 %v11611_v0  ;;  %v11676_v2 = vld [vmem:[%s8068_s21 + $0x18] sm:$0xff] }
 0x44a   : > { %v5090_v45 = vadd.f32 %v5074_v20, %v4969_v9  ;;  %v13643_v18 = vld [vmem:[#allocation210_spill] sm:$0xff]  ;;  %v3874_v34 = vmul.f32 %v13644_v19, %v3858_v17  ;;  %v4946_v55 = vunpack.c.l.bf16 %v11666_v21  ;;  %v5067_v16 = vunpack.c.l.bf16 %v11669_v62 }
 0x44b   : > { %v4494_v15 = vadd.f32 %v4478_v30, %v4373_v47  ;;  %v4720_v38 = vmul.f32 %v13643_v18, %v4704_v1  ;;  %v3769_v60 = vadd.f32 %v3753_v50, %v3648_v3  ;;  %v11681_v10 = vld [vmem:[%s8068_s21 + $0x58] sm:$0xff]  ;;  %v3995_v35 = vmul.f32 %v10890_v24, %v3979_v39  ;;  %v13648_v50 = vld [vmem:[#allocation29_spill] sm:$0xff]  ;;  %v13649_v18 = vld [vmem:[#allocation59_spill] sm:$0xff] }
 0x44c   : > { %v5211_v31 = vadd.f32 %v5195_v27, %v5090_v45  ;;  %v4221_v36 = vunpack.c.h.bf16 %v11619_v54  ;;  %v3365_v28 = vunpack.c.l.bf16 %v11676_v2  ;;  %v11689_v22 = vld [vmem:[%s8068_s21 + $0x98] sm:$0xff]  ;;  %v4841_v40 = vmul.f32 %v10857_v48, %v4825_v44  ;;  %v13646_v54 = vld [vmem:[#allocation201_spill] sm:$0xff] }
 0x44d   : > { %v4615_v0 = vadd.f32 %v4599_v33, %v4494_v15  ;;  %v3890_v5 = vadd.f32 %v3874_v34, %v3769_v60  ;;  %v11692_v13 = vld [vmem:[%s8068_s21 + $0xd8] sm:$0xff]  ;;  %v4116_v53 = vmul.f32 %v10901_v59, %v4100_v4  ;;  %v3486_v58 = vunpack.c.l.bf16 %v11681_v10 }
 0x44e   : > { %v5243_v1 = vmul.f32 %v13645_v63, %v5211_v31  ;;  %v4342_v17 = vunpack.c.h.bf16 %v11625_v61  ;;  %v3381_v9 = vmul.f32 %v13646_v54, %v3365_v28  ;;  %v11701_v26 = vld [vmem:[%s8068_s21 + $0x118] sm:$0xff]  ;;  %v4962_v20 = vmul.f32 %v10871_v7, %v4946_v55 }
 0x44f   : > { %v4736_v24 = vadd.f32 %v4720_v38, %v4615_v0  ;;  %v4011_v25 = vadd.f32 %v3995_v35, %v3890_v5  ;;  %v3502_v27 = vmul.f32 %v13647_v11, %v3486_v58  ;;  %v3607_v48 = vunpack.c.l.bf16 %v11689_v22  ;;  %v11710_v30 = vld [vmem:[%s8068_s21 + $0x158] sm:$0xff] }
 0x450   : > { %5454 = vmatpush.msrb.mxu1 %v5243_v1  ;;  %v3728_v59 = vunpack.c.l.bf16 %v11692_v13  ;;  %v4237_v23 = vmul.f32 %v10910_v57, %v4221_v36  ;;  %v4463_v61 = vunpack.c.h.bf16 %v11633_v29  ;;  %v5083_v3 = vmul.f32 %v10885_v37, %v5067_v16  ;;  %v11718_v15 = vld [vmem:[%s8068_s21 + $0x198] sm:$0xff]  ;;  %v13652_v36 = vld [vmem:[#allocation53_spill] sm:$0xff] }
 0x451   : > { %v4857_v39 = vadd.f32 %v4841_v40, %v4736_v24  ;;  %v4132_v47 = vadd.f32 %v4116_v53, %v4011_v25  ;;  %v3518_v56 = vadd.f32 %v3502_v27, %v3381_v9  ;;  %v3623_v7 = vmul.f32 %v13648_v50, %v3607_v48  ;;  %v11728_v55 = vld [vmem:[%s8068_s21 + $0x1d8] sm:$0xff]  ;;  %v13653_v1 = vld [vmem:[#allocation85_spill] sm:$0xff]  ;;  %v13654_v53 = vld [vmem:[#allocation123_spill] sm:$0xff] }
 0x452   : > { %v3849_v45 = vunpack.c.l.bf16 %v11701_v26  ;;  %v4358_v44 = vmul.f32 %v10917_v8, %v4342_v17  ;;  %v4584_v4 = vunpack.c.h.bf16 %v11641_v52  ;;  %v4705_v57 = vunpack.c.h.bf16 %v11644_v51  ;;  %v13651_v51 = vld [vmem:[#allocation91_spill] sm:$0xff]  ;;  %v11736_v63 = vld [vmem:[%s8068_s21 + $0x218] sm:$0xff]  ;;  %v13655_v24 = vld [vmem:[#allocation117_spill] sm:$0xff] }
 0x453   : > { %v4978_v43 = vadd.f32 %v4962_v20, %v4857_v39  ;;  %v4253_v33 = vadd.f32 %v4237_v23, %v4132_v47  ;;  %v3639_v29 = vadd.f32 %v3623_v7, %v3518_v56  ;;  %v3744_v37 = vmul.f32 %v13649_v18, %v3728_v59  ;;  %v11744_v9 = vld [vmem:[%s8068_s21 + $0x258] sm:$0xff]  ;;  %v13656_v27 = vld [vmem:[#allocation155_spill] sm:$0xff]  ;;  %v13657_v47 = vld [vmem:[#allocation101_spill] sm:$0xff] }
 0x454   : > { %v3970_v38 = vunpack.c.l.bf16 %v11710_v30  ;;  %v13650_v60 = vunpack.c.l.bf16 %v10625_v41  ;;  %v4479_v8 = vmul.f32 %v10925_v46, %v4463_v61  ;;  %7692 = vrcp.f32 %v11489_v42  ;;  %v11752_v61 = vld [vmem:[%s8068_s21 + $0x298] sm:$0xff] }
 0x455   : > { %v5099_v34 = vadd.f32 %v5083_v3, %v4978_v43  ;;  %v4374_v31 = vadd.f32 %v4358_v44, %v4253_v33  ;;  %v3760_v52 = vadd.f32 %v3744_v37, %v3639_v29  ;;  %v3865_v16 = vmul.f32 %v13651_v51, %v3849_v45  ;;  %v13658_v3 = vld [vmem:[#allocation239_spill] sm:$0xff]  ;;  %v13660_v44 = vld [vmem:[#allocation69_spill] sm:$0xff]  ;;  %v13661_v29 = vld [vmem:[#allocation30_spill] sm:$0xff] }
 0x456   : > { %v5204_v19 = vmul.f32 %v10939_v32, %v13650_v60  ;;  %v4091_v35 = vunpack.c.l.bf16 %v11718_v15  ;;  %v4600_v28 = vmul.f32 %v13652_v36, %v4584_v4  ;;  %v4826_v32 = vunpack.c.h.bf16 %v11657_v49  ;;  %v13662_v60 = vld [vmem:[#allocation187_spill] sm:$0xff] }
 0x457   : > { %v4495_v5 = vadd.f32 %v4479_v8, %v4374_v31  ;;  %v4721_v46 = vmul.f32 %v13653_v1, %v4705_v57  ;;  %v3881_v40 = vadd.f32 %v3865_v16, %v3760_v52  ;;  %v3986_v42 = vmul.f32 %v13654_v53, %v3970_v38  ;;  %v11761_v57 = vld [vmem:[%s8068_s21 + $0x2d8] sm:$0xff]  ;;  %v13663_v52 = vld [vmem:[#allocation60_spill] sm:$0xff] }
 0x458   : > { %v5220_v0 = vadd.f32 %v5204_v19, %v5099_v34  ;;  %v4212_v58 = vunpack.c.l.bf16 %v11728_v55  ;;  %v4947_v54 = vunpack.c.h.bf16 %v11666_v21  ;;  %v3366_v20 = vunpack.c.h.bf16 %v11676_v2  ;;  %v11769_v31 = vld [vmem:[%s8068_s21 + $0x318] sm:$0xff]  ;;  %v13666_v53 = vld [vmem:[#allocation108_spill] sm:$0xff] }
 0x459   : > { %v4616_v17 = vadd.f32 %v4600_v28, %v4495_v5  ;;  %v5068_v49 = vunpack.c.h.bf16 %v11669_v62  ;;  %v4002_v11 = vadd.f32 %v3986_v42, %v3881_v40  ;;  %v4107_v48 = vmul.f32 %v13656_v27, %v4091_v35  ;;  %v13659_v62 = vld [vmem:[#allocation171_spill] sm:$0xff]  ;;  %v5261_v35 = vld [vmem:[%s12106_s3 + $0x18] sm:$0xff]  ;;  %v13665_v28 = vld [vmem:[#allocation204_spill] sm:$0xff] }
 0x45a   : > { %v5252_v25 = vmul.f32 %v13655_v24, %v5220_v0  ;;  %v4333_v59 = vunpack.c.l.bf16 %v11736_v63  ;;  %v4842_v23 = vmul.f32 %v13657_v47, %v4826_v32  ;;  %v3382_v21 = vmul.f32 %v13658_v3, %v3366_v20  ;;  %v7693_v2 = vpop.eup %7692  ;;  %5279 = vperm.xlu0 %7153, %v5261_v35   ;;  %v13670_v27 = vld [vmem:[#allocation240_spill] sm:$0xff]  ;;  %v13672_v47 = vld [vmem:[#allocation77_spill] sm:$0xff]  ;;  %v13680_v35 = vld [vmem:[#allocation202_spill] sm:$0xff] }
 0x45b   : > { %v4737_v39 = vadd.f32 %v4721_v46, %v4616_v17  ;;  %v3487_v56 = vunpack.c.h.bf16 %v11681_v10  ;;  %v4123_v50 = vadd.f32 %v4107_v48, %v4002_v11  ;;  %v4228_v7 = vmul.f32 %v13659_v62, %v4212_v58  ;;  %v11792_v46 = vld [vmem:[%s8068_s21 + $0x358] sm:$0xff]  ;;  %v13668_v58 = vld [vmem:[#allocation140_spill] sm:$0xff] }
 0x45c   : > { %5482 = vmatpush.msrb.mxu2 %v5252_v25  ;;  %v4454_v45 = vunpack.c.l.bf16 %v11744_v9  ;;  %v3608_v43 = vunpack.c.h.bf16 %v11689_v22  ;;  %v4963_v4 = vmul.f32 %v13660_v44, %v4947_v54  ;;  %v3729_v37 = vunpack.c.h.bf16 %v11692_v13  ;;  %v5258_v13 = vld [vmem:[%s12106_s3] sm:$0xff]  ;;  %v13669_v17 = vld [vmem:[#allocation222_spill] sm:$0xff] }
 0x45d   : > { %v4858_v33 = vadd.f32 %v4842_v23, %v4737_v39  ;;  %v3503_v18 = vmul.f32 %v13661_v29, %v3487_v56  ;;  %v5084_v38 = vmul.f32 %v11009_v14, %v5068_v49  ;;  %v4244_v10 = vadd.f32 %v4228_v7, %v4123_v50  ;;  %v11779_v14 = vld [vmem:[%s12105_s2 + $0x18] sm:$0xff]  ;;  %5264 = vperm.xlu1 %7154, %v5258_v13  }
 0x45e   : > { %v4349_v19 = vmul.f32 %v13662_v60, %v4333_v59  ;;  %v4575_v34 = vunpack.c.l.bf16 %v11752_v61  ;;  %v3624_v51 = vmul.f32 %v13663_v52, %v3608_v43  ;;  %v3850_v16 = vunpack.c.h.bf16 %v11701_v26  ;;  %6832 = vmatmul.msk.f32.gmra.mxu0 %vm531_vm0, %v11779_v14  ;;  %6836 = vmatmul.msk.f32.gmra.mxu1 %vm531_vm0, %v11779_v14  ;;  %v11805_v11 = vld [vmem:[%s8068_s21 + $0x398] sm:$0xff]  ;;  %v13674_v43 = vld [vmem:[#allocation156_spill] sm:$0xff] }
 0x45f   : > { %v4979_v22 = vadd.f32 %v4963_v4, %v4858_v33  ;;  %v3519_v8 = vadd.f32 %v3503_v18, %v3382_v21  ;;  %v13664_v0 = vunpack.c.h.bf16 %v10625_v41  ;;  %v4470_v26 = vmul.f32 %v13665_v28, %v4454_v45  ;;  %6840 = vmatmul.msk.f32.gmra.mxu2 %vm531_vm0, %v11779_v14  ;;  %6844 = vmatmul.msk.f32.gmra.mxu3 %vm531_vm0, %v11779_v14  ;;  %v13671_v39 = vld [vmem:[#allocation246_spill] sm:$0xff]  ;;  %v13675_v4 = vld [vmem:[#allocation45_spill] sm:$0xff] }
 0x460   : > { %v4365_v36 = vadd.f32 %v4349_v19, %v4244_v10  ;;  %v4696_v32 = vunpack.c.l.bf16 %v11761_v57  ;;  %v3745_v42 = vmul.f32 %v13666_v53, %v3729_v37  ;;  %v3971_v41 = vunpack.c.h.bf16 %v11710_v30  ;;  %v13673_v21 = vld [vmem:[#allocation238_spill] sm:$0xff]  ;;  %v5260_v37 = vld [vmem:[%s12106_s3 + $0x10] sm:$0xff] }
 0x461   : > { %v5205_v5 = vmul.f32 %v11031_v12, %v13664_v0  ;;  %v5100_v1 = vadd.f32 %v5084_v38, %v4979_v22  ;;  %v3640_v40 = vadd.f32 %v3624_v51, %v3519_v8  ;;  %v13667_v12 = vld [vmem:[#allocation125_spill] sm:$0xff]  ;;  %v4591_v54 = vmul.f32 %v13669_v17, %v4575_v34  ;;  %v11816_v7 = vld [vmem:[%s8068_s21 + $0x3d8] sm:$0xff]  ;;  %v7700_v51 = vld [vmem:[%s12105_s2] sm:$0xff] }
 0x462   : > { %v5155_v24 = vadd.f32 %v13668_v58, %v13667_v12  ;;  %v4486_v25 = vadd.f32 %v4470_v26, %v4365_v36  ;;  %v4817_v20 = vunpack.c.l.bf16 %v11769_v31  ;;  %v3866_v48 = vmul.f32 %v13670_v27, %v3850_v16  ;;  %v13677_v19 = vld [vmem:[#allocation109_spill] sm:$0xff]  ;;  %v13679_v16 = vld [vmem:[#allocation92_spill] sm:$0xff]  ;;  %5274 = vperm.xlu0 %7153, %v5260_v37  }
 0x463   : > { %v5221_v49 = vadd.f32 %v5205_v5, %v5100_v1  ;;  %v3761_v30 = vadd.f32 %v3745_v42, %v3640_v40  ;;  %v4092_v59 = vunpack.c.h.bf16 %v11718_v15  ;;  %v4793_v23 = vadd.f32 %v13672_v47, %v13671_v39  ;;  %v13681_v36 = vld [vmem:[#allocation124_spill] sm:$0xff]  ;;  %v13683_v53 = vld [vmem:[#allocation157_spill] sm:$0xff] }
 0x464   : > { %v4607_v3 = vadd.f32 %v4591_v54, %v4486_v25  ;;  %v4712_v56 = vmul.f32 %v13673_v21, %v4696_v32  ;;  %v4938_v50 = vunpack.c.l.bf16 %v11792_v46  ;;  %v3987_v33 = vmul.f32 %v13674_v43, %v3971_v41  ;;  %v13682_v32 = vld [vmem:[#allocation217_spill] sm:$0xff] }
 0x465   : > { %v5253_v62 = vmul.f32 %v7693_v2, %v5221_v49  ;;  %v3882_v45 = vadd.f32 %v3866_v48, %v3761_v30  ;;  %v4213_v44 = vunpack.c.h.bf16 %v11728_v55  ;;  %v4833_v29 = vmul.f32 %v13675_v4, %v4817_v20  ;;  %v13676_v2 = vld [vmem:[#allocation188_spill] sm:$0xff]  ;;  %v13684_v17 = vld [vmem:[#allocation241_spill] sm:$0xff]  ;;  %v13685_v48 = vld [vmem:[#allocation242_spill] sm:$0xff] }
 0x466   : > { %v4728_v15 = vadd.f32 %v4712_v56, %v4607_v3  ;;  %v5059_v18 = vunpack.c.l.bf16 %v11805_v11  ;;  %7694 = vrcp.f32 %v5155_v24  ;;  %v4108_v10 = vmul.f32 %v13676_v2, %v4092_v59  ;;  %v13678_v55 = vld [vmem:[#allocation76_spill] sm:$0xff]  ;;  %6845 = vmatmul.msk.f32.vlgmr.msrb.gmra.mxu0 %vm531_vm0, %v7700_v51  ;;  %6849 = vmatmul.msk.f32.vlgmr.msrb.gmra.mxu1 %vm531_vm0, %v7700_v51  ;;  %v5564_v49 = vld [vmem:[%s12108_s5 + $0x10] sm:$0xff]  ;;  %v13686_v3 = vld [vmem:[#allocation31_spill] sm:$0xff] }
 0x467   : > { %5511 = vmatpush.msrb.mxu3 %v5253_v62  ;;  %v4003_v38 = vadd.f32 %v3987_v33, %v3882_v45  ;;  %v4334_v60 = vunpack.c.h.bf16 %v11736_v63  ;;  %v4914_v34 = vadd.f32 %v13677_v19, %v4793_v23  ;;  %v4954_v8 = vmul.f32 %v13678_v55, %v4938_v50 }
 0x468   : > { %v4849_v22 = vadd.f32 %v4833_v29, %v4728_v15  ;;  %v5180_v52 = vunpack.c.l.bf16 %v11816_v7  ;;  %7696 = vpow2.f32 %v13679_v16  ;;  %v4229_v0 = vmul.f32 %v13680_v35, %v4213_v44 }
 0x469   : > { %v4124_v13 = vadd.f32 %v4108_v10, %v4003_v38  ;;  %v4455_v63 = vunpack.c.h.bf16 %v11744_v9  ;;  %v5075_v28 = vmul.f32 %v13681_v36, %v5059_v18  ;;  %v4350_v1 = vmul.f32 %v13682_v32, %v4334_v60  ;;  %v5311_v18 = vpop.f32.mrf.mxu0 }
 0x46a   : > { %v4970_v5 = vadd.f32 %v4954_v8, %v4849_v22  ;;  %v4576_v40 = vunpack.c.h.bf16 %v11752_v61  ;;  %v5035_v42 = vadd.f32 %v13683_v53, %v4914_v34  ;;  %v5196_v12 = vmul.f32 %v13668_v58, %v5180_v52  ;;  %v7701_v58 = vld [vmem:[%s12105_s2 + $0x8] sm:$0xff]  ;;  %5578 = vperm.xlu0 %7153, %v5564_v49  }
 0x46b   : > { %v4245_v26 = vadd.f32 %v4229_v0, %v4124_v13  ;;  %v4471_v9 = vmul.f32 %v13684_v17, %v4455_v63  ;;  %v4697_v54 = vunpack.c.h.bf16 %v11761_v57  ;;  %v4818_v59 = vunpack.c.h.bf16 %v11769_v31 }
 0x46c   : > { %v5091_v41 = vadd.f32 %v5075_v28, %v4970_v5  ;;  %v7695_v24 = vpop.eup %7694  ;;  %v4592_v61 = vmul.f32 %v13685_v48, %v4576_v40  ;;  %v4939_v56 = vunpack.c.h.bf16 %v11792_v46  ;;  %v5060_v62 = vunpack.c.h.bf16 %v11805_v11 }
 0x46d   : > { %v4366_v25 = vadd.f32 %v4350_v1, %v4245_v26  ;;  %v4713_v21 = vmul.f32 %v13686_v3, %v4697_v54  ;;  %v4834_v31 = vmul.f32 %v13672_v47, %v4818_v59  ;;  %v5181_v33 = vunpack.c.h.bf16 %v11816_v7  ;;  %v5565_v47 = vld [vmem:[%s12108_s5 + $0x18] sm:$0xff] }
 0x46e   : > { %v5212_v20 = vadd.f32 %v5196_v12, %v5091_v41  ;;  %v7697_v30 = vpop.eup %7696  ;;  %6846 = vmatmul.msk.f32.gmra.mxu0 %vm531_vm0, %v7701_v58  ;;  %6850 = vmatmul.msk.f32.gmra.mxu1 %vm531_vm0, %v7701_v58  ;;  %v4955_v43 = vmul.f32 %v13677_v19, %v4939_v56  ;;  %v5076_v46 = vmul.f32 %v13683_v53, %v5060_v62 }
 0x46f   : > { %v4487_v27 = vadd.f32 %v4471_v9, %v4366_v25  ;;  %v5156_v39 = vadd.f32 %v7697_v30, %v5035_v42  ;;  %v5197_v11 = vmul.f32 %v7697_v30, %v5181_v33  ;;  %5583 = vperm.xlu1 %7154, %v5565_v47   ;;  %v5340_v37 = vpop.f32.mrf.mxu1 }
 0x470   : > { %v5244_v23 = vmul.f32 %v7695_v24, %v5212_v20 }
 0x471   : > { %v4608_v57 = vadd.f32 %v4592_v61, %v4487_v27  ;;  %7698 = vrcp.f32 %v5156_v39  ;;  %v11907_v27 = vld [vmem:[#allocation7] sm:$0xff] }
 0x472   : > { %5483 = vmatpush.msrb.mxu2 %v5244_v23 }
 0x473   : > { %v4729_v50 = vadd.f32 %v4713_v21, %v4608_v57  ;;  %6853 = vmatmul.msk.f32.vlgmr.msrb.gmra.mxu2 %vm531_vm0, %v7700_v51 }
 0x475   : > { %v4850_v45 = vadd.f32 %v4834_v31, %v4729_v50 }
 0x476   : > { %6847 = vmatmul.msk.f32.gmra.mxu0 %vm531_vm0, %v11545_v6  ;;  %6851 = vmatmul.msk.f32.gmra.mxu1 %vm531_vm0, %v11545_v6 }
 0x477   : > { %v4971_v44 = vadd.f32 %v4955_v43, %v4850_v45  ;;  %v7699_v4 = vpop.eup %7698 }
 0x479   : > { %v5092_v15 = vadd.f32 %v5076_v46, %v4971_v44  ;;  %v11919_v44 = vld [vmem:[#allocation7 + $0x8] sm:$0xff] }
 0x47b   : > { %v5213_v29 = vadd.f32 %v5197_v11, %v5092_v15  ;;  %6854 = vmatmul.msk.f32.gmra.mxu2 %vm531_vm0, %v7701_v58 }
 0x47d   : > { %v5245_v7 = vmul.f32 %v7699_v4, %v5213_v29  ;;  %v11929_v4 = vld [vmem:[#allocation7 + $0x10] sm:$0xff] }
 0x47e   : > { %6848 = vmatmul.msk.f32.gmra.mxu0 %vm531_vm0, %v11779_v14  ;;  %6852 = vmatmul.msk.f32.gmra.mxu1 %vm531_vm0, %v11779_v14 }
 0x47f   : > { %5512 = vmatpush.msrb.mxu3 %v5245_v7 }
 0x480   : > { %6857 = vmatmul.msk.f32.vlgmr.msrb.gmra.mxu3 %vm531_vm0, %v7700_v51 }
 0x481   : > { %v5314_v10 = vpop.f32.mrf.mxu0  ;;  %v5343_v60 = vpop.f32.mrf.mxu1 }
 0x483   : > { %6855 = vmatmul.msk.f32.gmra.mxu2 %vm531_vm0, %v11545_v6 }
 0x488   : > { %6858 = vmatmul.msk.f32.gmra.mxu3 %vm531_vm0, %v7701_v58 }
 0x48b   : > { %6856 = vmatmul.msk.f32.gmra.mxu2 %vm531_vm0, %v11779_v14 }
 0x490   : > { %6859 = vmatmul.msk.f32.gmra.mxu3 %vm531_vm0, %v11545_v6  ;;  %v11887_v52 = vpop.permute.xlu1 %5269 }
 0x491   : > { %v5315_v36 = vadd.f32 %v5314_v10, %v11887_v52  ;;  %v5344_v32 = vadd.f32 %v5343_v60, %v11887_v52 }
 0x493   : > { %v5534_v12 = vmax.f32 %v5315_v36, 0.0  ;;  %v5535_v24 = vmax.f32 %v5344_v32, 0.0 }
 0x498   : > { %6860 = vmatmul.msk.f32.gmra.mxu3 %vm531_vm0, %v11779_v14  ;;  %v5369_v38 = vpop.f32.mrf.mxu2 }
 0x4a0   : > { %v5372_v19 = vpop.f32.mrf.mxu2 }
 0x4a1   : > { %v5373_v39 = vadd.f32 %v5372_v19, %v11887_v52 }
 0x4a3   : > { %v5536_v31 = vmax.f32 %v5373_v39, 0.0 }
 0x4a7   : > { %v5398_v2 = vpop.f32.mrf.mxu3 }
 0x4ad   : > { %v5317_v22 = vpop.f32.mrf.mxu0  ;;  %v5346_v8 = vpop.f32.mrf.mxu1 }
 0x4af   : > { %v5401_v34 = vpop.f32.mrf.mxu3 }
 0x4b0   : > { %v5402_v58 = vadd.f32 %v5401_v34, %v11887_v52 }
 0x4b2   : > { %v5537_v62 = vmax.f32 %v5402_v58, 0.0 }
 0x4b4   : > { %v5375_v6 = vpop.f32.mrf.mxu2 }
 0x4b7   : > { %v5404_v16 = vpop.f32.mrf.mxu3 }
 0x4cc   : > { %v11885_v55 = vpop.permute.xlu0 %5279 }
 0x4cf   : > { %v11897_v1 = vpop.permute.xlu1 %5264 }
 0x4d0   : > { %v5312_v42 = vadd.f32 %v5311_v18, %v11897_v1  ;;  %v5341_v41 = vadd.f32 %v5340_v37, %v11897_v1  ;;  %v5370_v3 = vadd.f32 %v5369_v38, %v11897_v1  ;;  %v5399_v56 = vadd.f32 %v5398_v2, %v11897_v1  ;;  %v11941_v2 = vld [vmem:[#allocation7 + $0x18] sm:$0xff] }
 0x4d2   : > { %v5526_v20 = vmax.f32 %v5312_v42, 0.0  ;;  %v5527_v61 = vmax.f32 %v5341_v41, 0.0  ;;  %v5528_v43 = vmax.f32 %v5370_v3, 0.0  ;;  %v5529_v46 = vmax.f32 %v5399_v56, 0.0 }
 0x4d4   : > { %v11889_v51 = vpop.permute.xlu0 %5274 }
 0x4d5   : > { %v5318_v14 = vadd.f32 %v5317_v22, %v11889_v51  ;;  %v5347_v35 = vadd.f32 %v5346_v8, %v11889_v51  ;;  %v5376_v9 = vadd.f32 %v5375_v6, %v11889_v51  ;;  %v5405_v48 = vadd.f32 %v5404_v16, %v11889_v51 }
 0x4d7   : > { %v5542_v26 = vmax.f32 %v5318_v14, 0.0  ;;  %v5543_v53 = vmax.f32 %v5347_v35, 0.0  ;;  %v5544_v21 = vmax.f32 %v5376_v9, 0.0  ;;  %v5545_v50 = vmax.f32 %v5405_v48, 0.0 }
 0x4db   : > { %v5320_v13 = vpop.f32.mrf.mxu0  ;;  %v5349_v63 = vpop.f32.mrf.mxu1 }
 0x4dc   : > { %v5321_v0 = vadd.f32 %v5320_v13, %v11885_v55  ;;  %v5350_v5 = vadd.f32 %v5349_v63, %v11885_v55 }
 0x4de   : > { %v5550_v28 = vmax.f32 %v5321_v0, 0.0  ;;  %v5551_v40 = vmax.f32 %v5350_v5, 0.0 }
 0x4e0   : > { %5611 = vmatpush.msra.mxu0 %v5550_v28  ;;  %5640 = vmatpush.msra.mxu1 %v5551_v40 }
 0x4e2   : > { %5612 = vmatpush.msra.mxu0 %v5542_v26  ;;  %5641 = vmatpush.msra.mxu1 %v5543_v53  ;;  %v5378_v17 = vpop.f32.mrf.mxu2  ;;  %v5407_v30 = vpop.f32.mrf.mxu3 }
 0x4e3   : > { %v11901_v25 = vpop.f32.mrf.mxu0  ;;  %v11904_v54 = vpop.f32.mrf.mxu1  ;;  %v5379_v49 = vadd.f32 %v5378_v17, %v11885_v55  ;;  %v5408_v59 = vadd.f32 %v5407_v30, %v11885_v55 }
 0x4e4   : > { %5613 = vmatpush.msra.mxu0 %v5534_v12  ;;  %5642 = vmatpush.msra.mxu1 %v5535_v24  ;;  %v5428_v6 = vadd.f32 %v11901_v25, %v11897_v1  ;;  %v5457_v14 = vadd.f32 %v11904_v54, %v11897_v1 }
 0x4e5   : > { %v5552_v23 = vmax.f32 %v5379_v49, 0.0  ;;  %v5553_v57 = vmax.f32 %v5408_v59, 0.0 }
 0x4e6   : > { %5614 = vmatpush.msra.mxu0 %v5526_v20  ;;  %5643 = vmatpush.msra.mxu1 %v5527_v61  ;;  %v5530_v5 = vmax.f32 %v5428_v6, 0.0  ;;  %v5531_v28 = vmax.f32 %v5457_v14, 0.0  ;;  %v5562_v61 = vld [vmem:[%s12108_s5] sm:$0xff] }
 0x4e7   : > { %6861 = vmatmul.msk.f32.vlgmr.msra.gmra.mxu0 %vm5586_vm1, %v11907_v27  ;;  %6865 = vmatmul.msk.f32.vlgmr.msra.gmra.mxu1 %vm5586_vm1, %v11907_v27 }
 0x4e8   : > { %5669 = vmatpush.msra.mxu2 %v5552_v23  ;;  %5698 = vmatpush.msra.mxu3 %v5553_v57  ;;  %v12009_v57 = vpop.permute.xlu0 %5578 }
 0x4e9   : > { %5568 = vperm.xlu2 %7155, %v5562_v61  }
 0x4ea   : > { %5670 = vmatpush.msra.mxu2 %v5544_v21  ;;  %5699 = vmatpush.msra.mxu3 %v5545_v50 }
 0x4eb   : > { %v5430_v45 = vpop.f32.mrf.mxu0  ;;  %v5459_v33 = vpop.f32.mrf.mxu1 }
 0x4ec   : > { %5671 = vmatpush.msra.mxu2 %v5536_v31  ;;  %5700 = vmatpush.msra.mxu3 %v5537_v62  ;;  %v5431_v19 = vadd.f32 %v5430_v45, %v11887_v52  ;;  %v5460_v22 = vadd.f32 %v5459_v33, %v11887_v52 }
 0x4ee   : > { %5672 = vmatpush.msra.mxu2 %v5528_v43  ;;  %5701 = vmatpush.msra.mxu3 %v5529_v46  ;;  %v5538_v0 = vmax.f32 %v5431_v19, 0.0  ;;  %v5539_v63 = vmax.f32 %v5460_v22, 0.0 }
 0x4ef   : > { %6862 = vmatmul.msk.f32.gmra.mxu0 %vm5586_vm1, %v11919_v44  ;;  %6866 = vmatmul.msk.f32.gmra.mxu1 %vm5586_vm1, %v11919_v44 }
 0x4f0   : > { %6869 = vmatmul.msk.f32.vlgmr.msra.gmra.mxu2 %vm5586_vm1, %v11907_v27  ;;  %6873 = vmatmul.msk.f32.vlgmr.msra.gmra.mxu3 %vm5586_vm1, %v11907_v27 }
 0x4f3   : > { %v5433_v47 = vpop.f32.mrf.mxu0  ;;  %v5462_v11 = vpop.f32.mrf.mxu1 }
 0x4f4   : > { %v5434_v7 = vadd.f32 %v5433_v47, %v11889_v51  ;;  %v5463_v10 = vadd.f32 %v5462_v11, %v11889_v51 }
 0x4f6   : > { %v5485_v15 = vpop.f32.mrf.mxu2  ;;  %v5546_v16 = vmax.f32 %v5434_v7, 0.0  ;;  %v5547_v35 = vmax.f32 %v5463_v10, 0.0 }
 0x4f7   : > { %6863 = vmatmul.msk.f32.gmra.mxu0 %vm5586_vm1, %v11929_v4  ;;  %6867 = vmatmul.msk.f32.gmra.mxu1 %vm5586_vm1, %v11929_v4  ;;  %v5486_v12 = vadd.f32 %v5485_v15, %v11897_v1  ;;  %v12023_v15 = vpop.permute.xlu1 %5583 }
 0x4f8   : > { %6870 = vmatmul.msk.f32.gmra.mxu2 %vm5586_vm1, %v11919_v44  ;;  %6874 = vmatmul.msk.f32.gmra.mxu3 %vm5586_vm1, %v11919_v44 }
 0x4f9   : > { %v5532_v9 = vmax.f32 %v5486_v12, 0.0 }
 0x4fb   : > { %v5436_v29 = vpop.f32.mrf.mxu0  ;;  %v5465_v38 = vpop.f32.mrf.mxu1 }
 0x4fc   : > { %v5437_v37 = vadd.f32 %v5436_v29, %v11885_v55  ;;  %v5466_v60 = vadd.f32 %v5465_v38, %v11885_v55 }
 0x4fe   : > { %v5488_v18 = vpop.f32.mrf.mxu2  ;;  %v5554_v34 = vmax.f32 %v5437_v37, 0.0  ;;  %v5555_v8 = vmax.f32 %v5466_v60, 0.0 }
 0x4ff   : > { %6864 = vmatmul.msk.f32.gmra.mxu0 %vm5586_vm1, %v11941_v2  ;;  %6868 = vmatmul.msk.f32.gmra.mxu1 %vm5586_vm1, %v11941_v2  ;;  %v5489_v42 = vadd.f32 %v5488_v18, %v11887_v52 }
 0x500   : > { %5727 = vmatpush.msrb.mxu0 %v5554_v34  ;;  %5756 = vmatpush.msrb.mxu1 %v5555_v8 }
 0x501   : > { %6871 = vmatmul.msk.f32.gmra.mxu2 %vm5586_vm1, %v11929_v4  ;;  %6875 = vmatmul.msk.f32.gmra.mxu3 %vm5586_vm1, %v11929_v4  ;;  %v5540_v17 = vmax.f32 %v5489_v42, 0.0 }
 0x502   : > { %5728 = vmatpush.msrb.mxu0 %v5546_v16  ;;  %5757 = vmatpush.msrb.mxu1 %v5547_v35 }
 0x503   : > { %v5514_v13 = vpop.f32.mrf.mxu3 }
 0x504   : > { %5729 = vmatpush.msrb.mxu0 %v5538_v0  ;;  %5758 = vmatpush.msrb.mxu1 %v5539_v63  ;;  %v5515_v59 = vadd.f32 %v5514_v13, %v11897_v1 }
 0x506   : > { %v5491_v36 = vpop.f32.mrf.mxu2  ;;  %5730 = vmatpush.msrb.mxu0 %v5530_v5  ;;  %5759 = vmatpush.msrb.mxu1 %v5531_v28 }
 0x507   : > { %6877 = vmatmul.msk.f32.vlgmr.msrb.gmra.mxu0 %vm5586_vm1, %v11907_v27  ;;  %6881 = vmatmul.msk.f32.vlgmr.msrb.gmra.mxu1 %vm5586_vm1, %v11907_v27  ;;  %v5492_v40 = vadd.f32 %v5491_v36, %v11889_v51 }
 0x509   : > { %6872 = vmatmul.msk.f32.gmra.mxu2 %vm5586_vm1, %v11941_v2  ;;  %6876 = vmatmul.msk.f32.gmra.mxu3 %vm5586_vm1, %v11941_v2  ;;  %v5548_v24 = vmax.f32 %v5492_v40, 0.0 }
 0x50b   : > { %v5517_v26 = vpop.f32.mrf.mxu3 }
 0x50c   : > { %v5518_v30 = vadd.f32 %v5517_v26, %v11887_v52  ;;  %v5563_v52 = vld [vmem:[%s12108_s5 + $0x8] sm:$0xff] }
 0x50d   : > { %5573 = vperm.xlu2 %7155, %v5563_v52  }
 0x50e   : > { %v5494_v32 = vpop.f32.mrf.mxu2  ;;  %v5541_v23 = vmax.f32 %v5518_v30, 0.0 }
 0x50f   : > { %v5495_v53 = vadd.f32 %v5494_v32, %v11885_v55  ;;  %6878 = vmatmul.msk.f32.gmra.mxu0 %vm5586_vm1, %v11919_v44  ;;  %6882 = vmatmul.msk.f32.gmra.mxu1 %vm5586_vm1, %v11919_v44 }
 0x511   : > { %v5556_v41 = vmax.f32 %v5495_v53, 0.0 }
 0x513   : > { %v5520_v25 = vpop.f32.mrf.mxu3  ;;  %5785 = vmatpush.msrb.mxu2 %v5556_v41 }
 0x514   : > { %v5521_v20 = vadd.f32 %v5520_v25, %v11889_v51 }
 0x515   : > { %5786 = vmatpush.msrb.mxu2 %v5548_v24 }
 0x516   : > { %v5549_v39 = vmax.f32 %v5521_v20, 0.0 }
 0x517   : > { %5787 = vmatpush.msrb.mxu2 %v5540_v17  ;;  %6879 = vmatmul.msk.f32.gmra.mxu0 %vm5586_vm1, %v11929_v4 }
 0x518   : > { %6883 = vmatmul.msk.f32.gmra.mxu1 %vm5586_vm1, %v11929_v4 }
 0x519   : > { %5788 = vmatpush.msrb.mxu2 %v5532_v9 }
 0x51a   : > { %6885 = vmatmul.msk.f32.vlgmr.msrb.gmra.mxu2 %vm5586_vm1, %v11907_v27 }
 0x51b   : > { %v5523_v54 = vpop.f32.mrf.mxu3 }
 0x51c   : > { %v5524_v49 = vadd.f32 %v5523_v54, %v11885_v55  ;;  %v5533_v55 = vmax.f32 %v5515_v59, 0.0 }
 0x51e   : > { %v5557_v48 = vmax.f32 %v5524_v49, 0.0 }
 0x51f   : > { %6880 = vmatmul.msk.f32.gmra.mxu0 %vm5586_vm1, %v11941_v2 }
 0x520   : > { %5814 = vmatpush.msrb.mxu3 %v5557_v48  ;;  %6884 = vmatmul.msk.f32.gmra.mxu1 %vm5586_vm1, %v11941_v2 }
 0x522   : > { %5815 = vmatpush.msrb.mxu3 %v5549_v39  ;;  %6886 = vmatmul.msk.f32.gmra.mxu2 %vm5586_vm1, %v11919_v44 }
 0x524   : > { %5816 = vmatpush.msrb.mxu3 %v5541_v23 }
 0x526   : > { %5817 = vmatpush.msrb.mxu3 %v5533_v55 }
 0x527   : > { %6889 = vmatmul.msk.f32.vlgmr.msrb.gmra.mxu3 %vm5586_vm1, %v11907_v27 }
 0x52a   : > { %6887 = vmatmul.msk.f32.gmra.mxu2 %vm5586_vm1, %v11929_v4 }
 0x52f   : > { %6890 = vmatmul.msk.f32.gmra.mxu3 %vm5586_vm1, %v11919_v44 }
 0x532   : > { %6888 = vmatmul.msk.f32.gmra.mxu2 %vm5586_vm1, %v11941_v2 }
 0x537   : > { %6891 = vmatmul.msk.f32.gmra.mxu3 %vm5586_vm1, %v11929_v4 }
 0x53f   : > { %6892 = vmatmul.msk.f32.gmra.mxu3 %vm5586_vm1, %v11941_v2 }
 0x543   : > { %v12014_v43 = vpop.permute.xlu2 %5568 }
 0x564   : > { %v5616_v51 = vpop.f32.mrf.mxu0  ;;  %v5645_v1 = vpop.f32.mrf.mxu1 }
 0x565   : > { %v5617_v33 = vadd.f32 %v5616_v51, %v12014_v43  ;;  %v5646_v44 = vadd.f32 %v5645_v1, %v12014_v43 }
 0x567   : > { %v5831_v4 = vpack.c.bf16 %v5646_v44, %v5617_v33  ;;  %v5574_v32 = vpop.permute.xlu2 %5573 }
 0x569   : > { %5847 = vst [vmem:[%s12020_s20] sm:$0xff] %v5831_v4 }
 0x56c   : > { %v5619_v58 = vpop.f32.mrf.mxu0  ;;  %v5648_v27 = vpop.f32.mrf.mxu1 }
 0x56d   : > { %v5620_v40 = vadd.f32 %v5619_v58, %v5574_v32  ;;  %v5649_v53 = vadd.f32 %v5648_v27, %v5574_v32 }
 0x56f   : > { %v5835_v17 = vpack.c.bf16 %v5649_v53, %v5620_v40 }
 0x571   : > { %5851 = vst [vmem:[%s12020_s20 + $0x20] sm:$0xff] %v5835_v17 }
 0x573   : > { %v5674_v3 = vpop.f32.mrf.mxu2  ;;  %v5703_v56 = vpop.f32.mrf.mxu3 }
 0x574   : > { %v5622_v21 = vpop.f32.mrf.mxu0  ;;  %v5651_v31 = vpop.f32.mrf.mxu1  ;;  %v5675_v46 = vadd.f32 %v5674_v3, %v12014_v43  ;;  %v5704_v47 = vadd.f32 %v5703_v56, %v12014_v43 }
 0x575   : > { %v5623_v50 = vadd.f32 %v5622_v21, %v12009_v57  ;;  %v5652_v62 = vadd.f32 %v5651_v31, %v12009_v57 }
 0x576   : > { %v5832_v29 = vpack.c.bf16 %v5704_v47, %v5675_v46 }
 0x577   : > { %v5839_v45 = vpack.c.bf16 %v5652_v62, %v5623_v50 }
 0x578   : > { %5848 = vst [vmem:[%s12020_s20 + $0x8] sm:$0xff] %v5832_v29 }
 0x579   : > { %5855 = vst [vmem:[%s12020_s20 + $0x40] sm:$0xff] %v5839_v45 }
 0x57b   : > { %v5677_v11 = vpop.f32.mrf.mxu2  ;;  %v5706_v18 = vpop.f32.mrf.mxu3 }
 0x57c   : > { %v5625_v7 = vpop.f32.mrf.mxu0  ;;  %v5654_v38 = vpop.f32.mrf.mxu1  ;;  %v5678_v42 = vadd.f32 %v5677_v11, %v5574_v32  ;;  %v5707_v41 = vadd.f32 %v5706_v18, %v5574_v32 }
 0x57d   : > { %v5626_v37 = vadd.f32 %v5625_v7, %v12023_v15  ;;  %v5655_v2 = vadd.f32 %v5654_v38, %v12023_v15 }
 0x57e   : > { %v5836_v9 = vpack.c.bf16 %v5707_v41, %v5678_v42 }
 0x57f   : > { %v5843_v10 = vpack.c.bf16 %v5655_v2, %v5626_v37 }
 0x580   : > { %5852 = vst [vmem:[%s12020_s20 + $0x28] sm:$0xff] %v5836_v9 }
 0x581   : > { %5859 = vst [vmem:[%s12020_s20 + $0x60] sm:$0xff] %v5843_v10 }
 0x584   : > { %v5732_v60 = vpop.f32.mrf.mxu0  ;;  %v5680_v19 = vpop.f32.mrf.mxu2 }
 0x585   : > { %v5761_v34 = vpop.f32.mrf.mxu1  ;;  %v5681_v22 = vadd.f32 %v5680_v19, %v12009_v57  ;;  %v5709_v8 = vpop.f32.mrf.mxu3  ;;  %v5733_v6 = vadd.f32 %v5732_v60, %v12014_v43 }
 0x586   : > { %v5710_v16 = vadd.f32 %v5709_v8, %v12009_v57  ;;  %v5762_v14 = vadd.f32 %v5761_v34, %v12014_v43 }
 0x588   : > { %v5840_v13 = vpack.c.bf16 %v5710_v16, %v5681_v22  ;;  %v5833_v35 = vpack.c.bf16 %v5762_v14, %v5733_v6 }
 0x58a   : > { %5856 = vst [vmem:[%s12020_s20 + $0x48] sm:$0xff] %v5840_v13 }
 0x58b   : > { %5849 = vst [vmem:[%s12020_s20 + $0x10] sm:$0xff] %v5833_v35 }
 0x58c   : > { %v5735_v0 = vpop.f32.mrf.mxu0  ;;  %v5683_v63 = vpop.f32.mrf.mxu2 }
 0x58d   : > { %v5764_v5 = vpop.f32.mrf.mxu1  ;;  %v5684_v36 = vadd.f32 %v5683_v63, %v12023_v15  ;;  %v5712_v28 = vpop.f32.mrf.mxu3  ;;  %v5736_v24 = vadd.f32 %v5735_v0, %v5574_v32 }
 0x58e   : > { %v5713_v26 = vadd.f32 %v5712_v28, %v12023_v15  ;;  %v5765_v25 = vadd.f32 %v5764_v5, %v5574_v32 }
 0x590   : > { %v5844_v12 = vpack.c.bf16 %v5713_v26, %v5684_v36  ;;  %v5837_v54 = vpack.c.bf16 %v5765_v25, %v5736_v24 }
 0x592   : > { %5860 = vst [vmem:[%s12020_s20 + $0x68] sm:$0xff] %v5844_v12 }
 0x593   : > { %5853 = vst [vmem:[%s12020_s20 + $0x30] sm:$0xff] %v5837_v54 }
 0x594   : > { %v5738_v20 = vpop.f32.mrf.mxu0 }
 0x595   : > { %v5739_v49 = vadd.f32 %v5738_v20, %v12009_v57  ;;  %v5767_v30 = vpop.f32.mrf.mxu1 }
 0x596   : > { %v5768_v48 = vadd.f32 %v5767_v30, %v12009_v57 }
 0x598   : > { %v5841_v61 = vpack.c.bf16 %v5768_v48, %v5739_v49 }
 0x59a   : > { %5857 = vst [vmem:[%s12020_s20 + $0x50] sm:$0xff] %v5841_v61 }
 0x59c   : > { %v5741_v59 = vpop.f32.mrf.mxu0 }
 0x59d   : > { %v5742_v39 = vadd.f32 %v5741_v59, %v12023_v15  ;;  %v5790_v23 = vpop.f32.mrf.mxu2  ;;  %v5770_v55 = vpop.f32.mrf.mxu1 }
 0x59e   : > { %v5771_v52 = vadd.f32 %v5770_v55, %v12023_v15  ;;  %v5791_v1 = vadd.f32 %v5790_v23, %v12014_v43 }
 0x5a0   : > { %v5845_v51 = vpack.c.bf16 %v5771_v52, %v5742_v39 }
 0x5a2   : > { %5861 = vst [vmem:[%s12020_s20 + $0x70] sm:$0xff] %v5845_v51 }
 0x5a5   : > { %v5793_v27 = vpop.f32.mrf.mxu2 }
 0x5a6   : > { %v5794_v56 = vadd.f32 %v5793_v27, %v5574_v32 }
 0x5aa   : > { %v5819_v58 = vpop.f32.mrf.mxu3 }
 0x5ab   : > { %v5820_v3 = vadd.f32 %v5819_v58, %v12014_v43 }
 0x5ad   : > { %v5834_v21 = vpack.c.bf16 %v5820_v3, %v5791_v1  ;;  %v5796_v62 = vpop.f32.mrf.mxu2 }
 0x5ae   : > { %v5797_v33 = vadd.f32 %v5796_v62, %v12009_v57 }
 0x5af   : > { %5850 = vst [vmem:[%s12020_s20 + $0x18] sm:$0xff] %v5834_v21 }
 0x5b2   : > { %v5822_v50 = vpop.f32.mrf.mxu3 }
 0x5b3   : > { %v5823_v31 = vadd.f32 %v5822_v50, %v5574_v32 }
 0x5b5   : > { %v5838_v45 = vpack.c.bf16 %v5823_v31, %v5794_v56  ;;  %v5799_v47 = vpop.f32.mrf.mxu2 }
 0x5b6   : > { %v5800_v11 = vadd.f32 %v5799_v47, %v12023_v15 }
 0x5b7   : > { %5854 = vst [vmem:[%s12020_s20 + $0x38] sm:$0xff] %v5838_v45 }
 0x5ba   : > { %v5825_v44 = vpop.f32.mrf.mxu3 }
 0x5bb   : > { %v5826_v43 = vadd.f32 %v5825_v44, %v12009_v57 }
 0x5bd   : > { %v5842_v46 = vpack.c.bf16 %v5826_v43, %v5797_v33 }
 0x5bf   : > { %5858 = vst [vmem:[%s12020_s20 + $0x58] sm:$0xff] %v5842_v46 }
 0x5c2   : > { %v5828_v4 = vpop.f32.mrf.mxu3 }
 0x5c3   : > { %v5829_v29 = vadd.f32 %v5828_v4, %v12023_v15 }
 0x5c5   : > { %v5846_v7 = vpack.c.bf16 %v5829_v29, %v5800_v11 }
 0x5c7   : > { %5862 = vst [vmem:[%s12020_s20 + $0x78] sm:$0xff] %v5846_v7 }
 0x5c8   : > { %7819 = shalt.err (!%p7816_p13)
}
 0x5c9   : > { %s7906_s1 = smov 512   ;;  %s7907_s20 = smov 1024  }
 0x5ca   : > { %s7908_s15 = smov 32  }
 0x5cb   : > { %7053 = dma.vmem_to_hbm [thread:$0]  (%p8039_p5), %s5879_s25, 2048, %s5881_s7, %s5864_s9, %s7906_s1, %s7907_s20, %s7908_s15  }
 0x5cc PF: > { %s13691_s8 = sld [smem:[#allocation12_spill]]  ;;  %p7075_p0 = scmp.ge.s32.totalorder %s7894_s28, 2 }
 0x5ce   : > { %p7067_p3 = pnand %p7075_p0, %p8003_p6 }
 0x5d0   : > { %p7068_p7 = pneg %p7067_p3 }
 0x5d2   : > { %s5895_s30 = sand.u32 1, %s13691_s8  }
 0x5d3   : > { %s5896_s11 = scalar_lea.sflag [#allocation4], %s5895_s30 }
 0x5d4   : > { %7861 = dma.done.wait (%p7068_p7), %s5896_s11, 2048  }
 0x5d5   : > { %7863 = vsyncadd (%p7068_p7), %s5896_s11, 4294965248  ;;  %s23_s28 = sadd.s32 1, %s7894_s28   ;;  %s13693_s4 = sld [smem:[#allocation16_spill]] }
 0x5d6   : > { %p20_p9 = scmp.ge.s32.totalorder %s23_s28, 6   ;;  %s13694_s7 = sld [smem:[#allocation18_spill]] }
 0x5d7   : > { %s13695_s21 = smov %s7870_s22  ;;  %s13696_s22 = smov %s7874_s23 }
 0x5d8   : > { %s13697_s23 = smov %s8052_s10  ;;  %s13698_s24 = smov %s7886_s26 }
 0x5d9   : > { %s13699_s25 = smov %s7890_s27  ;;  %22 = sbr.rel (!%p20_p9) target bundleno = 12 (0xc), region = 112 }
 0x5db   : > { %s13700_s26 = smov %s13693_s4 }
 0x5dc   : > { %s13701_s27 = smov %s13694_s7 }
 0x5de   :  { %5902 = vsyncpa [#allocation3], 1 }
 0x5df   :  { %5904 = vsyncpa [#allocation3 + $0x1], 1 }
 0x5e0   :  { %5905 = vsyncpa [#allocation6], 1 }
 0x5e1   :  { %5906 = vsyncpa [#allocation4], 1 }
 0x5e2   :  { %5908 = vsyncpa [#allocation4 + $0x1], 1 }

</bundles_post_ra>
